<compile_context>
chip_gen: v5e
topology: v5e:2x2
jax: 0.10.0
libtpu: 0.0.40
codegen_flags: <defaults>
</compile_context>

<pallas_src>
import functools

import jax
import jax.numpy as jnp
from jax.experimental import pallas as pl
from jax.experimental.pallas import tpu as pltpu

BIG = 1e30  # penalty (squared-distance domain, f32 accumulation only)


def _vmem_capacity_bytes():
    """Per-core VMEM capacity; conservative fallback if the query is unavailable."""
    try:
        info = pltpu.get_tpu_info()
        cap = getattr(info, "vmem_capacity_bytes", None)
        if cap:
            return int(cap)
    except Exception:
        pass
    return 64 * 1024 * 1024  # v7x per-TensorCore VMEM (most restrictive)


def _pick_tile(total, pref):
    """Largest multiple-of-128 divisor of `total` that is <= max(pref, 128).

    `total` is padded to a multiple of 128 by the caller, so 128 is always a
    valid fallback (no unbounded blocks for non-power-of-two image sizes).
    """
    pref = max(int(pref), 128)
    best = None
    d = 128
    while d <= total:
        if total % d == 0:
            if best is None or d <= pref:
                best = d
            if d > pref:
                break
        d += 128
    return best if best is not None else total


def _hd_min_kernel(pr_ref, pc_ref, qr_ref, qc_ref, penA_ref, penB_ref,
                   fwd_ref, rev_ref, *, G):
    """Grid = (pair-chunk i [parallel], p-tile pt [parallel], q-tile jt [arbitrary]).

    pr_ref/pc_ref : (PT, 1)  pixel row/col coordinates for the p (sublane) axis
    qr_ref/qc_ref : (1, QT)  pixel row/col coordinates for the q (lane) axis
    penA_ref      : (1, G, QT) prediction-set penalty rows (set A)
    penB_ref      : (1, G, QT) label-set penalty rows (set B)
    fwd_ref       : (1, G, PT) output, revisited across jt (running-min accumulator)
    rev_ref       : (1, G, PT) output, revisited across jt
    """
    jt = pl.program_id(2)

    @pl.when(jt == 0)
    def _():
        fwd_ref[...] = jnp.full(fwd_ref.shape, BIG, dtype=fwd_ref.dtype)
        rev_ref[...] = jnp.full(rev_ref.shape, BIG, dtype=rev_ref.dtype)

    # Squared pairwise pixel distances for this (PT, QT) tile, generated
    # in-register from the coordinate column/row inputs (~5 VPU ops / element;
    # no HW^2 HBM array, no sqd DMA, no per-chunk re-streaming).
    dr = pr_ref[...] - qr_ref[...]             # (PT, 1) - (1, QT) -> (PT, QT)
    dc = pc_ref[...] - qc_ref[...]
    sqd = dr * dr + dc * dc                    # (PT, QT) f32

    penA = penA_ref[0]                         # (G, QT), precomputed on host
    penB = penB_ref[0]

    fwd_parts = []
    rev_parts = []
    for k in range(G):                         # static unroll over pairs
        # fwd[p] = min_{q in B} sqd[p, q]  (lane-axis reduce -> XLU)
        fwd_parts.append(jnp.min(sqd + penB[k:k + 1, :], axis=-1))   # (PT,)
        # rev[q] = min_{p in A} sqd[q, p]  (sqd symmetric, same orientation)
        rev_parts.append(jnp.min(sqd + penA[k:k + 1, :], axis=-1))   # (PT,)

    # Batched (G, PT) accumulate + single lane-dense store per output per step.
    fwd_ref[0] = jnp.minimum(fwd_ref[0], jnp.stack(fwd_parts, axis=0))
    rev_ref[0] = jnp.minimum(rev_ref[0], jnp.stack(rev_parts, axis=0))

    # sqrt deferred to the (G, PT) result (min is monotone under sqrt).
    @pl.when(jt == pl.num_programs(2) - 1)
    def _():
        fwd_ref[...] = jnp.sqrt(fwd_ref[...])
        rev_ref[...] = jnp.sqrt(rev_ref[...])


def hausdorff_min_fields(maskA, maskB, H, W):
    """maskA/maskB: (P, HW) f32 {0,1}.  Returns fwd, rev: (P, HW) f32."""
    P, HW = maskA.shape
    HWpad = ((HW + 127) // 128) * 128          # lane-friendly pixel count

    G = min(8, P)                              # one sublane group of pairs/step
    nchunks = -(-P // G)
    Ppad = nchunks * G

    padA = jnp.zeros((Ppad, HWpad), jnp.float32).at[:P, :HW].set(maskA)
    padB = jnp.zeros((Ppad, HWpad), jnp.float32).at[:P, :HW].set(maskB)
    # Penalties precomputed once; padded pixels / padded pairs have mask 0 so
    # their penalty is BIG and they never win a min.
    penA = ((1.0 - padA) * BIG).reshape(nchunks, G, HWpad)
    penB = ((1.0 - padB) * BIG).reshape(nchunks, G, HWpad)

    # Tiny grid-invariant coordinate inputs (p axis as columns, q axis as rows).
    pid = jnp.arange(HWpad, dtype=jnp.int32)
    r = (pid // W).astype(jnp.float32)
    c = (pid % W).astype(jnp.float32)
    pr = r.reshape(HWpad, 1)
    pc = c.reshape(HWpad, 1)
    qr = r.reshape(1, HWpad)
    qc = c.reshape(1, HWpad)

    # Generation-aware tiling / VMEM budget.
    cap = _vmem_capacity_bytes()
    vmem_limit = min(int(0.7 * cap), 100 * 1024 * 1024)
    tile_budget = max(1 << 20, min(cap // 24, 8 << 20))   # bytes per (PT, QT) tile
    side = int((tile_budget // 4) ** 0.5)
    PT = _pick_tile(HWpad, side)
    QT = _pick_tile(HWpad, side)
    npt = HWpad // PT
    nq = HWpad // QT
    grid = (nchunks, npt, nq)                  # reduction (q-tile) axis last

    kernel = functools.partial(_hd_min_kernel, G=G)
    cost = pl.CostEstimate(
        flops=int(Ppad * HWpad * HWpad * 4 + nchunks * HWpad * HWpad * 5),
        transcendentals=int(2 * Ppad * HWpad),
        bytes_accessed=int(2 * nchunks * npt * G * HWpad * 4
                           + 4 * Ppad * HWpad * 4),
    )

    fwd, rev = pl.pallas_call(
        kernel,
        out_shape=(jax.ShapeDtypeStruct((nchunks, G, HWpad), jnp.float32),
                   jax.ShapeDtypeStruct((nchunks, G, HWpad), jnp.float32)),
        grid=grid,
        in_specs=[
            pl.BlockSpec((PT, 1), lambda i, p, j: (p, 0)),        # pr (p coords)
            pl.BlockSpec((PT, 1), lambda i, p, j: (p, 0)),        # pc
            pl.BlockSpec((1, QT), lambda i, p, j: (0, j)),        # qr (q coords)
            pl.BlockSpec((1, QT), lambda i, p, j: (0, j)),        # qc
            pl.BlockSpec((1, G, QT), lambda i, p, j: (i, 0, j)),  # penA
            pl.BlockSpec((1, G, QT), lambda i, p, j: (i, 0, j)),  # penB
        ],
        out_specs=(pl.BlockSpec((1, G, PT), lambda i, p, j: (i, 0, p)),
                   pl.BlockSpec((1, G, PT), lambda i, p, j: (i, 0, p))),
        compiler_params=pltpu.CompilerParams(
            dimension_semantics=("parallel", "parallel", "arbitrary"),
            vmem_limit_bytes=vmem_limit),
        cost_estimate=cost,
    )(pr, pc, qr, qc, penA, penB)

    fwd = fwd.reshape(Ppad, HWpad)[:P, :HW]
    rev = rev.reshape(Ppad, HWpad)[:P, :HW]
    return fwd, rev


def _masked_stats(vals, mask, percs):
    """vals, mask: (B, C, HW); percs: (K,).  np.percentile 'linear' semantics."""
    HW = vals.shape[-1]
    n = mask.sum(-1)                                                  # (B, C) int
    vmax = jnp.where(mask, vals, -jnp.inf).max(-1)
    vmean = jnp.where(mask, vals, 0.0).sum(-1) / jnp.maximum(n, 1)
    svals = jnp.sort(jnp.where(mask, vals, jnp.inf), axis=-1)         # valid first
    n_eff = jnp.maximum(n, 1).astype(jnp.float32)
    ranks = percs[None, None, :] * (n_eff[..., None] - 1.0) / 100.0   # (B, C, K)
    lo = jnp.floor(ranks)
    frac = ranks - lo
    lo_i = jnp.clip(lo.astype(jnp.int32), 0, HW - 1)
    upper = jnp.maximum(n - 1, 0)[..., None].astype(jnp.int32)
    hi_i = jnp.minimum(lo_i + 1, upper)
    vlo = jnp.take_along_axis(svals, lo_i, axis=-1)
    vhi = jnp.take_along_axis(svals, hi_i, axis=-1)
    vperc = vlo + frac * (vhi - vlo)                                  # (B, C, K)
    return vmax, vmean, vperc, n


def hausdorff_forward(predictions, labels, percentiles, ignore_class_index,
                      ignore_failed_hd):
    """Mirrors All_Hausdorff_Distances_Chunked.forward.  Returns (MHD, FHD, RHD)."""
    B, C, H, W = predictions.shape
    HW = H * W

    pred_cls = jnp.argmax(predictions, axis=1)                        # (B, H, W)
    maskA = jax.nn.one_hot(pred_cls, C, axis=1, dtype=jnp.float32)    # (B, C, H, W)
    maskB = (labels != 0).astype(jnp.float32)                         # argwhere == nonzero

    mA = maskA.reshape(B * C, HW)
    mB = maskB.reshape(B * C, HW)
    fwd, rev = hausdorff_min_fields(mA, mB, H, W)                     # hot path (Pallas)
    fwd = fwd.reshape(B, C, HW)
    rev = rev.reshape(B, C, HW)
    mA_b = mA.reshape(B, C, HW) > 0.5
    mB_b = mB.reshape(B, C, HW) > 0.5

    percs = jnp.asarray(percentiles, jnp.float32)
    fmax, fmean, fperc, nA = _masked_stats(fwd, mA_b, percs)
    rmax, rmean, rperc, nB = _masked_stats(rev, mB_b, percs)

    # (B, C, 2+K) stat blocks: [max, mean, percentiles...]
    Fs = jnp.concatenate([fmax[:, :, None], fmean[:, :, None], fperc], axis=-1)
    Rs = jnp.concatenate([rmax[:, :, None], rmean[:, :, None], rperc], axis=-1)
    Ms = jnp.maximum(Fs, Rs)
    Fs = jnp.transpose(Fs, (0, 2, 1))   # (B, 2+K, C)
    Rs = jnp.transpose(Rs, (0, 2, 1))
    Ms = jnp.transpose(Ms, (0, 2, 1))

    # Empty prediction set A -> nan or (h+w)/4 (reference semantics).  Empty
    # label set B (the reference crashes there -> undefined) is mapped to the
    # same fail value so sqrt(BIG) sentinels never leak into the statistics.
    fail_val = float('nan') if ignore_failed_hd else float((H + W) / 4)
    empty = ((nA == 0) | (nB == 0))[:, None, :]      # (B, 1, C)
    Fs = jnp.where(empty, fail_val, Fs)
    Rs = jnp.where(empty, fail_val, Rs)
    Ms = jnp.where(empty, fail_val, Ms)

    # Ignored class column stays 0 (the reference `continue`s and leaves zeros).
    if ignore_class_index is not None and 0 <= ignore_class_index < C:
        keep = (jnp.arange(C) != ignore_class_index)[None, None, :]
        Fs = jnp.where(keep, Fs, 0.0)
        Rs = jnp.where(keep, Rs, 0.0)
        Ms = jnp.where(keep, Ms, 0.0)

    def finalize(X):
        # X: (B, 2+K, C) -> append the two "mean over class columns" slots.
        col_all = jnp.mean(X, axis=-1, keepdims=True)            # classes 0..C-1
        col_sub = jnp.mean(X[:, :, 1:], axis=-1, keepdims=True)  # classes 1..C-1
        return jnp.concatenate([X, col_all, col_sub], axis=-1)   # (B, 2+K, C+2)

    MHD = finalize(Ms)
    FHD = finalize(Fs)
    RHD = finalize(Rs)
    return MHD, FHD, RHD


if __name__ == "__main__":
    PARAMS = {
        'TRUNCATED_HAUSDORFF_PERCENTILES': [90.0, 95.0],
        'HD_IGNORE_CLASS_INDEX': 0,
        'IGNORE_FAILED_HD': False,
    }
    B, C, H, W = 2, 4, 16, 16

    key = jax.random.PRNGKey(0)
    k1, k2 = jax.random.split(key)
    predictions = jax.random.normal(k1, (B, C, H, W), dtype=jnp.float32)
    label_cls = jax.random.randint(k2, (B, H, W), 0, C)
    labels = jax.nn.one_hot(label_cls, C, axis=1, dtype=jnp.float32)   # (B, C, H, W)

    MHD, FHD, RHD = hausdorff_forward(
        predictions, labels,
        PARAMS['TRUNCATED_HAUSDORFF_PERCENTILES'],
        PARAMS['HD_IGNORE_CLASS_INDEX'],
        PARAMS['IGNORE_FAILED_HD'],
    )
    jax.block_until_ready((MHD, FHD, RHD))
    K = len(PARAMS['TRUNCATED_HAUSDORFF_PERCENTILES'])
    assert MHD.shape == (B, 2 + K, C + 2)
    assert FHD.shape == (B, 2 + K, C + 2)
    assert RHD.shape == (B, 2 + K, C + 2)
    print("KERNEL_OK")
</pallas_src>

<mosaic_0001>
module attributes {stable_mosaic.version = 11 : i64} {
  func.func @_hd_min_kernel(%arg0: i32, %arg1: i32, %arg2: i32, %arg3: memref<256x1xf32, #tpu.memory_space<vmem>>, %arg4: memref<256x1xf32, #tpu.memory_space<vmem>>, %arg5: memref<1x256xf32, #tpu.memory_space<vmem>>, %arg6: memref<1x256xf32, #tpu.memory_space<vmem>>, %arg7: memref<1x8x256xf32, #tpu.memory_space<vmem>>, %arg8: memref<1x8x256xf32, #tpu.memory_space<vmem>>, %arg9: memref<1x8x256xf32, #tpu.memory_space<vmem>>, %arg10: memref<1x8x256xf32, #tpu.memory_space<vmem>>) attributes {dimension_semantics = [#tpu.dimension_semantics<parallel>, #tpu.dimension_semantics<parallel>, #tpu.dimension_semantics<arbitrary>], iteration_bounds = array<i64: 1, 1, 1>, scalar_prefetch = 0 : i64, scratch_operands = 0 : i64, tpu.core_type = #tpu.core_type<tc>, window_params = [{transform_indices = @transform_0, window_bounds = array<i64: 256, 1>}, {transform_indices = @transform_1, window_bounds = array<i64: 256, 1>}, {transform_indices = @transform_2, window_bounds = array<i64: 1, 256>}, {transform_indices = @transform_3, window_bounds = array<i64: 1, 256>}, {transform_indices = @transform_4, window_bounds = array<i64: 1, 8, 256>}, {transform_indices = @transform_5, window_bounds = array<i64: 1, 8, 256>}, {transform_indices = @transform_6, window_bounds = array<i64: 1, 8, 256>}, {transform_indices = @transform_7, window_bounds = array<i64: 1, 8, 256>}]} {
    %c0_i32 = arith.constant 0 : i32
    %0 = arith.cmpi eq, %arg2, %c0_i32 : i32
    %1 = arith.extui %0 : i1 to i32
    %c0_i32_0 = arith.constant 0 : i32
    %2 = arith.cmpi ne, %1, %c0_i32_0 : i32
    scf.if %2 {
      %cst_43 = arith.constant 1.000000e+30 : f32
      %117 = vector.broadcast %cst_43 : f32 to vector<1x8x256xf32>
      %c0_44 = arith.constant 0 : index
      %c0_45 = arith.constant 0 : index
      %c0_46 = arith.constant 0 : index
      %118 = vector.load %arg9[%c0_44, %c0_45, %c0_46] : memref<1x8x256xf32, #tpu.memory_space<vmem>>, vector<1x8x256xf32>
      tpu.vector_store %arg9[%c0_44, %c0_45, %c0_46], %117 {strides = array<i32>} : memref<1x8x256xf32, #tpu.memory_space<vmem>>, vector<1x8x256xf32>,
      %cst_47 = arith.constant 1.000000e+30 : f32
      %119 = vector.broadcast %cst_47 : f32 to vector<1x8x256xf32>
      %c0_48 = arith.constant 0 : index
      %c0_49 = arith.constant 0 : index
      %c0_50 = arith.constant 0 : index
      %120 = vector.load %arg10[%c0_48, %c0_49, %c0_50] : memref<1x8x256xf32, #tpu.memory_space<vmem>>, vector<1x8x256xf32>
      tpu.vector_store %arg10[%c0_48, %c0_49, %c0_50], %119 {strides = array<i32>} : memref<1x8x256xf32, #tpu.memory_space<vmem>>, vector<1x8x256xf32>,
    } else {
    }
    %c0 = arith.constant 0 : index
    %c0_1 = arith.constant 0 : index
    %3 = vector.load %arg3[%c0, %c0_1] : memref<256x1xf32, #tpu.memory_space<vmem>>, vector<256x1xf32>
    %c0_2 = arith.constant 0 : index
    %c0_3 = arith.constant 0 : index
    %4 = vector.load %arg5[%c0_2, %c0_3] : memref<1x256xf32, #tpu.memory_space<vmem>>, vector<1x256xf32>
    %5 = vector.broadcast %3 : vector<256x1xf32> to vector<256x256xf32>
    %6 = vector.broadcast %4 : vector<1x256xf32> to vector<256x256xf32>
    %7 = arith.subf %5, %6 : vector<256x256xf32>
    %c0_4 = arith.constant 0 : index
    %c0_5 = arith.constant 0 : index
    %8 = vector.load %arg4[%c0_4, %c0_5] : memref<256x1xf32, #tpu.memory_space<vmem>>, vector<256x1xf32>
    %c0_6 = arith.constant 0 : index
    %c0_7 = arith.constant 0 : index
    %9 = vector.load %arg6[%c0_6, %c0_7] : memref<1x256xf32, #tpu.memory_space<vmem>>, vector<1x256xf32>
    %10 = vector.broadcast %8 : vector<256x1xf32> to vector<256x256xf32>
    %11 = vector.broadcast %9 : vector<1x256xf32> to vector<256x256xf32>
    %12 = arith.subf %10, %11 : vector<256x256xf32>
    %13 = arith.mulf %7, %7 : vector<256x256xf32>
    %14 = arith.mulf %12, %12 : vector<256x256xf32>
    %15 = arith.addf %13, %14 : vector<256x256xf32>
    %c0_8 = arith.constant 0 : index
    %c0_9 = arith.constant 0 : index
    %c0_10 = arith.constant 0 : index
    %16 = vector.load %arg7[%c0_8, %c0_9, %c0_10] : memref<1x8x256xf32, #tpu.memory_space<vmem>>, vector<1x8x256xf32>
    %17 = vector.shape_cast %16 : vector<1x8x256xf32> to vector<8x256xf32>
    %c0_11 = arith.constant 0 : index
    %c0_12 = arith.constant 0 : index
    %c0_13 = arith.constant 0 : index
    %18 = vector.load %arg8[%c0_11, %c0_12, %c0_13] : memref<1x8x256xf32, #tpu.memory_space<vmem>>, vector<1x8x256xf32>
    %19 = vector.shape_cast %18 : vector<1x8x256xf32> to vector<8x256xf32>
    %20 = vector.extract_strided_slice %19 {offsets = [0, 0], sizes = [1, 256], strides = [1, 1]} : vector<8x256xf32> to vector<1x256xf32>
    %21 = vector.broadcast %20 : vector<1x256xf32> to vector<256x256xf32>
    %22 = arith.addf %15, %21 : vector<256x256xf32>
    %cst = arith.constant dense<0x7F800000> : vector<256xf32>
    %23 = vector.multi_reduction <minimumf>, %22, %cst [1] : vector<256x256xf32> to vector<256xf32>
    %24 = vector.extract_strided_slice %17 {offsets = [0, 0], sizes = [1, 256], strides = [1, 1]} : vector<8x256xf32> to vector<1x256xf32>
    %25 = vector.broadcast %24 : vector<1x256xf32> to vector<256x256xf32>
    %26 = arith.addf %15, %25 : vector<256x256xf32>
    %cst_14 = arith.constant dense<0x7F800000> : vector<256xf32>
    %27 = vector.multi_reduction <minimumf>, %26, %cst_14 [1] : vector<256x256xf32> to vector<256xf32>
    %28 = vector.extract_strided_slice %19 {offsets = [1, 0], sizes = [1, 256], strides = [1, 1]} : vector<8x256xf32> to vector<1x256xf32>
    %29 = vector.broadcast %28 : vector<1x256xf32> to vector<256x256xf32>
    %30 = arith.addf %15, %29 : vector<256x256xf32>
    %cst_15 = arith.constant dense<0x7F800000> : vector<256xf32>
    %31 = vector.multi_reduction <minimumf>, %30, %cst_15 [1] : vector<256x256xf32> to vector<256xf32>
    %32 = vector.extract_strided_slice %17 {offsets = [1, 0], sizes = [1, 256], strides = [1, 1]} : vector<8x256xf32> to vector<1x256xf32>
    %33 = vector.broadcast %32 : vector<1x256xf32> to vector<256x256xf32>
    %34 = arith.addf %15, %33 : vector<256x256xf32>
    %cst_16 = arith.constant dense<0x7F800000> : vector<256xf32>
    %35 = vector.multi_reduction <minimumf>, %34, %cst_16 [1] : vector<256x256xf32> to vector<256xf32>
    %36 = vector.extract_strided_slice %19 {offsets = [2, 0], sizes = [1, 256], strides = [1, 1]} : vector<8x256xf32> to vector<1x256xf32>
    %37 = vector.broadcast %36 : vector<1x256xf32> to vector<256x256xf32>
    %38 = arith.addf %15, %37 : vector<256x256xf32>
    %cst_17 = arith.constant dense<0x7F800000> : vector<256xf32>
    %39 = vector.multi_reduction <minimumf>, %38, %cst_17 [1] : vector<256x256xf32> to vector<256xf32>
    %40 = vector.extract_strided_slice %17 {offsets = [2, 0], sizes = [1, 256], strides = [1, 1]} : vector<8x256xf32> to vector<1x256xf32>
    %41 = vector.broadcast %40 : vector<1x256xf32> to vector<256x256xf32>
    %42 = arith.addf %15, %41 : vector<256x256xf32>
    %cst_18 = arith.constant dense<0x7F800000> : vector<256xf32>
    %43 = vector.multi_reduction <minimumf>, %42, %cst_18 [1] : vector<256x256xf32> to vector<256xf32>
    %44 = vector.extract_strided_slice %19 {offsets = [3, 0], sizes = [1, 256], strides = [1, 1]} : vector<8x256xf32> to vector<1x256xf32>
    %45 = vector.broadcast %44 : vector<1x256xf32> to vector<256x256xf32>
    %46 = arith.addf %15, %45 : vector<256x256xf32>
    %cst_19 = arith.constant dense<0x7F800000> : vector<256xf32>
    %47 = vector.multi_reduction <minimumf>, %46, %cst_19 [1] : vector<256x256xf32> to vector<256xf32>
    %48 = vector.extract_strided_slice %17 {offsets = [3, 0], sizes = [1, 256], strides = [1, 1]} : vector<8x256xf32> to vector<1x256xf32>
    %49 = vector.broadcast %48 : vector<1x256xf32> to vector<256x256xf32>
    %50 = arith.addf %15, %49 : vector<256x256xf32>
    %cst_20 = arith.constant dense<0x7F800000> : vector<256xf32>
    %51 = vector.multi_reduction <minimumf>, %50, %cst_20 [1] : vector<256x256xf32> to vector<256xf32>
    %52 = vector.extract_strided_slice %19 {offsets = [4, 0], sizes = [1, 256], strides = [1, 1]} : vector<8x256xf32> to vector<1x256xf32>
    %53 = vector.broadcast %52 : vector<1x256xf32> to vector<256x256xf32>
    %54 = arith.addf %15, %53 : vector<256x256xf32>
    %cst_21 = arith.constant dense<0x7F800000> : vector<256xf32>
    %55 = vector.multi_reduction <minimumf>, %54, %cst_21 [1] : vector<256x256xf32> to vector<256xf32>
    %56 = vector.extract_strided_slice %17 {offsets = [4, 0], sizes = [1, 256], strides = [1, 1]} : vector<8x256xf32> to vector<1x256xf32>
    %57 = vector.broadcast %56 : vector<1x256xf32> to vector<256x256xf32>
    %58 = arith.addf %15, %57 : vector<256x256xf32>
    %cst_22 = arith.constant dense<0x7F800000> : vector<256xf32>
    %59 = vector.multi_reduction <minimumf>, %58, %cst_22 [1] : vector<256x256xf32> to vector<256xf32>
    %60 = vector.extract_strided_slice %19 {offsets = [5, 0], sizes = [1, 256], strides = [1, 1]} : vector<8x256xf32> to vector<1x256xf32>
    %61 = vector.broadcast %60 : vector<1x256xf32> to vector<256x256xf32>
    %62 = arith.addf %15, %61 : vector<256x256xf32>
    %cst_23 = arith.constant dense<0x7F800000> : vector<256xf32>
    %63 = vector.multi_reduction <minimumf>, %62, %cst_23 [1] : vector<256x256xf32> to vector<256xf32>
    %64 = vector.extract_strided_slice %17 {offsets = [5, 0], sizes = [1, 256], strides = [1, 1]} : vector<8x256xf32> to vector<1x256xf32>
    %65 = vector.broadcast %64 : vector<1x256xf32> to vector<256x256xf32>
    %66 = arith.addf %15, %65 : vector<256x256xf32>
    %cst_24 = arith.constant dense<0x7F800000> : vector<256xf32>
    %67 = vector.multi_reduction <minimumf>, %66, %cst_24 [1] : vector<256x256xf32> to vector<256xf32>
    %68 = vector.extract_strided_slice %19 {offsets = [6, 0], sizes = [1, 256], strides = [1, 1]} : vector<8x256xf32> to vector<1x256xf32>
    %69 = vector.broadcast %68 : vector<1x256xf32> to vector<256x256xf32>
    %70 = arith.addf %15, %69 : vector<256x256xf32>
    %cst_25 = arith.constant dense<0x7F800000> : vector<256xf32>
    %71 = vector.multi_reduction <minimumf>, %70, %cst_25 [1] : vector<256x256xf32> to vector<256xf32>
    %72 = vector.extract_strided_slice %17 {offsets = [6, 0], sizes = [1, 256], strides = [1, 1]} : vector<8x256xf32> to vector<1x256xf32>
    %73 = vector.broadcast %72 : vector<1x256xf32> to vector<256x256xf32>
    %74 = arith.addf %15, %73 : vector<256x256xf32>
    %cst_26 = arith.constant dense<0x7F800000> : vector<256xf32>
    %75 = vector.multi_reduction <minimumf>, %74, %cst_26 [1] : vector<256x256xf32> to vector<256xf32>
    %76 = vector.extract_strided_slice %19 {offsets = [7, 0], sizes = [1, 256], strides = [1, 1]} : vector<8x256xf32> to vector<1x256xf32>
    %77 = vector.broadcast %76 : vector<1x256xf32> to vector<256x256xf32>
    %78 = arith.addf %15, %77 : vector<256x256xf32>
    %cst_27 = arith.constant dense<0x7F800000> : vector<256xf32>
    %79 = vector.multi_reduction <minimumf>, %78, %cst_27 [1] : vector<256x256xf32> to vector<256xf32>
    %80 = vector.extract_strided_slice %17 {offsets = [7, 0], sizes = [1, 256], strides = [1, 1]} : vector<8x256xf32> to vector<1x256xf32>
    %81 = vector.broadcast %80 : vector<1x256xf32> to vector<256x256xf32>
    %82 = arith.addf %15, %81 : vector<256x256xf32>
    %cst_28 = arith.constant dense<0x7F800000> : vector<256xf32>
    %83 = vector.multi_reduction <minimumf>, %82, %cst_28 [1] : vector<256x256xf32> to vector<256xf32>
    %c0_29 = arith.constant 0 : index
    %c0_30 = arith.constant 0 : index
    %c0_31 = arith.constant 0 : index
    %84 = vector.load %arg9[%c0_29, %c0_30, %c0_31] : memref<1x8x256xf32, #tpu.memory_space<vmem>>, vector<1x8x256xf32>
    %85 = vector.shape_cast %84 : vector<1x8x256xf32> to vector<8x256xf32>
    %86 = vector.shape_cast %23 : vector<256xf32> to vector<1x256xf32>
    %87 = vector.shape_cast %31 : vector<256xf32> to vector<1x256xf32>
    %88 = vector.shape_cast %39 : vector<256xf32> to vector<1x256xf32>
    %89 = vector.shape_cast %47 : vector<256xf32> to vector<1x256xf32>
    %90 = vector.shape_cast %55 : vector<256xf32> to vector<1x256xf32>
    %91 = vector.shape_cast %63 : vector<256xf32> to vector<1x256xf32>
    %92 = vector.shape_cast %71 : vector<256xf32> to vector<1x256xf32>
    %93 = vector.shape_cast %79 : vector<256xf32> to vector<1x256xf32>
    %94 = tpu.concatenate %86, %87, %88, %89, %90, %91, %92, %93 in 0 : vector<1x256xf32>, vector<1x256xf32>, vector<1x256xf32>, vector<1x256xf32>, vector<1x256xf32>, vector<1x256xf32>, vector<1x256xf32>, vector<1x256xf32> -> vector<8x256xf32>
    %95 = arith.minimumf %85, %94 : vector<8x256xf32>
    %c0_32 = arith.constant 0 : index
    %c0_33 = arith.constant 0 : index
    %c0_34 = arith.constant 0 : index
    %96 = vector.load %arg9[%c0_32, %c0_33, %c0_34] : memref<1x8x256xf32, #tpu.memory_space<vmem>>, vector<1x8x256xf32>
    %97 = vector.shape_cast %96 : vector<1x8x256xf32> to vector<8x256xf32>
    %98 = vector.shape_cast %95 : vector<8x256xf32> to vector<1x8x256xf32>
    tpu.vector_store %arg9[%c0_32, %c0_33, %c0_34], %98 {strides = array<i32>} : memref<1x8x256xf32, #tpu.memory_space<vmem>>, vector<1x8x256xf32>,
    %c0_35 = arith.constant 0 : index
    %c0_36 = arith.constant 0 : index
    %c0_37 = arith.constant 0 : index
    %99 = vector.load %arg10[%c0_35, %c0_36, %c0_37] : memref<1x8x256xf32, #tpu.memory_space<vmem>>, vector<1x8x256xf32>
    %100 = vector.shape_cast %99 : vector<1x8x256xf32> to vector<8x256xf32>
    %101 = vector.shape_cast %27 : vector<256xf32> to vector<1x256xf32>
    %102 = vector.shape_cast %35 : vector<256xf32> to vector<1x256xf32>
    %103 = vector.shape_cast %43 : vector<256xf32> to vector<1x256xf32>
    %104 = vector.shape_cast %51 : vector<256xf32> to vector<1x256xf32>
    %105 = vector.shape_cast %59 : vector<256xf32> to vector<1x256xf32>
    %106 = vector.shape_cast %67 : vector<256xf32> to vector<1x256xf32>
    %107 = vector.shape_cast %75 : vector<256xf32> to vector<1x256xf32>
    %108 = vector.shape_cast %83 : vector<256xf32> to vector<1x256xf32>
    %109 = tpu.concatenate %101, %102, %103, %104, %105, %106, %107, %108 in 0 : vector<1x256xf32>, vector<1x256xf32>, vector<1x256xf32>, vector<1x256xf32>, vector<1x256xf32>, vector<1x256xf32>, vector<1x256xf32>, vector<1x256xf32> -> vector<8x256xf32>
    %110 = arith.minimumf %100, %109 : vector<8x256xf32>
    %c0_38 = arith.constant 0 : index
    %c0_39 = arith.constant 0 : index
    %c0_40 = arith.constant 0 : index
    %111 = vector.load %arg10[%c0_38, %c0_39, %c0_40] : memref<1x8x256xf32, #tpu.memory_space<vmem>>, vector<1x8x256xf32>
    %112 = vector.shape_cast %111 : vector<1x8x256xf32> to vector<8x256xf32>
    %113 = vector.shape_cast %110 : vector<8x256xf32> to vector<1x8x256xf32>
    tpu.vector_store %arg10[%c0_38, %c0_39, %c0_40], %113 {strides = array<i32>} : memref<1x8x256xf32, #tpu.memory_space<vmem>>, vector<1x8x256xf32>,
    %c0_i32_41 = arith.constant 0 : i32
    %114 = arith.cmpi eq, %arg2, %c0_i32_41 : i32
    %115 = arith.extui %114 : i1 to i32
    %c0_i32_42 = arith.constant 0 : i32
    %116 = arith.cmpi ne, %115, %c0_i32_42 : i32
    scf.if %116 {
      %c0_43 = arith.constant 0 : index
      %c0_44 = arith.constant 0 : index
      %c0_45 = arith.constant 0 : index
      %117 = vector.load %arg9[%c0_43, %c0_44, %c0_45] : memref<1x8x256xf32, #tpu.memory_space<vmem>>, vector<1x8x256xf32>
      %118 = math.sqrt %117 : vector<1x8x256xf32>
      %c0_46 = arith.constant 0 : index
      %c0_47 = arith.constant 0 : index
      %c0_48 = arith.constant 0 : index
      %119 = vector.load %arg9[%c0_46, %c0_47, %c0_48] : memref<1x8x256xf32, #tpu.memory_space<vmem>>, vector<1x8x256xf32>
      tpu.vector_store %arg9[%c0_46, %c0_47, %c0_48], %118 {strides = array<i32>} : memref<1x8x256xf32, #tpu.memory_space<vmem>>, vector<1x8x256xf32>,
      %c0_49 = arith.constant 0 : index
      %c0_50 = arith.constant 0 : index
      %c0_51 = arith.constant 0 : index
      %120 = vector.load %arg10[%c0_49, %c0_50, %c0_51] : memref<1x8x256xf32, #tpu.memory_space<vmem>>, vector<1x8x256xf32>
      %121 = math.sqrt %120 : vector<1x8x256xf32>
      %c0_52 = arith.constant 0 : index
      %c0_53 = arith.constant 0 : index
      %c0_54 = arith.constant 0 : index
      %122 = vector.load %arg10[%c0_52, %c0_53, %c0_54] : memref<1x8x256xf32, #tpu.memory_space<vmem>>, vector<1x8x256xf32>
      tpu.vector_store %arg10[%c0_52, %c0_53, %c0_54], %121 {strides = array<i32>} : memref<1x8x256xf32, #tpu.memory_space<vmem>>, vector<1x8x256xf32>,
    } else {
    }
    return
  }
  func.func @transform_0(%arg0: i32, %arg1: i32, %arg2: i32) -> (i32, i32) {
    %c0_i32 = arith.constant 0 : i32
    %c0_i32_0 = arith.constant 0 : i32
    return %arg1, %c0_i32 : i32, i32
  }
  func.func @transform_1(%arg0: i32, %arg1: i32, %arg2: i32) -> (i32, i32) {
    %c0_i32 = arith.constant 0 : i32
    %c0_i32_0 = arith.constant 0 : i32
    return %arg1, %c0_i32 : i32, i32
  }
  func.func @transform_2(%arg0: i32, %arg1: i32, %arg2: i32) -> (i32, i32) {
    %c0_i32 = arith.constant 0 : i32
    %c0_i32_0 = arith.constant 0 : i32
    return %c0_i32, %arg2 : i32, i32
  }
  func.func @transform_3(%arg0: i32, %arg1: i32, %arg2: i32) -> (i32, i32) {
    %c0_i32 = arith.constant 0 : i32
    %c0_i32_0 = arith.constant 0 : i32
    return %c0_i32, %arg2 : i32, i32
  }
  func.func @transform_4(%arg0: i32, %arg1: i32, %arg2: i32) -> (i32, i32, i32) {
    %c0_i32 = arith.constant 0 : i32
    %c0_i32_0 = arith.constant 0 : i32
    return %arg0, %c0_i32, %arg2 : i32, i32, i32
  }
  func.func @transform_5(%arg0: i32, %arg1: i32, %arg2: i32) -> (i32, i32, i32) {
    %c0_i32 = arith.constant 0 : i32
    %c0_i32_0 = arith.constant 0 : i32
    return %arg0, %c0_i32, %arg2 : i32, i32, i32
  }
  func.func @transform_6(%arg0: i32, %arg1: i32, %arg2: i32) -> (i32, i32, i32) {
    %c0_i32 = arith.constant 0 : i32
    %c0_i32_0 = arith.constant 0 : i32
    return %arg0, %c0_i32, %arg1 : i32, i32, i32
  }
  func.func @transform_7(%arg0: i32, %arg1: i32, %arg2: i32) -> (i32, i32, i32) {
    %c0_i32 = arith.constant 0 : i32
    %c0_i32_0 = arith.constant 0 : i32
    return %arg0, %c0_i32, %arg1 : i32, i32, i32
  }
}

</mosaic_0001>

<bundles_post_ra>
// kernel: tpu_custom_call.1
= control target key start
LH: loop header
LB: loop body
LE: loop exit
PB: predicated region body
PF: predicated region fallthrough
CT: control target
= control target key end

     0   :  { %13 = vsyncpa [#allocation3], 0  ;;  %v5135_v3 = vmov 0   ;;  %s10627_s0 = inlined_call_operand.vmem [shape: f32[256,1], index: 0, kind: input, shape index: {}]   ;;  %s10628_s1 = inlined_call_operand.vmem [shape: f32[256,1], index: 1, kind: input, shape index: {}]   ;;  %s10629_s2 = inlined_call_operand.vmem [shape: f32[1,256], index: 2, kind: input, shape index: {}]   ;;  %s10630_s3 = inlined_call_operand.vmem [shape: f32[1,256], index: 3, kind: input, shape index: {}]   ;;  %s10631_s4 = inlined_call_operand.vmem [shape: f32[1,8,256], index: 4, kind: input, shape index: {}]   ;;  %s10632_s5 = inlined_call_operand.vmem [shape: f32[1,8,256], index: 5, kind: input, shape index: {}]   ;;  %s10633_s6 = inlined_call_operand.hbm [shape: f32[1,8,256], index: 6, kind: output, shape index: {0}]   ;;  %s10634_s7 = inlined_call_operand.hbm [shape: f32[1,8,256], index: 7, kind: output, shape index: {1}]  }
   0x1   :  { %v39_v0 = vld [vmem:[%s10627_s0 + $0x20] sm:$0xff]  ;;  %v37_v1 = vld [vmem:[%s10627_s0 + $0x10] sm:$0xff]  ;;  %5059 = vset.pattern.permute.xlu2 %v5135_v3  ;;  %5058 = vset.pattern.permute.xlu1 %v5135_v3 }
   0x2   :  { %v35_v2 = vld [vmem:[%s10627_s0] sm:$0xff]  ;;  %5057 = vset.pattern.permute.xlu0 %v5135_v3  ;;  %90 = vperm.xlu2 %5059, %v39_v0  }
   0x3   :  { %80 = vperm.xlu1 %5058, %v37_v1   ;;  %70 = vperm.xlu0 %5057, %v35_v2  }
   0x4   :  { %14 = vsyncpa [#allocation5], 0  ;;  %v40_v4 = vld [vmem:[%s10627_s0 + $0x28] sm:$0xff]  ;;  %v38_v5 = vld [vmem:[%s10627_s0 + $0x18] sm:$0xff]  ;;  %vm3386_vm0 = vcmask 130112   ;;  %vm3390_vm1 = vcmask 195712  }
   0x5   :  { %v36_v6 = vld [vmem:[%s10627_s0 + $0x8] sm:$0xff]  ;;  %v43_v7 = vld [vmem:[%s10627_s0 + $0x40] sm:$0xff]  ;;  %v42_v8 = vld [vmem:[%s10627_s0 + $0x38] sm:$0xff]  ;;  %vm10965_vm2 = vcmask 261312   ;;  %vm10964_vm3 = vcmask 326912   ;;  %vm10963_vm4 = vcmask 392512  }
   0x6   :  { %v41_v9 = vld [vmem:[%s10627_s0 + $0x30] sm:$0xff]  ;;  %v46_v10 = vld [vmem:[%s10627_s0 + $0x58] sm:$0xff]  ;;  %v44_v12 = vld [vmem:[%s10627_s0 + $0x48] sm:$0xff]  ;;  %vm10962_vm5 = vcmask 458112   ;;  %vm3410_vm6 = vcmask 523712   ;;  %vm10952_vm7 = vcmask 589312  }
   0x7   :  { %v45_v11 = vld [vmem:[%s10627_s0 + $0x50] sm:$0xff]  ;;  %v48_v14 = vld [vmem:[%s10627_s0 + $0x68] sm:$0xff]  ;;  %v47_v15 = vld [vmem:[%s10627_s0 + $0x60] sm:$0xff]  ;;  %vm10951_vm8 = vcmask 654912   ;;  %vm10950_vm9 = vcmask 720512   ;;  %vm10949_vm10 = vcmask 786112  }
   0x8   :  { %v49_v13 = vld [vmem:[%s10627_s0 + $0x70] sm:$0xff]  ;;  %v52_v16 = vld [vmem:[%s10627_s0 + $0x88] sm:$0xff]  ;;  %v51_v17 = vld [vmem:[%s10627_s0 + $0x80] sm:$0xff]  ;;  %vm3430_vm11 = vcmask 851712   ;;  %vm3434_vm12 = vcmask 917312   ;;  %vm3438_vm13 = vcmask 982912  }
   0x9   :  { %v50_v18 = vld [vmem:[%s10627_s0 + $0x78] sm:$0xff]  ;;  %v55_v19 = vld [vmem:[%s10627_s0 + $0xa0] sm:$0xff]  ;;  %v53_v21 = vld [vmem:[%s10627_s0 + $0x90] sm:$0xff]  ;;  %vm3442_vm14 = vcmask 1048512   ;;  %vm10954_vm15 = vcmask 1040384   ;;  %s5028_s25 = sshll.u32 %s10633_s6, 4  ;;  %s5029_s25 = int_to_ptr.hbm [resolvable:$true] %s5028_s25 }
   0xa   :  { %95 = vperm.xlu2 %5059, %v40_v4   ;;  %v54_v20 = vld [vmem:[%s10627_s0 + $0x98] sm:$0xff]  ;;  %v57_v23 = vld [vmem:[%s10627_s0 + $0xb0] sm:$0xff]  ;;  %v56_v24 = vld [vmem:[%s10627_s0 + $0xa8] sm:$0xff]  ;;  %s5137_s6 = smov [#allocation4]   ;;  %s5039_s28 = sshll.u32 %s10634_s7, 4  ;;  %s5040_s28 = int_to_ptr.hbm [resolvable:$true] %s5039_s28 }
   0xb   :  { %85 = vperm.xlu1 %5058, %v38_v5   ;;  %75 = vperm.xlu0 %5057, %v36_v6   ;;  %v58_v22 = vld [vmem:[%s10627_s0 + $0xb8] sm:$0xff]  ;;  %v61_v25 = vld [vmem:[%s10627_s0 + $0xd0] sm:$0xff]  ;;  %v60_v26 = vld [vmem:[%s10627_s0 + $0xc8] sm:$0xff]  ;;  %s5037_s26 = sshll.u32 %s5137_s6, 4  ;;  %s5038_s26 = int_to_ptr.vmem [resolvable:$true] %s5037_s26 }
   0xc   :  { %v59_v27 = vld [vmem:[%s10627_s0 + $0xc0] sm:$0xff]  ;;  %v64_v28 = vld [vmem:[%s10627_s0 + $0xe8] sm:$0xff]  ;;  %v62_v30 = vld [vmem:[%s10627_s0 + $0xd8] sm:$0xff] }
   0xd   :  { %v63_v29 = vld [vmem:[%s10627_s0 + $0xe0] sm:$0xff]  ;;  %v66_v32 = vld [vmem:[%s10627_s0 + $0xf8] sm:$0xff]  ;;  %v65_v33 = vld [vmem:[%s10627_s0 + $0xf0] sm:$0xff] }
   0xe   :  { %v297_v31 = vld [vmem:[%s10628_s1] sm:$0xff]  ;;  %v300_v34 = vld [vmem:[%s10628_s1 + $0x18] sm:$0xff]  ;;  %v299_v35 = vld [vmem:[%s10628_s1 + $0x10] sm:$0xff] }
   0xf   :  { %v298_v36 = vld [vmem:[%s10628_s1 + $0x8] sm:$0xff]  ;;  %v303_v38 = vld [vmem:[%s10628_s1 + $0x30] sm:$0xff]  ;;  %v301_v40 = vld [vmem:[%s10628_s1 + $0x20] sm:$0xff] }
  0x10   :  { %v302_v39 = vld [vmem:[%s10628_s1 + $0x28] sm:$0xff]  ;;  %v305_v43 = vld [vmem:[%s10628_s1 + $0x40] sm:$0xff]  ;;  %v304_v44 = vld [vmem:[%s10628_s1 + $0x38] sm:$0xff] }
  0x11   :  { %v306_v42 = vld [vmem:[%s10628_s1 + $0x48] sm:$0xff]  ;;  %v309_v46 = vld [vmem:[%s10628_s1 + $0x60] sm:$0xff]  ;;  %v308_v47 = vld [vmem:[%s10628_s1 + $0x58] sm:$0xff] }
  0x12   :  { %110 = vperm.xlu2 %5059, %v43_v7   ;;  %v307_v48 = vld [vmem:[%s10628_s1 + $0x50] sm:$0xff]  ;;  %v312_v52 = vld [vmem:[%s10628_s1 + $0x78] sm:$0xff]  ;;  %v310_v54 = vld [vmem:[%s10628_s1 + $0x68] sm:$0xff] }
  0x13   :  { %105 = vperm.xlu1 %5058, %v42_v8   ;;  %100 = vperm.xlu0 %5057, %v41_v9   ;;  %v311_v53 = vld [vmem:[%s10628_s1 + $0x70] sm:$0xff]  ;;  %v314_v59 = vld [vmem:[%s10628_s1 + $0x88] sm:$0xff]  ;;  %v313_v60 = vld [vmem:[%s10628_s1 + $0x80] sm:$0xff] }
  0x14   :  { %v315_v58 = vld [vmem:[%s10628_s1 + $0x90] sm:$0xff]  ;;  %v318_v0 = vld [vmem:[%s10628_s1 + $0xa8] sm:$0xff]  ;;  %v317_v1 = vld [vmem:[%s10628_s1 + $0xa0] sm:$0xff] }
  0x15   :  { %v316_v2 = vld [vmem:[%s10628_s1 + $0x98] sm:$0xff]  ;;  %v321_v6 = vld [vmem:[%s10628_s1 + $0xc0] sm:$0xff]  ;;  %v319_v8 = vld [vmem:[%s10628_s1 + $0xb0] sm:$0xff] }
  0x16   :  { %v320_v7 = vld [vmem:[%s10628_s1 + $0xb8] sm:$0xff] }
  0x1a   :  { %125 = vperm.xlu2 %5059, %v46_v10  }
  0x1b   :  { %120 = vperm.xlu1 %5058, %v45_v11   ;;  %115 = vperm.xlu0 %5057, %v44_v12   ;;  %v324_v12 = vld [vmem:[%s10628_s1 + $0xd8] sm:$0xff] }
  0x22   :  { %140 = vperm.xlu2 %5059, %v49_v13   ;;  %v323_v13 = vld [vmem:[%s10628_s1 + $0xd0] sm:$0xff] }
  0x23   :  { %135 = vperm.xlu1 %5058, %v48_v14   ;;  %130 = vperm.xlu0 %5057, %v47_v15   ;;  %v322_v14 = vld [vmem:[%s10628_s1 + $0xc8] sm:$0xff] }
  0x2a   :  { %155 = vperm.xlu2 %5059, %v52_v16  }
  0x2b   :  { %150 = vperm.xlu1 %5058, %v51_v17   ;;  %145 = vperm.xlu0 %5057, %v50_v18   ;;  %v327_v18 = vld [vmem:[%s10628_s1 + $0xf0] sm:$0xff] }
  0x32   :  { %170 = vperm.xlu2 %5059, %v55_v19   ;;  %v326_v19 = vld [vmem:[%s10628_s1 + $0xe8] sm:$0xff] }
  0x33   :  { %165 = vperm.xlu1 %5058, %v54_v20   ;;  %160 = vperm.xlu0 %5057, %v53_v21   ;;  %v325_v20 = vld [vmem:[%s10628_s1 + $0xe0] sm:$0xff] }
  0x3a   :  { %185 = vperm.xlu2 %5059, %v58_v22  }
  0x3b   :  { %180 = vperm.xlu1 %5058, %v57_v23   ;;  %175 = vperm.xlu0 %5057, %v56_v24   ;;  %v328_v24 = vld [vmem:[%s10628_s1 + $0xf8] sm:$0xff] }
  0x42   :  { %200 = vperm.xlu2 %5059, %v61_v25  }
  0x43   :  { %195 = vperm.xlu1 %5058, %v60_v26   ;;  %190 = vperm.xlu0 %5057, %v59_v27  }
  0x4a   :  { %215 = vperm.xlu2 %5059, %v64_v28   ;;  %v67_v28 = vld [vmem:[%s10629_s2] sm:$0x3] }
  0x4b   :  { %210 = vperm.xlu1 %5058, %v63_v29   ;;  %205 = vperm.xlu0 %5057, %v62_v30   ;;  %v5425_v29 = vperm.slane %v67_v28, 0  ;;  %v5427_v30 = vperm.slane %v67_v28, 1 }
  0x52   :  { %332 = vperm.xlu2 %5059, %v297_v31   ;;  %v329_v31 = vld [vmem:[%s10630_s3] sm:$0x3] }
  0x53   :  { %225 = vperm.xlu1 %5058, %v66_v32   ;;  %220 = vperm.xlu0 %5057, %v65_v33  }
  0x5a   :  { %347 = vperm.xlu2 %5059, %v300_v34  }
  0x5b   :  { %342 = vperm.xlu1 %5058, %v299_v35   ;;  %337 = vperm.xlu0 %5057, %v298_v36  }
  0x5c   :  { %v5286_v37 = vpop.permute.xlu2 %90 }
  0x5d   :  { %v241_v33 = vsub.f32 %v5286_v37, %v5425_v29  ;;  %v242_v34 = vsub.f32 %v5286_v37, %v5427_v30 }
  0x62   :  { %362 = vperm.xlu2 %5059, %v303_v38  }
  0x63   :  { %357 = vperm.xlu1 %5058, %v302_v39   ;;  %352 = vperm.xlu0 %5057, %v301_v40  }
  0x64   :  { %v5297_v41 = vpop.permute.xlu2 %95 }
  0x65   :  { %v243_v35 = vsub.f32 %v5297_v41, %v5425_v29  ;;  %v244_v39 = vsub.f32 %v5297_v41, %v5427_v30 }
  0x67   :  { %v5462_v41 = vmul.f32 %v243_v35, %v243_v35 }
  0x6a   :  { %377 = vperm.xlu2 %5059, %v306_v42   ;;  %v5448_v42 = vperm.slane %v329_v31, 0 }
  0x6b   :  { %372 = vperm.xlu1 %5058, %v305_v43   ;;  %367 = vperm.xlu0 %5057, %v304_v44   ;;  %v5450_v43 = vperm.slane %v329_v31, 1 }
  0x6c   :  { %v5308_v45 = vpop.permute.xlu2 %110 }
  0x6d   :  { %v249_v40 = vsub.f32 %v5308_v45, %v5425_v29  ;;  %v250_v37 = vsub.f32 %v5308_v45, %v5427_v30 }
  0x72   :  { %392 = vperm.xlu2 %5059, %v309_v46  }
  0x73   :  { %387 = vperm.xlu1 %5058, %v308_v47   ;;  %382 = vperm.xlu0 %5057, %v307_v48   ;;  %v5458_v47 = vmul.f32 %v241_v33, %v241_v33  ;;  %v5460_v48 = vmul.f32 %v242_v34, %v242_v34 }
  0x74   :  { %v5319_v49 = vpop.permute.xlu2 %125 }
  0x75   :  { %v5321_v50 = vpop.permute.xlu1 %80  ;;  %v5323_v51 = vpop.permute.xlu0 %70  ;;  %v255_v44 = vsub.f32 %v5319_v49, %v5425_v29  ;;  %v256_v46 = vsub.f32 %v5319_v49, %v5427_v30 }
  0x76   :  { %v238_v45 = vsub.f32 %v5321_v50, %v5427_v30  ;;  %v234_v49 = vsub.f32 %v5323_v51, %v5427_v30 }
  0x7a   :  { %407 = vperm.xlu2 %5059, %v312_v52   ;;  %v5464_v52 = vmul.f32 %v244_v39, %v244_v39  ;;  %v754_v39 = vld [vmem:[%s10632_s5 + $0x8] sm:$0xff] }
  0x7b   :  { %402 = vperm.xlu1 %5058, %v311_v53   ;;  %397 = vperm.xlu0 %5057, %v310_v54   ;;  %v5466_v53 = vmul.f32 %v249_v40, %v249_v40  ;;  %v237_v54 = vsub.f32 %v5321_v50, %v5425_v29 }
  0x7c   :  { %v5334_v55 = vpop.permute.xlu2 %140 }
  0x7d   :  { %v5336_v56 = vpop.permute.xlu1 %85  ;;  %v5338_v57 = vpop.permute.xlu0 %75 }
  0x82   :  { %422 = vperm.xlu2 %5059, %v315_v58   ;;  %v233_v58 = vsub.f32 %v5323_v51, %v5425_v29  ;;  %v239_v51 = vsub.f32 %v5336_v56, %v5425_v29 }
  0x83   :  { %417 = vperm.xlu1 %5058, %v314_v59   ;;  %412 = vperm.xlu0 %5057, %v313_v60  }
  0x84   :  { %v5349_v61 = vpop.permute.xlu2 %155 }
  0x85   :  { %v5351_v62 = vpop.permute.xlu1 %105  ;;  %v5353_v63 = vpop.permute.xlu0 %100  ;;  %v268_v33 = vsub.f32 %v5349_v61, %v5427_v30 }
  0x86   :  { %v247_v34 = vsub.f32 %v5351_v62, %v5425_v29  ;;  %v248_v35 = vsub.f32 %v5351_v62, %v5427_v30  ;;  %v245_v62 = vsub.f32 %v5353_v63, %v5425_v29 }
  0x8a   :  { %437 = vperm.xlu2 %5059, %v318_v0   ;;  %v5478_v0 = vmul.f32 %v250_v37, %v250_v37  ;;  %v5524_v37 = vmul.f32 %v239_v51, %v239_v51  ;;  %v5550_v51 = vmul.f32 %v248_v35, %v248_v35 }
  0x8b   :  { %432 = vperm.xlu1 %5058, %v317_v1   ;;  %427 = vperm.xlu0 %5057, %v316_v2   ;;  %v5480_v1 = vmul.f32 %v255_v44, %v255_v44  ;;  %v5482_v2 = vmul.f32 %v256_v46, %v256_v46 }
  0x8c   :  { %v5364_v3 = vpop.permute.xlu2 %170 }
  0x8d   :  { %v5366_v4 = vpop.permute.xlu1 %120  ;;  %v5368_v5 = vpop.permute.xlu0 %115 }
  0x92   :  { %452 = vperm.xlu2 %5059, %v321_v6   ;;  %v261_v6 = vsub.f32 %v5334_v55, %v5425_v29 }
  0x93   :  { %447 = vperm.xlu1 %5058, %v320_v7   ;;  %442 = vperm.xlu0 %5057, %v319_v8   ;;  %v262_v7 = vsub.f32 %v5334_v55, %v5427_v30  ;;  %v240_v8 = vsub.f32 %v5336_v56, %v5427_v30  ;;  %v236_v55 = vsub.f32 %v5338_v57, %v5427_v30 }
  0x94   :  { %v5379_v9 = vpop.permute.xlu2 %185  ;;  %v5508_v31 = vmul.f32 %v261_v6, %v261_v6  ;;  %v5546_v6 = vmul.f32 %v268_v33, %v268_v33 }
  0x95   :  { %v5381_v10 = vpop.permute.xlu1 %135  ;;  %v5383_v11 = vpop.permute.xlu0 %130  ;;  %v5522_v40 = vmul.f32 %v262_v7, %v262_v7  ;;  %v5526_v44 = vmul.f32 %v240_v8, %v240_v8  ;;  %v5530_v46 = vmul.f32 %v236_v55, %v236_v55  ;;  %v5548_v7 = vmul.f32 %v247_v34, %v247_v34 }
  0x96   :  { %10974 = vst [vmem:[#allocation15_spill] sm:$0xff] %v5546_v6  ;;  %v273_v8 = vsub.f32 %v5364_v3, %v5425_v29  ;;  %v253_v55 = vsub.f32 %v5366_v4, %v5425_v29  ;;  %v279_v33 = vsub.f32 %v5379_v9, %v5425_v29  ;;  %v259_v34 = vsub.f32 %v5381_v10, %v5425_v29 }
  0x97   :  { %v260_v35 = vsub.f32 %v5381_v10, %v5427_v30 }
  0x9a   :  { %467 = vperm.xlu2 %5059, %v324_v12   ;;  %v235_v12 = vsub.f32 %v5338_v57, %v5425_v29  ;;  %v753_v57 = vld [vmem:[%s10632_s5] sm:$0xff] }
  0x9b   :  { %462 = vperm.xlu1 %5058, %v323_v13   ;;  %457 = vperm.xlu0 %5057, %v322_v14  }
  0x9c   :  { %v5394_v15 = vpop.permute.xlu2 %200 }
  0x9d   :  { %v5396_v16 = vpop.permute.xlu1 %150  ;;  %v5398_v17 = vpop.permute.xlu0 %145 }
  0xa2   :  { %482 = vperm.xlu2 %5059, %v327_v18   ;;  %v5500_v18 = vmul.f32 %v237_v54, %v237_v54 }
  0xa3   :  { %477 = vperm.xlu1 %5058, %v326_v19   ;;  %472 = vperm.xlu0 %5057, %v325_v20   ;;  %v5502_v19 = vmul.f32 %v238_v45, %v238_v45  ;;  %v267_v20 = vsub.f32 %v5349_v61, %v5425_v29  ;;  %v5528_v61 = vmul.f32 %v235_v12, %v235_v12 }
  0xa4   :  { %v5409_v21 = vpop.permute.xlu2 %215  ;;  %v246_v45 = vsub.f32 %v5353_v63, %v5427_v30  ;;  %v274_v63 = vsub.f32 %v5364_v3, %v5427_v30  ;;  %v280_v3 = vsub.f32 %v5379_v9, %v5427_v30  ;;  %v257_v9 = vsub.f32 %v5383_v11, %v5425_v29 }
  0xa5   :  { %10967 = vst [vmem:[#allocation8_spill] sm:$0xff] %v5409_v21  ;;  %v5411_v22 = vpop.permute.xlu1 %165  ;;  %v5413_v23 = vpop.permute.xlu0 %160  ;;  %v5532_v54 = vmul.f32 %v267_v20, %v267_v20  ;;  %v254_v20 = vsub.f32 %v5366_v4, %v5427_v30  ;;  %v5576_v4 = vmul.f32 %v245_v62, %v245_v62  ;;  %v258_v62 = vsub.f32 %v5383_v11, %v5427_v30 }
  0xa6   :  { %v5592_v21 = vmul.f32 %v274_v63, %v274_v63  ;;  %v265_v11 = vsub.f32 %v5396_v16, %v5425_v29  ;;  %v266_v63 = vsub.f32 %v5396_v16, %v5427_v30 }
  0xa7   :  { %10971 = vst [vmem:[#allocation12_spill] sm:$0xff] %v5532_v54  ;;  %v5596_v10 = vmul.f32 %v254_v20, %v254_v20  ;;  %v5614_v20 = vmul.f32 %v257_v9, %v257_v9 }
  0xa8   :  { %10978 = vst [vmem:[#allocation19_spill] sm:$0xff] %v5592_v21 }
  0xab   :  { %487 = vperm.xlu0 %5057, %v328_v24   ;;  %v559_v24 = vmul.f32 %v233_v58, %v233_v58 }
  0xac   :  { %v333_v25 = vpop.permute.xlu2 %332 }
  0xad   :  { %v5418_v26 = vpop.permute.xlu1 %180  ;;  %v5420_v27 = vpop.permute.xlu0 %175  ;;  %v495_v59 = vsub.f32 %v333_v25, %v5448_v42  ;;  %v496_v60 = vsub.f32 %v333_v25, %v5450_v43  ;;  %v560_v25 = vmul.f32 %v234_v49, %v234_v49 }
  0xaf   :  { %v623_v56 = vmul.f32 %v495_v59, %v495_v59  ;;  %v624_v28 = vmul.f32 %v496_v60, %v496_v60  ;;  %v5542_v59 = vperm.slane %v753_v57, 0  ;;  %v5544_v60 = vperm.slane %v754_v39, 0 }
  0xb0   :  { %v5584_v39 = vmul.f32 %v246_v45, %v246_v45  ;;  %v5602_v45 = vmul.f32 %v279_v33, %v279_v33  ;;  %v5624_v33 = vsub.f32 %v5394_v15, %v5427_v30 }
  0xb1   :  { %v5538_v58 = vadd.f32 %v623_v56, %v559_v24  ;;  %v5540_v49 = vadd.f32 %v624_v28, %v560_v25  ;;  %v251_v24 = vsub.f32 %v5368_v5, %v5425_v29  ;;  %v252_v28 = vsub.f32 %v5368_v5, %v5427_v30 }
  0xb2   :  { %10979 = vst [vmem:[#allocation20_spill] sm:$0xff] %v5602_v45 }
  0xb3   :  { %10972 = vst [vmem:[#allocation13_spill] sm:$0xff] %v5538_v58  ;;  %v757_v57 = vadd.f32 %v5542_v59, %v5538_v58  ;;  %v758_v5 = vadd.f32 %v5544_v60, %v5540_v49  ;;  %v5598_v58 = vmul.f32 %v251_v24, %v251_v24  ;;  %v5616_v24 = vmul.f32 %v258_v62, %v258_v62 }
  0xb4   :  { %v5432_v32 = vpop.permute.xlu2 %347  ;;  %10973 = vst [vmem:[#allocation14_spill] sm:$0xff] %v5540_v49  ;;  %v5606_v49 = vmul.f32 %v259_v34, %v259_v34  ;;  %v264_v34 = vsub.f32 %v5398_v17, %v5427_v30 }
  0xb5   :  { %v5440_v36 = vpop.permute.xlu1 %195  ;;  %v5442_v38 = vpop.permute.xlu0 %190  ;;  %10982 = vst [vmem:[#allocation23_spill] sm:$0xff] %v5624_v33  ;;  %v501_v16 = vsub.f32 %v5432_v32, %v5448_v42 }
  0xb6   :  { %10968 = vst [vmem:[#allocation9_spill] sm:$0xff] %v5442_v38 }
  0xb7   :  { %v629_v38 = vmul.f32 %v501_v16, %v501_v16 }
  0xbc   :  { %v5486_v50 = vpop.permute.xlu2 %362 }
  0xbd   :  { %v5496_v13 = vpop.permute.xlu1 %210  ;;  %v5498_v14 = vpop.permute.xlu0 %205 }
  0xbe   :  { %10969 = vst [vmem:[#allocation10_spill] sm:$0xff] %v5496_v13  ;;  %v5594_v13 = vmul.f32 %v253_v55, %v253_v55  ;;  %v821_v55 = vmin.f32 %v757_v57, %v758_v5 }
  0xbf   :  { %10970 = vst [vmem:[#allocation11_spill] sm:$0xff] %v5498_v14 }
  0xc4   :  { %v5554_v12 = vpop.permute.xlu2 %377 }
  0xc5   :  { %v5564_v25 = vpop.permute.xlu1 %225  ;;  %v5566_v56 = vpop.permute.xlu0 %220 }
  0xc6   :  { %10975 = vst [vmem:[#allocation16_spill] sm:$0xff] %v5564_v25  ;;  %v5586_v25 = vmul.f32 %v273_v8, %v273_v8  ;;  %v5604_v8 = vmul.f32 %v280_v3, %v280_v3  ;;  %v263_v3 = vsub.f32 %v5398_v17, %v5425_v29  ;;  %v5640_v17 = vmul.f32 %v265_v11, %v265_v11 }
  0xc7   :  { %10976 = vst [vmem:[#allocation17_spill] sm:$0xff] %v5566_v56  ;;  %v5600_v56 = vmul.f32 %v252_v28, %v252_v28  ;;  %v5620_v28 = vsub.f32 %v5394_v15, %v5425_v29 }
  0xc8   :  { %10977 = vst [vmem:[#allocation18_spill] sm:$0xff] %v5586_v25  ;;  %v5608_v25 = vmul.f32 %v260_v35, %v260_v35  ;;  %v502_v35 = vsub.f32 %v5432_v32, %v5450_v43  ;;  %v507_v32 = vsub.f32 %v5486_v50, %v5448_v42  ;;  %v5648_v54 = vmul.f32 %v263_v3, %v263_v3 }
  0xc9   :  { %10980 = vst [vmem:[#allocation21_spill] sm:$0xff] %v5604_v8  ;;  %v5642_v8 = vmul.f32 %v266_v63, %v266_v63 }
  0xca   :  { %10981 = vst [vmem:[#allocation22_spill] sm:$0xff] %v5620_v28 }
  0xcb   :  { %10983 = vst [vmem:[#allocation24_spill] sm:$0xff] %v5642_v8 }
  0xcc   :  { %v5634_v9 = vpop.permute.xlu2 %392 }
  0xcd   :  { %v343_v57 = vpop.permute.xlu1 %342  ;;  %822 = vmin.xlane.f32.xlu1 %v821_v55  ;;  %v338_v5 = vpop.permute.xlu0 %337  ;;  %v508_v55 = vsub.f32 %v5486_v50, %v5450_v43 }
  0xce   :  { %v499_v15 = vsub.f32 %v343_v57, %v5448_v42  ;;  %v500_v62 = vsub.f32 %v343_v57, %v5450_v43  ;;  %v497_v33 = vsub.f32 %v338_v5, %v5448_v42  ;;  %v498_v28 = vsub.f32 %v338_v5, %v5450_v43 }
  0xcf   :  { %v5650_v57 = vmul.f32 %v264_v34, %v264_v34  ;;  %v630_v5 = vmul.f32 %v502_v35, %v502_v35  ;;  %v636_v3 = vmul.f32 %v508_v55, %v508_v55  ;;  %v513_v34 = vsub.f32 %v5554_v12, %v5448_v42 }
  0xd0   :  { %v627_v45 = vmul.f32 %v499_v15, %v499_v15  ;;  %v628_v21 = vmul.f32 %v500_v62, %v500_v62  ;;  %v625_v14 = vmul.f32 %v497_v33, %v497_v33  ;;  %v626_v6 = vmul.f32 %v498_v28, %v498_v28 }
  0xd1   :  { %v271_v28 = vsub.f32 %v5411_v22, %v5425_v29  ;;  %v635_v33 = vmul.f32 %v507_v32, %v507_v32 }
  0xd2   :  { %v5653_v11 = vadd.f32 %v627_v45, %v5500_v18  ;;  %v5656_v63 = vadd.f32 %v628_v21, %v5502_v19  ;;  %v5659_v8 = vadd.f32 %v625_v14, %v5528_v61  ;;  %v5662_v50 = vadd.f32 %v626_v6, %v5530_v46 }
  0xd3   :  { %v272_v61 = vsub.f32 %v5411_v22, %v5427_v30  ;;  %v5679_v46 = vadd.f32 %v629_v38, %v5524_v37  ;;  %v5682_v6 = vadd.f32 %v630_v5, %v5526_v44  ;;  %v514_v45 = vsub.f32 %v5554_v12, %v5450_v43 }
  0xd4   :  { %10984 = vst [vmem:[#allocation25_spill] sm:$0xff] %v5653_v11  ;;  %v761_v18 = vadd.f32 %v5542_v59, %v5653_v11  ;;  %v762_v21 = vadd.f32 %v5544_v60, %v5656_v63  ;;  %v759_v14 = vadd.f32 %v5542_v59, %v5659_v8  ;;  %v760_v19 = vadd.f32 %v5544_v60, %v5662_v50 }
  0xd5   :  { %10985 = vst [vmem:[#allocation26_spill] sm:$0xff] %v5656_v63  ;;  %v358_v16 = vpop.permute.xlu1 %357  ;;  %v353_v35 = vpop.permute.xlu0 %352  ;;  %v5691_v22 = vadd.f32 %v635_v33, %v5576_v4  ;;  %v5694_v38 = vadd.f32 %v636_v3, %v5584_v39  ;;  %v269_v12 = vsub.f32 %v5413_v23, %v5425_v29  ;;  %v641_v5 = vmul.f32 %v513_v34, %v513_v34 }
  0xd6   :  { %10986 = vst [vmem:[#allocation27_spill] sm:$0xff] %v5659_v8  ;;  %v505_v15 = vsub.f32 %v358_v16, %v5448_v42  ;;  %v506_v62 = vsub.f32 %v358_v16, %v5450_v43  ;;  %v503_v32 = vsub.f32 %v353_v35, %v5448_v42  ;;  %v504_v55 = vsub.f32 %v353_v35, %v5450_v43  ;;  %v408_v63 = vpop.permute.xlu2 %407 }
  0xd7   :  { %10987 = vst [vmem:[#allocation28_spill] sm:$0xff] %v5662_v50  ;;  %v827_v37 = vmin.f32 %v761_v18, %v762_v21  ;;  %v824_v44 = vmin.f32 %v759_v14, %v760_v19  ;;  %v270_v16 = vsub.f32 %v5413_v23, %v5427_v30  ;;  %v642_v8 = vmul.f32 %v514_v45, %v514_v45 }
  0xd8   :  { %10988 = vst [vmem:[#allocation29_spill] sm:$0xff] %v5679_v46  ;;  %v631_v11 = vmul.f32 %v503_v32, %v503_v32  ;;  %v632_v50 = vmul.f32 %v504_v55, %v504_v55  ;;  %v633_v35 = vmul.f32 %v505_v15, %v505_v15  ;;  %v5700_v4 = vmul.f32 %v271_v28, %v271_v28 }
  0xd9   :  { %10989 = vst [vmem:[#allocation30_spill] sm:$0xff] %v5682_v6  ;;  %828 = vmin.xlane.f32.xlu0 %v827_v37  ;;  %825 = vmin.xlane.f32.xlu2 %v824_v44  ;;  %v634_v39 = vmul.f32 %v506_v62, %v506_v62  ;;  %v769_v34 = vadd.f32 %v5542_v59, %v5691_v22 }
  0xda   :  { %10990 = vst [vmem:[#allocation31_spill] sm:$0xff] %v5691_v22  ;;  %v5703_v33 = vadd.f32 %v631_v11, %v5458_v47  ;;  %v5706_v3 = vadd.f32 %v632_v50, %v5460_v48  ;;  %v770_v18 = vadd.f32 %v5544_v60, %v5694_v38  ;;  %v763_v23 = vadd.f32 %v5542_v59, %v5679_v46 }
  0xdb   :  { %10991 = vst [vmem:[#allocation32_spill] sm:$0xff] %v5694_v38  ;;  %v764_v28 = vadd.f32 %v5544_v60, %v5682_v6  ;;  %v5717_v21 = vadd.f32 %v641_v5, %v5598_v58  ;;  %v519_v47 = vsub.f32 %v5634_v9, %v5448_v42  ;;  %v5725_v50 = vmul.f32 %v272_v61, %v272_v61 }
  0xdc   :  { %10992 = vst [vmem:[#allocation33_spill] sm:$0xff] %v5703_v33  ;;  %v765_v48 = vadd.f32 %v5542_v59, %v5703_v33  ;;  %v766_v11 = vadd.f32 %v5544_v60, %v5706_v3  ;;  %v5728_v14 = vadd.f32 %v642_v8, %v5600_v56  ;;  %v520_v19 = vsub.f32 %v5634_v9, %v5450_v43 }
  0xdd   :  { %10993 = vst [vmem:[#allocation34_spill] sm:$0xff] %v5706_v3  ;;  %v5733_v58 = vadd.f32 %v633_v35, %v5462_v41  ;;  %v373_v45 = vpop.permute.xlu1 %372  ;;  %v368_v15 = vpop.permute.xlu0 %367  ;;  %v5736_v62 = vadd.f32 %v634_v39, %v5464_v52  ;;  %v839_v8 = vmin.f32 %v769_v34, %v770_v18  ;;  %v830_v37 = vmin.f32 %v763_v23, %v764_v28 }
  0xde   :  { %10994 = vst [vmem:[#allocation35_spill] sm:$0xff] %v5717_v21  ;;  %v511_v32 = vsub.f32 %v373_v45, %v5448_v42  ;;  %v509_v55 = vsub.f32 %v368_v15, %v5448_v42  ;;  %v510_v61 = vsub.f32 %v368_v15, %v5450_v43  ;;  %v512_v56 = vsub.f32 %v373_v45, %v5450_v43  ;;  %v423_v15 = vpop.permute.xlu2 %422 }
  0xdf   :  { %10995 = vst [vmem:[#allocation36_spill] sm:$0xff] %v5728_v14  ;;  %v833_v44 = vmin.f32 %v765_v48, %v766_v11  ;;  %v647_v9 = vmul.f32 %v519_v47, %v519_v47  ;;  %v775_v35 = vadd.f32 %v5542_v59, %v5717_v21  ;;  %v648_v38 = vmul.f32 %v520_v19, %v520_v19 }
  0xe0   :  { %10996 = vst [vmem:[#allocation37_spill] sm:$0xff] %v5733_v58  ;;  %v637_v5 = vmul.f32 %v509_v55, %v509_v55  ;;  %v638_v41 = vmul.f32 %v510_v61, %v510_v61  ;;  %v776_v52 = vadd.f32 %v5544_v60, %v5728_v14  ;;  %v767_v39 = vadd.f32 %v5542_v59, %v5733_v58 }
  0xe1   :  { %10997 = vst [vmem:[#allocation38_spill] sm:$0xff] %v5736_v62  ;;  %840 = vmin.xlane.f32.xlu0 %v839_v8  ;;  %831 = vmin.xlane.f32.xlu2 %v830_v37  ;;  %v639_v45 = vmul.f32 %v511_v32, %v511_v32  ;;  %v768_v23 = vadd.f32 %v5544_v60, %v5736_v62 }
  0xe2   :  { %v5749_v34 = vadd.f32 %v637_v5, %v5548_v7  ;;  %v5752_v18 = vadd.f32 %v638_v41, %v5550_v51  ;;  %834 = vmin.xlane.f32.xlu1 %v833_v44  ;;  %v5756_v28 = vmul.f32 %v269_v12, %v269_v12  ;;  %v5758_v47 = vmul.f32 %v270_v16, %v270_v16 }
  0xe3   :  { %v277_v48 = vsub.f32 %v5418_v26, %v5425_v29  ;;  %v640_v11 = vmul.f32 %v512_v56, %v512_v56  ;;  %v278_v19 = vsub.f32 %v5418_v26, %v5427_v30  ;;  %v5765_v7 = vadd.f32 %v647_v9, %v5614_v20 }
  0xe4   :  { %10998 = vst [vmem:[#allocation39_spill] sm:$0xff] %v5749_v34  ;;  %v771_v51 = vadd.f32 %v5542_v59, %v5749_v34  ;;  %v772_v32 = vadd.f32 %v5544_v60, %v5752_v18  ;;  %v5772_v12 = vadd.f32 %v648_v38, %v5616_v24  ;;  %v525_v16 = vsub.f32 %v408_v63, %v5448_v42 }
  0xe5   :  { %10999 = vst [vmem:[#allocation40_spill] sm:$0xff] %v5752_v18  ;;  %v526_v55 = vsub.f32 %v408_v63, %v5450_v43  ;;  %v388_v61 = vpop.permute.xlu1 %387  ;;  %v383_v56 = vpop.permute.xlu0 %382  ;;  %v848_v8 = vmin.f32 %v775_v35, %v776_v52  ;;  %v5777_v26 = vadd.f32 %v639_v45, %v5466_v53  ;;  %v836_v44 = vmin.f32 %v767_v39, %v768_v23 }
  0xe6   :  { %11000 = vst [vmem:[#allocation41_spill] sm:$0xff] %v5765_v7  ;;  %v515_v20 = vsub.f32 %v383_v56, %v5448_v42  ;;  %v516_v37 = vsub.f32 %v383_v56, %v5450_v43  ;;  %v5782_v9 = vadd.f32 %v640_v11, %v5478_v0  ;;  %v517_v24 = vsub.f32 %v388_v61, %v5448_v42 }
  0xe7   :  { %11001 = vst [vmem:[#allocation42_spill] sm:$0xff] %v5772_v12  ;;  %v518_v38 = vsub.f32 %v388_v61, %v5450_v43  ;;  %v842_v5 = vmin.f32 %v771_v51, %v772_v32  ;;  %v275_v63 = vsub.f32 %v5420_v27, %v5425_v29  ;;  %v781_v53 = vadd.f32 %v5542_v59, %v5765_v7 }
  0xe8   :  { %11002 = vst [vmem:[#allocation43_spill] sm:$0xff] %v5777_v26  ;;  %v643_v41 = vmul.f32 %v515_v20, %v515_v20  ;;  %v644_v35 = vmul.f32 %v516_v37, %v516_v37  ;;  %v653_v52 = vmul.f32 %v525_v16, %v525_v16  ;;  %v654_v45 = vmul.f32 %v526_v55, %v526_v55 }
  0xe9   :  { %11003 = vst [vmem:[#allocation44_spill] sm:$0xff] %v5782_v9  ;;  %849 = vmin.xlane.f32.xlu0 %v848_v8  ;;  %837 = vmin.xlane.f32.xlu2 %v836_v44  ;;  %v782_v0 = vadd.f32 %v5544_v60, %v5772_v12  ;;  %v5792_v39 = vmul.f32 %v277_v48, %v277_v48 }
  0xea   :  { %v276_v23 = vsub.f32 %v5420_v27, %v5427_v30  ;;  %v5797_v11 = vadd.f32 %v643_v41, %v5594_v13  ;;  %v5800_v51 = vadd.f32 %v644_v35, %v5596_v10  ;;  %843 = vmin.xlane.f32.xlu1 %v842_v5  ;;  %v645_v32 = vmul.f32 %v517_v24, %v517_v24  ;;  %v438_v27 = vpop.permute.xlu2 %437 }
  0xeb   :  { %v646_v16 = vmul.f32 %v518_v38, %v518_v38  ;;  %v773_v55 = vadd.f32 %v5542_v59, %v5777_v26  ;;  %v774_v61 = vadd.f32 %v5544_v60, %v5782_v9  ;;  %v5806_v48 = vmul.f32 %v278_v19, %v278_v19 }
  0xec   :  { %11004 = vst [vmem:[#allocation45_spill] sm:$0xff] %v5797_v11  ;;  %v531_v56 = vsub.f32 %v423_v15, %v5448_v42  ;;  %v777_v13 = vadd.f32 %v5542_v59, %v5797_v11  ;;  %v778_v10 = vadd.f32 %v5544_v60, %v5800_v51  ;;  %v5814_v8 = vadd.f32 %v653_v52, %v5648_v54 }
  0xed   :  { %11005 = vst [vmem:[#allocation46_spill] sm:$0xff] %v5800_v51  ;;  %v5817_v20 = vadd.f32 %v654_v45, %v5650_v57  ;;  %v532_v37 = vsub.f32 %v423_v15, %v5450_v43  ;;  %v403_v44 = vpop.permute.xlu1 %402  ;;  %v398_v19 = vpop.permute.xlu0 %397  ;;  %v857_v24 = vmin.f32 %v781_v53, %v782_v0  ;;  %v5825_v12 = vadd.f32 %v645_v32, %v5480_v1 }
  0xee   :  { %11006 = vst [vmem:[#allocation47_spill] sm:$0xff] %v5814_v8  ;;  %v523_v38 = vsub.f32 %v403_v44, %v5448_v42  ;;  %v524_v5 = vsub.f32 %v403_v44, %v5450_v43  ;;  %v521_v41 = vsub.f32 %v398_v19, %v5448_v42  ;;  %v522_v35 = vsub.f32 %v398_v19, %v5450_v43 }
  0xef   :  { %11007 = vst [vmem:[#allocation48_spill] sm:$0xff] %v5817_v20  ;;  %v5828_v54 = vadd.f32 %v646_v16, %v5482_v2  ;;  %v845_v57 = vmin.f32 %v773_v55, %v774_v61  ;;  %v851_v52 = vmin.f32 %v777_v13, %v778_v10  ;;  %v601_v15 = vmul.f32 %v275_v63, %v275_v63 }
  0xf0   :  { %11008 = vst [vmem:[#allocation49_spill] sm:$0xff] %v5825_v12  ;;  %v659_v45 = vmul.f32 %v531_v56, %v531_v56  ;;  %v649_v7 = vmul.f32 %v521_v41, %v521_v41  ;;  %v650_v53 = vmul.f32 %v522_v35, %v522_v35  ;;  %v602_v0 = vmul.f32 %v276_v23, %v276_v23 }
  0xf1   :  { %11009 = vst [vmem:[#allocation50_spill] sm:$0xff] %v5828_v54  ;;  %v660_v14 = vmul.f32 %v532_v37, %v532_v37  ;;  %v651_v21 = vmul.f32 %v523_v38, %v523_v38  ;;  %858 = vmin.xlane.f32.xlu0 %v857_v24  ;;  %846 = vmin.xlane.f32.xlu2 %v845_v57 }
  0xf2   :  { %v283_v44 = vsub.f32 %v5440_v36, %v5425_v29  ;;  %v652_v19 = vmul.f32 %v524_v5, %v524_v5  ;;  %v5833_v1 = vadd.f32 %v649_v7, %v5606_v49  ;;  %v5836_v2 = vadd.f32 %v650_v53, %v5608_v25  ;;  %852 = vmin.xlane.f32.xlu1 %v851_v52  ;;  %v453_v24 = vpop.permute.xlu2 %452 }
  0xf3   :  { %v787_v63 = vadd.f32 %v5542_v59, %v5814_v8  ;;  %v788_v23 = vadd.f32 %v5544_v60, %v5817_v20  ;;  %v779_v32 = vadd.f32 %v5542_v59, %v5825_v12  ;;  %v780_v16 = vadd.f32 %v5544_v60, %v5828_v54 }
  0xf4   :  { %11010 = vst [vmem:[#allocation51_spill] sm:$0xff] %v5833_v1  ;;  %v5847_v55 = vadd.f32 %v659_v45, %v5756_v28  ;;  %v537_v49 = vsub.f32 %v438_v27, %v5448_v42  ;;  %v783_v25 = vadd.f32 %v5542_v59, %v5833_v1  ;;  %v784_v7 = vadd.f32 %v5544_v60, %v5836_v2 }
  0xf5   :  { %11011 = vst [vmem:[#allocation52_spill] sm:$0xff] %v5836_v2  ;;  %v284_v61 = vsub.f32 %v5440_v36, %v5427_v30  ;;  %v5857_v56 = vadd.f32 %v660_v14, %v5758_v47  ;;  %v538_v13 = vsub.f32 %v438_v27, %v5450_v43  ;;  %v5861_v10 = vadd.f32 %v651_v21, %v5508_v31  ;;  %v418_v28 = vpop.permute.xlu1 %417  ;;  %v413_v37 = vpop.permute.xlu0 %412 }
  0xf6   :  { %11012 = vst [vmem:[#allocation53_spill] sm:$0xff] %v5847_v55  ;;  %v5864_v38 = vadd.f32 %v652_v19, %v5522_v40  ;;  %v529_v5 = vsub.f32 %v418_v28, %v5448_v42  ;;  %v527_v41 = vsub.f32 %v413_v37, %v5448_v42  ;;  %v528_v36 = vsub.f32 %v413_v37, %v5450_v43 }
  0xf7   :  { %11013 = vst [vmem:[#allocation54_spill] sm:$0xff] %v5857_v56  ;;  %v530_v14 = vsub.f32 %v418_v28, %v5450_v43  ;;  %v866_v47 = vmin.f32 %v787_v63, %v788_v23  ;;  %v854_v35 = vmin.f32 %v779_v32, %v780_v16  ;;  %v860_v27 = vmin.f32 %v783_v25, %v784_v7  ;;  %v11017_v23 = vld [vmem:[#allocation24_spill] sm:$0xff]  ;;  %v11019_v25 = vld [vmem:[#allocation9_spill] sm:$0xff] }
  0xf8   :  { %11014 = vst [vmem:[#allocation55_spill] sm:$0xff] %v5861_v10  ;;  %v665_v57 = vmul.f32 %v537_v49, %v537_v49  ;;  %v655_v31 = vmul.f32 %v527_v41, %v527_v41  ;;  %v656_v21 = vmul.f32 %v528_v36, %v528_v36  ;;  %v793_v52 = vadd.f32 %v5542_v59, %v5847_v55 }
  0xf9   :  { %11015 = vst [vmem:[#allocation56_spill] sm:$0xff] %v5864_v38  ;;  %v666_v45 = vmul.f32 %v538_v13, %v538_v13  ;;  %867 = vmin.xlane.f32.xlu0 %v866_v47  ;;  %855 = vmin.xlane.f32.xlu2 %v854_v35  ;;  %v794_v40 = vadd.f32 %v5544_v60, %v5857_v56 }
  0xfa   :  { %v785_v53 = vadd.f32 %v5542_v59, %v5861_v10  ;;  %v657_v19 = vmul.f32 %v529_v5, %v529_v5  ;;  %v5877_v63 = vadd.f32 %v655_v31, %v5640_v17  ;;  %v5880_v32 = vadd.f32 %v656_v21, %v11017_v23  ;;  %861 = vmin.xlane.f32.xlu1 %v860_v27  ;;  %v11024_v23 = vld [vmem:[#allocation15_spill] sm:$0xff]  ;;  %v468_v55 = vpop.permute.xlu2 %467 }
  0xfb   :  { %v786_v16 = vadd.f32 %v5544_v60, %v5864_v38  ;;  %v5884_v49 = vmul.f32 %v283_v44, %v283_v44  ;;  %v281_v7 = vsub.f32 %v11019_v25, %v5425_v29  ;;  %v282_v13 = vsub.f32 %v11019_v25, %v5427_v30 }
  0xfc   :  { %11016 = vst [vmem:[#allocation57_spill] sm:$0xff] %v5877_v63  ;;  %v658_v28 = vmul.f32 %v530_v14, %v530_v14  ;;  %v5890_v37 = vmul.f32 %v284_v61, %v284_v61  ;;  %v5892_v17 = vadd.f32 %v665_v57, %v601_v15  ;;  %v789_v5 = vadd.f32 %v5542_v59, %v5877_v63  ;;  %v11022_v14 = vld [vmem:[#allocation12_spill] sm:$0xff] }
  0xfd   :  { %11018 = vst [vmem:[#allocation24_spill] sm:$0xff] %v5880_v32  ;;  %v790_v41 = vadd.f32 %v5544_v60, %v5880_v32  ;;  %v5898_v36 = vadd.f32 %v666_v45, %v602_v0  ;;  %v543_v44 = vsub.f32 %v453_v24, %v5448_v42  ;;  %v544_v47 = vsub.f32 %v453_v24, %v5450_v43  ;;  %v433_v35 = vpop.permute.xlu1 %432  ;;  %v428_v27 = vpop.permute.xlu0 %427 }
  0xfe   :  { %11020 = vst [vmem:[#allocation9_spill] sm:$0xff] %v5892_v17  ;;  %v875_v31 = vmin.f32 %v793_v52, %v794_v40  ;;  %v5903_v61 = vadd.f32 %v657_v19, %v11022_v14  ;;  %v533_v15 = vsub.f32 %v428_v27, %v5448_v42  ;;  %v534_v57 = vsub.f32 %v428_v27, %v5450_v43 }
  0xff   :  { %11021 = vst [vmem:[#allocation58_spill] sm:$0xff] %v5898_v36  ;;  %v863_v21 = vmin.f32 %v785_v53, %v786_v16  ;;  %v5908_v25 = vadd.f32 %v658_v28, %v11024_v23  ;;  %v535_v0 = vsub.f32 %v433_v35, %v5448_v42  ;;  %v536_v45 = vsub.f32 %v433_v35, %v5450_v43  ;;  %v11026_v28 = vld [vmem:[#allocation11_spill] sm:$0xff] }
 0x100   :  { %11023 = vst [vmem:[#allocation12_spill] sm:$0xff] %v5903_v61  ;;  %v869_v56 = vmin.f32 %v789_v5, %v790_v41  ;;  %v607_v24 = vmul.f32 %v281_v7, %v281_v7  ;;  %v661_v20 = vmul.f32 %v533_v15, %v533_v15  ;;  %v662_v52 = vmul.f32 %v534_v57, %v534_v57 }
 0x101   :  { %11025 = vst [vmem:[#allocation15_spill] sm:$0xff] %v5908_v25  ;;  %v799_v40 = vadd.f32 %v5542_v59, %v5892_v17  ;;  %v671_v19 = vmul.f32 %v543_v44, %v543_v44  ;;  %v672_v14 = vmul.f32 %v544_v47, %v544_v47  ;;  %876 = vmin.xlane.f32.xlu0 %v875_v31 }
 0x102   :  { %864 = vmin.xlane.f32.xlu2 %v863_v21  ;;  %v800_v53 = vadd.f32 %v5544_v60, %v5898_v36  ;;  %v608_v16 = vmul.f32 %v282_v13, %v282_v13  ;;  %v287_v27 = vsub.f32 %v11026_v28, %v5425_v29  ;;  %v5919_v5 = vadd.f32 %v661_v20, %v5700_v4  ;;  %v11031_v36 = vld [vmem:[#allocation18_spill] sm:$0xff]  ;;  %v483_v8 = vpop.permute.xlu2 %482 }
 0x103   :  { %v5922_v7 = vadd.f32 %v662_v52, %v5725_v50  ;;  %870 = vmin.xlane.f32.xlu1 %v869_v56  ;;  %v663_v41 = vmul.f32 %v535_v0, %v535_v0  ;;  %v664_v35 = vmul.f32 %v536_v45, %v536_v45  ;;  %v791_v44 = vadd.f32 %v5542_v59, %v5903_v61 }
 0x104   :  { %11027 = vst [vmem:[#allocation11_spill] sm:$0xff] %v5919_v5  ;;  %v792_v47 = vadd.f32 %v5544_v60, %v5908_v25  ;;  %v549_v13 = vsub.f32 %v468_v55, %v5448_v42  ;;  %v550_v31 = vsub.f32 %v468_v55, %v5450_v43  ;;  %v795_v4 = vadd.f32 %v5542_v59, %v5919_v5  ;;  %v11033_v25 = vld [vmem:[#allocation19_spill] sm:$0xff] }
 0x105   :  { %11028 = vst [vmem:[#allocation59_spill] sm:$0xff] %v5922_v7  ;;  %v796_v50 = vadd.f32 %v5544_v60, %v5922_v7  ;;  %v288_v20 = vsub.f32 %v11026_v28, %v5427_v30  ;;  %v5936_v56 = vadd.f32 %v671_v19, %v607_v24  ;;  %v5938_v15 = vadd.f32 %v672_v14, %v608_v16  ;;  %v448_v57 = vpop.permute.xlu1 %447  ;;  %v443_v21 = vpop.permute.xlu0 %442 }
 0x106   :  { %v884_v23 = vmin.f32 %v799_v40, %v800_v53  ;;  %v541_v0 = vsub.f32 %v448_v57, %v5448_v42  ;;  %v542_v55 = vsub.f32 %v448_v57, %v5450_v43  ;;  %v539_v45 = vsub.f32 %v443_v21, %v5448_v42  ;;  %v11035_v57 = vld [vmem:[#allocation17_spill] sm:$0xff] }
 0x107   :  { %11029 = vst [vmem:[#allocation60_spill] sm:$0xff] %v5936_v56  ;;  %v540_v52 = vsub.f32 %v443_v21, %v5450_v43  ;;  %v5945_v17 = vadd.f32 %v663_v41, %v11031_v36  ;;  %v5948_v28 = vadd.f32 %v664_v35, %v11033_v25  ;;  %v872_v24 = vmin.f32 %v791_v44, %v792_v47 }
 0x108   :  { %11030 = vst [vmem:[#allocation61_spill] sm:$0xff] %v5938_v15  ;;  %v878_v19 = vmin.f32 %v795_v4, %v796_v50  ;;  %v677_v14 = vmul.f32 %v549_v13, %v549_v13  ;;  %v678_v16 = vmul.f32 %v550_v31, %v550_v31  ;;  %v667_v61 = vmul.f32 %v539_v45, %v539_v45 }
 0x109   :  { %11032 = vst [vmem:[#allocation18_spill] sm:$0xff] %v5945_v17  ;;  %v668_v40 = vmul.f32 %v540_v52, %v540_v52  ;;  %v613_v53 = vmul.f32 %v287_v27, %v287_v27  ;;  %v614_v7 = vmul.f32 %v288_v20, %v288_v20  ;;  %v669_v5 = vmul.f32 %v541_v0, %v541_v0  ;;  %v11040_v20 = vld [vmem:[#allocation20_spill] sm:$0xff] }
 0x10a   :  { %11034 = vst [vmem:[#allocation19_spill] sm:$0xff] %v5948_v28  ;;  %885 = vmin.xlane.f32.xlu0 %v884_v23  ;;  %873 = vmin.xlane.f32.xlu2 %v872_v24  ;;  %v293_v21 = vsub.f32 %v11035_v57, %v5425_v29  ;;  %v670_v36 = vmul.f32 %v542_v55, %v542_v55 }
 0x10b   :  { %v5953_v41 = vadd.f32 %v667_v61, %v5792_v39  ;;  %v5956_v25 = vadd.f32 %v668_v40, %v5806_v48  ;;  %879 = vmin.xlane.f32.xlu1 %v878_v19  ;;  %v805_v35 = vadd.f32 %v5542_v59, %v5936_v56  ;;  %v806_v27 = vadd.f32 %v5544_v60, %v5938_v15 }
 0x10c   :  { %v797_v44 = vadd.f32 %v5542_v59, %v5945_v17  ;;  %v798_v47 = vadd.f32 %v5544_v60, %v5948_v28  ;;  %v5966_v13 = vadd.f32 %v677_v14, %v613_v53  ;;  %v5968_v39 = vadd.f32 %v678_v16, %v614_v7  ;;  %v11042_v7 = vld [vmem:[#allocation21_spill] sm:$0xff] }
 0x10d   :  { %11036 = vst [vmem:[#allocation17_spill] sm:$0xff] %v5953_v41  ;;  %v801_v48 = vadd.f32 %v5542_v59, %v5953_v41  ;;  %v802_v61 = vadd.f32 %v5544_v60, %v5956_v25  ;;  %v294_v31 = vsub.f32 %v11035_v57, %v5427_v30  ;;  %v555_v4 = vsub.f32 %v483_v8, %v5448_v42  ;;  %v463_v0 = vpop.permute.xlu1 %462  ;;  %v458_v55 = vpop.permute.xlu0 %457 }
 0x10e   :  { %11037 = vst [vmem:[#allocation62_spill] sm:$0xff] %v5956_v25  ;;  %v556_v50 = vsub.f32 %v483_v8, %v5450_v43  ;;  %v5979_v23 = vadd.f32 %v669_v5, %v11040_v20  ;;  %v5982_v45 = vadd.f32 %v670_v36, %v11042_v7  ;;  %v547_v52 = vsub.f32 %v463_v0, %v5448_v42 }
 0x10f   :  { %11038 = vst [vmem:[#allocation63_spill] sm:$0xff] %v5966_v13  ;;  %v545_v24 = vsub.f32 %v458_v55, %v5448_v42  ;;  %v546_v19 = vsub.f32 %v458_v55, %v5450_v43  ;;  %v548_v14 = vsub.f32 %v463_v0, %v5450_v43  ;;  %v893_v16 = vmin.f32 %v805_v35, %v806_v27  ;;  %v11047_v0 = vld [vmem:[#allocation10_spill] sm:$0xff] }
 0x110   :  { %11039 = vst [vmem:[#allocation64_spill] sm:$0xff] %v5968_v39  ;;  %v881_v40 = vmin.f32 %v797_v44, %v798_v47  ;;  %v887_v53 = vmin.f32 %v801_v48, %v802_v61  ;;  %v811_v5 = vadd.f32 %v5542_v59, %v5966_v13  ;;  %v812_v36 = vadd.f32 %v5544_v60, %v5968_v39  ;;  %v11046_v47 = vld [vmem:[#allocation22_spill] sm:$0xff] }
 0x111   :  { %11041 = vst [vmem:[#allocation20_spill] sm:$0xff] %v5979_v23  ;;  %v673_v8 = vmul.f32 %v545_v24, %v545_v24  ;;  %v674_v57 = vmul.f32 %v546_v19, %v546_v19  ;;  %v683_v20 = vmul.f32 %v555_v4, %v555_v4  ;;  %v684_v7 = vmul.f32 %v556_v50, %v556_v50  ;;  %v11048_v19 = vld [vmem:[#allocation23_spill] sm:$0xff] }
 0x112   :  { %11043 = vst [vmem:[#allocation21_spill] sm:$0xff] %v5982_v45  ;;  %894 = vmin.xlane.f32.xlu0 %v893_v16  ;;  %882 = vmin.xlane.f32.xlu2 %v881_v40  ;;  %v803_v55 = vadd.f32 %v5542_v59, %v5979_v23  ;;  %v675_v15 = vmul.f32 %v547_v52, %v547_v52 }
 0x113   :  { %v5995_v35 = vadd.f32 %v673_v8, %v5884_v49  ;;  %v5998_v27 = vadd.f32 %v674_v57, %v5890_v37  ;;  %888 = vmin.xlane.f32.xlu1 %v887_v53  ;;  %v804_v44 = vadd.f32 %v5544_v60, %v5982_v45  ;;  %v611_v48 = vmul.f32 %v11046_v47, %v11046_v47 }
 0x114   :  { %v619_v61 = vmul.f32 %v293_v21, %v293_v21  ;;  %v620_v4 = vmul.f32 %v294_v31, %v294_v31  ;;  %v676_v50 = vmul.f32 %v548_v14, %v548_v14  ;;  %v289_v24 = vsub.f32 %v11047_v0, %v5425_v29 }
 0x115   :  { %11044 = vst [vmem:[#allocation65_spill] sm:$0xff] %v5995_v35  ;;  %v290_v49 = vsub.f32 %v11047_v0, %v5427_v30  ;;  %v807_v37 = vadd.f32 %v5542_v59, %v5995_v35  ;;  %v808_v52 = vadd.f32 %v5544_v60, %v5998_v27  ;;  %v612_v16 = vmul.f32 %v11048_v19, %v11048_v19  ;;  %v478_v31 = vpop.permute.xlu1 %477  ;;  %v473_v14 = vpop.permute.xlu0 %472 }
 0x116   :  { %11045 = vst [vmem:[#allocation66_spill] sm:$0xff] %v5998_v27  ;;  %v6014_v40 = vadd.f32 %v683_v20, %v619_v61  ;;  %v6016_v21 = vadd.f32 %v684_v7, %v620_v4  ;;  %v902_v53 = vmin.f32 %v811_v5, %v812_v36  ;;  %v6018_v8 = vadd.f32 %v675_v15, %v611_v48  ;;  %v11053_v5 = vld [vmem:[#allocation8_spill] sm:$0xff] }
 0x117   :  { %v551_v57 = vsub.f32 %v473_v14, %v5448_v42  ;;  %v552_v47 = vsub.f32 %v473_v14, %v5450_v43  ;;  %v890_v0 = vmin.f32 %v803_v55, %v804_v44  ;;  %v6022_v39 = vadd.f32 %v676_v50, %v612_v16  ;;  %v11056_v16 = vld [vmem:[#allocation16_spill] sm:$0xff] }
 0x118   :  { %11049 = vst [vmem:[#allocation22_spill] sm:$0xff] %v6014_v40  ;;  %v553_v13 = vsub.f32 %v478_v31, %v5448_v42  ;;  %v554_v19 = vsub.f32 %v478_v31, %v5450_v43  ;;  %v896_v20 = vmin.f32 %v807_v37, %v808_v52  ;;  %v615_v61 = vmul.f32 %v289_v24, %v289_v24 }
 0x119   :  { %11050 = vst [vmem:[#allocation10_spill] sm:$0xff] %v6016_v21  ;;  %v616_v7 = vmul.f32 %v290_v49, %v290_v49  ;;  %v679_v4 = vmul.f32 %v551_v57, %v551_v57  ;;  %v680_v56 = vmul.f32 %v552_v47, %v552_v47  ;;  %v291_v15 = vsub.f32 %v11053_v5, %v5425_v29 }
 0x11a   :  { %11051 = vst [vmem:[#allocation23_spill] sm:$0xff] %v6018_v8  ;;  %v292_v36 = vsub.f32 %v11053_v5, %v5427_v30  ;;  %903 = vmin.xlane.f32.xlu0 %v902_v53  ;;  %891 = vmin.xlane.f32.xlu2 %v890_v0  ;;  %v817_v48 = vadd.f32 %v5542_v59, %v6014_v40 }
 0x11b   :  { %11052 = vst [vmem:[#allocation67_spill] sm:$0xff] %v6022_v39  ;;  %v6030_v55 = vadd.f32 %v679_v4, %v615_v61  ;;  %v6032_v44 = vadd.f32 %v680_v56, %v616_v7  ;;  %897 = vmin.xlane.f32.xlu1 %v896_v20  ;;  %v818_v50 = vadd.f32 %v5544_v60, %v6016_v21 }
 0x11c   :  { %v681_v24 = vmul.f32 %v553_v13, %v553_v13  ;;  %v682_v49 = vmul.f32 %v554_v19, %v554_v19  ;;  %v809_v37 = vadd.f32 %v5542_v59, %v6018_v8  ;;  %v810_v52 = vadd.f32 %v5544_v60, %v6022_v39 }
 0x11d   :  { %11054 = vst [vmem:[#allocation8_spill] sm:$0xff] %v6030_v55  ;;  %v295_v31 = vsub.f32 %v11056_v16, %v5425_v29  ;;  %v296_v56 = vsub.f32 %v11056_v16, %v5427_v30  ;;  %v813_v14 = vadd.f32 %v5542_v59, %v6030_v55  ;;  %v814_v53 = vadd.f32 %v5544_v60, %v6032_v44  ;;  %v488_v47 = vpop.permute.xlu0 %487  ;;  %v6055_v29 = vld [vmem:[%s10631_s4] sm:$0xff]  ;;  %v6060_v30 = vld [vmem:[%s10631_s4 + $0x8] sm:$0xff] }
 0x11e   :  { %11055 = vst [vmem:[#allocation68_spill] sm:$0xff] %v6032_v44  ;;  %v617_v13 = vmul.f32 %v291_v15, %v291_v15  ;;  %v618_v57 = vmul.f32 %v292_v36, %v292_v36  ;;  %v557_v0 = vsub.f32 %v488_v47, %v5448_v42  ;;  %v558_v19 = vsub.f32 %v488_v47, %v5450_v43 }
 0x11f   :  { %v905_v20 = vmin.f32 %v813_v14, %v814_v53  ;;  %11057 = vst [vmem:[#allocation16_spill] sm:$0xff] %v6055_v29  ;;  %v911_v4 = vmin.f32 %v817_v48, %v818_v50  ;;  %v899_v5 = vmin.f32 %v809_v37, %v810_v52  ;;  %v621_v42 = vmul.f32 %v295_v31, %v295_v31  ;;  %v11064_v50 = vld [vmem:[#allocation28_spill] sm:$0xff] }
 0x120   :  { %11058 = vst [vmem:[#allocation69_spill] sm:$0xff] %v6060_v30  ;;  %v6062_v61 = vadd.f32 %v681_v24, %v617_v13  ;;  %v6064_v7 = vadd.f32 %v682_v49, %v618_v57  ;;  %v622_v15 = vmul.f32 %v296_v56, %v296_v56  ;;  %v685_v43 = vmul.f32 %v557_v0, %v557_v0  ;;  %v11063_v49 = vld [vmem:[#allocation27_spill] sm:$0xff] }
 0x121   :  { %v686_v36 = vmul.f32 %v558_v19, %v558_v19  ;;  %v6067_v16 = vperm.slane %v6055_v29, 0  ;;  %v6070_v14 = vperm.slane %v6060_v30, 0  ;;  %v11065_v19 = vld [vmem:[#allocation13_spill] sm:$0xff] }
 0x122   :  { %11059 = vst [vmem:[#allocation70_spill] sm:$0xff] %v6062_v61  ;;  %912 = vmin.xlane.f32.xlu0 %v911_v4  ;;  %900 = vmin.xlane.f32.xlu2 %v899_v5  ;;  %v6072_v53 = vadd.f32 %v685_v43, %v621_v42  ;;  %v815_v52 = vadd.f32 %v5542_v59, %v6062_v61  ;;  %v11066_v4 = vld [vmem:[#allocation14_spill] sm:$0xff] }
 0x123   :  { %11060 = vst [vmem:[#allocation71_spill] sm:$0xff] %v6064_v7  ;;  %v6074_v24 = vadd.f32 %v686_v36, %v622_v15  ;;  %906 = vmin.xlane.f32.xlu1 %v905_v20  ;;  %v921_v48 = vadd.f32 %v6067_v16, %v11063_v49  ;;  %v922_v37 = vadd.f32 %v6070_v14, %v11064_v50  ;;  %v11067_v15 = vld [vmem:[#allocation25_spill] sm:$0xff]  ;;  %v11068_v43 = vld [vmem:[#allocation26_spill] sm:$0xff] }
 0x124   :  { %11061 = vst [vmem:[#allocation72_spill] sm:$0xff] %v6072_v53  ;;  %v816_v31 = vadd.f32 %v5544_v60, %v6064_v7  ;;  %v819_v56 = vadd.f32 %v5542_v59, %v6072_v53  ;;  %v919_v20 = vadd.f32 %v6067_v16, %v11065_v19  ;;  %v920_v5 = vadd.f32 %v6070_v14, %v11066_v4 }
 0x125   :  { %11062 = vst [vmem:[#allocation73_spill] sm:$0xff] %v6074_v24  ;;  %v820_v13 = vadd.f32 %v5544_v60, %v6074_v24  ;;  %v986_v47 = vmin.f32 %v921_v48, %v922_v37  ;;  %v927_v42 = vadd.f32 %v6067_v16, %v5703_v33  ;;  %v928_v59 = vadd.f32 %v6070_v14, %v5706_v3 }
 0x126   :  { %v908_v0 = vmin.f32 %v815_v52, %v816_v31  ;;  %v923_v60 = vadd.f32 %v6067_v16, %v11067_v15  ;;  %v924_v36 = vadd.f32 %v6070_v14, %v11068_v43  ;;  %v983_v48 = vmin.f32 %v919_v20, %v920_v5 }
 0x127   :  { %v914_v57 = vmin.f32 %v819_v56, %v820_v13  ;;  %v995_v37 = vmin.f32 %v927_v42, %v928_v59  ;;  %v925_v31 = vadd.f32 %v6067_v16, %v5679_v46  ;;  %v926_v56 = vadd.f32 %v6070_v14, %v5682_v6 }
 0x128   :  { %v989_v52 = vmin.f32 %v923_v60, %v924_v36  ;;  %v933_v13 = vadd.f32 %v6067_v16, %v5749_v34  ;;  %v931_v59 = vadd.f32 %v6067_v16, %v5691_v22  ;;  %v11069_v60 = vld [vmem:[#allocation32_spill] sm:$0xff]  ;;  %v946_v30 = vadd.f32 %v6070_v14, %v5836_v2 }
 0x129   :  { %v992_v20 = vmin.f32 %v925_v31, %v926_v56  ;;  %v932_v36 = vadd.f32 %v6070_v14, %v11069_v60  ;;  %v936_v31 = vadd.f32 %v6070_v14, %v5782_v9  ;;  %v951_v29 = vadd.f32 %v6067_v16, %v5877_v63 }
 0x12a   :  { %987 = vmin.xlane.f32.xlu0 %v986_v47  ;;  %909 = vmin.xlane.f32.xlu2 %v908_v0  ;;  %v929_v47 = vadd.f32 %v6067_v16, %v5733_v58  ;;  %v930_v0 = vadd.f32 %v6070_v14, %v5736_v62  ;;  %v952_v2 = vadd.f32 %v6070_v14, %v5880_v32  ;;  %v11079_v32 = vld [vmem:[#allocation11_spill] sm:$0xff] }
 0x12b   :  { %915 = vmin.xlane.f32.xlu1 %v914_v57  ;;  %v934_v57 = vadd.f32 %v6070_v14, %v5752_v18  ;;  %v1001_v56 = vmin.f32 %v931_v59, %v932_v36  ;;  %v941_v59 = vadd.f32 %v6067_v16, %v5825_v12  ;;  %v942_v36 = vadd.f32 %v6070_v14, %v5828_v54 }
 0x12c   :  { %v998_v42 = vmin.f32 %v929_v47, %v930_v0  ;;  %v11070_v47 = vld [vmem:[#allocation35_spill] sm:$0xff]  ;;  %v957_v63 = vadd.f32 %v6067_v16, %v11079_v32  ;;  %v963_v32 = vadd.f32 %v6067_v16, %v5953_v41 }
 0x12d   :  { %v1004_v5 = vmin.f32 %v933_v13, %v934_v57  ;;  %v937_v0 = vadd.f32 %v6067_v16, %v11070_v47 }
 0x132   :  { %984 = vmin.xlane.f32.xlu2 %v983_v48  ;;  %996 = vmin.xlane.f32.xlu0 %v995_v37  ;;  %v939_v48 = vadd.f32 %v6067_v16, %v5797_v11  ;;  %v940_v37 = vadd.f32 %v6070_v14, %v5800_v51 }
 0x133   :  { %990 = vmin.xlane.f32.xlu1 %v989_v52  ;;  %v935_v52 = vadd.f32 %v6067_v16, %v5777_v26 }
 0x134   :  { %v1013_v13 = vmin.f32 %v939_v48, %v940_v37 }
 0x135   :  { %v1007_v57 = vmin.f32 %v935_v52, %v936_v31  ;;  %v1016_v52 = vmin.f32 %v941_v59, %v942_v36  ;;  %v11072_v31 = vld [vmem:[#allocation41_spill] sm:$0xff]  ;;  %v1031_v36 = vmin.f32 %v951_v29, %v952_v2  ;;  %v11083_v2 = vld [vmem:[#allocation12_spill] sm:$0xff] }
 0x136   :  { %v953_v29 = vadd.f32 %v6067_v16, %v11083_v2 }
 0x13a   :  { %993 = vmin.xlane.f32.xlu2 %v992_v20  ;;  %1005 = vmin.xlane.f32.xlu0 %v1004_v5  ;;  %v11071_v20 = vld [vmem:[#allocation36_spill] sm:$0xff] }
 0x13b   :  { %999 = vmin.xlane.f32.xlu1 %v998_v42  ;;  %v938_v5 = vadd.f32 %v6070_v14, %v11071_v20  ;;  %v945_v42 = vadd.f32 %v6067_v16, %v5833_v1 }
 0x13d   :  { %v1010_v48 = vmin.f32 %v937_v0, %v938_v5  ;;  %v1022_v37 = vmin.f32 %v945_v42, %v946_v30  ;;  %v947_v30 = vadd.f32 %v6067_v16, %v5861_v10  ;;  %v948_v5 = vadd.f32 %v6070_v14, %v5864_v38 }
 0x140   :  { %v6152_v42 = vpop.xlane.xlu1 %822 }
 0x141   :  { %11076 = vst [vmem:[#allocation76_spill] sm:$0xff] %v6152_v42  ;;  %v11086_v42 = vld [vmem:[#allocation53_spill] sm:$0xff] }
 0x142   :  { %1002 = vmin.xlane.f32.xlu2 %v1001_v56  ;;  %1014 = vmin.xlane.f32.xlu0 %v1013_v13  ;;  %v943_v56 = vadd.f32 %v6067_v16, %v11072_v31  ;;  %v11073_v13 = vld [vmem:[#allocation42_spill] sm:$0xff] }
 0x143   :  { %1008 = vmin.xlane.f32.xlu1 %v1007_v57  ;;  %v944_v57 = vadd.f32 %v6070_v14, %v11073_v13  ;;  %v11080_v13 = vld [vmem:[#allocation59_spill] sm:$0xff] }
 0x144   :  { %v958_v31 = vadd.f32 %v6070_v14, %v11080_v13  ;;  %v955_v13 = vadd.f32 %v6067_v16, %v11086_v42 }
 0x145   :  { %v1019_v59 = vmin.f32 %v943_v56, %v944_v57  ;;  %v11084_v57 = vld [vmem:[#allocation15_spill] sm:$0xff] }
 0x14a   :  { %1011 = vmin.xlane.f32.xlu2 %v1010_v48  ;;  %1023 = vmin.xlane.f32.xlu0 %v1022_v37  ;;  %v1025_v48 = vmin.f32 %v947_v30, %v948_v5  ;;  %v11077_v37 = vld [vmem:[#allocation47_spill] sm:$0xff]  ;;  %v954_v30 = vadd.f32 %v6070_v14, %v11084_v57 }
 0x14b   :  { %1017 = vmin.xlane.f32.xlu1 %v1016_v52  ;;  %v949_v52 = vadd.f32 %v6067_v16, %v11077_v37 }
 0x14c   :  { %v6144_v1 = vpop.xlane.xlu2 %825  ;;  %v6146_v0 = vpop.xlane.xlu0 %828 }
 0x14d   :  { %11074 = vst [vmem:[#allocation74_spill] sm:$0xff] %v6144_v1  ;;  %v11078_v1 = vld [vmem:[#allocation48_spill] sm:$0xff] }
 0x14e   :  { %11075 = vst [vmem:[#allocation75_spill] sm:$0xff] %v6146_v0  ;;  %v950_v0 = vadd.f32 %v6070_v14, %v11078_v1  ;;  %v964_v1 = vadd.f32 %v6070_v14, %v5956_v25  ;;  %v970_v25 = vadd.f32 %v6070_v14, %v5998_v27  ;;  %v976_v27 = vadd.f32 %v6070_v14, %v6032_v44 }
 0x14f   :  { %v982_v44 = vadd.f32 %v6070_v14, %v6074_v24 }
 0x152   :  { %1020 = vmin.xlane.f32.xlu2 %v1019_v59  ;;  %1032 = vmin.xlane.f32.xlu0 %v1031_v36  ;;  %v1028_v59 = vmin.f32 %v949_v52, %v950_v0  ;;  %v1040_v36 = vmin.f32 %v957_v63, %v958_v31  ;;  %v959_v63 = vadd.f32 %v6067_v16, %v5945_v17 }
 0x153   :  { %1026 = vmin.xlane.f32.xlu1 %v1025_v48  ;;  %v1034_v48 = vmin.f32 %v953_v29, %v954_v30  ;;  %v960_v31 = vadd.f32 %v6070_v14, %v5948_v28  ;;  %v1049_v30 = vmin.f32 %v963_v32, %v964_v1  ;;  %v965_v1 = vadd.f32 %v6067_v16, %v5979_v23 }
 0x154   :  { %v6162_v38 = vpop.xlane.xlu2 %831  ;;  %v6164_v56 = vpop.xlane.xlu0 %840  ;;  %v966_v32 = vadd.f32 %v6070_v14, %v5982_v45 }
 0x155   :  { %11081 = vst [vmem:[#allocation77_spill] sm:$0xff] %v6162_v38  ;;  %v6170_v5 = vpop.xlane.xlu1 %834  ;;  %v11087_v38 = vld [vmem:[#allocation54_spill] sm:$0xff] }
 0x156   :  { %11082 = vst [vmem:[#allocation78_spill] sm:$0xff] %v6164_v56  ;;  %v956_v56 = vadd.f32 %v6070_v14, %v11087_v38 }
 0x157   :  { %11085 = vst [vmem:[#allocation79_spill] sm:$0xff] %v6170_v5  ;;  %v969_v5 = vadd.f32 %v6067_v16, %v5995_v35 }
 0x158   :  { %v1037_v29 = vmin.f32 %v955_v13, %v956_v56 }
 0x15a   :  { %1029 = vmin.xlane.f32.xlu2 %v1028_v59  ;;  %1041 = vmin.xlane.f32.xlu0 %v1040_v36  ;;  %v1043_v59 = vmin.f32 %v959_v63, %v960_v31  ;;  %v11091_v36 = vld [vmem:[#allocation9_spill] sm:$0xff]  ;;  %v1058_v31 = vmin.f32 %v969_v5, %v970_v25  ;;  %v971_v25 = vadd.f32 %v6067_v16, %v6018_v8 }
 0x15b   :  { %1035 = vmin.xlane.f32.xlu1 %v1034_v48  ;;  %v961_v48 = vadd.f32 %v6067_v16, %v11091_v36  ;;  %v972_v5 = vadd.f32 %v6070_v14, %v6022_v39 }
 0x15c   :  { %v6180_v37 = vpop.xlane.xlu2 %837  ;;  %v6182_v0 = vpop.xlane.xlu0 %849 }
 0x15d   :  { %11088 = vst [vmem:[#allocation80_spill] sm:$0xff] %v6180_v37  ;;  %v6188_v52 = vpop.xlane.xlu1 %843  ;;  %v11092_v37 = vld [vmem:[#allocation58_spill] sm:$0xff] }
 0x15e   :  { %11089 = vst [vmem:[#allocation81_spill] sm:$0xff] %v6182_v0  ;;  %v962_v0 = vadd.f32 %v6070_v14, %v11092_v37 }
 0x15f   :  { %11090 = vst [vmem:[#allocation82_spill] sm:$0xff] %v6188_v52  ;;  %v975_v52 = vadd.f32 %v6067_v16, %v6030_v55 }
 0x160   :  { %v1046_v63 = vmin.f32 %v961_v48, %v962_v0 }
 0x162   :  { %1038 = vmin.xlane.f32.xlu2 %v1037_v29  ;;  %1050 = vmin.xlane.f32.xlu0 %v1049_v30  ;;  %v1052_v29 = vmin.f32 %v965_v1, %v966_v32  ;;  %v11096_v30 = vld [vmem:[#allocation60_spill] sm:$0xff]  ;;  %v1067_v32 = vmin.f32 %v975_v52, %v976_v27  ;;  %v977_v27 = vadd.f32 %v6067_v16, %v6062_v61 }
 0x163   :  { %1044 = vmin.xlane.f32.xlu1 %v1043_v59  ;;  %v967_v59 = vadd.f32 %v6067_v16, %v11096_v30  ;;  %v978_v52 = vadd.f32 %v6070_v14, %v6064_v7 }
 0x164   :  { %v6198_v41 = vpop.xlane.xlu2 %846  ;;  %v6200_v13 = vpop.xlane.xlu0 %858 }
 0x165   :  { %11093 = vst [vmem:[#allocation83_spill] sm:$0xff] %v6198_v41  ;;  %v6206_v56 = vpop.xlane.xlu1 %852  ;;  %v11097_v41 = vld [vmem:[#allocation61_spill] sm:$0xff] }
 0x166   :  { %11094 = vst [vmem:[#allocation84_spill] sm:$0xff] %v6200_v13  ;;  %v968_v13 = vadd.f32 %v6070_v14, %v11097_v41 }
 0x167   :  { %11095 = vst [vmem:[#allocation85_spill] sm:$0xff] %v6206_v56  ;;  %v981_v56 = vadd.f32 %v6067_v16, %v6072_v53 }
 0x168   :  { %v1055_v1 = vmin.f32 %v967_v59, %v968_v13 }
 0x16a   :  { %1047 = vmin.xlane.f32.xlu2 %v1046_v63  ;;  %1059 = vmin.xlane.f32.xlu0 %v1058_v31  ;;  %v1061_v63 = vmin.f32 %v971_v25, %v972_v5  ;;  %v11101_v31 = vld [vmem:[#allocation63_spill] sm:$0xff]  ;;  %v1076_v5 = vmin.f32 %v981_v56, %v982_v44  ;;  %v979_v44 = vadd.f32 %v6067_v16, %v6014_v40 }
 0x16b   :  { %1053 = vmin.xlane.f32.xlu1 %v1052_v29  ;;  %v973_v29 = vadd.f32 %v6067_v16, %v11101_v31  ;;  %v980_v56 = vadd.f32 %v6070_v14, %v6016_v21 }
 0x16c   :  { %v6216_v35 = vpop.xlane.xlu2 %855  ;;  %v6218_v0 = vpop.xlane.xlu0 %867 }
 0x16d   :  { %11098 = vst [vmem:[#allocation86_spill] sm:$0xff] %v6216_v35  ;;  %v6224_v48 = vpop.xlane.xlu1 %861  ;;  %v11102_v35 = vld [vmem:[#allocation64_spill] sm:$0xff] }
 0x16e   :  { %11099 = vst [vmem:[#allocation87_spill] sm:$0xff] %v6218_v0  ;;  %v974_v0 = vadd.f32 %v6070_v14, %v11102_v35 }
 0x16f   :  { %11100 = vst [vmem:[#allocation88_spill] sm:$0xff] %v6224_v48 }
 0x170   :  { %v1064_v25 = vmin.f32 %v973_v29, %v974_v0 }
 0x172   :  { %1056 = vmin.xlane.f32.xlu2 %v1055_v1  ;;  %1068 = vmin.xlane.f32.xlu0 %v1067_v32  ;;  %v1070_v1 = vmin.f32 %v977_v27, %v978_v52  ;;  %v6247_v32 = vld [vmem:[%s10632_s5] sm:$0xff] }
 0x173   :  { %1062 = vmin.xlane.f32.xlu1 %v1061_v63  ;;  %11106 = vst [vmem:[#allocation92_spill] sm:$0xff] %v6247_v32  ;;  %v6250_v63 = vperm.slane %v6247_v32, 1 }
 0x174   :  { %v6236_v13 = vpop.xlane.xlu0 %876 }
 0x175   :  { %v6234_v55 = vpop.xlane.xlu2 %864  ;;  %11104 = vst [vmem:[#allocation90_spill] sm:$0xff] %v6236_v13  ;;  %v1085_v0 = vadd.f32 %v6250_v63, %v11067_v15 }
 0x176   :  { %11103 = vst [vmem:[#allocation89_spill] sm:$0xff] %v6234_v55  ;;  %v6242_v59 = vpop.xlane.xlu1 %870  ;;  %v6255_v55 = vld [vmem:[%s10632_s5 + $0x8] sm:$0xff] }
 0x177   :  { %11105 = vst [vmem:[#allocation91_spill] sm:$0xff] %v6242_v59  ;;  %v6258_v48 = vperm.slane %v6255_v55, 1  ;;  %v1083_v59 = vadd.f32 %v6250_v63, %v11063_v49 }
 0x178   :  { %11107 = vst [vmem:[#allocation93_spill] sm:$0xff] %v6255_v55 }
 0x179   :  { %v1086_v29 = vadd.f32 %v6258_v48, %v11068_v43  ;;  %v1092_v55 = vadd.f32 %v6258_v48, %v5736_v62 }
 0x17a   :  { %1065 = vmin.xlane.f32.xlu2 %v1064_v25  ;;  %1077 = vmin.xlane.f32.xlu0 %v1076_v5  ;;  %v1081_v25 = vadd.f32 %v6250_v63, %v11065_v19  ;;  %v1082_v5 = vadd.f32 %v6258_v48, %v11066_v4 }
 0x17b   :  { %1071 = vmin.xlane.f32.xlu1 %v1070_v1  ;;  %v1073_v1 = vmin.f32 %v979_v44, %v980_v56  ;;  %v1151_v14 = vmin.f32 %v1085_v0, %v1086_v29  ;;  %v1087_v56 = vadd.f32 %v6250_v63, %v5679_v46 }
 0x17c   :  { %v1145_v13 = vmin.f32 %v1081_v25, %v1082_v5 }
 0x17d   :  { %v6268_v27 = vpop.xlane.xlu2 %873  ;;  %v6270_v52 = vpop.xlane.xlu0 %885 }
 0x17e   :  { %11108 = vst [vmem:[#allocation94_spill] sm:$0xff] %v6268_v27  ;;  %v6276_v16 = vpop.xlane.xlu1 %879  ;;  %v1091_v27 = vadd.f32 %v6250_v63, %v5733_v58 }
 0x17f   :  { %11109 = vst [vmem:[#allocation95_spill] sm:$0xff] %v6270_v52  ;;  %v1084_v52 = vadd.f32 %v6258_v48, %v11064_v50 }
 0x180   :  { %11110 = vst [vmem:[#allocation96_spill] sm:$0xff] %v6276_v16  ;;  %v1160_v25 = vmin.f32 %v1091_v27, %v1092_v55  ;;  %v1098_v16 = vadd.f32 %v6258_v48, %v5782_v9  ;;  %v1093_v55 = vadd.f32 %v6250_v63, %v5691_v22  ;;  %v1094_v27 = vadd.f32 %v6258_v48, %v11069_v60 }
 0x181   :  { %v1148_v29 = vmin.f32 %v1083_v59, %v1084_v52 }
 0x182   :  { %1074 = vmin.xlane.f32.xlu2 %v1073_v1  ;;  %1152 = vmin.xlane.f32.xlu0 %v1151_v14  ;;  %v1089_v1 = vadd.f32 %v6250_v63, %v5703_v33  ;;  %v1090_v14 = vadd.f32 %v6258_v48, %v5706_v3 }
 0x183   :  { %1146 = vmin.xlane.f32.xlu1 %v1145_v13  ;;  %v1088_v13 = vadd.f32 %v6258_v48, %v5682_v6 }
 0x185   :  { %v6286_v32 = vpop.xlane.xlu2 %882  ;;  %v6288_v44 = vpop.xlane.xlu0 %894  ;;  %v1154_v5 = vmin.f32 %v1087_v56, %v1088_v13  ;;  %v1157_v56 = vmin.f32 %v1089_v1, %v1090_v14 }
 0x186   :  { %11111 = vst [vmem:[#allocation97_spill] sm:$0xff] %v6286_v32  ;;  %v6294_v0 = vpop.xlane.xlu1 %888 }
 0x187   :  { %11112 = vst [vmem:[#allocation98_spill] sm:$0xff] %v6288_v44  ;;  %v1097_v44 = vadd.f32 %v6250_v63, %v5777_v26 }
 0x188   :  { %11113 = vst [vmem:[#allocation99_spill] sm:$0xff] %v6294_v0  ;;  %v1104_v0 = vadd.f32 %v6258_v48, %v5828_v54 }
 0x189   :  { %v1169_v13 = vmin.f32 %v1097_v44, %v1098_v16  ;;  %v1099_v16 = vadd.f32 %v6250_v63, %v11070_v47  ;;  %v1100_v44 = vadd.f32 %v6258_v48, %v11071_v20 }
 0x18a   :  { %1149 = vmin.xlane.f32.xlu2 %v1148_v29  ;;  %1161 = vmin.xlane.f32.xlu0 %v1160_v25  ;;  %v1163_v29 = vmin.f32 %v1093_v55, %v1094_v27  ;;  %v1095_v25 = vadd.f32 %v6250_v63, %v5749_v34 }
 0x18b   :  { %1155 = vmin.xlane.f32.xlu1 %v1154_v5  ;;  %v1096_v5 = vadd.f32 %v6258_v48, %v5752_v18 }
 0x18d   :  { %v6304_v32 = vpop.xlane.xlu2 %891  ;;  %v6306_v59 = vpop.xlane.xlu0 %903  ;;  %v1166_v55 = vmin.f32 %v1095_v25, %v1096_v5  ;;  %v11124_v5 = vld [vmem:[#allocation42_spill] sm:$0xff] }
 0x18e   :  { %11114 = vst [vmem:[#allocation100_spill] sm:$0xff] %v6304_v32  ;;  %v6312_v52 = vpop.xlane.xlu1 %897 }
 0x18f   :  { %11115 = vst [vmem:[#allocation101_spill] sm:$0xff] %v6306_v59  ;;  %v1103_v59 = vadd.f32 %v6250_v63, %v5825_v12  ;;  %v1116_v12 = vadd.f32 %v6258_v48, %v11084_v57 }
 0x190   :  { %11116 = vst [vmem:[#allocation102_spill] sm:$0xff] %v6312_v52 }
 0x191   :  { %v1178_v27 = vmin.f32 %v1103_v59, %v1104_v0  ;;  %v11123_v0 = vld [vmem:[#allocation41_spill] sm:$0xff] }
 0x192   :  { %1158 = vmin.xlane.f32.xlu2 %v1157_v56  ;;  %1170 = vmin.xlane.f32.xlu0 %v1169_v13  ;;  %v1172_v56 = vmin.f32 %v1099_v16, %v1100_v44  ;;  %v1101_v13 = vadd.f32 %v6250_v63, %v5797_v11  ;;  %v1105_v59 = vadd.f32 %v6250_v63, %v11123_v0 }
 0x193   :  { %1164 = vmin.xlane.f32.xlu1 %v1163_v29  ;;  %v1102_v29 = vadd.f32 %v6258_v48, %v5800_v51  ;;  %v1106_v16 = vadd.f32 %v6258_v48, %v11124_v5 }
 0x195   :  { %v6322_v32 = vpop.xlane.xlu2 %900  ;;  %v6324_v1 = vpop.xlane.xlu0 %912 }
 0x196   :  { %11117 = vst [vmem:[#allocation103_spill] sm:$0xff] %v6322_v32  ;;  %v6330_v14 = vpop.xlane.xlu1 %906  ;;  %v11120_v32 = vld [vmem:[#allocation56_spill] sm:$0xff] }
 0x197   :  { %11118 = vst [vmem:[#allocation104_spill] sm:$0xff] %v6324_v1  ;;  %v1109_v1 = vadd.f32 %v6250_v63, %v5861_v10  ;;  %v1110_v52 = vadd.f32 %v6258_v48, %v11120_v32  ;;  %v1115_v10 = vadd.f32 %v6250_v63, %v11083_v2  ;;  %v1121_v2 = vadd.f32 %v6250_v63, %v5945_v17 }
 0x198   :  { %11119 = vst [vmem:[#allocation105_spill] sm:$0xff] %v6330_v14  ;;  %v11126_v14 = vld [vmem:[#allocation51_spill] sm:$0xff] }
 0x199   :  { %v1107_v32 = vadd.f32 %v6250_v63, %v11126_v14 }
 0x19a   :  { %1167 = vmin.xlane.f32.xlu2 %v1166_v55  ;;  %1179 = vmin.xlane.f32.xlu0 %v1178_v27  ;;  %v1175_v55 = vmin.f32 %v1101_v13, %v1102_v29  ;;  %v1187_v27 = vmin.f32 %v1109_v1, %v1110_v52  ;;  %v11130_v52 = vld [vmem:[#allocation47_spill] sm:$0xff]  ;;  %v11131_v29 = vld [vmem:[#allocation48_spill] sm:$0xff] }
 0x19b   :  { %1173 = vmin.xlane.f32.xlu1 %v1172_v56  ;;  %v1181_v56 = vmin.f32 %v1105_v59, %v1106_v16  ;;  %v1111_v1 = vadd.f32 %v6250_v63, %v11130_v52  ;;  %v1112_v59 = vadd.f32 %v6258_v48, %v11131_v29 }
 0x19d   :  { %v6340_v54 = vpop.xlane.xlu2 %909  ;;  %v6342_v25 = vpop.xlane.xlu0 %987 }
 0x19e   :  { %11121 = vst [vmem:[#allocation106_spill] sm:$0xff] %v6340_v54  ;;  %v6348_v44 = vpop.xlane.xlu1 %915  ;;  %v11127_v54 = vld [vmem:[#allocation52_spill] sm:$0xff] }
 0x19f   :  { %11122 = vst [vmem:[#allocation107_spill] sm:$0xff] %v6342_v25  ;;  %v1108_v25 = vadd.f32 %v6258_v48, %v11127_v54  ;;  %v1122_v54 = vadd.f32 %v6258_v48, %v5948_v28  ;;  %v1128_v28 = vadd.f32 %v6258_v48, %v5982_v45  ;;  %v1134_v45 = vadd.f32 %v6258_v48, %v6022_v39 }
 0x1a0   :  { %11125 = vst [vmem:[#allocation108_spill] sm:$0xff] %v6348_v44  ;;  %v11133_v44 = vld [vmem:[#allocation57_spill] sm:$0xff]  ;;  %v1140_v39 = vadd.f32 %v6258_v48, %v6064_v7 }
 0x1a1   :  { %v1113_v57 = vadd.f32 %v6250_v63, %v11133_v44 }
 0x1a2   :  { %1176 = vmin.xlane.f32.xlu2 %v1175_v55  ;;  %1188 = vmin.xlane.f32.xlu0 %v1187_v27  ;;  %v1184_v55 = vmin.f32 %v1107_v32, %v1108_v25  ;;  %v1196_v27 = vmin.f32 %v1115_v10, %v1116_v12  ;;  %v1117_v12 = vadd.f32 %v6250_v63, %v11086_v42 }
 0x1a3   :  { %1182 = vmin.xlane.f32.xlu1 %v1181_v56  ;;  %v1190_v56 = vmin.f32 %v1111_v1, %v1112_v59  ;;  %v1118_v10 = vadd.f32 %v6258_v48, %v11087_v38  ;;  %v1205_v59 = vmin.f32 %v1121_v2, %v1122_v54  ;;  %v1123_v54 = vadd.f32 %v6250_v63, %v11091_v36 }
 0x1a4   :  { %v1124_v2 = vadd.f32 %v6258_v48, %v11092_v37 }
 0x1a5   :  { %v6358_v51 = vpop.xlane.xlu2 %984  ;;  %v6360_v13 = vpop.xlane.xlu0 %996 }
 0x1a6   :  { %11128 = vst [vmem:[#allocation109_spill] sm:$0xff] %v6358_v51  ;;  %v6366_v16 = vpop.xlane.xlu1 %990  ;;  %v11134_v51 = vld [vmem:[#allocation24_spill] sm:$0xff] }
 0x1a7   :  { %11129 = vst [vmem:[#allocation110_spill] sm:$0xff] %v6360_v13  ;;  %v1114_v13 = vadd.f32 %v6258_v48, %v11134_v51 }
 0x1a8   :  { %11132 = vst [vmem:[#allocation111_spill] sm:$0xff] %v6366_v16  ;;  %v1127_v16 = vadd.f32 %v6250_v63, %v5979_v23 }
 0x1a9   :  { %v1193_v1 = vmin.f32 %v1113_v57, %v1114_v13 }
 0x1aa   :  { %1185 = vmin.xlane.f32.xlu2 %v1184_v55  ;;  %1197 = vmin.xlane.f32.xlu0 %v1196_v27  ;;  %v1199_v55 = vmin.f32 %v1117_v12, %v1118_v10  ;;  %v11138_v27 = vld [vmem:[#allocation11_spill] sm:$0xff]  ;;  %v1214_v10 = vmin.f32 %v1127_v16, %v1128_v28  ;;  %v1129_v28 = vadd.f32 %v6250_v63, %v11096_v30 }
 0x1ab   :  { %1191 = vmin.xlane.f32.xlu1 %v1190_v56  ;;  %v1119_v56 = vadd.f32 %v6250_v63, %v11138_v27  ;;  %v1130_v16 = vadd.f32 %v6258_v48, %v11097_v41 }
 0x1ad   :  { %v6376_v14 = vpop.xlane.xlu2 %993  ;;  %v6378_v32 = vpop.xlane.xlu0 %1005 }
 0x1ae   :  { %11135 = vst [vmem:[#allocation112_spill] sm:$0xff] %v6376_v14  ;;  %v6384_v25 = vpop.xlane.xlu1 %999  ;;  %v11139_v14 = vld [vmem:[#allocation59_spill] sm:$0xff] }
 0x1af   :  { %11136 = vst [vmem:[#allocation113_spill] sm:$0xff] %v6378_v32  ;;  %v1120_v32 = vadd.f32 %v6258_v48, %v11139_v14 }
 0x1b0   :  { %11137 = vst [vmem:[#allocation114_spill] sm:$0xff] %v6384_v25  ;;  %v1133_v25 = vadd.f32 %v6250_v63, %v6018_v8 }
 0x1b1   :  { %v1202_v12 = vmin.f32 %v1119_v56, %v1120_v32 }
 0x1b2   :  { %1194 = vmin.xlane.f32.xlu2 %v1193_v1  ;;  %1206 = vmin.xlane.f32.xlu0 %v1205_v59  ;;  %v1208_v1 = vmin.f32 %v1123_v54, %v1124_v2  ;;  %v11143_v59 = vld [vmem:[#allocation17_spill] sm:$0xff]  ;;  %v1223_v2 = vmin.f32 %v1133_v25, %v1134_v45  ;;  %v1135_v45 = vadd.f32 %v6250_v63, %v11101_v31 }
 0x1b3   :  { %1200 = vmin.xlane.f32.xlu1 %v1199_v55  ;;  %v1125_v55 = vadd.f32 %v6250_v63, %v11143_v59  ;;  %v1136_v25 = vadd.f32 %v6258_v48, %v11102_v35 }
 0x1b5   :  { %v6394_v17 = vpop.xlane.xlu2 %1002  ;;  %v6396_v57 = vpop.xlane.xlu0 %1014  ;;  %v1226_v7 = vmin.f32 %v1135_v45, %v1136_v25  ;;  %v1141_v45 = vadd.f32 %v6250_v63, %v6014_v40 }
 0x1b6   :  { %11140 = vst [vmem:[#allocation115_spill] sm:$0xff] %v6394_v17  ;;  %v6402_v13 = vpop.xlane.xlu1 %1008  ;;  %v11144_v17 = vld [vmem:[#allocation62_spill] sm:$0xff] }
 0x1b7   :  { %11141 = vst [vmem:[#allocation116_spill] sm:$0xff] %v6396_v57  ;;  %v1126_v57 = vadd.f32 %v6258_v48, %v11144_v17 }
 0x1b8   :  { %11142 = vst [vmem:[#allocation117_spill] sm:$0xff] %v6402_v13  ;;  %v1139_v13 = vadd.f32 %v6250_v63, %v6062_v61  ;;  %v11156_v61 = vld [vmem:[#allocation68_spill] sm:$0xff] }
 0x1b9   :  { %v1211_v54 = vmin.f32 %v1125_v55, %v1126_v57 }
 0x1ba   :  { %1203 = vmin.xlane.f32.xlu2 %v1202_v12  ;;  %1215 = vmin.xlane.f32.xlu0 %v1214_v10  ;;  %v1217_v12 = vmin.f32 %v1129_v28, %v1130_v16  ;;  %v11148_v10 = vld [vmem:[#allocation65_spill] sm:$0xff]  ;;  %v1232_v16 = vmin.f32 %v1139_v13, %v1140_v39 }
 0x1bb   :  { %1209 = vmin.xlane.f32.xlu1 %v1208_v1  ;;  %v1131_v1 = vadd.f32 %v6250_v63, %v11148_v10 }
 0x1bd   :  { %v6412_v23 = vpop.xlane.xlu2 %1011  ;;  %v6414_v32 = vpop.xlane.xlu0 %1023 }
 0x1be   :  { %11145 = vst [vmem:[#allocation118_spill] sm:$0xff] %v6412_v23  ;;  %v6420_v56 = vpop.xlane.xlu1 %1017  ;;  %v11149_v23 = vld [vmem:[#allocation66_spill] sm:$0xff] }
 0x1bf   :  { %11146 = vst [vmem:[#allocation119_spill] sm:$0xff] %v6414_v32  ;;  %v1132_v32 = vadd.f32 %v6258_v48, %v11149_v23  ;;  %v1138_v23 = vadd.f32 %v6258_v48, %v11156_v61 }
 0x1c0   :  { %11147 = vst [vmem:[#allocation120_spill] sm:$0xff] %v6420_v56 }
 0x1c1   :  { %v1220_v28 = vmin.f32 %v1131_v1, %v1132_v32 }
 0x1c2   :  { %1212 = vmin.xlane.f32.xlu2 %v1211_v54  ;;  %1224 = vmin.xlane.f32.xlu0 %v1223_v2  ;;  %v11153_v54 = vld [vmem:[#allocation16_spill] sm:$0xff] }
 0x1c3   :  { %1218 = vmin.xlane.f32.xlu1 %v1217_v12  ;;  %v6441_v2 = vperm.slane %v11153_v54, 1  ;;  %v11154_v12 = vld [vmem:[#allocation69_spill] sm:$0xff] }
 0x1c4   :  { %v6444_v56 = vperm.slane %v11154_v12, 1  ;;  %v1143_v12 = vadd.f32 %v6250_v63, %v6072_v53 }
 0x1c5   :  { %v6430_v8 = vpop.xlane.xlu2 %1020  ;;  %v6432_v57 = vpop.xlane.xlu0 %1032  ;;  %v1243_v32 = vadd.f32 %v6441_v2, %v11065_v19 }
 0x1c6   :  { %11150 = vst [vmem:[#allocation121_spill] sm:$0xff] %v6430_v8  ;;  %v6438_v55 = vpop.xlane.xlu1 %1026  ;;  %v1244_v39 = vadd.f32 %v6444_v56, %v11066_v4 }
 0x1c7   :  { %11151 = vst [vmem:[#allocation122_spill] sm:$0xff] %v6432_v57  ;;  %v11155_v57 = vld [vmem:[#allocation8_spill] sm:$0xff] }
 0x1c8   :  { %11152 = vst [vmem:[#allocation123_spill] sm:$0xff] %v6438_v55  ;;  %v1137_v8 = vadd.f32 %v6250_v63, %v11155_v57  ;;  %v1250_v55 = vadd.f32 %v6444_v56, %v5682_v6 }
 0x1ca   :  { %1221 = vmin.xlane.f32.xlu2 %v1220_v28  ;;  %1233 = vmin.xlane.f32.xlu0 %v1232_v16  ;;  %v1229_v28 = vmin.f32 %v1137_v8, %v1138_v23  ;;  %v1307_v16 = vmin.f32 %v1243_v32, %v1244_v39  ;;  %v1245_v8 = vadd.f32 %v6441_v2, %v11063_v49 }
 0x1cb   :  { %1227 = vmin.xlane.f32.xlu1 %v1226_v7  ;;  %v1142_v7 = vadd.f32 %v6258_v48, %v6016_v21  ;;  %v1246_v32 = vadd.f32 %v6444_v56, %v11064_v50 }
 0x1cd   :  { %v6454_v13 = vpop.xlane.xlu2 %1029  ;;  %v6456_v1 = vpop.xlane.xlu0 %1041  ;;  %v1235_v54 = vmin.f32 %v1141_v45, %v1142_v7  ;;  %v1310_v45 = vmin.f32 %v1245_v8, %v1246_v32  ;;  %v1247_v7 = vadd.f32 %v6441_v2, %v11067_v15 }
 0x1ce   :  { %11157 = vst [vmem:[#allocation16_spill] sm:$0xff] %v6454_v13  ;;  %v6462_v25 = vpop.xlane.xlu1 %1035  ;;  %v1249_v13 = vadd.f32 %v6441_v2, %v5679_v46 }
 0x1cf   :  { %11158 = vst [vmem:[#allocation69_spill] sm:$0xff] %v6456_v1  ;;  %v1144_v1 = vadd.f32 %v6258_v48, %v6074_v24 }
 0x1d0   :  { %11159 = vst [vmem:[#allocation124_spill] sm:$0xff] %v6462_v25  ;;  %v1316_v48 = vmin.f32 %v1249_v13, %v1250_v55  ;;  %v1251_v55 = vadd.f32 %v6441_v2, %v5703_v33  ;;  %v1252_v13 = vadd.f32 %v6444_v56, %v5706_v3  ;;  %v1274_v25 = vadd.f32 %v6444_v56, %v11131_v29 }
 0x1d1   :  { %v1238_v39 = vmin.f32 %v1143_v12, %v1144_v1 }
 0x1d2   :  { %1230 = vmin.xlane.f32.xlu2 %v1229_v28  ;;  %1308 = vmin.xlane.f32.xlu0 %v1307_v16  ;;  %v1248_v28 = vadd.f32 %v6444_v56, %v11068_v43  ;;  %v1255_v16 = vadd.f32 %v6441_v2, %v5691_v22 }
 0x1d3   :  { %1236 = vmin.xlane.f32.xlu1 %v1235_v54  ;;  %v1256_v54 = vadd.f32 %v6444_v56, %v11069_v60 }
 0x1d4   :  { %v1313_v8 = vmin.f32 %v1247_v7, %v1248_v28  ;;  %v1257_v28 = vadd.f32 %v6441_v2, %v5749_v34 }
 0x1d5   :  { %v6472_v4 = vpop.xlane.xlu2 %1038  ;;  %v6474_v23 = vpop.xlane.xlu0 %1050  ;;  %v1325_v32 = vmin.f32 %v1255_v16, %v1256_v54  ;;  %v1258_v16 = vadd.f32 %v6444_v56, %v5752_v18 }
 0x1d6   :  { %11160 = vst [vmem:[#allocation125_spill] sm:$0xff] %v6472_v4  ;;  %v6480_v63 = vpop.xlane.xlu1 %1044  ;;  %v1273_v4 = vadd.f32 %v6441_v2, %v11130_v52  ;;  %v1279_v52 = vadd.f32 %v6441_v2, %v11086_v42 }
 0x1d7   :  { %11161 = vst [vmem:[#allocation126_spill] sm:$0xff] %v6474_v23 }
 0x1d8   :  { %11162 = vst [vmem:[#allocation127_spill] sm:$0xff] %v6480_v63  ;;  %v1262_v63 = vadd.f32 %v6444_v56, %v11071_v20 }
 0x1da   :  { %1239 = vmin.xlane.f32.xlu2 %v1238_v39  ;;  %1317 = vmin.xlane.f32.xlu0 %v1316_v48  ;;  %v1319_v39 = vmin.f32 %v1251_v55, %v1252_v13  ;;  %v1253_v48 = vadd.f32 %v6441_v2, %v5733_v58 }
 0x1db   :  { %1311 = vmin.xlane.f32.xlu1 %v1310_v45  ;;  %v1254_v45 = vadd.f32 %v6444_v56, %v5736_v62 }
 0x1dd   :  { %v6490_v23 = vpop.xlane.xlu2 %1047  ;;  %v6492_v1 = vpop.xlane.xlu0 %1059  ;;  %v1322_v55 = vmin.f32 %v1253_v48, %v1254_v45 }
 0x1de   :  { %11163 = vst [vmem:[#allocation128_spill] sm:$0xff] %v6490_v23  ;;  %v6498_v12 = vpop.xlane.xlu1 %1053 }
 0x1df   :  { %11164 = vst [vmem:[#allocation129_spill] sm:$0xff] %v6492_v1  ;;  %v1261_v1 = vadd.f32 %v6441_v2, %v11070_v47 }
 0x1e0   :  { %11165 = vst [vmem:[#allocation130_spill] sm:$0xff] %v6498_v12 }
 0x1e1   :  { %v1334_v13 = vmin.f32 %v1261_v1, %v1262_v63  ;;  %v1263_v63 = vadd.f32 %v6441_v2, %v5797_v11  ;;  %v11171_v1 = vld [vmem:[#allocation46_spill] sm:$0xff] }
 0x1e2   :  { %1314 = vmin.xlane.f32.xlu2 %v1313_v8  ;;  %1326 = vmin.xlane.f32.xlu0 %v1325_v32  ;;  %v1328_v8 = vmin.f32 %v1257_v28, %v1258_v16  ;;  %v1259_v32 = vadd.f32 %v6441_v2, %v5777_v26  ;;  %v1264_v45 = vadd.f32 %v6444_v56, %v11171_v1 }
 0x1e3   :  { %1320 = vmin.xlane.f32.xlu1 %v1319_v39  ;;  %v1260_v39 = vadd.f32 %v6444_v56, %v5782_v9 }
 0x1e5   :  { %v6508_v23 = vpop.xlane.xlu2 %1056  ;;  %v6510_v7 = vpop.xlane.xlu0 %1068  ;;  %v1331_v16 = vmin.f32 %v1259_v32, %v1260_v39  ;;  %v11178_v39 = vld [vmem:[#allocation52_spill] sm:$0xff] }
 0x1e6   :  { %11166 = vst [vmem:[#allocation131_spill] sm:$0xff] %v6508_v23  ;;  %v6516_v54 = vpop.xlane.xlu1 %1062  ;;  %v1268_v23 = vadd.f32 %v6444_v56, %v11124_v5 }
 0x1e7   :  { %11167 = vst [vmem:[#allocation132_spill] sm:$0xff] %v6510_v7  ;;  %v1267_v7 = vadd.f32 %v6441_v2, %v11123_v0  ;;  %v1280_v0 = vadd.f32 %v6444_v56, %v11087_v38  ;;  %v1286_v38 = vadd.f32 %v6444_v56, %v11092_v37  ;;  %v1292_v37 = vadd.f32 %v6444_v56, %v11097_v41 }
 0x1e8   :  { %11168 = vst [vmem:[#allocation133_spill] sm:$0xff] %v6516_v54  ;;  %v1298_v41 = vadd.f32 %v6444_v56, %v11102_v35  ;;  %v1303_v35 = vadd.f32 %v6441_v2, %v6014_v40  ;;  %v11209_v40 = vld [vmem:[#allocation71_spill] sm:$0xff] }
 0x1ea   :  { %1323 = vmin.xlane.f32.xlu2 %v1322_v55  ;;  %1335 = vmin.xlane.f32.xlu0 %v1334_v13  ;;  %v1343_v55 = vmin.f32 %v1267_v7, %v1268_v23  ;;  %v1337_v13 = vmin.f32 %v1263_v63, %v1264_v45  ;;  %v11177_v23 = vld [vmem:[#allocation51_spill] sm:$0xff]  ;;  %v1270_v63 = vadd.f32 %v6444_v56, %v11178_v39 }
 0x1eb   :  { %1329 = vmin.xlane.f32.xlu1 %v1328_v8  ;;  %v11173_v8 = vld [vmem:[#allocation49_spill] sm:$0xff]  ;;  %v1269_v7 = vadd.f32 %v6441_v2, %v11177_v23 }
 0x1ec   :  { %v1265_v54 = vadd.f32 %v6441_v2, %v11173_v8 }
 0x1ed   :  { %v6526_v12 = vpop.xlane.xlu2 %1065  ;;  %v6528_v48 = vpop.xlane.xlu0 %1077 }
 0x1ee   :  { %11169 = vst [vmem:[#allocation134_spill] sm:$0xff] %v6526_v12  ;;  %v6534_v28 = vpop.xlane.xlu1 %1071  ;;  %v11174_v12 = vld [vmem:[#allocation50_spill] sm:$0xff] }
 0x1ef   :  { %11170 = vst [vmem:[#allocation135_spill] sm:$0xff] %v6528_v48  ;;  %v1266_v48 = vadd.f32 %v6444_v56, %v11174_v12 }
 0x1f0   :  { %11172 = vst [vmem:[#allocation136_spill] sm:$0xff] %v6534_v28  ;;  %v11180_v28 = vld [vmem:[#allocation55_spill] sm:$0xff] }
 0x1f1   :  { %v1271_v29 = vadd.f32 %v6441_v2, %v11180_v28 }
 0x1f2   :  { %1332 = vmin.xlane.f32.xlu2 %v1331_v16  ;;  %1344 = vmin.xlane.f32.xlu0 %v1343_v55  ;;  %v1340_v16 = vmin.f32 %v1265_v54, %v1266_v48  ;;  %v1352_v55 = vmin.f32 %v1273_v4, %v1274_v25  ;;  %v1275_v4 = vadd.f32 %v6441_v2, %v11133_v44 }
 0x1f3   :  { %1338 = vmin.xlane.f32.xlu1 %v1337_v13  ;;  %v1346_v13 = vmin.f32 %v1269_v7, %v1270_v63  ;;  %v1276_v25 = vadd.f32 %v6444_v56, %v11134_v51  ;;  %v1361_v63 = vmin.f32 %v1279_v52, %v1280_v0  ;;  %v1281_v0 = vadd.f32 %v6441_v2, %v11138_v27 }
 0x1f4   :  { %v1282_v52 = vadd.f32 %v6444_v56, %v11139_v14 }
 0x1f5   :  { %v6544_v5 = vpop.xlane.xlu2 %1074  ;;  %v6546_v32 = vpop.xlane.xlu0 %1152 }
 0x1f6   :  { %11175 = vst [vmem:[#allocation137_spill] sm:$0xff] %v6544_v5  ;;  %v6552_v45 = vpop.xlane.xlu1 %1146  ;;  %v11181_v5 = vld [vmem:[#allocation56_spill] sm:$0xff] }
 0x1f7   :  { %11176 = vst [vmem:[#allocation138_spill] sm:$0xff] %v6546_v32  ;;  %v1272_v32 = vadd.f32 %v6444_v56, %v11181_v5 }
 0x1f8   :  { %11179 = vst [vmem:[#allocation139_spill] sm:$0xff] %v6552_v45  ;;  %v1285_v45 = vadd.f32 %v6441_v2, %v11091_v36 }
 0x1f9   :  { %v1349_v7 = vmin.f32 %v1271_v29, %v1272_v32 }
 0x1fa   :  { %1341 = vmin.xlane.f32.xlu2 %v1340_v16  ;;  %1353 = vmin.xlane.f32.xlu0 %v1352_v55  ;;  %v1355_v16 = vmin.f32 %v1275_v4, %v1276_v25  ;;  %v11185_v55 = vld [vmem:[#allocation12_spill] sm:$0xff]  ;;  %v1370_v25 = vmin.f32 %v1285_v45, %v1286_v38  ;;  %v1287_v38 = vadd.f32 %v6441_v2, %v11143_v59 }
 0x1fb   :  { %1347 = vmin.xlane.f32.xlu1 %v1346_v13  ;;  %v1277_v13 = vadd.f32 %v6441_v2, %v11185_v55  ;;  %v1288_v45 = vadd.f32 %v6444_v56, %v11144_v17 }
 0x1fd   :  { %v6562_v12 = vpop.xlane.xlu2 %1149  ;;  %v6564_v54 = vpop.xlane.xlu0 %1161 }
 0x1fe   :  { %11182 = vst [vmem:[#allocation140_spill] sm:$0xff] %v6562_v12  ;;  %v6570_v48 = vpop.xlane.xlu1 %1155  ;;  %v11186_v12 = vld [vmem:[#allocation15_spill] sm:$0xff] }
 0x1ff   :  { %11183 = vst [vmem:[#allocation141_spill] sm:$0xff] %v6564_v54  ;;  %v1278_v54 = vadd.f32 %v6444_v56, %v11186_v12 }
 0x200   :  { %11184 = vst [vmem:[#allocation142_spill] sm:$0xff] %v6570_v48  ;;  %v1291_v48 = vadd.f32 %v6441_v2, %v11096_v30 }
 0x201   :  { %v1358_v4 = vmin.f32 %v1277_v13, %v1278_v54 }
 0x202   :  { %1350 = vmin.xlane.f32.xlu2 %v1349_v7  ;;  %1362 = vmin.xlane.f32.xlu0 %v1361_v63  ;;  %v1364_v7 = vmin.f32 %v1281_v0, %v1282_v52  ;;  %v11190_v63 = vld [vmem:[#allocation18_spill] sm:$0xff]  ;;  %v1379_v52 = vmin.f32 %v1291_v48, %v1292_v37  ;;  %v1293_v37 = vadd.f32 %v6441_v2, %v11148_v10 }
 0x203   :  { %1356 = vmin.xlane.f32.xlu1 %v1355_v16  ;;  %v1283_v16 = vadd.f32 %v6441_v2, %v11190_v63  ;;  %v11199_v48 = vld [vmem:[#allocation66_spill] sm:$0xff] }
 0x205   :  { %v6580_v42 = vpop.xlane.xlu2 %1158  ;;  %v6582_v29 = vpop.xlane.xlu0 %1170 }
 0x206   :  { %11187 = vst [vmem:[#allocation143_spill] sm:$0xff] %v6580_v42  ;;  %v6588_v32 = vpop.xlane.xlu1 %1164  ;;  %v11191_v42 = vld [vmem:[#allocation19_spill] sm:$0xff] }
 0x207   :  { %11188 = vst [vmem:[#allocation144_spill] sm:$0xff] %v6582_v29  ;;  %v1284_v29 = vadd.f32 %v6444_v56, %v11191_v42 }
 0x208   :  { %11189 = vst [vmem:[#allocation145_spill] sm:$0xff] %v6588_v32  ;;  %v1297_v32 = vadd.f32 %v6441_v2, %v11101_v31  ;;  %v1304_v31 = vadd.f32 %v6444_v56, %v6016_v21 }
 0x209   :  { %v1367_v0 = vmin.f32 %v1283_v16, %v1284_v29  ;;  %v1294_v16 = vadd.f32 %v6444_v56, %v11199_v48 }
 0x20a   :  { %1359 = vmin.xlane.f32.xlu2 %v1358_v4  ;;  %1371 = vmin.xlane.f32.xlu0 %v1370_v25  ;;  %v1373_v4 = vmin.f32 %v1287_v38, %v1288_v45  ;;  %v11195_v25 = vld [vmem:[#allocation20_spill] sm:$0xff] }
 0x20b   :  { %1365 = vmin.xlane.f32.xlu1 %v1364_v7  ;;  %v1289_v7 = vadd.f32 %v6441_v2, %v11195_v25 }
 0x20d   :  { %v6598_v36 = vpop.xlane.xlu2 %1167  ;;  %v6600_v54 = vpop.xlane.xlu0 %1179 }
 0x20e   :  { %11192 = vst [vmem:[#allocation146_spill] sm:$0xff] %v6598_v36  ;;  %v6606_v13 = vpop.xlane.xlu1 %1173  ;;  %v11196_v36 = vld [vmem:[#allocation21_spill] sm:$0xff] }
 0x20f   :  { %11193 = vst [vmem:[#allocation147_spill] sm:$0xff] %v6600_v54  ;;  %v1290_v54 = vadd.f32 %v6444_v56, %v11196_v36 }
 0x210   :  { %11194 = vst [vmem:[#allocation148_spill] sm:$0xff] %v6606_v13 }
 0x211   :  { %v1376_v45 = vmin.f32 %v1289_v7, %v1290_v54 }
 0x212   :  { %1368 = vmin.xlane.f32.xlu2 %v1367_v0  ;;  %1380 = vmin.xlane.f32.xlu0 %v1379_v52  ;;  %v1388_v0 = vmin.f32 %v1297_v32, %v1298_v41  ;;  %v1382_v52 = vmin.f32 %v1293_v37, %v1294_v16  ;;  %v1299_v41 = vadd.f32 %v6441_v2, %v11155_v57 }
 0x213   :  { %1374 = vmin.xlane.f32.xlu1 %v1373_v4  ;;  %v11201_v4 = vld [vmem:[#allocation23_spill] sm:$0xff]  ;;  %v1300_v32 = vadd.f32 %v6444_v56, %v11156_v61  ;;  %v1397_v16 = vmin.f32 %v1303_v35, %v1304_v31 }
 0x214   :  { %v1295_v13 = vadd.f32 %v6441_v2, %v11201_v4 }
 0x215   :  { %v6616_v30 = vpop.xlane.xlu2 %1176  ;;  %v6618_v29 = vpop.xlane.xlu0 %1188 }
 0x216   :  { %11197 = vst [vmem:[#allocation149_spill] sm:$0xff] %v6616_v30  ;;  %v6624_v38 = vpop.xlane.xlu1 %1182  ;;  %v11202_v30 = vld [vmem:[#allocation67_spill] sm:$0xff] }
 0x217   :  { %11198 = vst [vmem:[#allocation150_spill] sm:$0xff] %v6618_v29  ;;  %v1296_v29 = vadd.f32 %v6444_v56, %v11202_v30  ;;  %v1302_v30 = vadd.f32 %v6444_v56, %v11209_v40 }
 0x218   :  { %11200 = vst [vmem:[#allocation151_spill] sm:$0xff] %v6624_v38  ;;  %v11207_v38 = vld [vmem:[#allocation93_spill] sm:$0xff] }
 0x219   :  { %v1385_v37 = vmin.f32 %v1295_v13, %v1296_v29 }
 0x21a   :  { %1377 = vmin.xlane.f32.xlu2 %v1376_v45  ;;  %1389 = vmin.xlane.f32.xlu0 %v1388_v0  ;;  %v1391_v45 = vmin.f32 %v1299_v41, %v1300_v32  ;;  %v11206_v0 = vld [vmem:[#allocation92_spill] sm:$0xff]  ;;  %v1306_v41 = vadd.f32 %v6444_v56, %v6074_v24 }
 0x21b   :  { %1383 = vmin.xlane.f32.xlu1 %v1382_v52  ;;  %v6645_v52 = vperm.slane %v11206_v0, 2 }
 0x21d   :  { %v6634_v36 = vpop.xlane.xlu2 %1185  ;;  %v6636_v54 = vpop.xlane.xlu0 %1197  ;;  %v1407_v13 = vadd.f32 %v6645_v52, %v11063_v49  ;;  %v1405_v0 = vadd.f32 %v6645_v52, %v11065_v19 }
 0x21e   :  { %11203 = vst [vmem:[#allocation152_spill] sm:$0xff] %v6634_v36  ;;  %v6642_v7 = vpop.xlane.xlu1 %1191  ;;  %v6648_v36 = vperm.slane %v11207_v38, 2  ;;  %v1305_v38 = vadd.f32 %v6441_v2, %v6072_v53 }
 0x21f   :  { %11204 = vst [vmem:[#allocation153_spill] sm:$0xff] %v6636_v54  ;;  %v11208_v54 = vld [vmem:[#allocation70_spill] sm:$0xff] }
 0x220   :  { %11205 = vst [vmem:[#allocation154_spill] sm:$0xff] %v6642_v7  ;;  %v1301_v21 = vadd.f32 %v6441_v2, %v11208_v54  ;;  %v1408_v35 = vadd.f32 %v6648_v36, %v11064_v50  ;;  %v1413_v2 = vadd.f32 %v6645_v52, %v5703_v33  ;;  %v1414_v56 = vadd.f32 %v6648_v36, %v5706_v3 }
 0x222   :  { %1386 = vmin.xlane.f32.xlu2 %v1385_v37  ;;  %1398 = vmin.xlane.f32.xlu0 %v1397_v16  ;;  %v1394_v37 = vmin.f32 %v1301_v21, %v1302_v30  ;;  %v1472_v16 = vmin.f32 %v1407_v13, %v1408_v35  ;;  %v1409_v30 = vadd.f32 %v6645_v52, %v11067_v15 }
 0x223   :  { %1392 = vmin.xlane.f32.xlu1 %v1391_v45  ;;  %v1400_v45 = vmin.f32 %v1305_v38, %v1306_v41  ;;  %v1410_v13 = vadd.f32 %v6648_v36, %v11068_v43  ;;  %v1481_v41 = vmin.f32 %v1413_v2, %v1414_v56  ;;  %v1416_v2 = vadd.f32 %v6648_v36, %v5736_v62 }
 0x225   :  { %v6658_v31 = vpop.xlane.xlu2 %1194  ;;  %v6660_v29 = vpop.xlane.xlu0 %1206 }
 0x226   :  { %11210 = vst [vmem:[#allocation92_spill] sm:$0xff] %v6658_v31  ;;  %v6666_v32 = vpop.xlane.xlu1 %1200  ;;  %v11213_v31 = vld [vmem:[#allocation14_spill] sm:$0xff] }
 0x227   :  { %11211 = vst [vmem:[#allocation93_spill] sm:$0xff] %v6660_v29  ;;  %v1406_v29 = vadd.f32 %v6648_v36, %v11213_v31 }
 0x228   :  { %11212 = vst [vmem:[#allocation155_spill] sm:$0xff] %v6666_v32 }
 0x229   :  { %v1469_v38 = vmin.f32 %v1405_v0, %v1406_v29  ;;  %v1415_v0 = vadd.f32 %v6645_v52, %v5733_v58 }
 0x22a   :  { %1395 = vmin.xlane.f32.xlu2 %v1394_v37  ;;  %1473 = vmin.xlane.f32.xlu0 %v1472_v16  ;;  %v1475_v37 = vmin.f32 %v1409_v30, %v1410_v13  ;;  %v1411_v16 = vadd.f32 %v6645_v52, %v5679_v46 }
 0x22b   :  { %1401 = vmin.xlane.f32.xlu1 %v1400_v45  ;;  %v1412_v45 = vadd.f32 %v6648_v36, %v5682_v6 }
 0x22d   :  { %v6676_v7 = vpop.xlane.xlu2 %1203  ;;  %v6678_v21 = vpop.xlane.xlu0 %1215  ;;  %v1478_v30 = vmin.f32 %v1411_v16, %v1412_v45 }
 0x22e   :  { %11214 = vst [vmem:[#allocation156_spill] sm:$0xff] %v6676_v7  ;;  %v6684_v35 = vpop.xlane.xlu1 %1209  ;;  %v1420_v7 = vadd.f32 %v6648_v36, %v5752_v18 }
 0x22f   :  { %11215 = vst [vmem:[#allocation157_spill] sm:$0xff] %v6678_v21  ;;  %v1419_v21 = vadd.f32 %v6645_v52, %v5749_v34 }
 0x230   :  { %11216 = vst [vmem:[#allocation158_spill] sm:$0xff] %v6684_v35  ;;  %v1426_v35 = vadd.f32 %v6648_v36, %v11171_v1 }
 0x231   :  { %v1490_v13 = vmin.f32 %v1419_v21, %v1420_v7  ;;  %v1421_v7 = vadd.f32 %v6645_v52, %v5777_v26  ;;  %v1422_v21 = vadd.f32 %v6648_v36, %v5782_v9 }
 0x232   :  { %1470 = vmin.xlane.f32.xlu2 %v1469_v38  ;;  %1482 = vmin.xlane.f32.xlu0 %v1481_v41  ;;  %v1484_v38 = vmin.f32 %v1415_v0, %v1416_v2  ;;  %v1417_v41 = vadd.f32 %v6645_v52, %v5691_v22 }
 0x233   :  { %1476 = vmin.xlane.f32.xlu1 %v1475_v37  ;;  %v1418_v37 = vadd.f32 %v6648_v36, %v11069_v60 }
 0x235   :  { %v6694_v32 = vpop.xlane.xlu2 %1212  ;;  %v6696_v29 = vpop.xlane.xlu0 %1224  ;;  %v1487_v0 = vmin.f32 %v1417_v41, %v1418_v37 }
 0x236   :  { %11217 = vst [vmem:[#allocation159_spill] sm:$0xff] %v6694_v32  ;;  %v6702_v56 = vpop.xlane.xlu1 %1218 }
 0x237   :  { %11218 = vst [vmem:[#allocation160_spill] sm:$0xff] %v6696_v29  ;;  %v1425_v29 = vadd.f32 %v6645_v52, %v5797_v11 }
 0x238   :  { %11219 = vst [vmem:[#allocation161_spill] sm:$0xff] %v6702_v56 }
 0x239   :  { %v1499_v2 = vmin.f32 %v1425_v29, %v1426_v35  ;;  %v1427_v35 = vadd.f32 %v6645_v52, %v11173_v8  ;;  %v11225_v29 = vld [vmem:[#allocation50_spill] sm:$0xff] }
 0x23a   :  { %1479 = vmin.xlane.f32.xlu2 %v1478_v30  ;;  %1491 = vmin.xlane.f32.xlu0 %v1490_v13  ;;  %v1493_v30 = vmin.f32 %v1421_v7, %v1422_v21  ;;  %v1423_v13 = vadd.f32 %v6645_v52, %v11070_v47  ;;  %v1428_v37 = vadd.f32 %v6648_v36, %v11225_v29 }
 0x23b   :  { %1485 = vmin.xlane.f32.xlu1 %v1484_v38  ;;  %v1424_v38 = vadd.f32 %v6648_v36, %v11071_v20 }
 0x23d   :  { %v6712_v32 = vpop.xlane.xlu2 %1221  ;;  %v6714_v16 = vpop.xlane.xlu0 %1233  ;;  %v1496_v21 = vmin.f32 %v1423_v13, %v1424_v38 }
 0x23e   :  { %11220 = vst [vmem:[#allocation162_spill] sm:$0xff] %v6712_v32  ;;  %v6720_v45 = vpop.xlane.xlu1 %1227  ;;  %v1432_v32 = vadd.f32 %v6648_v36, %v11178_v39  ;;  %v1437_v39 = vadd.f32 %v6645_v52, %v11133_v44 }
 0x23f   :  { %11221 = vst [vmem:[#allocation163_spill] sm:$0xff] %v6714_v16  ;;  %v1431_v16 = vadd.f32 %v6645_v52, %v11177_v23  ;;  %v1438_v23 = vadd.f32 %v6648_v36, %v11134_v51  ;;  %v1444_v51 = vadd.f32 %v6648_v36, %v11139_v14  ;;  %v1450_v14 = vadd.f32 %v6648_v36, %v11144_v17 }
 0x240   :  { %11222 = vst [vmem:[#allocation164_spill] sm:$0xff] %v6720_v45  ;;  %v1456_v17 = vadd.f32 %v6648_v36, %v11199_v48  ;;  %v1461_v48 = vadd.f32 %v6645_v52, %v11155_v57  ;;  %v1468_v57 = vadd.f32 %v6648_v36, %v6074_v24 }
 0x242   :  { %1488 = vmin.xlane.f32.xlu2 %v1487_v0  ;;  %1500 = vmin.xlane.f32.xlu0 %v1499_v2  ;;  %v1508_v0 = vmin.f32 %v1431_v16, %v1432_v32  ;;  %v1502_v2 = vmin.f32 %v1427_v35, %v1428_v37  ;;  %v1433_v32 = vadd.f32 %v6645_v52, %v11180_v28 }
 0x243   :  { %1494 = vmin.xlane.f32.xlu1 %v1493_v30  ;;  %v11227_v30 = vld [vmem:[#allocation41_spill] sm:$0xff]  ;;  %v1434_v16 = vadd.f32 %v6648_v36, %v11181_v5  ;;  %v1517_v37 = vmin.f32 %v1437_v39, %v1438_v23  ;;  %v1439_v23 = vadd.f32 %v6645_v52, %v11185_v55  ;;  %v1440_v39 = vadd.f32 %v6648_v36, %v11186_v12 }
 0x244   :  { %v1429_v45 = vadd.f32 %v6645_v52, %v11227_v30 }
 0x245   :  { %v6730_v56 = vpop.xlane.xlu2 %1230  ;;  %v6732_v41 = vpop.xlane.xlu0 %1308 }
 0x246   :  { %11223 = vst [vmem:[#allocation165_spill] sm:$0xff] %v6730_v56  ;;  %v6738_v7 = vpop.xlane.xlu1 %1236  ;;  %v11228_v56 = vld [vmem:[#allocation42_spill] sm:$0xff] }
 0x247   :  { %11224 = vst [vmem:[#allocation166_spill] sm:$0xff] %v6732_v41  ;;  %v1430_v41 = vadd.f32 %v6648_v36, %v11228_v56 }
 0x248   :  { %11226 = vst [vmem:[#allocation167_spill] sm:$0xff] %v6738_v7 }
 0x249   :  { %v1505_v35 = vmin.f32 %v1429_v45, %v1430_v41 }
 0x24a   :  { %1497 = vmin.xlane.f32.xlu2 %v1496_v21  ;;  %1509 = vmin.xlane.f32.xlu0 %v1508_v0  ;;  %v1511_v21 = vmin.f32 %v1433_v32, %v1434_v16  ;;  %v11232_v0 = vld [vmem:[#allocation47_spill] sm:$0xff] }
 0x24b   :  { %1503 = vmin.xlane.f32.xlu1 %v1502_v2  ;;  %v1435_v2 = vadd.f32 %v6645_v52, %v11232_v0 }
 0x24d   :  { %v6748_v1 = vpop.xlane.xlu2 %1239  ;;  %v6750_v13 = vpop.xlane.xlu0 %1317 }
 0x24e   :  { %11229 = vst [vmem:[#allocation168_spill] sm:$0xff] %v6748_v1  ;;  %v6756_v38 = vpop.xlane.xlu1 %1311  ;;  %v11233_v1 = vld [vmem:[#allocation48_spill] sm:$0xff] }
 0x24f   :  { %11230 = vst [vmem:[#allocation169_spill] sm:$0xff] %v6750_v13  ;;  %v1436_v7 = vadd.f32 %v6648_v36, %v11233_v1  ;;  %v1443_v13 = vadd.f32 %v6645_v52, %v11138_v27 }
 0x250   :  { %11231 = vst [vmem:[#allocation170_spill] sm:$0xff] %v6756_v38  ;;  %v1449_v38 = vadd.f32 %v6645_v52, %v11143_v59 }
 0x251   :  { %v1514_v32 = vmin.f32 %v1435_v2, %v1436_v7  ;;  %v1526_v16 = vmin.f32 %v1443_v13, %v1444_v51  ;;  %v1445_v51 = vadd.f32 %v6645_v52, %v11190_v63  ;;  %v1446_v13 = vadd.f32 %v6648_v36, %v11191_v42 }
 0x252   :  { %1506 = vmin.xlane.f32.xlu2 %v1505_v35  ;;  %1518 = vmin.xlane.f32.xlu0 %v1517_v37  ;;  %v1520_v35 = vmin.f32 %v1439_v23, %v1440_v39  ;;  %v11237_v37 = vld [vmem:[#allocation53_spill] sm:$0xff]  ;;  %v1535_v39 = vmin.f32 %v1449_v38, %v1450_v14  ;;  %v1451_v14 = vadd.f32 %v6645_v52, %v11195_v25 }
 0x253   :  { %1512 = vmin.xlane.f32.xlu1 %v1511_v21  ;;  %v1441_v21 = vadd.f32 %v6645_v52, %v11237_v37  ;;  %v11246_v38 = vld [vmem:[#allocation21_spill] sm:$0xff] }
 0x255   :  { %v6766_v44 = vpop.xlane.xlu2 %1314  ;;  %v6768_v45 = vpop.xlane.xlu0 %1326 }
 0x256   :  { %11234 = vst [vmem:[#allocation171_spill] sm:$0xff] %v6766_v44  ;;  %v6774_v41 = vpop.xlane.xlu1 %1320  ;;  %v11238_v44 = vld [vmem:[#allocation54_spill] sm:$0xff] }
 0x257   :  { %11235 = vst [vmem:[#allocation172_spill] sm:$0xff] %v6768_v45  ;;  %v1442_v45 = vadd.f32 %v6648_v36, %v11238_v44 }
 0x258   :  { %11236 = vst [vmem:[#allocation173_spill] sm:$0xff] %v6774_v41  ;;  %v1455_v41 = vadd.f32 %v6645_v52, %v11148_v10  ;;  %v1462_v10 = vadd.f32 %v6648_v36, %v11156_v61  ;;  %v1467_v61 = vadd.f32 %v6645_v52, %v6072_v53 }
 0x259   :  { %v1523_v23 = vmin.f32 %v1441_v21, %v1442_v45  ;;  %v1452_v21 = vadd.f32 %v6648_v36, %v11246_v38 }
 0x25a   :  { %1515 = vmin.xlane.f32.xlu2 %v1514_v32  ;;  %1527 = vmin.xlane.f32.xlu0 %v1526_v16  ;;  %v1529_v32 = vmin.f32 %v1445_v51, %v1446_v13  ;;  %v11242_v16 = vld [vmem:[#allocation9_spill] sm:$0xff] }
 0x25b   :  { %1521 = vmin.xlane.f32.xlu1 %v1520_v35  ;;  %v1447_v35 = vadd.f32 %v6645_v52, %v11242_v16 }
 0x25d   :  { %v6784_v27 = vpop.xlane.xlu2 %1323  ;;  %v6786_v7 = vpop.xlane.xlu0 %1335 }
 0x25e   :  { %11239 = vst [vmem:[#allocation174_spill] sm:$0xff] %v6784_v27  ;;  %v6792_v2 = vpop.xlane.xlu1 %1329  ;;  %v11243_v27 = vld [vmem:[#allocation58_spill] sm:$0xff] }
 0x25f   :  { %11240 = vst [vmem:[#allocation175_spill] sm:$0xff] %v6786_v7  ;;  %v1448_v7 = vadd.f32 %v6648_v36, %v11243_v27 }
 0x260   :  { %11241 = vst [vmem:[#allocation176_spill] sm:$0xff] %v6792_v2 }
 0x261   :  { %v1532_v13 = vmin.f32 %v1447_v35, %v1448_v7 }
 0x262   :  { %1524 = vmin.xlane.f32.xlu2 %v1523_v23  ;;  %1536 = vmin.xlane.f32.xlu0 %v1535_v39  ;;  %v1544_v23 = vmin.f32 %v1455_v41, %v1456_v17  ;;  %v1538_v39 = vmin.f32 %v1451_v14, %v1452_v21  ;;  %v1457_v17 = vadd.f32 %v6645_v52, %v11201_v4  ;;  %v11252_v41 = vld [vmem:[#allocation67_spill] sm:$0xff] }
 0x263   :  { %1530 = vmin.xlane.f32.xlu1 %v1529_v32  ;;  %v11248_v32 = vld [vmem:[#allocation60_spill] sm:$0xff]  ;;  %v1458_v35 = vadd.f32 %v6648_v36, %v11252_v41 }
 0x264   :  { %v1453_v2 = vadd.f32 %v6645_v52, %v11248_v32 }
 0x265   :  { %v6802_v59 = vpop.xlane.xlu2 %1332  ;;  %v6804_v45 = vpop.xlane.xlu0 %1344 }
 0x266   :  { %11244 = vst [vmem:[#allocation177_spill] sm:$0xff] %v6802_v59  ;;  %v6810_v51 = vpop.xlane.xlu1 %1338  ;;  %v11249_v59 = vld [vmem:[#allocation61_spill] sm:$0xff] }
 0x267   :  { %11245 = vst [vmem:[#allocation178_spill] sm:$0xff] %v6804_v45  ;;  %v1454_v45 = vadd.f32 %v6648_v36, %v11249_v59 }
 0x268   :  { %11247 = vst [vmem:[#allocation179_spill] sm:$0xff] %v6810_v51 }
 0x269   :  { %v1541_v21 = vmin.f32 %v1453_v2, %v1454_v45 }
 0x26a   :  { %1533 = vmin.xlane.f32.xlu2 %v1532_v13  ;;  %1545 = vmin.xlane.f32.xlu0 %v1544_v23  ;;  %v1553_v13 = vmin.f32 %v1461_v48, %v1462_v10  ;;  %v1547_v23 = vmin.f32 %v1457_v17, %v1458_v35  ;;  %v1463_v10 = vadd.f32 %v6645_v52, %v11208_v54 }
 0x26b   :  { %1539 = vmin.xlane.f32.xlu1 %v1538_v39  ;;  %v11254_v39 = vld [vmem:[#allocation63_spill] sm:$0xff]  ;;  %v1464_v48 = vadd.f32 %v6648_v36, %v11209_v40  ;;  %v1562_v35 = vmin.f32 %v1467_v61, %v1468_v57  ;;  %v11261_v61 = vld [vmem:[#allocation22_spill] sm:$0xff] }
 0x26c   :  { %v1459_v51 = vadd.f32 %v6645_v52, %v11254_v39  ;;  %v1465_v57 = vadd.f32 %v6645_v52, %v11261_v61 }
 0x26d   :  { %v6820_v27 = vpop.xlane.xlu2 %1341  ;;  %v6822_v7 = vpop.xlane.xlu0 %1353 }
 0x26e   :  { %11250 = vst [vmem:[#allocation180_spill] sm:$0xff] %v6820_v27  ;;  %v6828_v14 = vpop.xlane.xlu1 %1347  ;;  %v11255_v27 = vld [vmem:[#allocation64_spill] sm:$0xff] }
 0x26f   :  { %11251 = vst [vmem:[#allocation181_spill] sm:$0xff] %v6822_v7  ;;  %v1460_v7 = vadd.f32 %v6648_v36, %v11255_v27 }
 0x270   :  { %11253 = vst [vmem:[#allocation182_spill] sm:$0xff] %v6828_v14 }
 0x271   :  { %v1550_v17 = vmin.f32 %v1459_v51, %v1460_v7  ;;  %v11262_v51 = vld [vmem:[#allocation10_spill] sm:$0xff] }
 0x272   :  { %1542 = vmin.xlane.f32.xlu2 %v1541_v21  ;;  %1554 = vmin.xlane.f32.xlu0 %v1553_v13  ;;  %v1556_v21 = vmin.f32 %v1463_v10, %v1464_v48  ;;  %v6851_v13 = vld [vmem:[%s10631_s4] sm:$0xff]  ;;  %v1466_v7 = vadd.f32 %v6648_v36, %v11262_v51 }
 0x273   :  { %1548 = vmin.xlane.f32.xlu1 %v1547_v23  ;;  %11259 = vst [vmem:[#allocation186_spill] sm:$0xff] %v6851_v13  ;;  %v6854_v23 = vperm.slane %v6851_v13, 2 }
 0x275   :  { %v6838_v59 = vpop.xlane.xlu2 %1350  ;;  %v6840_v2 = vpop.xlane.xlu0 %1362  ;;  %v1571_v10 = vadd.f32 %v6854_v23, %v11067_v15  ;;  %v1569_v13 = vadd.f32 %v6854_v23, %v11063_v49 }
 0x276   :  { %11256 = vst [vmem:[#allocation183_spill] sm:$0xff] %v6838_v59  ;;  %v6846_v45 = vpop.xlane.xlu1 %1356 }
 0x277   :  { %11257 = vst [vmem:[#allocation184_spill] sm:$0xff] %v6840_v2  ;;  %v6859_v2 = vld [vmem:[%s10631_s4 + $0x8] sm:$0xff] }
 0x278   :  { %11258 = vst [vmem:[#allocation185_spill] sm:$0xff] %v6846_v45  ;;  %v6862_v59 = vperm.slane %v6859_v2, 2 }
 0x279   :  { %11260 = vst [vmem:[#allocation187_spill] sm:$0xff] %v6859_v2 }
 0x27a   :  { %1551 = vmin.xlane.f32.xlu2 %v1550_v17  ;;  %1563 = vmin.xlane.f32.xlu0 %v1562_v35  ;;  %v1572_v48 = vadd.f32 %v6862_v59, %v11068_v43  ;;  %v1567_v17 = vadd.f32 %v6854_v23, %v11065_v19  ;;  %v1568_v35 = vadd.f32 %v6862_v59, %v11213_v31 }
 0x27b   :  { %1557 = vmin.xlane.f32.xlu1 %v1556_v21  ;;  %v1559_v21 = vmin.f32 %v1465_v57, %v1466_v7  ;;  %v1578_v43 = vadd.f32 %v6862_v59, %v5736_v62  ;;  %v1573_v7 = vadd.f32 %v6854_v23, %v5679_v46 }
 0x27c   :  { %v1637_v36 = vmin.f32 %v1571_v10, %v1572_v48  ;;  %v1631_v2 = vmin.f32 %v1567_v17, %v1568_v35 }
 0x27d   :  { %v6872_v45 = vpop.xlane.xlu2 %1359  ;;  %v6874_v14 = vpop.xlane.xlu0 %1371 }
 0x27e   :  { %11263 = vst [vmem:[#allocation188_spill] sm:$0xff] %v6872_v45  ;;  %v6880_v52 = vpop.xlane.xlu1 %1365  ;;  %v1577_v45 = vadd.f32 %v6854_v23, %v5733_v58 }
 0x27f   :  { %11264 = vst [vmem:[#allocation189_spill] sm:$0xff] %v6874_v14  ;;  %v1570_v14 = vadd.f32 %v6862_v59, %v11064_v50 }
 0x280   :  { %11265 = vst [vmem:[#allocation190_spill] sm:$0xff] %v6880_v52  ;;  %v1646_v17 = vmin.f32 %v1577_v45, %v1578_v43  ;;  %v1584_v52 = vadd.f32 %v6862_v59, %v5782_v9  ;;  %v1579_v43 = vadd.f32 %v6854_v23, %v5691_v22  ;;  %v1580_v45 = vadd.f32 %v6862_v59, %v11069_v60 }
 0x281   :  { %v1634_v48 = vmin.f32 %v1569_v13, %v1570_v14 }
 0x282   :  { %1560 = vmin.xlane.f32.xlu2 %v1559_v21  ;;  %1638 = vmin.xlane.f32.xlu0 %v1637_v36  ;;  %v1575_v21 = vadd.f32 %v6854_v23, %v5703_v33  ;;  %v1576_v36 = vadd.f32 %v6862_v59, %v5706_v3 }
 0x283   :  { %1632 = vmin.xlane.f32.xlu1 %v1631_v2  ;;  %v1574_v2 = vadd.f32 %v6862_v59, %v5682_v6 }
 0x285   :  { %v6890_v15 = vpop.xlane.xlu2 %1368  ;;  %v6892_v57 = vpop.xlane.xlu0 %1380  ;;  %v1640_v35 = vmin.f32 %v1573_v7, %v1574_v2  ;;  %v1643_v7 = vmin.f32 %v1575_v21, %v1576_v36 }
 0x286   :  { %11266 = vst [vmem:[#allocation191_spill] sm:$0xff] %v6890_v15  ;;  %v6898_v10 = vpop.xlane.xlu1 %1374 }
 0x287   :  { %11267 = vst [vmem:[#allocation192_spill] sm:$0xff] %v6892_v57  ;;  %v1583_v57 = vadd.f32 %v6854_v23, %v5777_v26 }
 0x288   :  { %11268 = vst [vmem:[#allocation193_spill] sm:$0xff] %v6898_v10  ;;  %v1590_v10 = vadd.f32 %v6862_v59, %v11225_v29 }
 0x289   :  { %v1655_v2 = vmin.f32 %v1583_v57, %v1584_v52  ;;  %v1585_v52 = vadd.f32 %v6854_v23, %v11070_v47  ;;  %v1586_v57 = vadd.f32 %v6862_v59, %v11071_v20 }
 0x28a   :  { %1635 = vmin.xlane.f32.xlu2 %v1634_v48  ;;  %1647 = vmin.xlane.f32.xlu0 %v1646_v17  ;;  %v1649_v48 = vmin.f32 %v1579_v43, %v1580_v45  ;;  %v1581_v17 = vadd.f32 %v6854_v23, %v5749_v34 }
 0x28b   :  { %1641 = vmin.xlane.f32.xlu1 %v1640_v35  ;;  %v1582_v35 = vadd.f32 %v6862_v59, %v5752_v18 }
 0x28d   :  { %v6908_v15 = vpop.xlane.xlu2 %1377  ;;  %v6910_v14 = vpop.xlane.xlu0 %1389  ;;  %v1652_v43 = vmin.f32 %v1581_v17, %v1582_v35 }
 0x28e   :  { %11269 = vst [vmem:[#allocation194_spill] sm:$0xff] %v6908_v15  ;;  %v6916_v13 = vpop.xlane.xlu1 %1383 }
 0x28f   :  { %11270 = vst [vmem:[#allocation195_spill] sm:$0xff] %v6910_v14  ;;  %v1589_v14 = vadd.f32 %v6854_v23, %v11173_v8 }
 0x290   :  { %11271 = vst [vmem:[#allocation196_spill] sm:$0xff] %v6916_v13  ;;  %v1595_v13 = vadd.f32 %v6854_v23, %v11180_v28 }
 0x291   :  { %v1664_v45 = vmin.f32 %v1589_v14, %v1590_v10  ;;  %v1591_v10 = vadd.f32 %v6854_v23, %v11227_v30  ;;  %v1592_v14 = vadd.f32 %v6862_v59, %v11228_v56 }
 0x292   :  { %1644 = vmin.xlane.f32.xlu2 %v1643_v7  ;;  %1656 = vmin.xlane.f32.xlu0 %v1655_v2  ;;  %v1658_v7 = vmin.f32 %v1585_v52, %v1586_v57  ;;  %v1587_v2 = vadd.f32 %v6854_v23, %v5797_v11 }
 0x293   :  { %1650 = vmin.xlane.f32.xlu1 %v1649_v48  ;;  %v11275_v48 = vld [vmem:[#allocation46_spill] sm:$0xff] }
 0x295   :  { %v6926_v15 = vpop.xlane.xlu2 %1386  ;;  %v6928_v21 = vpop.xlane.xlu0 %1398 }
 0x296   :  { %11272 = vst [vmem:[#allocation197_spill] sm:$0xff] %v6926_v15  ;;  %v6934_v36 = vpop.xlane.xlu1 %1392  ;;  %v1596_v15 = vadd.f32 %v6862_v59, %v11181_v5  ;;  %v1602_v5 = vadd.f32 %v6862_v59, %v11186_v12  ;;  %v1608_v12 = vadd.f32 %v6862_v59, %v11191_v42  ;;  %v1614_v42 = vadd.f32 %v6862_v59, %v11246_v38 }
 0x297   :  { %11273 = vst [vmem:[#allocation198_spill] sm:$0xff] %v6928_v21  ;;  %v1588_v21 = vadd.f32 %v6862_v59, %v11275_v48  ;;  %v1619_v38 = vadd.f32 %v6854_v23, %v11201_v4  ;;  %v1626_v4 = vadd.f32 %v6862_v59, %v11209_v40 }
 0x298   :  { %11274 = vst [vmem:[#allocation199_spill] sm:$0xff] %v6934_v36  ;;  %v1673_v57 = vmin.f32 %v1595_v13, %v1596_v15  ;;  %v11280_v36 = vld [vmem:[#allocation52_spill] sm:$0xff]  ;;  %v1597_v15 = vadd.f32 %v6854_v23, %v11232_v0  ;;  %v1598_v13 = vadd.f32 %v6862_v59, %v11233_v1 }
 0x299   :  { %v1661_v52 = vmin.f32 %v1587_v2, %v1588_v21 }
 0x29a   :  { %1653 = vmin.xlane.f32.xlu2 %v1652_v43  ;;  %1665 = vmin.xlane.f32.xlu0 %v1664_v45  ;;  %v1667_v43 = vmin.f32 %v1591_v10, %v1592_v14  ;;  %v11279_v45 = vld [vmem:[#allocation51_spill] sm:$0xff] }
 0x29b   :  { %1659 = vmin.xlane.f32.xlu1 %v1658_v7  ;;  %v1593_v7 = vadd.f32 %v6854_v23, %v11279_v45 }
 0x29d   :  { %v6944_v29 = vpop.xlane.xlu2 %1395  ;;  %v6946_v17 = vpop.xlane.xlu0 %1473 }
 0x29e   :  { %11276 = vst [vmem:[#allocation200_spill] sm:$0xff] %v6944_v29  ;;  %v6952_v35 = vpop.xlane.xlu1 %1401  ;;  %v1594_v29 = vadd.f32 %v6862_v59, %v11280_v36 }
 0x29f   :  { %11277 = vst [vmem:[#allocation201_spill] sm:$0xff] %v6946_v17  ;;  %v1601_v17 = vadd.f32 %v6854_v23, %v11185_v55 }
 0x2a0   :  { %11278 = vst [vmem:[#allocation202_spill] sm:$0xff] %v6952_v35  ;;  %v1670_v10 = vmin.f32 %v1593_v7, %v1594_v29  ;;  %v11285_v35 = vld [vmem:[#allocation24_spill] sm:$0xff] }
 0x2a1   :  { %v1682_v14 = vmin.f32 %v1601_v17, %v1602_v5  ;;  %v1603_v5 = vadd.f32 %v6854_v23, %v11237_v37  ;;  %v1604_v17 = vadd.f32 %v6862_v59, %v11238_v44 }
 0x2a2   :  { %1662 = vmin.xlane.f32.xlu2 %v1661_v52  ;;  %1674 = vmin.xlane.f32.xlu0 %v1673_v57  ;;  %v1676_v52 = vmin.f32 %v1597_v15, %v1598_v13  ;;  %v11284_v57 = vld [vmem:[#allocation57_spill] sm:$0xff] }
 0x2a3   :  { %1668 = vmin.xlane.f32.xlu1 %v1667_v43  ;;  %v1599_v43 = vadd.f32 %v6854_v23, %v11284_v57 }
 0x2a5   :  { %v6962_v28 = vpop.xlane.xlu2 %1470  ;;  %v6964_v21 = vpop.xlane.xlu0 %1482 }
 0x2a6   :  { %11281 = vst [vmem:[#allocation203_spill] sm:$0xff] %v6962_v28  ;;  %v6970_v2 = vpop.xlane.xlu1 %1476  ;;  %v1607_v28 = vadd.f32 %v6854_v23, %v11190_v63 }
 0x2a7   :  { %11282 = vst [vmem:[#allocation204_spill] sm:$0xff] %v6964_v21  ;;  %v1600_v21 = vadd.f32 %v6862_v59, %v11285_v35 }
 0x2a8   :  { %11283 = vst [vmem:[#allocation205_spill] sm:$0xff] %v6970_v2  ;;  %v1691_v13 = vmin.f32 %v1607_v28, %v1608_v12  ;;  %v1613_v2 = vadd.f32 %v6854_v23, %v11195_v25  ;;  %v1609_v12 = vadd.f32 %v6854_v23, %v11242_v16  ;;  %v11293_v28 = vld [vmem:[#allocation58_spill] sm:$0xff]  ;;  %v1620_v25 = vadd.f32 %v6862_v59, %v11252_v41 }
 0x2a9   :  { %v1679_v15 = vmin.f32 %v1599_v43, %v1600_v21  ;;  %v1610_v43 = vadd.f32 %v6862_v59, %v11293_v28  ;;  %v1625_v41 = vadd.f32 %v6854_v23, %v11208_v54 }
 0x2aa   :  { %1671 = vmin.xlane.f32.xlu2 %v1670_v10  ;;  %1683 = vmin.xlane.f32.xlu0 %v1682_v14  ;;  %v1685_v10 = vmin.f32 %v1603_v5, %v1604_v17  ;;  %v11289_v14 = vld [vmem:[#allocation11_spill] sm:$0xff] }
 0x2ab   :  { %1677 = vmin.xlane.f32.xlu1 %v1676_v52  ;;  %v1605_v52 = vadd.f32 %v6854_v23, %v11289_v14 }
 0x2ad   :  { %v6980_v55 = vpop.xlane.xlu2 %1479  ;;  %v6982_v29 = vpop.xlane.xlu0 %1491 }
 0x2ae   :  { %11286 = vst [vmem:[#allocation206_spill] sm:$0xff] %v6980_v55  ;;  %v6988_v7 = vpop.xlane.xlu1 %1485  ;;  %v11290_v55 = vld [vmem:[#allocation59_spill] sm:$0xff] }
 0x2af   :  { %11287 = vst [vmem:[#allocation207_spill] sm:$0xff] %v6982_v29  ;;  %v1606_v29 = vadd.f32 %v6862_v59, %v11290_v55 }
 0x2b0   :  { %11288 = vst [vmem:[#allocation208_spill] sm:$0xff] %v6988_v7 }
 0x2b1   :  { %v1688_v17 = vmin.f32 %v1605_v52, %v1606_v29 }
 0x2b2   :  { %1680 = vmin.xlane.f32.xlu2 %v1679_v15  ;;  %1692 = vmin.xlane.f32.xlu0 %v1691_v13  ;;  %v1700_v15 = vmin.f32 %v1613_v2, %v1614_v42  ;;  %v1694_v13 = vmin.f32 %v1609_v12, %v1610_v43  ;;  %v1615_v42 = vadd.f32 %v6854_v23, %v11248_v32  ;;  %v11299_v2 = vld [vmem:[#allocation61_spill] sm:$0xff] }
 0x2b3   :  { %1686 = vmin.xlane.f32.xlu1 %v1685_v10  ;;  %v11295_v10 = vld [vmem:[#allocation17_spill] sm:$0xff]  ;;  %v1616_v52 = vadd.f32 %v6862_v59, %v11299_v2 }
 0x2b4   :  { %v1611_v7 = vadd.f32 %v6854_v23, %v11295_v10 }
 0x2b5   :  { %v6998_v63 = vpop.xlane.xlu2 %1488  ;;  %v7000_v21 = vpop.xlane.xlu0 %1500 }
 0x2b6   :  { %11291 = vst [vmem:[#allocation209_spill] sm:$0xff] %v6998_v63  ;;  %v7006_v5 = vpop.xlane.xlu1 %1494  ;;  %v11296_v63 = vld [vmem:[#allocation62_spill] sm:$0xff] }
 0x2b7   :  { %11292 = vst [vmem:[#allocation210_spill] sm:$0xff] %v7000_v21  ;;  %v1612_v21 = vadd.f32 %v6862_v59, %v11296_v63 }
 0x2b8   :  { %11294 = vst [vmem:[#allocation211_spill] sm:$0xff] %v7006_v5 }
 0x2b9   :  { %v1697_v43 = vmin.f32 %v1611_v7, %v1612_v21 }
 0x2ba   :  { %1689 = vmin.xlane.f32.xlu2 %v1688_v17  ;;  %1701 = vmin.xlane.f32.xlu0 %v1700_v15  ;;  %v1709_v17 = vmin.f32 %v1619_v38, %v1620_v25  ;;  %v1703_v15 = vmin.f32 %v1615_v42, %v1616_v52  ;;  %v1621_v25 = vadd.f32 %v6854_v23, %v11254_v39 }
 0x2bb   :  { %1695 = vmin.xlane.f32.xlu1 %v1694_v13  ;;  %v11301_v13 = vld [vmem:[#allocation65_spill] sm:$0xff]  ;;  %v1622_v38 = vadd.f32 %v6862_v59, %v11255_v27  ;;  %v1718_v52 = vmin.f32 %v1625_v41, %v1626_v4  ;;  %v11308_v4 = vld [vmem:[#allocation8_spill] sm:$0xff] }
 0x2bc   :  { %v1617_v5 = vadd.f32 %v6854_v23, %v11301_v13  ;;  %v1623_v41 = vadd.f32 %v6854_v23, %v11308_v4 }
 0x2bd   :  { %v7016_v55 = vpop.xlane.xlu2 %1497  ;;  %v7018_v29 = vpop.xlane.xlu0 %1509 }
 0x2be   :  { %11297 = vst [vmem:[#allocation212_spill] sm:$0xff] %v7016_v55  ;;  %v7024_v12 = vpop.xlane.xlu1 %1503  ;;  %v11302_v55 = vld [vmem:[#allocation66_spill] sm:$0xff] }
 0x2bf   :  { %11298 = vst [vmem:[#allocation213_spill] sm:$0xff] %v7018_v29  ;;  %v1618_v29 = vadd.f32 %v6862_v59, %v11302_v55 }
 0x2c0   :  { %11300 = vst [vmem:[#allocation214_spill] sm:$0xff] %v7024_v12 }
 0x2c1   :  { %v1706_v42 = vmin.f32 %v1617_v5, %v1618_v29  ;;  %v11309_v5 = vld [vmem:[#allocation68_spill] sm:$0xff] }
 0x2c2   :  { %1698 = vmin.xlane.f32.xlu2 %v1697_v43  ;;  %1710 = vmin.xlane.f32.xlu0 %v1709_v17  ;;  %v7047_v43 = vld [vmem:[%s10632_s5] sm:$0xff]  ;;  %v1624_v29 = vadd.f32 %v6862_v59, %v11309_v5 }
 0x2c3   :  { %1704 = vmin.xlane.f32.xlu1 %v1703_v15  ;;  %11306 = vst [vmem:[#allocation218_spill] sm:$0xff] %v7047_v43  ;;  %v7050_v17 = vperm.slane %v7047_v43, 3  ;;  %v7055_v15 = vld [vmem:[%s10632_s5 + $0x8] sm:$0xff] }
 0x2c4   :  { %11307 = vst [vmem:[#allocation219_spill] sm:$0xff] %v7055_v15 }
 0x2c5   :  { %v7034_v63 = vpop.xlane.xlu2 %1506  ;;  %v7036_v7 = vpop.xlane.xlu0 %1518 }
 0x2c6   :  { %11303 = vst [vmem:[#allocation215_spill] sm:$0xff] %v7034_v63  ;;  %v7042_v21 = vpop.xlane.xlu1 %1512  ;;  %v1712_v63 = vmin.f32 %v1621_v25, %v1622_v38  ;;  %v1627_v25 = vadd.f32 %v6854_v23, %v11261_v61 }
 0x2c7   :  { %11304 = vst [vmem:[#allocation216_spill] sm:$0xff] %v7036_v7  ;;  %v7058_v7 = vperm.slane %v7055_v15, 3 }
 0x2c8   :  { %11305 = vst [vmem:[#allocation217_spill] sm:$0xff] %v7042_v21  ;;  %v1729_v21 = vadd.f32 %v7050_v17, %v11065_v19 }
 0x2c9   :  { %v1730_v12 = vadd.f32 %v7058_v7, %v11213_v31  ;;  %v1629_v31 = vadd.f32 %v6854_v23, %v6072_v53  ;;  %v1736_v19 = vadd.f32 %v7058_v7, %v5682_v6 }
 0x2ca   :  { %1707 = vmin.xlane.f32.xlu2 %v1706_v42  ;;  %1719 = vmin.xlane.f32.xlu0 %v1718_v52  ;;  %v1715_v42 = vmin.f32 %v1623_v41, %v1624_v29 }
 0x2cb   :  { %1713 = vmin.xlane.f32.xlu1 %v1712_v63  ;;  %v1628_v63 = vadd.f32 %v6862_v59, %v11262_v51  ;;  %v1793_v52 = vmin.f32 %v1729_v21, %v1730_v12  ;;  %v1731_v12 = vadd.f32 %v7050_v17, %v11063_v49 }
 0x2cd   :  { %v7068_v43 = vpop.xlane.xlu2 %1515  ;;  %v7070_v15 = vpop.xlane.xlu0 %1527  ;;  %v1721_v40 = vmin.f32 %v1627_v25, %v1628_v63  ;;  %v11316_v25 = vld [vmem:[#allocation25_spill] sm:$0xff] }
 0x2ce   :  { %11310 = vst [vmem:[#allocation220_spill] sm:$0xff] %v7068_v43  ;;  %v7076_v38 = vpop.xlane.xlu1 %1521  ;;  %v1735_v43 = vadd.f32 %v7050_v17, %v5679_v46  ;;  %v1733_v63 = vadd.f32 %v7050_v17, %v11316_v25 }
 0x2cf   :  { %11311 = vst [vmem:[#allocation221_spill] sm:$0xff] %v7070_v15  ;;  %v1630_v15 = vadd.f32 %v6862_v59, %v6074_v24 }
 0x2d0   :  { %11312 = vst [vmem:[#allocation222_spill] sm:$0xff] %v7076_v38  ;;  %v1802_v59 = vmin.f32 %v1735_v43, %v1736_v19  ;;  %v1737_v19 = vadd.f32 %v7050_v17, %v5703_v33  ;;  %v1738_v43 = vadd.f32 %v7058_v7, %v5706_v3 }
 0x2d1   :  { %v1724_v21 = vmin.f32 %v1629_v31, %v1630_v15 }
 0x2d2   :  { %1716 = vmin.xlane.f32.xlu2 %v1715_v42  ;;  %1794 = vmin.xlane.f32.xlu0 %v1793_v52  ;;  %v11317_v42 = vld [vmem:[#allocation26_spill] sm:$0xff] }
 0x2d3   :  { %1722 = vmin.xlane.f32.xlu1 %v1721_v40  ;;  %v1732_v40 = vadd.f32 %v7058_v7, %v11064_v50  ;;  %v1734_v52 = vadd.f32 %v7058_v7, %v11317_v42 }
 0x2d5   :  { %v7086_v54 = vpop.xlane.xlu2 %1524  ;;  %v7088_v41 = vpop.xlane.xlu0 %1536  ;;  %v1796_v29 = vmin.f32 %v1731_v12, %v1732_v40  ;;  %v1799_v12 = vmin.f32 %v1733_v63, %v1734_v52 }
 0x2d6   :  { %11313 = vst [vmem:[#allocation223_spill] sm:$0xff] %v7086_v54  ;;  %v7094_v23 = vpop.xlane.xlu1 %1530  ;;  %v1742_v54 = vadd.f32 %v7058_v7, %v11069_v60 }
 0x2d7   :  { %11314 = vst [vmem:[#allocation224_spill] sm:$0xff] %v7088_v41  ;;  %v1741_v41 = vadd.f32 %v7050_v17, %v5691_v22 }
 0x2d8   :  { %11315 = vst [vmem:[#allocation225_spill] sm:$0xff] %v7094_v23  ;;  %v1748_v23 = vadd.f32 %v7058_v7, %v11071_v20 }
 0x2d9   :  { %v1811_v40 = vmin.f32 %v1741_v41, %v1742_v54  ;;  %v1743_v54 = vadd.f32 %v7050_v17, %v5749_v34  ;;  %v1744_v41 = vadd.f32 %v7058_v7, %v5752_v18 }
 0x2da   :  { %1725 = vmin.xlane.f32.xlu2 %v1724_v21  ;;  %1803 = vmin.xlane.f32.xlu0 %v1802_v59  ;;  %v1805_v21 = vmin.f32 %v1737_v19, %v1738_v43  ;;  %v1739_v59 = vadd.f32 %v7050_v17, %v5733_v58 }
 0x2db   :  { %1797 = vmin.xlane.f32.xlu1 %v1796_v29  ;;  %v1740_v29 = vadd.f32 %v7058_v7, %v5736_v62 }
 0x2dd   :  { %v7104_v38 = vpop.xlane.xlu2 %1533  ;;  %v7106_v31 = vpop.xlane.xlu0 %1545  ;;  %v1808_v19 = vmin.f32 %v1739_v59, %v1740_v29 }
 0x2de   :  { %11318 = vst [vmem:[#allocation226_spill] sm:$0xff] %v7104_v38  ;;  %v7112_v15 = vpop.xlane.xlu1 %1539 }
 0x2df   :  { %11319 = vst [vmem:[#allocation227_spill] sm:$0xff] %v7106_v31  ;;  %v1747_v31 = vadd.f32 %v7050_v17, %v11070_v47 }
 0x2e0   :  { %11320 = vst [vmem:[#allocation228_spill] sm:$0xff] %v7112_v15 }
 0x2e1   :  { %v1820_v43 = vmin.f32 %v1747_v31, %v1748_v23  ;;  %v1749_v23 = vadd.f32 %v7050_v17, %v5797_v11  ;;  %v1750_v31 = vadd.f32 %v7058_v7, %v11275_v48 }
 0x2e2   :  { %1800 = vmin.xlane.f32.xlu2 %v1799_v12  ;;  %1812 = vmin.xlane.f32.xlu0 %v1811_v40  ;;  %v1814_v12 = vmin.f32 %v1743_v54, %v1744_v41  ;;  %v1745_v40 = vadd.f32 %v7050_v17, %v5777_v26 }
 0x2e3   :  { %1806 = vmin.xlane.f32.xlu1 %v1805_v21  ;;  %v1746_v21 = vadd.f32 %v7058_v7, %v5782_v9 }
 0x2e5   :  { %v7122_v38 = vpop.xlane.xlu2 %1542  ;;  %v7124_v63 = vpop.xlane.xlu0 %1554  ;;  %v1817_v54 = vmin.f32 %v1745_v40, %v1746_v21 }
 0x2e6   :  { %11321 = vst [vmem:[#allocation229_spill] sm:$0xff] %v7122_v38  ;;  %v7130_v52 = vpop.xlane.xlu1 %1548  ;;  %v1754_v38 = vadd.f32 %v7058_v7, %v11228_v56 }
 0x2e7   :  { %11322 = vst [vmem:[#allocation230_spill] sm:$0xff] %v7124_v63  ;;  %v1753_v63 = vadd.f32 %v7050_v17, %v11227_v30 }
 0x2e8   :  { %11323 = vst [vmem:[#allocation231_spill] sm:$0xff] %v7130_v52  ;;  %v1760_v52 = vadd.f32 %v7058_v7, %v11233_v1  ;;  %v1766_v1 = vadd.f32 %v7058_v7, %v11238_v44  ;;  %v1772_v44 = vadd.f32 %v7058_v7, %v11293_v28  ;;  %v1777_v28 = vadd.f32 %v7050_v17, %v11248_v32 }
 0x2e9   :  { %v1829_v41 = vmin.f32 %v1753_v63, %v1754_v38  ;;  %v1755_v38 = vadd.f32 %v7050_v17, %v11279_v45  ;;  %v1756_v63 = vadd.f32 %v7058_v7, %v11280_v36  ;;  %v1784_v32 = vadd.f32 %v7058_v7, %v11255_v27 }
 0x2ea   :  { %1809 = vmin.xlane.f32.xlu2 %v1808_v19  ;;  %1821 = vmin.xlane.f32.xlu0 %v1820_v43  ;;  %v1823_v19 = vmin.f32 %v1749_v23, %v1750_v31  ;;  %v1751_v43 = vadd.f32 %v7050_v17, %v11173_v8  ;;  %v1790_v27 = vadd.f32 %v7058_v7, %v11262_v51 }
 0x2eb   :  { %1815 = vmin.xlane.f32.xlu1 %v1814_v12  ;;  %v11327_v12 = vld [vmem:[#allocation50_spill] sm:$0xff] }
 0x2ed   :  { %v7140_v15 = vpop.xlane.xlu2 %1551  ;;  %v7142_v59 = vpop.xlane.xlu0 %1563 }
 0x2ee   :  { %11324 = vst [vmem:[#allocation232_spill] sm:$0xff] %v7140_v15  ;;  %v7148_v29 = vpop.xlane.xlu1 %1557  ;;  %v1759_v15 = vadd.f32 %v7050_v17, %v11232_v0 }
 0x2ef   :  { %11325 = vst [vmem:[#allocation233_spill] sm:$0xff] %v7142_v59  ;;  %v1752_v59 = vadd.f32 %v7058_v7, %v11327_v12 }
 0x2f0   :  { %11326 = vst [vmem:[#allocation234_spill] sm:$0xff] %v7148_v29  ;;  %v1838_v31 = vmin.f32 %v1759_v15, %v1760_v52  ;;  %v1761_v15 = vadd.f32 %v7050_v17, %v11284_v57  ;;  %v1762_v52 = vadd.f32 %v7058_v7, %v11285_v35 }
 0x2f1   :  { %v1826_v23 = vmin.f32 %v1751_v43, %v1752_v59 }
 0x2f2   :  { %1818 = vmin.xlane.f32.xlu2 %v1817_v54  ;;  %1830 = vmin.xlane.f32.xlu0 %v1829_v41  ;;  %v1832_v54 = vmin.f32 %v1755_v38, %v1756_v63  ;;  %v11331_v41 = vld [vmem:[#allocation55_spill] sm:$0xff] }
 0x2f3   :  { %1824 = vmin.xlane.f32.xlu1 %v1823_v19  ;;  %v1757_v19 = vadd.f32 %v7050_v17, %v11331_v41 }
 0x2f5   :  { %v7158_v56 = vpop.xlane.xlu2 %1560  ;;  %v7160_v40 = vpop.xlane.xlu0 %1638 }
 0x2f6   :  { %11328 = vst [vmem:[#allocation235_spill] sm:$0xff] %v7158_v56  ;;  %v7166_v21 = vpop.xlane.xlu1 %1632  ;;  %v11332_v56 = vld [vmem:[#allocation56_spill] sm:$0xff] }
 0x2f7   :  { %11329 = vst [vmem:[#allocation236_spill] sm:$0xff] %v7160_v40  ;;  %v1758_v29 = vadd.f32 %v7058_v7, %v11332_v56  ;;  %v1765_v40 = vadd.f32 %v7050_v17, %v11237_v37 }
 0x2f8   :  { %11330 = vst [vmem:[#allocation237_spill] sm:$0xff] %v7166_v21  ;;  %v11337_v21 = vld [vmem:[#allocation15_spill] sm:$0xff] }
 0x2f9   :  { %v1835_v38 = vmin.f32 %v1757_v19, %v1758_v29  ;;  %v1847_v63 = vmin.f32 %v1765_v40, %v1766_v1  ;;  %v1767_v1 = vadd.f32 %v7050_v17, %v11289_v14  ;;  %v11340_v40 = vld [vmem:[#allocation59_spill] sm:$0xff] }
 0x2fa   :  { %1827 = vmin.xlane.f32.xlu2 %v1826_v23  ;;  %1839 = vmin.xlane.f32.xlu0 %v1838_v31  ;;  %v1841_v23 = vmin.f32 %v1761_v15, %v1762_v52  ;;  %v11336_v31 = vld [vmem:[#allocation12_spill] sm:$0xff]  ;;  %v1768_v19 = vadd.f32 %v7058_v7, %v11340_v40 }
 0x2fb   :  { %1833 = vmin.xlane.f32.xlu1 %v1832_v54  ;;  %v1763_v54 = vadd.f32 %v7050_v17, %v11336_v31 }
 0x2fd   :  { %v7176_v0 = vpop.xlane.xlu2 %1635  ;;  %v7178_v59 = vpop.xlane.xlu0 %1647 }
 0x2fe   :  { %11333 = vst [vmem:[#allocation238_spill] sm:$0xff] %v7176_v0  ;;  %v7184_v43 = vpop.xlane.xlu1 %1641  ;;  %v1771_v0 = vadd.f32 %v7050_v17, %v11242_v16  ;;  %v1778_v16 = vadd.f32 %v7058_v7, %v11299_v2  ;;  %v1783_v2 = vadd.f32 %v7050_v17, %v11254_v39 }
 0x2ff   :  { %11334 = vst [vmem:[#allocation239_spill] sm:$0xff] %v7178_v59  ;;  %v1764_v59 = vadd.f32 %v7058_v7, %v11337_v21 }
 0x300   :  { %11335 = vst [vmem:[#allocation240_spill] sm:$0xff] %v7184_v43 }
 0x301   :  { %v1844_v52 = vmin.f32 %v1763_v54, %v1764_v59 }
 0x302   :  { %1836 = vmin.xlane.f32.xlu2 %v1835_v38  ;;  %1848 = vmin.xlane.f32.xlu0 %v1847_v63  ;;  %v1856_v38 = vmin.f32 %v1771_v0, %v1772_v44  ;;  %v1850_v63 = vmin.f32 %v1767_v1, %v1768_v19  ;;  %v1773_v44 = vadd.f32 %v7050_v17, %v11295_v10  ;;  %v11346_v0 = vld [vmem:[#allocation62_spill] sm:$0xff] }
 0x303   :  { %1842 = vmin.xlane.f32.xlu1 %v1841_v23  ;;  %v11342_v23 = vld [vmem:[#allocation18_spill] sm:$0xff]  ;;  %v1774_v54 = vadd.f32 %v7058_v7, %v11346_v0 }
 0x304   :  { %v1769_v43 = vadd.f32 %v7050_v17, %v11342_v23 }
 0x305   :  { %v7194_v37 = vpop.xlane.xlu2 %1644  ;;  %v7196_v29 = vpop.xlane.xlu0 %1656 }
 0x306   :  { %11338 = vst [vmem:[#allocation241_spill] sm:$0xff] %v7194_v37  ;;  %v7202_v15 = vpop.xlane.xlu1 %1650  ;;  %v11343_v37 = vld [vmem:[#allocation19_spill] sm:$0xff] }
 0x307   :  { %11339 = vst [vmem:[#allocation242_spill] sm:$0xff] %v7196_v29  ;;  %v1770_v29 = vadd.f32 %v7058_v7, %v11343_v37 }
 0x308   :  { %11341 = vst [vmem:[#allocation243_spill] sm:$0xff] %v7202_v15 }
 0x309   :  { %v1853_v19 = vmin.f32 %v1769_v43, %v1770_v29 }
 0x30a   :  { %1845 = vmin.xlane.f32.xlu2 %v1844_v52  ;;  %1857 = vmin.xlane.f32.xlu0 %v1856_v38  ;;  %v1865_v52 = vmin.f32 %v1777_v28, %v1778_v16  ;;  %v1859_v38 = vmin.f32 %v1773_v44, %v1774_v54  ;;  %v1779_v16 = vadd.f32 %v7050_v17, %v11301_v13 }
 0x30b   :  { %1851 = vmin.xlane.f32.xlu1 %v1850_v63  ;;  %v11348_v63 = vld [vmem:[#allocation20_spill] sm:$0xff]  ;;  %v1780_v28 = vadd.f32 %v7058_v7, %v11302_v55  ;;  %v1874_v54 = vmin.f32 %v1783_v2, %v1784_v32  ;;  %v1785_v32 = vadd.f32 %v7050_v17, %v11308_v4  ;;  %v1786_v2 = vadd.f32 %v7058_v7, %v11309_v5 }
 0x30c   :  { %v1775_v15 = vadd.f32 %v7050_v17, %v11348_v63 }
 0x30d   :  { %v7212_v21 = vpop.xlane.xlu2 %1653  ;;  %v7214_v59 = vpop.xlane.xlu0 %1665 }
 0x30e   :  { %11344 = vst [vmem:[#allocation244_spill] sm:$0xff] %v7212_v21  ;;  %v7220_v1 = vpop.xlane.xlu1 %1659  ;;  %v11349_v21 = vld [vmem:[#allocation21_spill] sm:$0xff] }
 0x30f   :  { %11345 = vst [vmem:[#allocation245_spill] sm:$0xff] %v7214_v59  ;;  %v1776_v59 = vadd.f32 %v7058_v7, %v11349_v21 }
 0x310   :  { %11347 = vst [vmem:[#allocation246_spill] sm:$0xff] %v7220_v1  ;;  %v11354_v1 = vld [vmem:[#allocation67_spill] sm:$0xff] }
 0x311   :  { %v1862_v44 = vmin.f32 %v1775_v15, %v1776_v59 }
 0x312   :  { %1854 = vmin.xlane.f32.xlu2 %v1853_v19  ;;  %1866 = vmin.xlane.f32.xlu0 %v1865_v52  ;;  %v1868_v19 = vmin.f32 %v1779_v16, %v1780_v28  ;;  %v11353_v52 = vld [vmem:[#allocation23_spill] sm:$0xff] }
 0x313   :  { %1860 = vmin.xlane.f32.xlu1 %v1859_v38  ;;  %v1781_v38 = vadd.f32 %v7050_v17, %v11353_v52 }
 0x315   :  { %v7230_v37 = vpop.xlane.xlu2 %1662  ;;  %v7232_v43 = vpop.xlane.xlu0 %1674 }
 0x316   :  { %11350 = vst [vmem:[#allocation247_spill] sm:$0xff] %v7230_v37  ;;  %v7238_v29 = vpop.xlane.xlu1 %1668  ;;  %v1789_v37 = vadd.f32 %v7050_v17, %v11261_v61  ;;  %v11361_v61 = vld [vmem:[#allocation71_spill] sm:$0xff] }
 0x317   :  { %11351 = vst [vmem:[#allocation248_spill] sm:$0xff] %v7232_v43  ;;  %v1782_v43 = vadd.f32 %v7058_v7, %v11354_v1  ;;  %v1788_v1 = vadd.f32 %v7058_v7, %v11361_v61 }
 0x318   :  { %11352 = vst [vmem:[#allocation249_spill] sm:$0xff] %v7238_v29  ;;  %v1883_v28 = vmin.f32 %v1789_v37, %v1790_v27  ;;  %v11359_v29 = vld [vmem:[#allocation187_spill] sm:$0xff] }
 0x319   :  { %v1871_v16 = vmin.f32 %v1781_v38, %v1782_v43 }
 0x31a   :  { %1863 = vmin.xlane.f32.xlu2 %v1862_v44  ;;  %1875 = vmin.xlane.f32.xlu0 %v1874_v54  ;;  %v1877_v44 = vmin.f32 %v1785_v32, %v1786_v2  ;;  %v11358_v54 = vld [vmem:[#allocation186_spill] sm:$0xff]  ;;  %v1792_v32 = vadd.f32 %v7058_v7, %v6074_v24 }
 0x31b   :  { %1869 = vmin.xlane.f32.xlu1 %v1868_v19  ;;  %v7259_v19 = vperm.slane %v11358_v54, 3  ;;  %v11365_v54 = vld [vmem:[#allocation13_spill] sm:$0xff] }
 0x31d   :  { %v7248_v39 = vpop.xlane.xlu2 %1671  ;;  %v7250_v15 = vpop.xlane.xlu0 %1683  ;;  %v1893_v43 = vadd.f32 %v7259_v19, %v11063_v49 }
 0x31e   :  { %11355 = vst [vmem:[#allocation250_spill] sm:$0xff] %v7248_v39  ;;  %v7256_v59 = vpop.xlane.xlu1 %1677  ;;  %v7262_v39 = vperm.slane %v11359_v29, 3  ;;  %v1791_v29 = vadd.f32 %v7050_v17, %v6072_v53 }
 0x31f   :  { %11356 = vst [vmem:[#allocation251_spill] sm:$0xff] %v7250_v15  ;;  %v11360_v15 = vld [vmem:[#allocation70_spill] sm:$0xff] }
 0x320   :  { %11357 = vst [vmem:[#allocation252_spill] sm:$0xff] %v7256_v59  ;;  %v1787_v51 = vadd.f32 %v7050_v17, %v11360_v15  ;;  %v1894_v27 = vadd.f32 %v7262_v39, %v11064_v50  ;;  %v1891_v59 = vadd.f32 %v7259_v19, %v11365_v54  ;;  %v1899_v17 = vadd.f32 %v7259_v19, %v5703_v33 }
 0x321   :  { %v1900_v7 = vadd.f32 %v7262_v39, %v5706_v3 }
 0x322   :  { %1872 = vmin.xlane.f32.xlu2 %v1871_v16  ;;  %1884 = vmin.xlane.f32.xlu0 %v1883_v28  ;;  %v1880_v16 = vmin.f32 %v1787_v51, %v1788_v1  ;;  %v1958_v28 = vmin.f32 %v1893_v43, %v1894_v27  ;;  %v1895_v1 = vadd.f32 %v7259_v19, %v11316_v25 }
 0x323   :  { %1878 = vmin.xlane.f32.xlu1 %v1877_v44  ;;  %v1886_v44 = vmin.f32 %v1791_v29, %v1792_v32  ;;  %v1896_v43 = vadd.f32 %v7262_v39, %v11317_v42  ;;  %v1967_v32 = vmin.f32 %v1899_v17, %v1900_v7  ;;  %v1902_v17 = vadd.f32 %v7262_v39, %v5736_v62 }
 0x325   :  { %v7272_v37 = vpop.xlane.xlu2 %1680  ;;  %v7274_v38 = vpop.xlane.xlu0 %1692 }
 0x326   :  { %11362 = vst [vmem:[#allocation186_spill] sm:$0xff] %v7272_v37  ;;  %v7280_v2 = vpop.xlane.xlu1 %1686  ;;  %v11366_v37 = vld [vmem:[#allocation14_spill] sm:$0xff] }
 0x327   :  { %11363 = vst [vmem:[#allocation187_spill] sm:$0xff] %v7274_v38  ;;  %v1892_v38 = vadd.f32 %v7262_v39, %v11366_v37 }
 0x328   :  { %11364 = vst [vmem:[#allocation253_spill] sm:$0xff] %v7280_v2 }
 0x329   :  { %v1955_v29 = vmin.f32 %v1891_v59, %v1892_v38  ;;  %v1901_v38 = vadd.f32 %v7259_v19, %v5733_v58 }
 0x32a   :  { %1881 = vmin.xlane.f32.xlu2 %v1880_v16  ;;  %1959 = vmin.xlane.f32.xlu0 %v1958_v28  ;;  %v1961_v16 = vmin.f32 %v1895_v1, %v1896_v43  ;;  %v1897_v28 = vadd.f32 %v7259_v19, %v5679_v46 }
 0x32b   :  { %1887 = vmin.xlane.f32.xlu1 %v1886_v44  ;;  %v1898_v44 = vadd.f32 %v7262_v39, %v5682_v6 }
 0x32d   :  { %v7290_v50 = vpop.xlane.xlu2 %1689  ;;  %v7292_v51 = vpop.xlane.xlu0 %1701  ;;  %v1964_v1 = vmin.f32 %v1897_v28, %v1898_v44 }
 0x32e   :  { %11367 = vst [vmem:[#allocation254_spill] sm:$0xff] %v7290_v50  ;;  %v7298_v27 = vpop.xlane.xlu1 %1695  ;;  %v1906_v50 = vadd.f32 %v7262_v39, %v5752_v18 }
 0x32f   :  { %11368 = vst [vmem:[#allocation255_spill] sm:$0xff] %v7292_v51  ;;  %v1905_v51 = vadd.f32 %v7259_v19, %v5749_v34 }
 0x330   :  { %11369 = vst [vmem:[#allocation256_spill] sm:$0xff] %v7298_v27  ;;  %v1912_v27 = vadd.f32 %v7262_v39, %v11275_v48 }
 0x331   :  { %v1976_v43 = vmin.f32 %v1905_v51, %v1906_v50  ;;  %v1907_v50 = vadd.f32 %v7259_v19, %v5777_v26  ;;  %v1908_v51 = vadd.f32 %v7262_v39, %v5782_v9 }
 0x332   :  { %1956 = vmin.xlane.f32.xlu2 %v1955_v29  ;;  %1968 = vmin.xlane.f32.xlu0 %v1967_v32  ;;  %v1970_v29 = vmin.f32 %v1901_v38, %v1902_v17  ;;  %v1903_v32 = vadd.f32 %v7259_v19, %v5691_v22 }
 0x333   :  { %1962 = vmin.xlane.f32.xlu1 %v1961_v16  ;;  %v1904_v16 = vadd.f32 %v7262_v39, %v11069_v60 }
 0x335   :  { %v7308_v2 = vpop.xlane.xlu2 %1698  ;;  %v7310_v59 = vpop.xlane.xlu0 %1710  ;;  %v1973_v38 = vmin.f32 %v1903_v32, %v1904_v16 }
 0x336   :  { %11370 = vst [vmem:[#allocation257_spill] sm:$0xff] %v7308_v2  ;;  %v7316_v7 = vpop.xlane.xlu1 %1704 }
 0x337   :  { %11371 = vst [vmem:[#allocation258_spill] sm:$0xff] %v7310_v59  ;;  %v1911_v59 = vadd.f32 %v7259_v19, %v5797_v11 }
 0x338   :  { %11372 = vst [vmem:[#allocation259_spill] sm:$0xff] %v7316_v7  ;;  %v1918_v7 = vadd.f32 %v7262_v39, %v11280_v36 }
 0x339   :  { %v1985_v17 = vmin.f32 %v1911_v59, %v1912_v27  ;;  %v1913_v27 = vadd.f32 %v7259_v19, %v11173_v8  ;;  %v1914_v59 = vadd.f32 %v7262_v39, %v11327_v12 }
 0x33a   :  { %1965 = vmin.xlane.f32.xlu2 %v1964_v1  ;;  %1977 = vmin.xlane.f32.xlu0 %v1976_v43  ;;  %v1979_v1 = vmin.f32 %v1907_v50, %v1908_v51  ;;  %v1909_v43 = vadd.f32 %v7259_v19, %v11070_v47 }
 0x33b   :  { %1971 = vmin.xlane.f32.xlu1 %v1970_v29  ;;  %v1910_v29 = vadd.f32 %v7262_v39, %v11071_v20 }
 0x33d   :  { %v7326_v2 = vpop.xlane.xlu2 %1707  ;;  %v7328_v28 = vpop.xlane.xlu0 %1719  ;;  %v1982_v50 = vmin.f32 %v1909_v43, %v1910_v29 }
 0x33e   :  { %11373 = vst [vmem:[#allocation260_spill] sm:$0xff] %v7326_v2  ;;  %v7334_v44 = vpop.xlane.xlu1 %1713 }
 0x33f   :  { %11374 = vst [vmem:[#allocation261_spill] sm:$0xff] %v7328_v28  ;;  %v1917_v28 = vadd.f32 %v7259_v19, %v11279_v45 }
 0x340   :  { %11375 = vst [vmem:[#allocation262_spill] sm:$0xff] %v7334_v44 }
 0x341   :  { %v1994_v51 = vmin.f32 %v1917_v28, %v1918_v7  ;;  %v1919_v7 = vadd.f32 %v7259_v19, %v11331_v41  ;;  %v1920_v28 = vadd.f32 %v7262_v39, %v11332_v56 }
 0x342   :  { %1974 = vmin.xlane.f32.xlu2 %v1973_v38  ;;  %1986 = vmin.xlane.f32.xlu0 %v1985_v17  ;;  %v1988_v38 = vmin.f32 %v1913_v27, %v1914_v59  ;;  %v1915_v17 = vadd.f32 %v7259_v19, %v11227_v30 }
 0x343   :  { %1980 = vmin.xlane.f32.xlu1 %v1979_v1  ;;  %v11379_v1 = vld [vmem:[#allocation42_spill] sm:$0xff] }
 0x344   :  { %v1916_v44 = vadd.f32 %v7262_v39, %v11379_v1 }
 0x345   :  { %v7344_v2 = vpop.xlane.xlu2 %1716  ;;  %v7346_v32 = vpop.xlane.xlu0 %1794 }
 0x346   :  { %11376 = vst [vmem:[#allocation263_spill] sm:$0xff] %v7344_v2  ;;  %v7352_v16 = vpop.xlane.xlu1 %1722  ;;  %v1923_v2 = vadd.f32 %v7259_v19, %v11284_v57  ;;  %v1991_v27 = vmin.f32 %v1915_v17, %v1916_v44 }
 0x347   :  { %11377 = vst [vmem:[#allocation264_spill] sm:$0xff] %v7346_v32  ;;  %v1924_v32 = vadd.f32 %v7262_v39, %v11285_v35  ;;  %v1930_v35 = vadd.f32 %v7262_v39, %v11340_v40  ;;  %v1935_v40 = vadd.f32 %v7259_v19, %v11295_v10  ;;  %v1942_v10 = vadd.f32 %v7262_v39, %v11302_v55 }
 0x348   :  { %11378 = vst [vmem:[#allocation265_spill] sm:$0xff] %v7352_v16  ;;  %v11384_v16 = vld [vmem:[#allocation48_spill] sm:$0xff]  ;;  %v1948_v55 = vadd.f32 %v7262_v39, %v11309_v5  ;;  %v1953_v5 = vadd.f32 %v7259_v19, %v6072_v53  ;;  %v11414_v53 = vld [vmem:[#allocation10_spill] sm:$0xff] }
 0x349   :  { %v2003_v59 = vmin.f32 %v1923_v2, %v1924_v32  ;;  %v1925_v2 = vadd.f32 %v7259_v19, %v11336_v31  ;;  %v11387_v32 = vld [vmem:[#allocation15_spill] sm:$0xff] }
 0x34a   :  { %1983 = vmin.xlane.f32.xlu2 %v1982_v50  ;;  %1995 = vmin.xlane.f32.xlu0 %v1994_v51  ;;  %v1997_v50 = vmin.f32 %v1919_v7, %v1920_v28  ;;  %v11383_v51 = vld [vmem:[#allocation47_spill] sm:$0xff]  ;;  %v1926_v17 = vadd.f32 %v7262_v39, %v11387_v32 }
 0x34b   :  { %1989 = vmin.xlane.f32.xlu1 %v1988_v38  ;;  %v1921_v38 = vadd.f32 %v7259_v19, %v11383_v51 }
 0x34d   :  { %v7362_v36 = vpop.xlane.xlu2 %1725  ;;  %v7364_v43 = vpop.xlane.xlu0 %1803 }
 0x34e   :  { %11380 = vst [vmem:[#allocation266_spill] sm:$0xff] %v7362_v36  ;;  %v7370_v29 = vpop.xlane.xlu1 %1797  ;;  %v1922_v36 = vadd.f32 %v7262_v39, %v11384_v16 }
 0x34f   :  { %11381 = vst [vmem:[#allocation267_spill] sm:$0xff] %v7364_v43  ;;  %v1929_v43 = vadd.f32 %v7259_v19, %v11289_v14  ;;  %v1936_v14 = vadd.f32 %v7262_v39, %v11346_v0  ;;  %v1941_v0 = vadd.f32 %v7259_v19, %v11301_v13 }
 0x350   :  { %11382 = vst [vmem:[#allocation268_spill] sm:$0xff] %v7370_v29  ;;  %v2000_v28 = vmin.f32 %v1921_v38, %v1922_v36 }
 0x352   :  { %1992 = vmin.xlane.f32.xlu2 %v1991_v27  ;;  %2004 = vmin.xlane.f32.xlu0 %v2003_v59  ;;  %v2012_v27 = vmin.f32 %v1929_v43, %v1930_v35  ;;  %v2006_v59 = vmin.f32 %v1925_v2, %v1926_v17  ;;  %v1931_v35 = vadd.f32 %v7259_v19, %v11342_v23  ;;  %v11393_v43 = vld [vmem:[#allocation19_spill] sm:$0xff] }
 0x353   :  { %1998 = vmin.xlane.f32.xlu1 %v1997_v50  ;;  %v11389_v50 = vld [vmem:[#allocation53_spill] sm:$0xff]  ;;  %v1932_v38 = vadd.f32 %v7262_v39, %v11393_v43 }
 0x354   :  { %v1927_v29 = vadd.f32 %v7259_v19, %v11389_v50 }
 0x355   :  { %v7380_v57 = vpop.xlane.xlu2 %1800  ;;  %v7382_v44 = vpop.xlane.xlu0 %1812 }
 0x356   :  { %11385 = vst [vmem:[#allocation269_spill] sm:$0xff] %v7380_v57  ;;  %v7388_v7 = vpop.xlane.xlu1 %1806  ;;  %v11390_v57 = vld [vmem:[#allocation54_spill] sm:$0xff] }
 0x357   :  { %11386 = vst [vmem:[#allocation270_spill] sm:$0xff] %v7382_v44  ;;  %v1928_v44 = vadd.f32 %v7262_v39, %v11390_v57 }
 0x358   :  { %11388 = vst [vmem:[#allocation271_spill] sm:$0xff] %v7388_v7 }
 0x359   :  { %v2009_v17 = vmin.f32 %v1927_v29, %v1928_v44 }
 0x35a   :  { %2001 = vmin.xlane.f32.xlu2 %v2000_v28  ;;  %2013 = vmin.xlane.f32.xlu0 %v2012_v27  ;;  %v2021_v28 = vmin.f32 %v1935_v40, %v1936_v14  ;;  %v2015_v27 = vmin.f32 %v1931_v35, %v1932_v38  ;;  %v1937_v14 = vadd.f32 %v7259_v19, %v11348_v63 }
 0x35b   :  { %2007 = vmin.xlane.f32.xlu1 %v2006_v59  ;;  %v11395_v59 = vld [vmem:[#allocation9_spill] sm:$0xff]  ;;  %v1938_v40 = vadd.f32 %v7262_v39, %v11349_v21  ;;  %v2030_v38 = vmin.f32 %v1941_v0, %v1942_v10  ;;  %v1943_v10 = vadd.f32 %v7259_v19, %v11353_v52  ;;  %v11404_v0 = vld [vmem:[#allocation67_spill] sm:$0xff] }
 0x35c   :  { %v1933_v7 = vadd.f32 %v7259_v19, %v11395_v59 }
 0x35d   :  { %v7398_v16 = vpop.xlane.xlu2 %1809  ;;  %v7400_v36 = vpop.xlane.xlu0 %1821 }
 0x35e   :  { %11391 = vst [vmem:[#allocation272_spill] sm:$0xff] %v7398_v16  ;;  %v7406_v2 = vpop.xlane.xlu1 %1815  ;;  %v11396_v16 = vld [vmem:[#allocation58_spill] sm:$0xff] }
 0x35f   :  { %11392 = vst [vmem:[#allocation273_spill] sm:$0xff] %v7400_v36  ;;  %v1934_v36 = vadd.f32 %v7262_v39, %v11396_v16 }
 0x360   :  { %11394 = vst [vmem:[#allocation274_spill] sm:$0xff] %v7406_v2  ;;  %v1947_v2 = vadd.f32 %v7259_v19, %v11308_v4  ;;  %v1954_v4 = vadd.f32 %v7262_v39, %v6074_v24 }
 0x361   :  { %v2018_v35 = vmin.f32 %v1933_v7, %v1934_v36  ;;  %v1944_v36 = vadd.f32 %v7262_v39, %v11404_v0 }
 0x362   :  { %2010 = vmin.xlane.f32.xlu2 %v2009_v17  ;;  %2022 = vmin.xlane.f32.xlu0 %v2021_v28  ;;  %v2024_v17 = vmin.f32 %v1937_v14, %v1938_v40  ;;  %v11400_v28 = vld [vmem:[#allocation60_spill] sm:$0xff] }
 0x363   :  { %2016 = vmin.xlane.f32.xlu1 %v2015_v27  ;;  %v1939_v27 = vadd.f32 %v7259_v19, %v11400_v28 }
 0x365   :  { %v7416_v57 = vpop.xlane.xlu2 %1818  ;;  %v7418_v29 = vpop.xlane.xlu0 %1830 }
 0x366   :  { %11397 = vst [vmem:[#allocation275_spill] sm:$0xff] %v7416_v57  ;;  %v7424_v44 = vpop.xlane.xlu1 %1824  ;;  %v11401_v57 = vld [vmem:[#allocation61_spill] sm:$0xff] }
 0x367   :  { %11398 = vst [vmem:[#allocation276_spill] sm:$0xff] %v7418_v29  ;;  %v1940_v29 = vadd.f32 %v7262_v39, %v11401_v57 }
 0x368   :  { %11399 = vst [vmem:[#allocation277_spill] sm:$0xff] %v7424_v44 }
 0x369   :  { %v2027_v40 = vmin.f32 %v1939_v27, %v1940_v29 }
 0x36a   :  { %2019 = vmin.xlane.f32.xlu2 %v2018_v35  ;;  %2031 = vmin.xlane.f32.xlu0 %v2030_v38  ;;  %v2039_v35 = vmin.f32 %v1947_v2, %v1948_v55  ;;  %v2033_v38 = vmin.f32 %v1943_v10, %v1944_v36  ;;  %v1949_v55 = vadd.f32 %v7259_v19, %v11360_v15 }
 0x36b   :  { %2025 = vmin.xlane.f32.xlu1 %v2024_v17  ;;  %v11406_v17 = vld [vmem:[#allocation63_spill] sm:$0xff]  ;;  %v1950_v2 = vadd.f32 %v7262_v39, %v11361_v61  ;;  %v2048_v36 = vmin.f32 %v1953_v5, %v1954_v4 }
 0x36c   :  { %v1945_v44 = vadd.f32 %v7259_v19, %v11406_v17 }
 0x36d   :  { %v7434_v13 = vpop.xlane.xlu2 %1827  ;;  %v7436_v7 = vpop.xlane.xlu0 %1839 }
 0x36e   :  { %11402 = vst [vmem:[#allocation278_spill] sm:$0xff] %v7434_v13  ;;  %v7442_v14 = vpop.xlane.xlu1 %1833  ;;  %v11407_v13 = vld [vmem:[#allocation64_spill] sm:$0xff] }
 0x36f   :  { %11403 = vst [vmem:[#allocation279_spill] sm:$0xff] %v7436_v7  ;;  %v1946_v7 = vadd.f32 %v7262_v39, %v11407_v13  ;;  %v1952_v13 = vadd.f32 %v7262_v39, %v11414_v53 }
 0x370   :  { %11405 = vst [vmem:[#allocation280_spill] sm:$0xff] %v7442_v14  ;;  %v11412_v14 = vld [vmem:[#allocation219_spill] sm:$0xff] }
 0x371   :  { %v2036_v10 = vmin.f32 %v1945_v44, %v1946_v7  ;;  %v7466_v24 = vperm.slane %v11412_v14, 4 }
 0x372   :  { %2028 = vmin.xlane.f32.xlu2 %v2027_v40  ;;  %2040 = vmin.xlane.f32.xlu0 %v2039_v35  ;;  %v2042_v40 = vmin.f32 %v1949_v55, %v1950_v2  ;;  %v11411_v35 = vld [vmem:[#allocation218_spill] sm:$0xff] }
 0x373   :  { %2034 = vmin.xlane.f32.xlu1 %v2033_v38  ;;  %v7463_v38 = vperm.slane %v11411_v35, 4  ;;  %v2058_v4 = vadd.f32 %v7466_v24, %v11317_v42  ;;  %v2054_v55 = vadd.f32 %v7466_v24, %v11366_v37 }
 0x375   :  { %v7452_v57 = vpop.xlane.xlu2 %1836  ;;  %v7454_v29 = vpop.xlane.xlu0 %1848  ;;  %v2057_v44 = vadd.f32 %v7463_v38, %v11316_v25  ;;  %v2053_v14 = vadd.f32 %v7463_v38, %v11365_v54 }
 0x376   :  { %11408 = vst [vmem:[#allocation281_spill] sm:$0xff] %v7452_v57  ;;  %v7460_v27 = vpop.xlane.xlu1 %1842 }
 0x377   :  { %11409 = vst [vmem:[#allocation282_spill] sm:$0xff] %v7454_v29  ;;  %v11413_v29 = vld [vmem:[#allocation22_spill] sm:$0xff]  ;;  %v2123_v39 = vmin.f32 %v2057_v44, %v2058_v4  ;;  %v2060_v44 = vadd.f32 %v7466_v24, %v5682_v6 }
 0x378   :  { %11410 = vst [vmem:[#allocation283_spill] sm:$0xff] %v7460_v27  ;;  %v1951_v57 = vadd.f32 %v7259_v19, %v11413_v29  ;;  %v2064_v27 = vadd.f32 %v7466_v24, %v5736_v62 }
 0x37a   :  { %2037 = vmin.xlane.f32.xlu2 %v2036_v10  ;;  %2049 = vmin.xlane.f32.xlu0 %v2048_v36  ;;  %v2045_v2 = vmin.f32 %v1951_v57, %v1952_v13  ;;  %v2117_v10 = vmin.f32 %v2053_v14, %v2054_v55  ;;  %v2055_v36 = vadd.f32 %v7463_v38, %v11063_v49 }
 0x37b   :  { %2043 = vmin.xlane.f32.xlu1 %v2042_v40  ;;  %v11418_v40 = vld [vmem:[#allocation28_spill] sm:$0xff]  ;;  %v2059_v13 = vadd.f32 %v7463_v38, %v5679_v46 }
 0x37c   :  { %v2056_v35 = vadd.f32 %v7466_v24, %v11418_v40 }
 0x37d   :  { %v7476_v5 = vpop.xlane.xlu2 %1845  ;;  %v7478_v7 = vpop.xlane.xlu0 %1857 }
 0x37e   :  { %11415 = vst [vmem:[#allocation218_spill] sm:$0xff] %v7476_v5  ;;  %v7484_v19 = vpop.xlane.xlu1 %1851  ;;  %v2120_v14 = vmin.f32 %v2055_v36, %v2056_v35 }
 0x37f   :  { %11416 = vst [vmem:[#allocation219_spill] sm:$0xff] %v7478_v7  ;;  %v2063_v7 = vadd.f32 %v7463_v38, %v5733_v58 }
 0x380   :  { %11417 = vst [vmem:[#allocation284_spill] sm:$0xff] %v7484_v19  ;;  %v2070_v19 = vadd.f32 %v7466_v24, %v5782_v9 }
 0x381   :  { %v2132_v55 = vmin.f32 %v2063_v7, %v2064_v27  ;;  %v2065_v27 = vadd.f32 %v7463_v38, %v5691_v22  ;;  %v2066_v7 = vadd.f32 %v7466_v24, %v11069_v60 }
 0x382   :  { %2046 = vmin.xlane.f32.xlu2 %v2045_v2  ;;  %2124 = vmin.xlane.f32.xlu0 %v2123_v39  ;;  %v2126_v2 = vmin.f32 %v2059_v13, %v2060_v44  ;;  %v2061_v39 = vadd.f32 %v7463_v38, %v5703_v33 }
 0x383   :  { %2118 = vmin.xlane.f32.xlu1 %v2117_v10  ;;  %v2062_v10 = vadd.f32 %v7466_v24, %v5706_v3 }
 0x385   :  { %v7494_v5 = vpop.xlane.xlu2 %1854  ;;  %v7496_v57 = vpop.xlane.xlu0 %1866  ;;  %v2129_v13 = vmin.f32 %v2061_v39, %v2062_v10 }
 0x386   :  { %11419 = vst [vmem:[#allocation285_spill] sm:$0xff] %v7494_v5  ;;  %v7502_v4 = vpop.xlane.xlu1 %1860 }
 0x387   :  { %11420 = vst [vmem:[#allocation286_spill] sm:$0xff] %v7496_v57  ;;  %v2069_v57 = vadd.f32 %v7463_v38, %v5777_v26 }
 0x388   :  { %11421 = vst [vmem:[#allocation287_spill] sm:$0xff] %v7502_v4 }
 0x389   :  { %v2141_v44 = vmin.f32 %v2069_v57, %v2070_v19  ;;  %v2071_v19 = vadd.f32 %v7463_v38, %v11070_v47  ;;  %v2072_v57 = vadd.f32 %v7466_v24, %v11071_v20 }
 0x38a   :  { %2121 = vmin.xlane.f32.xlu2 %v2120_v14  ;;  %2133 = vmin.xlane.f32.xlu0 %v2132_v55  ;;  %v2135_v14 = vmin.f32 %v2065_v27, %v2066_v7  ;;  %v2067_v55 = vadd.f32 %v7463_v38, %v5749_v34 }
 0x38b   :  { %2127 = vmin.xlane.f32.xlu1 %v2126_v2  ;;  %v2068_v2 = vadd.f32 %v7466_v24, %v5752_v18 }
 0x38d   :  { %v7512_v5 = vpop.xlane.xlu2 %1863  ;;  %v7514_v36 = vpop.xlane.xlu0 %1875  ;;  %v2138_v27 = vmin.f32 %v2067_v55, %v2068_v2 }
 0x38e   :  { %11422 = vst [vmem:[#allocation288_spill] sm:$0xff] %v7512_v5  ;;  %v7520_v35 = vpop.xlane.xlu1 %1869  ;;  %v2076_v5 = vadd.f32 %v7466_v24, %v11327_v12 }
 0x38f   :  { %11423 = vst [vmem:[#allocation289_spill] sm:$0xff] %v7514_v36  ;;  %v2075_v36 = vadd.f32 %v7463_v38, %v11173_v8 }
 0x390   :  { %11424 = vst [vmem:[#allocation290_spill] sm:$0xff] %v7520_v35  ;;  %v2082_v35 = vadd.f32 %v7466_v24, %v11332_v56 }
 0x391   :  { %v2150_v7 = vmin.f32 %v2075_v36, %v2076_v5  ;;  %v2077_v5 = vadd.f32 %v7463_v38, %v11227_v30  ;;  %v2078_v36 = vadd.f32 %v7466_v24, %v11379_v1 }
 0x392   :  { %2130 = vmin.xlane.f32.xlu2 %v2129_v13  ;;  %2142 = vmin.xlane.f32.xlu0 %v2141_v44  ;;  %v2144_v13 = vmin.f32 %v2071_v19, %v2072_v57  ;;  %v2073_v44 = vadd.f32 %v7463_v38, %v5797_v11 }
 0x393   :  { %2136 = vmin.xlane.f32.xlu1 %v2135_v14  ;;  %v2074_v14 = vadd.f32 %v7466_v24, %v11275_v48 }
 0x395   :  { %v7530_v4 = vpop.xlane.xlu2 %1872  ;;  %v7532_v39 = vpop.xlane.xlu0 %1884  ;;  %v2147_v19 = vmin.f32 %v2073_v44, %v2074_v14 }
 0x396   :  { %11425 = vst [vmem:[#allocation291_spill] sm:$0xff] %v7530_v4  ;;  %v7538_v10 = vpop.xlane.xlu1 %1878 }
 0x397   :  { %11426 = vst [vmem:[#allocation292_spill] sm:$0xff] %v7532_v39  ;;  %v2081_v39 = vadd.f32 %v7463_v38, %v11331_v41 }
 0x398   :  { %11427 = vst [vmem:[#allocation293_spill] sm:$0xff] %v7538_v10 }
 0x399   :  { %v2159_v57 = vmin.f32 %v2081_v39, %v2082_v35  ;;  %v2083_v35 = vadd.f32 %v7463_v38, %v11383_v51  ;;  %v11434_v39 = vld [vmem:[#allocation48_spill] sm:$0xff] }
 0x39a   :  { %2139 = vmin.xlane.f32.xlu2 %v2138_v27  ;;  %2151 = vmin.xlane.f32.xlu0 %v2150_v7  ;;  %v2153_v27 = vmin.f32 %v2077_v5, %v2078_v36  ;;  %v2079_v7 = vadd.f32 %v7463_v38, %v11279_v45  ;;  %v2084_v14 = vadd.f32 %v7466_v24, %v11434_v39 }
 0x39b   :  { %2145 = vmin.xlane.f32.xlu1 %v2144_v13  ;;  %v11431_v13 = vld [vmem:[#allocation52_spill] sm:$0xff] }
 0x39c   :  { %v2080_v10 = vadd.f32 %v7466_v24, %v11431_v13 }
 0x39d   :  { %v7548_v4 = vpop.xlane.xlu2 %1881  ;;  %v7550_v55 = vpop.xlane.xlu0 %1959 }
 0x39e   :  { %11428 = vst [vmem:[#allocation294_spill] sm:$0xff] %v7548_v4  ;;  %v7556_v2 = vpop.xlane.xlu1 %1887  ;;  %v2087_v4 = vadd.f32 %v7463_v38, %v11336_v31  ;;  %v2156_v36 = vmin.f32 %v2079_v7, %v2080_v10  ;;  %v2094_v31 = vadd.f32 %v7466_v24, %v11393_v43  ;;  %v2099_v43 = vadd.f32 %v7463_v38, %v11348_v63 }
 0x39f   :  { %11429 = vst [vmem:[#allocation295_spill] sm:$0xff] %v7550_v55  ;;  %v2088_v55 = vadd.f32 %v7466_v24, %v11387_v32  ;;  %v2093_v32 = vadd.f32 %v7463_v38, %v11342_v23  ;;  %v2100_v23 = vadd.f32 %v7466_v24, %v11349_v21  ;;  %v2106_v21 = vadd.f32 %v7466_v24, %v11404_v0 }
 0x3a0   :  { %11430 = vst [vmem:[#allocation296_spill] sm:$0xff] %v7556_v2  ;;  %v2111_v0 = vadd.f32 %v7463_v38, %v11360_v15 }
 0x3a2   :  { %2148 = vmin.xlane.f32.xlu2 %v2147_v19  ;;  %2160 = vmin.xlane.f32.xlu0 %v2159_v57  ;;  %v2168_v19 = vmin.f32 %v2087_v4, %v2088_v55  ;;  %v2162_v57 = vmin.f32 %v2083_v35, %v2084_v14  ;;  %v2089_v4 = vadd.f32 %v7463_v38, %v11389_v50  ;;  %v11440_v55 = vld [vmem:[#allocation54_spill] sm:$0xff] }
 0x3a3   :  { %2154 = vmin.xlane.f32.xlu1 %v2153_v27  ;;  %v11436_v27 = vld [vmem:[#allocation57_spill] sm:$0xff]  ;;  %v2090_v7 = vadd.f32 %v7466_v24, %v11440_v55 }
 0x3a4   :  { %v2085_v2 = vadd.f32 %v7463_v38, %v11436_v27 }
 0x3a5   :  { %v7566_v56 = vpop.xlane.xlu2 %1956  ;;  %v7568_v44 = vpop.xlane.xlu0 %1968 }
 0x3a6   :  { %11432 = vst [vmem:[#allocation297_spill] sm:$0xff] %v7566_v56  ;;  %v7574_v5 = vpop.xlane.xlu1 %1962  ;;  %v11437_v56 = vld [vmem:[#allocation24_spill] sm:$0xff] }
 0x3a7   :  { %11433 = vst [vmem:[#allocation298_spill] sm:$0xff] %v7568_v44  ;;  %v2086_v44 = vadd.f32 %v7466_v24, %v11437_v56 }
 0x3a8   :  { %11435 = vst [vmem:[#allocation299_spill] sm:$0xff] %v7574_v5 }
 0x3a9   :  { %v2165_v14 = vmin.f32 %v2085_v2, %v2086_v44 }
 0x3aa   :  { %2157 = vmin.xlane.f32.xlu2 %v2156_v36  ;;  %2169 = vmin.xlane.f32.xlu0 %v2168_v19  ;;  %v2177_v36 = vmin.f32 %v2093_v32, %v2094_v31  ;;  %v2171_v19 = vmin.f32 %v2089_v4, %v2090_v7  ;;  %v2095_v31 = vadd.f32 %v7463_v38, %v11395_v59 }
 0x3ab   :  { %2163 = vmin.xlane.f32.xlu1 %v2162_v57  ;;  %v11442_v57 = vld [vmem:[#allocation11_spill] sm:$0xff]  ;;  %v2096_v32 = vadd.f32 %v7466_v24, %v11396_v16  ;;  %v2186_v7 = vmin.f32 %v2099_v43, %v2100_v23  ;;  %v2101_v23 = vadd.f32 %v7463_v38, %v11400_v28  ;;  %v11451_v43 = vld [vmem:[#allocation61_spill] sm:$0xff] }
 0x3ac   :  { %v2091_v5 = vadd.f32 %v7463_v38, %v11442_v57 }
 0x3ad   :  { %v7584_v41 = vpop.xlane.xlu2 %1965  ;;  %v7586_v10 = vpop.xlane.xlu0 %1977 }
 0x3ae   :  { %11438 = vst [vmem:[#allocation300_spill] sm:$0xff] %v7584_v41  ;;  %v7592_v35 = vpop.xlane.xlu1 %1971  ;;  %v11443_v41 = vld [vmem:[#allocation59_spill] sm:$0xff] }
 0x3af   :  { %11439 = vst [vmem:[#allocation301_spill] sm:$0xff] %v7586_v10  ;;  %v2092_v10 = vadd.f32 %v7466_v24, %v11443_v41 }
 0x3b0   :  { %11441 = vst [vmem:[#allocation302_spill] sm:$0xff] %v7592_v35  ;;  %v11448_v35 = vld [vmem:[#allocation62_spill] sm:$0xff] }
 0x3b1   :  { %v2174_v4 = vmin.f32 %v2091_v5, %v2092_v10  ;;  %v2102_v10 = vadd.f32 %v7466_v24, %v11451_v43 }
 0x3b2   :  { %2166 = vmin.xlane.f32.xlu2 %v2165_v14  ;;  %2178 = vmin.xlane.f32.xlu0 %v2177_v36  ;;  %v2180_v14 = vmin.f32 %v2095_v31, %v2096_v32  ;;  %v11447_v36 = vld [vmem:[#allocation17_spill] sm:$0xff] }
 0x3b3   :  { %2172 = vmin.xlane.f32.xlu1 %v2171_v19  ;;  %v2097_v19 = vadd.f32 %v7463_v38, %v11447_v36 }
 0x3b5   :  { %v7602_v56 = vpop.xlane.xlu2 %1974  ;;  %v7604_v2 = vpop.xlane.xlu0 %1986 }
 0x3b6   :  { %11444 = vst [vmem:[#allocation303_spill] sm:$0xff] %v7602_v56  ;;  %v7610_v44 = vpop.xlane.xlu1 %1980  ;;  %v2105_v56 = vadd.f32 %v7463_v38, %v11353_v52  ;;  %v2112_v52 = vadd.f32 %v7466_v24, %v11361_v61 }
 0x3b7   :  { %11445 = vst [vmem:[#allocation304_spill] sm:$0xff] %v7604_v2  ;;  %v2098_v2 = vadd.f32 %v7466_v24, %v11448_v35 }
 0x3b8   :  { %11446 = vst [vmem:[#allocation305_spill] sm:$0xff] %v7610_v44 }
 0x3b9   :  { %v2183_v32 = vmin.f32 %v2097_v19, %v2098_v2 }
 0x3ba   :  { %2175 = vmin.xlane.f32.xlu2 %v2174_v4  ;;  %2187 = vmin.xlane.f32.xlu0 %v2186_v7  ;;  %v2195_v4 = vmin.f32 %v2105_v56, %v2106_v21  ;;  %v2189_v7 = vmin.f32 %v2101_v23, %v2102_v10  ;;  %v2107_v56 = vadd.f32 %v7463_v38, %v11406_v17  ;;  %v11457_v21 = vld [vmem:[#allocation64_spill] sm:$0xff] }
 0x3bb   :  { %2181 = vmin.xlane.f32.xlu1 %v2180_v14  ;;  %v11453_v14 = vld [vmem:[#allocation65_spill] sm:$0xff]  ;;  %v2108_v19 = vadd.f32 %v7466_v24, %v11457_v21 }
 0x3bc   :  { %v2103_v44 = vadd.f32 %v7463_v38, %v11453_v14 }
 0x3bd   :  { %v7620_v63 = vpop.xlane.xlu2 %1983  ;;  %v7622_v5 = vpop.xlane.xlu0 %1995 }
 0x3be   :  { %11449 = vst [vmem:[#allocation306_spill] sm:$0xff] %v7620_v63  ;;  %v7628_v31 = vpop.xlane.xlu1 %1989  ;;  %v11454_v63 = vld [vmem:[#allocation66_spill] sm:$0xff] }
 0x3bf   :  { %11450 = vst [vmem:[#allocation307_spill] sm:$0xff] %v7622_v5  ;;  %v2104_v5 = vadd.f32 %v7466_v24, %v11454_v63 }
 0x3c0   :  { %11452 = vst [vmem:[#allocation308_spill] sm:$0xff] %v7628_v31 }
 0x3c1   :  { %v2192_v10 = vmin.f32 %v2103_v44, %v2104_v5  ;;  %v11462_v44 = vld [vmem:[#allocation68_spill] sm:$0xff] }
 0x3c2   :  { %2184 = vmin.xlane.f32.xlu2 %v2183_v32  ;;  %2196 = vmin.xlane.f32.xlu0 %v2195_v4  ;;  %v2204_v32 = vmin.f32 %v2111_v0, %v2112_v52  ;;  %v7651_v4 = vld [vmem:[%s10631_s4] sm:$0xff]  ;;  %v2110_v5 = vadd.f32 %v7466_v24, %v11462_v44 }
 0x3c3   :  { %2190 = vmin.xlane.f32.xlu1 %v2189_v7  ;;  %11459 = vst [vmem:[#allocation312_spill] sm:$0xff] %v7651_v4  ;;  %v7654_v7 = vperm.slane %v7651_v4, 4  ;;  %v11461_v52 = vld [vmem:[#allocation8_spill] sm:$0xff] }
 0x3c4   :  { %v2109_v0 = vadd.f32 %v7463_v38, %v11461_v52 }
 0x3c5   :  { %v7638_v35 = vpop.xlane.xlu2 %1992  ;;  %v7640_v2 = vpop.xlane.xlu0 %2004  ;;  %v2221_v44 = vadd.f32 %v7654_v7, %v5679_v46 }
 0x3c6   :  { %11455 = vst [vmem:[#allocation309_spill] sm:$0xff] %v7638_v35  ;;  %v7646_v23 = vpop.xlane.xlu1 %1998  ;;  %v2198_v35 = vmin.f32 %v2107_v56, %v2108_v19  ;;  %v2113_v56 = vadd.f32 %v7463_v38, %v11413_v29 }
 0x3c7   :  { %11456 = vst [vmem:[#allocation310_spill] sm:$0xff] %v7640_v2  ;;  %v7659_v2 = vld [vmem:[%s10631_s4 + $0x8] sm:$0xff] }
 0x3c8   :  { %11458 = vst [vmem:[#allocation311_spill] sm:$0xff] %v7646_v23  ;;  %v7662_v31 = vperm.slane %v7659_v2, 4  ;;  %v2215_v23 = vadd.f32 %v7654_v7, %v11365_v54  ;;  %v11466_v54 = vld [vmem:[#allocation72_spill] sm:$0xff] }
 0x3c9   :  { %11460 = vst [vmem:[#allocation313_spill] sm:$0xff] %v7659_v2 }
 0x3ca   :  { %2193 = vmin.xlane.f32.xlu2 %v2192_v10  ;;  %2205 = vmin.xlane.f32.xlu0 %v2204_v32  ;;  %v2216_v4 = vadd.f32 %v7662_v31, %v11366_v37  ;;  %v2201_v10 = vmin.f32 %v2109_v0, %v2110_v5  ;;  %v2115_v37 = vadd.f32 %v7463_v38, %v11466_v54 }
 0x3cb   :  { %2199 = vmin.xlane.f32.xlu1 %v2198_v35  ;;  %v2114_v35 = vadd.f32 %v7466_v24, %v11414_v53  ;;  %v2222_v52 = vadd.f32 %v7662_v31, %v5682_v6 }
 0x3cc   :  { %v2279_v32 = vmin.f32 %v2215_v23, %v2216_v4  ;;  %v2217_v23 = vadd.f32 %v7654_v7, %v11063_v49 }
 0x3cd   :  { %v7672_v61 = vpop.xlane.xlu2 %2001  ;;  %v7674_v2 = vpop.xlane.xlu0 %2013  ;;  %v2207_v15 = vmin.f32 %v2113_v56, %v2114_v35  ;;  %v2219_v56 = vadd.f32 %v7654_v7, %v11316_v25  ;;  %v2220_v35 = vadd.f32 %v7662_v31, %v11317_v42 }
 0x3ce   :  { %11463 = vst [vmem:[#allocation314_spill] sm:$0xff] %v7672_v61  ;;  %v7680_v19 = vpop.xlane.xlu1 %2007  ;;  %v11467_v61 = vld [vmem:[#allocation73_spill] sm:$0xff] }
 0x3cf   :  { %11464 = vst [vmem:[#allocation315_spill] sm:$0xff] %v7674_v2  ;;  %v2116_v2 = vadd.f32 %v7466_v24, %v11467_v61  ;;  %v2288_v24 = vmin.f32 %v2221_v44, %v2222_v52  ;;  %v2224_v52 = vadd.f32 %v7662_v31, %v5706_v3 }
 0x3d0   :  { %11465 = vst [vmem:[#allocation316_spill] sm:$0xff] %v7680_v19  ;;  %v2252_v19 = vadd.f32 %v7662_v31, %v11440_v55  ;;  %v2257_v55 = vadd.f32 %v7654_v7, %v11395_v59 }
 0x3d1   :  { %v2210_v4 = vmin.f32 %v2115_v37, %v2116_v2  ;;  %v2223_v2 = vadd.f32 %v7654_v7, %v5703_v33 }
 0x3d2   :  { %2202 = vmin.xlane.f32.xlu2 %v2201_v10  ;;  %2280 = vmin.xlane.f32.xlu0 %v2279_v32  ;;  %v2227_v10 = vadd.f32 %v7654_v7, %v5691_v22  ;;  %v2228_v32 = vadd.f32 %v7662_v31, %v11069_v60 }
 0x3d3   :  { %2208 = vmin.xlane.f32.xlu1 %v2207_v15  ;;  %v2218_v15 = vadd.f32 %v7662_v31, %v11418_v40 }
 0x3d5   :  { %v7690_v53 = vpop.xlane.xlu2 %2010  ;;  %v7692_v0 = vpop.xlane.xlu0 %2022  ;;  %v2282_v5 = vmin.f32 %v2217_v23, %v2218_v15  ;;  %v2285_v23 = vmin.f32 %v2219_v56, %v2220_v35  ;;  %v2297_v15 = vmin.f32 %v2227_v10, %v2228_v32  ;;  %v2229_v35 = vadd.f32 %v7654_v7, %v5749_v34 }
 0x3d6   :  { %11468 = vst [vmem:[#allocation317_spill] sm:$0xff] %v7690_v53  ;;  %v7698_v38 = vpop.xlane.xlu1 %2016  ;;  %v2230_v10 = vadd.f32 %v7662_v31, %v5752_v18  ;;  %v2251_v53 = vadd.f32 %v7654_v7, %v11389_v50  ;;  %v2258_v50 = vadd.f32 %v7662_v31, %v11396_v16  ;;  %v2264_v16 = vadd.f32 %v7662_v31, %v11451_v43 }
 0x3d7   :  { %11469 = vst [vmem:[#allocation318_spill] sm:$0xff] %v7692_v0  ;;  %v2269_v43 = vadd.f32 %v7654_v7, %v11406_v17 }
 0x3d8   :  { %11470 = vst [vmem:[#allocation319_spill] sm:$0xff] %v7698_v38  ;;  %v2234_v38 = vadd.f32 %v7662_v31, %v11071_v20 }
 0x3da   :  { %2211 = vmin.xlane.f32.xlu2 %v2210_v4  ;;  %2289 = vmin.xlane.f32.xlu0 %v2288_v24  ;;  %v2291_v4 = vmin.f32 %v2223_v2, %v2224_v52  ;;  %v2225_v24 = vadd.f32 %v7654_v7, %v5733_v58 }
 0x3db   :  { %2283 = vmin.xlane.f32.xlu1 %v2282_v5  ;;  %v2226_v5 = vadd.f32 %v7662_v31, %v5736_v62 }
 0x3dd   :  { %v7708_v0 = vpop.xlane.xlu2 %2019  ;;  %v7710_v37 = vpop.xlane.xlu0 %2031  ;;  %v2294_v2 = vmin.f32 %v2225_v24, %v2226_v5 }
 0x3de   :  { %11471 = vst [vmem:[#allocation320_spill] sm:$0xff] %v7708_v0  ;;  %v7716_v44 = vpop.xlane.xlu1 %2025 }
 0x3df   :  { %11472 = vst [vmem:[#allocation321_spill] sm:$0xff] %v7710_v37  ;;  %v2233_v37 = vadd.f32 %v7654_v7, %v11070_v47 }
 0x3e0   :  { %11473 = vst [vmem:[#allocation322_spill] sm:$0xff] %v7716_v44  ;;  %v2240_v44 = vadd.f32 %v7662_v31, %v11379_v1 }
 0x3e1   :  { %v2306_v52 = vmin.f32 %v2233_v37, %v2234_v38  ;;  %v2235_v38 = vadd.f32 %v7654_v7, %v5797_v11  ;;  %v2236_v37 = vadd.f32 %v7662_v31, %v11275_v48 }
 0x3e2   :  { %2286 = vmin.xlane.f32.xlu2 %v2285_v23  ;;  %2298 = vmin.xlane.f32.xlu0 %v2297_v15  ;;  %v2300_v23 = vmin.f32 %v2229_v35, %v2230_v10  ;;  %v2231_v15 = vadd.f32 %v7654_v7, %v5777_v26 }
 0x3e3   :  { %2292 = vmin.xlane.f32.xlu1 %v2291_v4  ;;  %v2232_v4 = vadd.f32 %v7662_v31, %v5782_v9 }
 0x3e5   :  { %v7726_v0 = vpop.xlane.xlu2 %2028  ;;  %v7728_v56 = vpop.xlane.xlu0 %2040  ;;  %v2303_v35 = vmin.f32 %v2231_v15, %v2232_v4 }
 0x3e6   :  { %11474 = vst [vmem:[#allocation323_spill] sm:$0xff] %v7726_v0  ;;  %v7734_v32 = vpop.xlane.xlu1 %2034 }
 0x3e7   :  { %11475 = vst [vmem:[#allocation324_spill] sm:$0xff] %v7728_v56  ;;  %v2239_v56 = vadd.f32 %v7654_v7, %v11227_v30 }
 0x3e8   :  { %11476 = vst [vmem:[#allocation325_spill] sm:$0xff] %v7734_v32  ;;  %v2246_v32 = vadd.f32 %v7662_v31, %v11434_v39 }
 0x3e9   :  { %v2315_v10 = vmin.f32 %v2239_v56, %v2240_v44  ;;  %v2241_v44 = vadd.f32 %v7654_v7, %v11279_v45  ;;  %v2242_v56 = vadd.f32 %v7662_v31, %v11431_v13 }
 0x3ea   :  { %2295 = vmin.xlane.f32.xlu2 %v2294_v2  ;;  %2307 = vmin.xlane.f32.xlu0 %v2306_v52  ;;  %v2309_v2 = vmin.f32 %v2235_v38, %v2236_v37  ;;  %v2237_v52 = vadd.f32 %v7654_v7, %v11173_v8 }
 0x3eb   :  { %2301 = vmin.xlane.f32.xlu1 %v2300_v23  ;;  %v2238_v23 = vadd.f32 %v7662_v31, %v11327_v12 }
 0x3ed   :  { %v7744_v0 = vpop.xlane.xlu2 %2037  ;;  %v7746_v24 = vpop.xlane.xlu0 %2049  ;;  %v2312_v38 = vmin.f32 %v2237_v52, %v2238_v23 }
 0x3ee   :  { %11477 = vst [vmem:[#allocation326_spill] sm:$0xff] %v7744_v0  ;;  %v7752_v5 = vpop.xlane.xlu1 %2043 }
 0x3ef   :  { %11478 = vst [vmem:[#allocation327_spill] sm:$0xff] %v7746_v24  ;;  %v2245_v24 = vadd.f32 %v7654_v7, %v11383_v51 }
 0x3f0   :  { %11479 = vst [vmem:[#allocation328_spill] sm:$0xff] %v7752_v5  ;;  %v11484_v5 = vld [vmem:[#allocation56_spill] sm:$0xff] }
 0x3f1   :  { %v2324_v37 = vmin.f32 %v2245_v24, %v2246_v32  ;;  %v2247_v32 = vadd.f32 %v7654_v7, %v11436_v27  ;;  %v11487_v24 = vld [vmem:[#allocation24_spill] sm:$0xff] }
 0x3f2   :  { %2304 = vmin.xlane.f32.xlu2 %v2303_v35  ;;  %2316 = vmin.xlane.f32.xlu0 %v2315_v10  ;;  %v2318_v35 = vmin.f32 %v2241_v44, %v2242_v56  ;;  %v11483_v10 = vld [vmem:[#allocation55_spill] sm:$0xff]  ;;  %v2248_v23 = vadd.f32 %v7662_v31, %v11487_v24 }
 0x3f3   :  { %2310 = vmin.xlane.f32.xlu1 %v2309_v2  ;;  %v2243_v2 = vadd.f32 %v7654_v7, %v11483_v10 }
 0x3f5   :  { %v7762_v0 = vpop.xlane.xlu2 %2046  ;;  %v7764_v15 = vpop.xlane.xlu0 %2124 }
 0x3f6   :  { %11480 = vst [vmem:[#allocation329_spill] sm:$0xff] %v7762_v0  ;;  %v7770_v4 = vpop.xlane.xlu1 %2118  ;;  %v2244_v0 = vadd.f32 %v7662_v31, %v11484_v5 }
 0x3f7   :  { %11481 = vst [vmem:[#allocation330_spill] sm:$0xff] %v7764_v15 }
 0x3f8   :  { %11482 = vst [vmem:[#allocation331_spill] sm:$0xff] %v7770_v4  ;;  %v2321_v56 = vmin.f32 %v2243_v2, %v2244_v0 }
 0x3fa   :  { %2313 = vmin.xlane.f32.xlu2 %v2312_v38  ;;  %2325 = vmin.xlane.f32.xlu0 %v2324_v37  ;;  %v2333_v38 = vmin.f32 %v2251_v53, %v2252_v19  ;;  %v2327_v37 = vmin.f32 %v2247_v32, %v2248_v23  ;;  %v2253_v53 = vadd.f32 %v7654_v7, %v11442_v57 }
 0x3fb   :  { %2319 = vmin.xlane.f32.xlu1 %v2318_v35  ;;  %v11489_v35 = vld [vmem:[#allocation12_spill] sm:$0xff]  ;;  %v2254_v19 = vadd.f32 %v7662_v31, %v11443_v41  ;;  %v2342_v23 = vmin.f32 %v2257_v55, %v2258_v50  ;;  %v2259_v50 = vadd.f32 %v7654_v7, %v11447_v36  ;;  %v11498_v55 = vld [vmem:[#allocation62_spill] sm:$0xff] }
 0x3fc   :  { %v2249_v4 = vadd.f32 %v7654_v7, %v11489_v35 }
 0x3fd   :  { %v7780_v15 = vpop.xlane.xlu2 %2121  ;;  %v7782_v52 = vpop.xlane.xlu0 %2133 }
 0x3fe   :  { %11485 = vst [vmem:[#allocation332_spill] sm:$0xff] %v7780_v15  ;;  %v7788_v44 = vpop.xlane.xlu1 %2127  ;;  %v11490_v15 = vld [vmem:[#allocation15_spill] sm:$0xff] }
 0x3ff   :  { %11486 = vst [vmem:[#allocation333_spill] sm:$0xff] %v7782_v52  ;;  %v2250_v52 = vadd.f32 %v7662_v31, %v11490_v15 }
 0x400   :  { %11488 = vst [vmem:[#allocation334_spill] sm:$0xff] %v7788_v44  ;;  %v2263_v44 = vadd.f32 %v7654_v7, %v11400_v28  ;;  %v2270_v28 = vadd.f32 %v7662_v31, %v11457_v21  ;;  %v11507_v21 = vld [vmem:[#allocation10_spill] sm:$0xff] }
 0x401   :  { %v2330_v32 = vmin.f32 %v2249_v4, %v2250_v52  ;;  %v2260_v52 = vadd.f32 %v7662_v31, %v11498_v55  ;;  %v2276_v17 = vadd.f32 %v7662_v31, %v11507_v21 }
 0x402   :  { %2322 = vmin.xlane.f32.xlu2 %v2321_v56  ;;  %2334 = vmin.xlane.f32.xlu0 %v2333_v38  ;;  %v2336_v56 = vmin.f32 %v2253_v53, %v2254_v19  ;;  %v11494_v38 = vld [vmem:[#allocation18_spill] sm:$0xff] }
 0x403   :  { %2328 = vmin.xlane.f32.xlu1 %v2327_v37  ;;  %v2255_v37 = vadd.f32 %v7654_v7, %v11494_v38 }
 0x405   :  { %v7798_v39 = vpop.xlane.xlu2 %2130  ;;  %v7800_v0 = vpop.xlane.xlu0 %2142 }
 0x406   :  { %11491 = vst [vmem:[#allocation335_spill] sm:$0xff] %v7798_v39  ;;  %v7806_v2 = vpop.xlane.xlu1 %2136  ;;  %v11495_v39 = vld [vmem:[#allocation19_spill] sm:$0xff] }
 0x407   :  { %11492 = vst [vmem:[#allocation336_spill] sm:$0xff] %v7800_v0  ;;  %v2256_v0 = vadd.f32 %v7662_v31, %v11495_v39 }
 0x408   :  { %11493 = vst [vmem:[#allocation337_spill] sm:$0xff] %v7806_v2 }
 0x409   :  { %v2339_v19 = vmin.f32 %v2255_v37, %v2256_v0 }
 0x40a   :  { %2331 = vmin.xlane.f32.xlu2 %v2330_v32  ;;  %2343 = vmin.xlane.f32.xlu0 %v2342_v23  ;;  %v2351_v32 = vmin.f32 %v2263_v44, %v2264_v16  ;;  %v2345_v23 = vmin.f32 %v2259_v50, %v2260_v52  ;;  %v2265_v16 = vadd.f32 %v7654_v7, %v11453_v14 }
 0x40b   :  { %2337 = vmin.xlane.f32.xlu1 %v2336_v56  ;;  %v11500_v56 = vld [vmem:[#allocation20_spill] sm:$0xff]  ;;  %v2266_v44 = vadd.f32 %v7662_v31, %v11454_v63  ;;  %v2360_v52 = vmin.f32 %v2269_v43, %v2270_v28 }
 0x40c   :  { %v2261_v2 = vadd.f32 %v7654_v7, %v11500_v56  ;;  %v11510_v28 = vld [vmem:[#allocation8_spill] sm:$0xff] }
 0x40d   :  { %v7816_v59 = vpop.xlane.xlu2 %2139  ;;  %v7818_v4 = vpop.xlane.xlu0 %2151  ;;  %v2271_v43 = vadd.f32 %v7654_v7, %v11510_v28 }
 0x40e   :  { %11496 = vst [vmem:[#allocation338_spill] sm:$0xff] %v7816_v59  ;;  %v7824_v53 = vpop.xlane.xlu1 %2145  ;;  %v11501_v59 = vld [vmem:[#allocation21_spill] sm:$0xff] }
 0x40f   :  { %11497 = vst [vmem:[#allocation339_spill] sm:$0xff] %v7818_v4  ;;  %v2262_v4 = vadd.f32 %v7662_v31, %v11501_v59 }
 0x410   :  { %11499 = vst [vmem:[#allocation340_spill] sm:$0xff] %v7824_v53  ;;  %v11506_v53 = vld [vmem:[#allocation67_spill] sm:$0xff] }
 0x411   :  { %v2348_v50 = vmin.f32 %v2261_v2, %v2262_v4  ;;  %v11511_v4 = vld [vmem:[#allocation68_spill] sm:$0xff] }
 0x412   :  { %2340 = vmin.xlane.f32.xlu2 %v2339_v19  ;;  %2352 = vmin.xlane.f32.xlu0 %v2351_v32  ;;  %v2354_v19 = vmin.f32 %v2265_v16, %v2266_v44  ;;  %v11505_v32 = vld [vmem:[#allocation23_spill] sm:$0xff]  ;;  %v2272_v16 = vadd.f32 %v7662_v31, %v11511_v4 }
 0x413   :  { %2346 = vmin.xlane.f32.xlu1 %v2345_v23  ;;  %v2267_v23 = vadd.f32 %v7654_v7, %v11505_v32 }
 0x415   :  { %v7834_v39 = vpop.xlane.xlu2 %2148  ;;  %v7836_v0 = vpop.xlane.xlu0 %2160 }
 0x416   :  { %11502 = vst [vmem:[#allocation341_spill] sm:$0xff] %v7834_v39  ;;  %v7842_v37 = vpop.xlane.xlu1 %2154  ;;  %v2275_v39 = vadd.f32 %v7654_v7, %v11413_v29 }
 0x417   :  { %11503 = vst [vmem:[#allocation342_spill] sm:$0xff] %v7836_v0  ;;  %v2268_v0 = vadd.f32 %v7662_v31, %v11506_v53 }
 0x418   :  { %11504 = vst [vmem:[#allocation343_spill] sm:$0xff] %v7842_v37  ;;  %v7865_v37 = vld [vmem:[%s10632_s5] sm:$0xff] }
 0x419   :  { %11513 = vst [vmem:[#allocation347_spill] sm:$0xff] %v7865_v37 }
 0x41a   :  { %2349 = vmin.xlane.f32.xlu2 %v2348_v50  ;;  %2361 = vmin.xlane.f32.xlu0 %v2360_v52  ;;  %v2357_v50 = vmin.f32 %v2267_v23, %v2268_v0  ;;  %v2369_v52 = vmin.f32 %v2275_v39, %v2276_v17  ;;  %v11515_v17 = vld [vmem:[#allocation70_spill] sm:$0xff]  ;;  %v11516_v0 = vld [vmem:[#allocation71_spill] sm:$0xff] }
 0x41b   :  { %2355 = vmin.xlane.f32.xlu1 %v2354_v19  ;;  %v2363_v19 = vmin.f32 %v2271_v43, %v2272_v16  ;;  %v2273_v39 = vadd.f32 %v7654_v7, %v11515_v17  ;;  %v2274_v23 = vadd.f32 %v7662_v31, %v11516_v0 }
 0x41d   :  { %v7852_v59 = vpop.xlane.xlu2 %2157  ;;  %v7854_v2 = vpop.xlane.xlu0 %2169  ;;  %v2366_v21 = vmin.f32 %v2273_v39, %v2274_v23 }
 0x41e   :  { %11508 = vst [vmem:[#allocation344_spill] sm:$0xff] %v7852_v59  ;;  %v7860_v44 = vpop.xlane.xlu1 %2163  ;;  %v7873_v59 = vld [vmem:[%s10632_s5 + $0x8] sm:$0xff] }
 0x41f   :  { %11509 = vst [vmem:[#allocation345_spill] sm:$0xff] %v7854_v2  ;;  %v7868_v2 = vperm.slane %v7865_v37, 5 }
 0x420   :  { %11512 = vst [vmem:[#allocation346_spill] sm:$0xff] %v7860_v44  ;;  %v7876_v44 = vperm.slane %v7873_v59, 5 }
 0x421   :  { %11514 = vst [vmem:[#allocation348_spill] sm:$0xff] %v7873_v59  ;;  %v2379_v43 = vadd.f32 %v7868_v2, %v11063_v49  ;;  %v2277_v59 = vadd.f32 %v7654_v7, %v11466_v54  ;;  %v11520_v49 = vld [vmem:[#allocation13_spill] sm:$0xff]  ;;  %v2385_v7 = vadd.f32 %v7868_v2, %v5703_v33 }
 0x422   :  { %2358 = vmin.xlane.f32.xlu2 %v2357_v50  ;;  %2370 = vmin.xlane.f32.xlu0 %v2369_v52  ;;  %v2380_v16 = vadd.f32 %v7876_v44, %v11418_v40  ;;  %v2377_v40 = vadd.f32 %v7868_v2, %v11520_v49 }
 0x423   :  { %2364 = vmin.xlane.f32.xlu1 %v2363_v19  ;;  %v2278_v19 = vadd.f32 %v7662_v31, %v11467_v61  ;;  %v2386_v31 = vadd.f32 %v7876_v44, %v5706_v3 }
 0x424   :  { %v2444_v29 = vmin.f32 %v2379_v43, %v2380_v16  ;;  %v2383_v16 = vadd.f32 %v7868_v2, %v5679_v46 }
 0x425   :  { %v7886_v50 = vpop.xlane.xlu2 %2166  ;;  %v7888_v52 = vpop.xlane.xlu0 %2178  ;;  %v2372_v0 = vmin.f32 %v2277_v59, %v2278_v19  ;;  %v2381_v59 = vadd.f32 %v7868_v2, %v11316_v25  ;;  %v2453_v23 = vmin.f32 %v2385_v7, %v2386_v31  ;;  %v2384_v19 = vadd.f32 %v7876_v44, %v5682_v6 }
 0x426   :  { %11517 = vst [vmem:[#allocation349_spill] sm:$0xff] %v7886_v50  ;;  %v7894_v37 = vpop.xlane.xlu1 %2172  ;;  %v11521_v50 = vld [vmem:[#allocation14_spill] sm:$0xff]  ;;  %v2388_v7 = vadd.f32 %v7876_v44, %v5736_v62 }
 0x427   :  { %11518 = vst [vmem:[#allocation350_spill] sm:$0xff] %v7888_v52  ;;  %v2378_v52 = vadd.f32 %v7876_v44, %v11521_v50 }
 0x428   :  { %11519 = vst [vmem:[#allocation351_spill] sm:$0xff] %v7894_v37 }
 0x42a   :  { %2367 = vmin.xlane.f32.xlu2 %v2366_v21  ;;  %2445 = vmin.xlane.f32.xlu0 %v2444_v29  ;;  %v2382_v29 = vadd.f32 %v7876_v44, %v11317_v42 }
 0x42b   :  { %2373 = vmin.xlane.f32.xlu1 %v2372_v0  ;;  %v2441_v0 = vmin.f32 %v2377_v40, %v2378_v52  ;;  %v2387_v52 = vadd.f32 %v7868_v2, %v5733_v58 }
 0x42c   :  { %v2447_v43 = vmin.f32 %v2381_v59, %v2382_v29  ;;  %v2450_v59 = vmin.f32 %v2383_v16, %v2384_v19 }
 0x42d   :  { %v7904_v17 = vpop.xlane.xlu2 %2175  ;;  %v7906_v39 = vpop.xlane.xlu0 %2187 }
 0x42e   :  { %11522 = vst [vmem:[#allocation352_spill] sm:$0xff] %v7904_v17  ;;  %v7912_v21 = vpop.xlane.xlu1 %2181  ;;  %v2392_v17 = vadd.f32 %v7876_v44, %v5752_v18 }
 0x42f   :  { %11523 = vst [vmem:[#allocation353_spill] sm:$0xff] %v7906_v39  ;;  %v2391_v39 = vadd.f32 %v7868_v2, %v5749_v34 }
 0x430   :  { %11524 = vst [vmem:[#allocation354_spill] sm:$0xff] %v7912_v21  ;;  %v2398_v21 = vadd.f32 %v7876_v44, %v11275_v48 }
 0x431   :  { %v2462_v29 = vmin.f32 %v2391_v39, %v2392_v17  ;;  %v2393_v17 = vadd.f32 %v7868_v2, %v5777_v26  ;;  %v2394_v39 = vadd.f32 %v7876_v44, %v5782_v9 }
 0x432   :  { %2442 = vmin.xlane.f32.xlu2 %v2441_v0  ;;  %2454 = vmin.xlane.f32.xlu0 %v2453_v23  ;;  %v2456_v0 = vmin.f32 %v2387_v52, %v2388_v7  ;;  %v2389_v23 = vadd.f32 %v7868_v2, %v5691_v22 }
 0x433   :  { %2448 = vmin.xlane.f32.xlu1 %v2447_v43  ;;  %v2390_v43 = vadd.f32 %v7876_v44, %v11069_v60 }
 0x435   :  { %v7922_v37 = vpop.xlane.xlu2 %2184  ;;  %v7924_v40 = vpop.xlane.xlu0 %2196  ;;  %v2459_v52 = vmin.f32 %v2389_v23, %v2390_v43 }
 0x436   :  { %11525 = vst [vmem:[#allocation355_spill] sm:$0xff] %v7922_v37  ;;  %v7930_v31 = vpop.xlane.xlu1 %2190 }
 0x437   :  { %11526 = vst [vmem:[#allocation356_spill] sm:$0xff] %v7924_v40  ;;  %v2397_v40 = vadd.f32 %v7868_v2, %v5797_v11 }
 0x438   :  { %11527 = vst [vmem:[#allocation357_spill] sm:$0xff] %v7930_v31  ;;  %v2404_v31 = vadd.f32 %v7876_v44, %v11431_v13 }
 0x439   :  { %v2471_v7 = vmin.f32 %v2397_v40, %v2398_v21  ;;  %v2399_v21 = vadd.f32 %v7868_v2, %v11173_v8  ;;  %v2400_v40 = vadd.f32 %v7876_v44, %v11327_v12 }
 0x43a   :  { %2451 = vmin.xlane.f32.xlu2 %v2450_v59  ;;  %2463 = vmin.xlane.f32.xlu0 %v2462_v29  ;;  %v2465_v59 = vmin.f32 %v2393_v17, %v2394_v39  ;;  %v2395_v29 = vadd.f32 %v7868_v2, %v11070_v47 }
 0x43b   :  { %2457 = vmin.xlane.f32.xlu1 %v2456_v0  ;;  %v2396_v0 = vadd.f32 %v7876_v44, %v11071_v20 }
 0x43d   :  { %v7940_v37 = vpop.xlane.xlu2 %2193  ;;  %v7942_v16 = vpop.xlane.xlu0 %2205  ;;  %v2468_v17 = vmin.f32 %v2395_v29, %v2396_v0 }
 0x43e   :  { %11528 = vst [vmem:[#allocation358_spill] sm:$0xff] %v7940_v37  ;;  %v7948_v19 = vpop.xlane.xlu1 %2199 }
 0x43f   :  { %11529 = vst [vmem:[#allocation359_spill] sm:$0xff] %v7942_v16  ;;  %v2403_v16 = vadd.f32 %v7868_v2, %v11279_v45 }
 0x440   :  { %11530 = vst [vmem:[#allocation360_spill] sm:$0xff] %v7948_v19  ;;  %v2409_v19 = vadd.f32 %v7868_v2, %v11436_v27 }
 0x441   :  { %v2480_v39 = vmin.f32 %v2403_v16, %v2404_v31  ;;  %v2405_v31 = vadd.f32 %v7868_v2, %v11483_v10  ;;  %v2406_v16 = vadd.f32 %v7876_v44, %v11484_v5 }
 0x442   :  { %2460 = vmin.xlane.f32.xlu2 %v2459_v52  ;;  %2472 = vmin.xlane.f32.xlu0 %v2471_v7  ;;  %v2474_v52 = vmin.f32 %v2399_v21, %v2400_v40  ;;  %v2401_v7 = vadd.f32 %v7868_v2, %v11227_v30 }
 0x443   :  { %2466 = vmin.xlane.f32.xlu1 %v2465_v59  ;;  %v2402_v59 = vadd.f32 %v7876_v44, %v11379_v1 }
 0x445   :  { %v7958_v37 = vpop.xlane.xlu2 %2202  ;;  %v7960_v23 = vpop.xlane.xlu0 %2280  ;;  %v2477_v21 = vmin.f32 %v2401_v7, %v2402_v59 }
 0x446   :  { %11531 = vst [vmem:[#allocation361_spill] sm:$0xff] %v7958_v37  ;;  %v7966_v43 = vpop.xlane.xlu1 %2208  ;;  %v2410_v37 = vadd.f32 %v7876_v44, %v11487_v24 }
 0x447   :  { %11532 = vst [vmem:[#allocation362_spill] sm:$0xff] %v7960_v23 }
 0x448   :  { %11533 = vst [vmem:[#allocation363_spill] sm:$0xff] %v7966_v43  ;;  %v2489_v40 = vmin.f32 %v2409_v19, %v2410_v37  ;;  %v2411_v37 = vadd.f32 %v7868_v2, %v11489_v35  ;;  %v2412_v19 = vadd.f32 %v7876_v44, %v11490_v15 }
 0x44a   :  { %2469 = vmin.xlane.f32.xlu2 %v2468_v17  ;;  %2481 = vmin.xlane.f32.xlu0 %v2480_v39  ;;  %v2483_v17 = vmin.f32 %v2405_v31, %v2406_v16  ;;  %v2407_v39 = vadd.f32 %v7868_v2, %v11383_v51 }
 0x44b   :  { %2475 = vmin.xlane.f32.xlu1 %v2474_v52  ;;  %v11537_v52 = vld [vmem:[#allocation48_spill] sm:$0xff] }
 0x44c   :  { %v2408_v43 = vadd.f32 %v7876_v44, %v11537_v52 }
 0x44d   :  { %v7976_v23 = vpop.xlane.xlu2 %2211  ;;  %v7978_v29 = vpop.xlane.xlu0 %2289 }
 0x44e   :  { %11534 = vst [vmem:[#allocation364_spill] sm:$0xff] %v7976_v23  ;;  %v7984_v0 = vpop.xlane.xlu1 %2283  ;;  %v2415_v23 = vadd.f32 %v7868_v2, %v11442_v57  ;;  %v2486_v31 = vmin.f32 %v2407_v39, %v2408_v43 }
 0x44f   :  { %11535 = vst [vmem:[#allocation365_spill] sm:$0xff] %v7978_v29  ;;  %v2416_v29 = vadd.f32 %v7876_v44, %v11443_v41  ;;  %v2422_v41 = vadd.f32 %v7876_v44, %v11498_v55  ;;  %v2427_v55 = vadd.f32 %v7868_v2, %v11453_v14  ;;  %v2434_v14 = vadd.f32 %v7876_v44, %v11511_v4 }
 0x450   :  { %11536 = vst [vmem:[#allocation366_spill] sm:$0xff] %v7984_v0  ;;  %v2421_v0 = vadd.f32 %v7868_v2, %v11447_v36  ;;  %v2428_v36 = vadd.f32 %v7876_v44, %v11454_v63  ;;  %v2433_v63 = vadd.f32 %v7868_v2, %v11510_v28  ;;  %v2440_v4 = vadd.f32 %v7876_v44, %v11467_v61 }
 0x451   :  { %v2498_v16 = vmin.f32 %v2415_v23, %v2416_v29  ;;  %v2417_v23 = vadd.f32 %v7868_v2, %v11494_v38  ;;  %v11545_v29 = vld [vmem:[#allocation19_spill] sm:$0xff] }
 0x452   :  { %2478 = vmin.xlane.f32.xlu2 %v2477_v21  ;;  %2490 = vmin.xlane.f32.xlu0 %v2489_v40  ;;  %v2492_v21 = vmin.f32 %v2411_v37, %v2412_v19  ;;  %v11541_v40 = vld [vmem:[#allocation53_spill] sm:$0xff]  ;;  %v2418_v39 = vadd.f32 %v7876_v44, %v11545_v29 }
 0x453   :  { %2484 = vmin.xlane.f32.xlu1 %v2483_v17  ;;  %v2413_v17 = vadd.f32 %v7868_v2, %v11541_v40 }
 0x455   :  { %v7994_v24 = vpop.xlane.xlu2 %2286  ;;  %v7996_v7 = vpop.xlane.xlu0 %2298 }
 0x456   :  { %11538 = vst [vmem:[#allocation367_spill] sm:$0xff] %v7994_v24  ;;  %v8002_v59 = vpop.xlane.xlu1 %2292  ;;  %v11542_v24 = vld [vmem:[#allocation54_spill] sm:$0xff] }
 0x457   :  { %11539 = vst [vmem:[#allocation368_spill] sm:$0xff] %v7996_v7  ;;  %v2414_v7 = vadd.f32 %v7876_v44, %v11542_v24 }
 0x458   :  { %11540 = vst [vmem:[#allocation369_spill] sm:$0xff] %v8002_v59 }
 0x459   :  { %v2495_v19 = vmin.f32 %v2413_v17, %v2414_v7 }
 0x45a   :  { %2487 = vmin.xlane.f32.xlu2 %v2486_v31  ;;  %2499 = vmin.xlane.f32.xlu0 %v2498_v16  ;;  %v2507_v31 = vmin.f32 %v2421_v0, %v2422_v41  ;;  %v2501_v16 = vmin.f32 %v2417_v23, %v2418_v39  ;;  %v2423_v41 = vadd.f32 %v7868_v2, %v11500_v56  ;;  %v11551_v0 = vld [vmem:[#allocation21_spill] sm:$0xff] }
 0x45b   :  { %2493 = vmin.xlane.f32.xlu1 %v2492_v21  ;;  %v11547_v21 = vld [vmem:[#allocation9_spill] sm:$0xff]  ;;  %v2424_v17 = vadd.f32 %v7876_v44, %v11551_v0 }
 0x45c   :  { %v2419_v59 = vadd.f32 %v7868_v2, %v11547_v21 }
 0x45d   :  { %v8012_v57 = vpop.xlane.xlu2 %2295  ;;  %v8014_v43 = vpop.xlane.xlu0 %2307 }
 0x45e   :  { %11543 = vst [vmem:[#allocation370_spill] sm:$0xff] %v8012_v57  ;;  %v8020_v37 = vpop.xlane.xlu1 %2301  ;;  %v11548_v57 = vld [vmem:[#allocation58_spill] sm:$0xff] }
 0x45f   :  { %11544 = vst [vmem:[#allocation371_spill] sm:$0xff] %v8014_v43  ;;  %v2420_v43 = vadd.f32 %v7876_v44, %v11548_v57 }
 0x460   :  { %11546 = vst [vmem:[#allocation372_spill] sm:$0xff] %v8020_v37 }
 0x461   :  { %v2504_v39 = vmin.f32 %v2419_v59, %v2420_v43 }
 0x462   :  { %2496 = vmin.xlane.f32.xlu2 %v2495_v19  ;;  %2508 = vmin.xlane.f32.xlu0 %v2507_v31  ;;  %v2516_v19 = vmin.f32 %v2427_v55, %v2428_v36  ;;  %v2510_v31 = vmin.f32 %v2423_v41, %v2424_v17  ;;  %v2429_v36 = vadd.f32 %v7868_v2, %v11505_v32 }
 0x463   :  { %2502 = vmin.xlane.f32.xlu1 %v2501_v16  ;;  %v11553_v16 = vld [vmem:[#allocation60_spill] sm:$0xff]  ;;  %v2430_v55 = vadd.f32 %v7876_v44, %v11506_v53  ;;  %v2525_v17 = vmin.f32 %v2433_v63, %v2434_v14  ;;  %v11562_v63 = vld [vmem:[#allocation70_spill] sm:$0xff] }
 0x464   :  { %v2425_v37 = vadd.f32 %v7868_v2, %v11553_v16  ;;  %v2435_v14 = vadd.f32 %v7868_v2, %v11562_v63 }
 0x465   :  { %v8030_v24 = vpop.xlane.xlu2 %2304  ;;  %v8032_v7 = vpop.xlane.xlu0 %2316 }
 0x466   :  { %11549 = vst [vmem:[#allocation373_spill] sm:$0xff] %v8030_v24  ;;  %v8038_v23 = vpop.xlane.xlu1 %2310  ;;  %v11554_v24 = vld [vmem:[#allocation61_spill] sm:$0xff] }
 0x467   :  { %11550 = vst [vmem:[#allocation374_spill] sm:$0xff] %v8032_v7  ;;  %v2426_v7 = vadd.f32 %v7876_v44, %v11554_v24 }
 0x468   :  { %11552 = vst [vmem:[#allocation375_spill] sm:$0xff] %v8038_v23  ;;  %v11559_v23 = vld [vmem:[#allocation64_spill] sm:$0xff] }
 0x469   :  { %v2513_v41 = vmin.f32 %v2425_v37, %v2426_v7  ;;  %v11563_v7 = vld [vmem:[#allocation71_spill] sm:$0xff] }
 0x46a   :  { %2505 = vmin.xlane.f32.xlu2 %v2504_v39  ;;  %2517 = vmin.xlane.f32.xlu0 %v2516_v19  ;;  %v2519_v39 = vmin.f32 %v2429_v36, %v2430_v55  ;;  %v11558_v19 = vld [vmem:[#allocation63_spill] sm:$0xff]  ;;  %v2436_v36 = vadd.f32 %v7876_v44, %v11563_v7 }
 0x46b   :  { %2511 = vmin.xlane.f32.xlu1 %v2510_v31  ;;  %v2431_v31 = vadd.f32 %v7868_v2, %v11558_v19  ;;  %v11568_v19 = vld [vmem:[#allocation10_spill] sm:$0xff] }
 0x46c   :  { %v2438_v7 = vadd.f32 %v7876_v44, %v11568_v19 }
 0x46d   :  { %v8048_v57 = vpop.xlane.xlu2 %2313  ;;  %v8050_v59 = vpop.xlane.xlu0 %2325 }
 0x46e   :  { %11555 = vst [vmem:[#allocation376_spill] sm:$0xff] %v8048_v57  ;;  %v8056_v43 = vpop.xlane.xlu1 %2319  ;;  %v2439_v57 = vadd.f32 %v7868_v2, %v11466_v54 }
 0x46f   :  { %11556 = vst [vmem:[#allocation377_spill] sm:$0xff] %v8050_v59  ;;  %v2432_v59 = vadd.f32 %v7876_v44, %v11559_v23  ;;  %v11566_v23 = vld [vmem:[#allocation313_spill] sm:$0xff] }
 0x470   :  { %11557 = vst [vmem:[#allocation378_spill] sm:$0xff] %v8056_v43  ;;  %v11565_v43 = vld [vmem:[#allocation312_spill] sm:$0xff]  ;;  %v8080_v61 = vperm.slane %v11566_v23, 5 }
 0x471   :  { %v8077_v54 = vperm.slane %v11565_v43, 5 }
 0x472   :  { %2514 = vmin.xlane.f32.xlu2 %v2513_v41  ;;  %2526 = vmin.xlane.f32.xlu0 %v2525_v17  ;;  %v2522_v41 = vmin.f32 %v2431_v31, %v2432_v59  ;;  %v2534_v17 = vmin.f32 %v2439_v57, %v2440_v4  ;;  %v2544_v57 = vadd.f32 %v8080_v61, %v11317_v42 }
 0x473   :  { %2520 = vmin.xlane.f32.xlu1 %v2519_v39  ;;  %v2528_v39 = vmin.f32 %v2435_v14, %v2436_v36  ;;  %v2543_v59 = vadd.f32 %v8077_v54, %v11316_v25  ;;  %v2539_v23 = vadd.f32 %v8077_v54, %v11520_v49  ;;  %v2540_v31 = vadd.f32 %v8080_v61, %v11521_v50 }
 0x475   :  { %v8066_v28 = vpop.xlane.xlu2 %2322  ;;  %v8068_v37 = vpop.xlane.xlu0 %2334  ;;  %v2609_v44 = vmin.f32 %v2543_v59, %v2544_v57  ;;  %v2603_v36 = vmin.f32 %v2539_v23, %v2540_v31  ;;  %v2546_v59 = vadd.f32 %v8080_v61, %v5682_v6 }
 0x476   :  { %11560 = vst [vmem:[#allocation379_spill] sm:$0xff] %v8066_v28  ;;  %v8074_v55 = vpop.xlane.xlu1 %2328 }
 0x477   :  { %11561 = vst [vmem:[#allocation380_spill] sm:$0xff] %v8068_v37  ;;  %v11567_v37 = vld [vmem:[#allocation22_spill] sm:$0xff] }
 0x478   :  { %11564 = vst [vmem:[#allocation381_spill] sm:$0xff] %v8074_v55  ;;  %v2437_v28 = vadd.f32 %v7868_v2, %v11567_v37  ;;  %v2549_v55 = vadd.f32 %v8077_v54, %v5733_v58 }
 0x47a   :  { %2523 = vmin.xlane.f32.xlu2 %v2522_v41  ;;  %2535 = vmin.xlane.f32.xlu0 %v2534_v17  ;;  %v2531_v14 = vmin.f32 %v2437_v28, %v2438_v7  ;;  %v11572_v41 = vld [vmem:[#allocation27_spill] sm:$0xff]  ;;  %v2545_v7 = vadd.f32 %v8077_v54, %v5679_v46 }
 0x47b   :  { %2529 = vmin.xlane.f32.xlu1 %v2528_v39  ;;  %v2541_v17 = vadd.f32 %v8077_v54, %v11572_v41  ;;  %v11573_v39 = vld [vmem:[#allocation28_spill] sm:$0xff] }
 0x47d   :  { %v8090_v4 = vpop.xlane.xlu2 %2331  ;;  %v8092_v43 = vpop.xlane.xlu0 %2343 }
 0x47e   :  { %11569 = vst [vmem:[#allocation312_spill] sm:$0xff] %v8090_v4  ;;  %v8098_v2 = vpop.xlane.xlu1 %2337  ;;  %v2550_v4 = vadd.f32 %v8080_v61, %v5736_v62 }
 0x47f   :  { %11570 = vst [vmem:[#allocation313_spill] sm:$0xff] %v8092_v43  ;;  %v2542_v43 = vadd.f32 %v8080_v61, %v11573_v39 }
 0x480   :  { %11571 = vst [vmem:[#allocation382_spill] sm:$0xff] %v8098_v2  ;;  %v2618_v31 = vmin.f32 %v2549_v55, %v2550_v4  ;;  %v2556_v2 = vadd.f32 %v8080_v61, %v5782_v9  ;;  %v2551_v55 = vadd.f32 %v8077_v54, %v5691_v22  ;;  %v2552_v4 = vadd.f32 %v8080_v61, %v11069_v60 }
 0x481   :  { %v2606_v23 = vmin.f32 %v2541_v17, %v2542_v43 }
 0x482   :  { %2532 = vmin.xlane.f32.xlu2 %v2531_v14  ;;  %2610 = vmin.xlane.f32.xlu0 %v2609_v44  ;;  %v2612_v14 = vmin.f32 %v2545_v7, %v2546_v59  ;;  %v2547_v44 = vadd.f32 %v8077_v54, %v5703_v33 }
 0x483   :  { %2604 = vmin.xlane.f32.xlu1 %v2603_v36  ;;  %v2548_v36 = vadd.f32 %v8080_v61, %v5706_v3 }
 0x485   :  { %v8108_v42 = vpop.xlane.xlu2 %2340  ;;  %v8110_v28 = vpop.xlane.xlu0 %2352  ;;  %v2615_v7 = vmin.f32 %v2547_v44, %v2548_v36 }
 0x486   :  { %11574 = vst [vmem:[#allocation383_spill] sm:$0xff] %v8108_v42  ;;  %v8116_v57 = vpop.xlane.xlu1 %2346 }
 0x487   :  { %11575 = vst [vmem:[#allocation384_spill] sm:$0xff] %v8110_v28  ;;  %v2555_v28 = vadd.f32 %v8077_v54, %v5777_v26 }
 0x488   :  { %11576 = vst [vmem:[#allocation385_spill] sm:$0xff] %v8116_v57  ;;  %v2562_v57 = vadd.f32 %v8080_v61, %v11327_v12 }
 0x489   :  { %v2627_v59 = vmin.f32 %v2555_v28, %v2556_v2  ;;  %v2557_v2 = vadd.f32 %v8077_v54, %v11070_v47  ;;  %v2558_v28 = vadd.f32 %v8080_v61, %v11071_v20 }
 0x48a   :  { %2607 = vmin.xlane.f32.xlu2 %v2606_v23  ;;  %2619 = vmin.xlane.f32.xlu0 %v2618_v31  ;;  %v2621_v23 = vmin.f32 %v2551_v55, %v2552_v4  ;;  %v2553_v31 = vadd.f32 %v8077_v54, %v5749_v34 }
 0x48b   :  { %2613 = vmin.xlane.f32.xlu1 %v2612_v14  ;;  %v2554_v14 = vadd.f32 %v8080_v61, %v5752_v18 }
 0x48d   :  { %v8126_v42 = vpop.xlane.xlu2 %2349  ;;  %v8128_v43 = vpop.xlane.xlu0 %2361  ;;  %v2624_v55 = vmin.f32 %v2553_v31, %v2554_v14 }
 0x48e   :  { %11577 = vst [vmem:[#allocation386_spill] sm:$0xff] %v8126_v42  ;;  %v8134_v17 = vpop.xlane.xlu1 %2355 }
 0x48f   :  { %11578 = vst [vmem:[#allocation387_spill] sm:$0xff] %v8128_v43  ;;  %v2561_v43 = vadd.f32 %v8077_v54, %v11173_v8 }
 0x490   :  { %11579 = vst [vmem:[#allocation388_spill] sm:$0xff] %v8134_v17  ;;  %v2568_v17 = vadd.f32 %v8080_v61, %v11484_v5 }
 0x491   :  { %v2636_v4 = vmin.f32 %v2561_v43, %v2562_v57  ;;  %v2563_v57 = vadd.f32 %v8077_v54, %v11227_v30  ;;  %v2564_v43 = vadd.f32 %v8080_v61, %v11379_v1 }
 0x492   :  { %2616 = vmin.xlane.f32.xlu2 %v2615_v7  ;;  %2628 = vmin.xlane.f32.xlu0 %v2627_v59  ;;  %v2630_v7 = vmin.f32 %v2557_v2, %v2558_v28  ;;  %v2559_v59 = vadd.f32 %v8077_v54, %v5797_v11 }
 0x493   :  { %2622 = vmin.xlane.f32.xlu1 %v2621_v23  ;;  %v2560_v23 = vadd.f32 %v8080_v61, %v11275_v48 }
 0x495   :  { %v8144_v42 = vpop.xlane.xlu2 %2358  ;;  %v8146_v44 = vpop.xlane.xlu0 %2370  ;;  %v2633_v2 = vmin.f32 %v2559_v59, %v2560_v23 }
 0x496   :  { %11580 = vst [vmem:[#allocation389_spill] sm:$0xff] %v8144_v42  ;;  %v8152_v36 = vpop.xlane.xlu1 %2364 }
 0x497   :  { %11581 = vst [vmem:[#allocation390_spill] sm:$0xff] %v8146_v44  ;;  %v2567_v44 = vadd.f32 %v8077_v54, %v11483_v10 }
 0x498   :  { %11582 = vst [vmem:[#allocation391_spill] sm:$0xff] %v8152_v36  ;;  %v2573_v36 = vadd.f32 %v8077_v54, %v11489_v35 }
 0x499   :  { %v2645_v28 = vmin.f32 %v2567_v44, %v2568_v17  ;;  %v2569_v17 = vadd.f32 %v8077_v54, %v11383_v51  ;;  %v2570_v44 = vadd.f32 %v8080_v61, %v11537_v52 }
 0x49a   :  { %2625 = vmin.xlane.f32.xlu2 %v2624_v55  ;;  %2637 = vmin.xlane.f32.xlu0 %v2636_v4  ;;  %v2639_v55 = vmin.f32 %v2563_v57, %v2564_v43  ;;  %v2565_v4 = vadd.f32 %v8077_v54, %v11279_v45 }
 0x49b   :  { %2631 = vmin.xlane.f32.xlu1 %v2630_v7  ;;  %v2566_v7 = vadd.f32 %v8080_v61, %v11431_v13 }
 0x49d   :  { %v8162_v42 = vpop.xlane.xlu2 %2367  ;;  %v8164_v31 = vpop.xlane.xlu0 %2445  ;;  %v2642_v57 = vmin.f32 %v2565_v4, %v2566_v7 }
 0x49e   :  { %11583 = vst [vmem:[#allocation392_spill] sm:$0xff] %v8162_v42  ;;  %v8170_v14 = vpop.xlane.xlu1 %2373  ;;  %v2574_v42 = vadd.f32 %v8080_v61, %v11490_v15 }
 0x49f   :  { %11584 = vst [vmem:[#allocation393_spill] sm:$0xff] %v8164_v31 }
 0x4a0   :  { %11585 = vst [vmem:[#allocation394_spill] sm:$0xff] %v8170_v14  ;;  %v2654_v43 = vmin.f32 %v2573_v36, %v2574_v42  ;;  %v2575_v42 = vadd.f32 %v8077_v54, %v11541_v40  ;;  %v11592_v36 = vld [vmem:[#allocation54_spill] sm:$0xff] }
 0x4a1   :  { %v2576_v7 = vadd.f32 %v8080_v61, %v11592_v36 }
 0x4a2   :  { %2634 = vmin.xlane.f32.xlu2 %v2633_v2  ;;  %2646 = vmin.xlane.f32.xlu0 %v2645_v28  ;;  %v2648_v2 = vmin.f32 %v2569_v17, %v2570_v44  ;;  %v2571_v28 = vadd.f32 %v8077_v54, %v11436_v27 }
 0x4a3   :  { %2640 = vmin.xlane.f32.xlu1 %v2639_v55  ;;  %v11589_v55 = vld [vmem:[#allocation24_spill] sm:$0xff] }
 0x4a4   :  { %v2572_v14 = vadd.f32 %v8080_v61, %v11589_v55 }
 0x4a5   :  { %v8180_v31 = vpop.xlane.xlu2 %2442  ;;  %v8182_v59 = vpop.xlane.xlu0 %2454 }
 0x4a6   :  { %11586 = vst [vmem:[#allocation395_spill] sm:$0xff] %v8180_v31  ;;  %v8188_v23 = vpop.xlane.xlu1 %2448  ;;  %v2580_v31 = vadd.f32 %v8080_v61, %v11545_v29  ;;  %v2651_v44 = vmin.f32 %v2571_v28, %v2572_v14  ;;  %v2585_v29 = vadd.f32 %v8077_v54, %v11500_v56  ;;  %v2592_v56 = vadd.f32 %v8080_v61, %v11506_v53  ;;  %v11607_v53 = vld [vmem:[#allocation71_spill] sm:$0xff] }
 0x4a7   :  { %11587 = vst [vmem:[#allocation396_spill] sm:$0xff] %v8182_v59  ;;  %v2579_v59 = vadd.f32 %v8077_v54, %v11494_v38  ;;  %v2586_v38 = vadd.f32 %v8080_v61, %v11551_v0  ;;  %v2591_v0 = vadd.f32 %v8077_v54, %v11505_v32  ;;  %v2598_v32 = vadd.f32 %v8080_v61, %v11607_v53 }
 0x4a8   :  { %11588 = vst [vmem:[#allocation397_spill] sm:$0xff] %v8188_v23 }
 0x4aa   :  { %2643 = vmin.xlane.f32.xlu2 %v2642_v57  ;;  %2655 = vmin.xlane.f32.xlu0 %v2654_v43  ;;  %v2663_v57 = vmin.f32 %v2579_v59, %v2580_v31  ;;  %v2657_v43 = vmin.f32 %v2575_v42, %v2576_v7  ;;  %v2581_v31 = vadd.f32 %v8077_v54, %v11547_v21  ;;  %v11598_v59 = vld [vmem:[#allocation58_spill] sm:$0xff] }
 0x4ab   :  { %2649 = vmin.xlane.f32.xlu1 %v2648_v2  ;;  %v11594_v2 = vld [vmem:[#allocation11_spill] sm:$0xff]  ;;  %v2582_v28 = vadd.f32 %v8080_v61, %v11598_v59 }
 0x4ac   :  { %v2577_v23 = vadd.f32 %v8077_v54, %v11594_v2 }
 0x4ad   :  { %v8198_v15 = vpop.xlane.xlu2 %2451  ;;  %v8200_v4 = vpop.xlane.xlu0 %2463 }
 0x4ae   :  { %11590 = vst [vmem:[#allocation398_spill] sm:$0xff] %v8198_v15  ;;  %v8206_v17 = vpop.xlane.xlu1 %2457  ;;  %v11595_v15 = vld [vmem:[#allocation59_spill] sm:$0xff] }
 0x4af   :  { %11591 = vst [vmem:[#allocation399_spill] sm:$0xff] %v8200_v4  ;;  %v2578_v4 = vadd.f32 %v8080_v61, %v11595_v15 }
 0x4b0   :  { %11593 = vst [vmem:[#allocation400_spill] sm:$0xff] %v8206_v17 }
 0x4b1   :  { %v2660_v7 = vmin.f32 %v2577_v23, %v2578_v4 }
 0x4b2   :  { %2652 = vmin.xlane.f32.xlu2 %v2651_v44  ;;  %2664 = vmin.xlane.f32.xlu0 %v2663_v57  ;;  %v2672_v44 = vmin.f32 %v2585_v29, %v2586_v38  ;;  %v2666_v57 = vmin.f32 %v2581_v31, %v2582_v28  ;;  %v2587_v38 = vadd.f32 %v8077_v54, %v11553_v16 }
 0x4b3   :  { %2658 = vmin.xlane.f32.xlu1 %v2657_v43  ;;  %v11600_v43 = vld [vmem:[#allocation17_spill] sm:$0xff]  ;;  %v2588_v29 = vadd.f32 %v8080_v61, %v11554_v24  ;;  %v2681_v28 = vmin.f32 %v2591_v0, %v2592_v56  ;;  %v11610_v56 = vld [vmem:[#allocation63_spill] sm:$0xff] }
 0x4b4   :  { %v2583_v17 = vadd.f32 %v8077_v54, %v11600_v43  ;;  %v2593_v0 = vadd.f32 %v8077_v54, %v11610_v56 }
 0x4b5   :  { %v8216_v35 = vpop.xlane.xlu2 %2460  ;;  %v8218_v14 = vpop.xlane.xlu0 %2472 }
 0x4b6   :  { %11596 = vst [vmem:[#allocation401_spill] sm:$0xff] %v8216_v35  ;;  %v8224_v42 = vpop.xlane.xlu1 %2466  ;;  %v11601_v35 = vld [vmem:[#allocation62_spill] sm:$0xff] }
 0x4b7   :  { %11597 = vst [vmem:[#allocation402_spill] sm:$0xff] %v8218_v14  ;;  %v2584_v14 = vadd.f32 %v8080_v61, %v11601_v35 }
 0x4b8   :  { %11599 = vst [vmem:[#allocation403_spill] sm:$0xff] %v8224_v42  ;;  %v11606_v42 = vld [vmem:[#allocation66_spill] sm:$0xff] }
 0x4b9   :  { %v2669_v31 = vmin.f32 %v2583_v17, %v2584_v14  ;;  %v11611_v14 = vld [vmem:[#allocation64_spill] sm:$0xff] }
 0x4ba   :  { %2661 = vmin.xlane.f32.xlu2 %v2660_v7  ;;  %2673 = vmin.xlane.f32.xlu0 %v2672_v44  ;;  %v2675_v7 = vmin.f32 %v2587_v38, %v2588_v29  ;;  %v11605_v44 = vld [vmem:[#allocation65_spill] sm:$0xff]  ;;  %v2594_v38 = vadd.f32 %v8080_v61, %v11611_v14 }
 0x4bb   :  { %2667 = vmin.xlane.f32.xlu1 %v2666_v57  ;;  %v2589_v57 = vadd.f32 %v8077_v54, %v11605_v44  ;;  %v11616_v44 = vld [vmem:[#allocation68_spill] sm:$0xff] }
 0x4bc   :  { %v2684_v53 = vmin.f32 %v2593_v0, %v2594_v38  ;;  %v2596_v14 = vadd.f32 %v8080_v61, %v11616_v44 }
 0x4bd   :  { %v8234_v15 = vpop.xlane.xlu2 %2469  ;;  %v8236_v23 = vpop.xlane.xlu0 %2481 }
 0x4be   :  { %11602 = vst [vmem:[#allocation404_spill] sm:$0xff] %v8234_v15  ;;  %v8242_v4 = vpop.xlane.xlu1 %2475  ;;  %v2597_v15 = vadd.f32 %v8077_v54, %v11562_v63  ;;  %v11614_v63 = vld [vmem:[#allocation348_spill] sm:$0xff] }
 0x4bf   :  { %11603 = vst [vmem:[#allocation405_spill] sm:$0xff] %v8236_v23  ;;  %v2590_v23 = vadd.f32 %v8080_v61, %v11606_v42  ;;  %v8266_v42 = vperm.slane %v11614_v63, 6 }
 0x4c0   :  { %11604 = vst [vmem:[#allocation406_spill] sm:$0xff] %v8242_v4 }
 0x4c2   :  { %2670 = vmin.xlane.f32.xlu2 %v2669_v31  ;;  %2682 = vmin.xlane.f32.xlu0 %v2681_v28  ;;  %v2678_v31 = vmin.f32 %v2589_v57, %v2590_v23  ;;  %v2690_v28 = vmin.f32 %v2597_v15, %v2598_v32  ;;  %v2702_v15 = vadd.f32 %v8266_v42, %v11521_v50 }
 0x4c3   :  { %2676 = vmin.xlane.f32.xlu1 %v2675_v7  ;;  %v11613_v7 = vld [vmem:[#allocation347_spill] sm:$0xff]  ;;  %v2599_v57 = vadd.f32 %v8077_v54, %v11567_v37 }
 0x4c4   :  { %v8263_v4 = vperm.slane %v11613_v7, 6  ;;  %v11620_v7 = vld [vmem:[#allocation72_spill] sm:$0xff] }
 0x4c5   :  { %v8252_v35 = vpop.xlane.xlu2 %2478  ;;  %v8254_v17 = vpop.xlane.xlu0 %2490 }
 0x4c6   :  { %11608 = vst [vmem:[#allocation407_spill] sm:$0xff] %v8252_v35  ;;  %v8260_v29 = vpop.xlane.xlu1 %2484  ;;  %v2701_v23 = vadd.f32 %v8263_v4, %v11520_v49  ;;  %v2707_v50 = vadd.f32 %v8263_v4, %v5679_v46  ;;  %v2708_v49 = vadd.f32 %v8266_v42, %v5682_v6 }
 0x4c7   :  { %11609 = vst [vmem:[#allocation408_spill] sm:$0xff] %v8254_v17  ;;  %v11615_v17 = vld [vmem:[#allocation8_spill] sm:$0xff] }
 0x4c8   :  { %11612 = vst [vmem:[#allocation409_spill] sm:$0xff] %v8260_v29  ;;  %v2595_v35 = vadd.f32 %v8077_v54, %v11615_v17  ;;  %v2601_v29 = vadd.f32 %v8077_v54, %v11620_v7 }
 0x4ca   :  { %2679 = vmin.xlane.f32.xlu2 %v2678_v31  ;;  %2691 = vmin.xlane.f32.xlu0 %v2690_v28  ;;  %v2687_v38 = vmin.f32 %v2595_v35, %v2596_v14  ;;  %v2765_v31 = vmin.f32 %v2701_v23, %v2702_v15  ;;  %v2703_v14 = vadd.f32 %v8263_v4, %v11572_v41 }
 0x4cb   :  { %2685 = vmin.xlane.f32.xlu1 %v2684_v53  ;;  %v2600_v53 = vadd.f32 %v8080_v61, %v11568_v19  ;;  %v2704_v23 = vadd.f32 %v8266_v42, %v11573_v39 }
 0x4cd   :  { %v8276_v32 = vpop.xlane.xlu2 %2487  ;;  %v8278_v63 = vpop.xlane.xlu0 %2499  ;;  %v2693_v28 = vmin.f32 %v2599_v57, %v2600_v53  ;;  %v2768_v57 = vmin.f32 %v2703_v14, %v2704_v23  ;;  %v2705_v53 = vadd.f32 %v8263_v4, %v11316_v25 }
 0x4ce   :  { %11617 = vst [vmem:[#allocation347_spill] sm:$0xff] %v8276_v32  ;;  %v8284_v0 = vpop.xlane.xlu1 %2493  ;;  %v11621_v32 = vld [vmem:[#allocation73_spill] sm:$0xff] }
 0x4cf   :  { %11618 = vst [vmem:[#allocation348_spill] sm:$0xff] %v8278_v63  ;;  %v2602_v63 = vadd.f32 %v8080_v61, %v11621_v32  ;;  %v2774_v61 = vmin.f32 %v2707_v50, %v2708_v49  ;;  %v2709_v49 = vadd.f32 %v8263_v4, %v5703_v33  ;;  %v2710_v50 = vadd.f32 %v8266_v42, %v5706_v3 }
 0x4d0   :  { %11619 = vst [vmem:[#allocation410_spill] sm:$0xff] %v8284_v0  ;;  %v2737_v0 = vadd.f32 %v8263_v4, %v11541_v40 }
 0x4d1   :  { %v2696_v15 = vmin.f32 %v2601_v29, %v2602_v63 }
 0x4d2   :  { %2688 = vmin.xlane.f32.xlu2 %v2687_v38  ;;  %2766 = vmin.xlane.f32.xlu0 %v2765_v31  ;;  %v11625_v38 = vld [vmem:[#allocation26_spill] sm:$0xff] }
 0x4d3   :  { %2694 = vmin.xlane.f32.xlu1 %v2693_v28  ;;  %v2706_v31 = vadd.f32 %v8266_v42, %v11625_v38  ;;  %v2713_v28 = vadd.f32 %v8263_v4, %v5691_v22 }
 0x4d5   :  { %v8294_v44 = vpop.xlane.xlu2 %2496  ;;  %v8296_v35 = vpop.xlane.xlu0 %2508  ;;  %v2771_v14 = vmin.f32 %v2705_v53, %v2706_v31  ;;  %v2716_v31 = vadd.f32 %v8266_v42, %v5752_v18 }
 0x4d6   :  { %11622 = vst [vmem:[#allocation411_spill] sm:$0xff] %v8294_v44  ;;  %v8302_v54 = vpop.xlane.xlu1 %2502 }
 0x4d7   :  { %11623 = vst [vmem:[#allocation412_spill] sm:$0xff] %v8296_v35  ;;  %v2714_v35 = vadd.f32 %v8266_v42, %v11069_v60 }
 0x4d8   :  { %11624 = vst [vmem:[#allocation413_spill] sm:$0xff] %v8302_v54  ;;  %v2720_v54 = vadd.f32 %v8266_v42, %v11071_v20 }
 0x4d9   :  { %v2783_v23 = vmin.f32 %v2713_v28, %v2714_v35  ;;  %v2715_v35 = vadd.f32 %v8263_v4, %v5749_v34 }
 0x4da   :  { %2697 = vmin.xlane.f32.xlu2 %v2696_v15  ;;  %2775 = vmin.xlane.f32.xlu0 %v2774_v61  ;;  %v2777_v15 = vmin.f32 %v2709_v49, %v2710_v50  ;;  %v2711_v61 = vadd.f32 %v8263_v4, %v5733_v58 }
 0x4db   :  { %2769 = vmin.xlane.f32.xlu1 %v2768_v57  ;;  %v2712_v57 = vadd.f32 %v8266_v42, %v5736_v62 }
 0x4dd   :  { %v8312_v44 = vpop.xlane.xlu2 %2505  ;;  %v8314_v29 = vpop.xlane.xlu0 %2517  ;;  %v2780_v49 = vmin.f32 %v2711_v61, %v2712_v57 }
 0x4de   :  { %11626 = vst [vmem:[#allocation414_spill] sm:$0xff] %v8312_v44  ;;  %v8320_v63 = vpop.xlane.xlu1 %2511 }
 0x4df   :  { %11627 = vst [vmem:[#allocation415_spill] sm:$0xff] %v8314_v29  ;;  %v2719_v29 = vadd.f32 %v8263_v4, %v11070_v47 }
 0x4e0   :  { %11628 = vst [vmem:[#allocation416_spill] sm:$0xff] %v8320_v63  ;;  %v2726_v63 = vadd.f32 %v8266_v42, %v11379_v1 }
 0x4e1   :  { %v2792_v50 = vmin.f32 %v2719_v29, %v2720_v54  ;;  %v2721_v54 = vadd.f32 %v8263_v4, %v5797_v11  ;;  %v2722_v29 = vadd.f32 %v8266_v42, %v11275_v48 }
 0x4e2   :  { %2772 = vmin.xlane.f32.xlu2 %v2771_v14  ;;  %2784 = vmin.xlane.f32.xlu0 %v2783_v23  ;;  %v2786_v14 = vmin.f32 %v2715_v35, %v2716_v31  ;;  %v2717_v23 = vadd.f32 %v8263_v4, %v5777_v26 }
 0x4e3   :  { %2778 = vmin.xlane.f32.xlu1 %v2777_v15  ;;  %v2718_v15 = vadd.f32 %v8266_v42, %v5782_v9 }
 0x4e5   :  { %v8330_v44 = vpop.xlane.xlu2 %2514  ;;  %v8332_v53 = vpop.xlane.xlu0 %2526  ;;  %v2789_v35 = vmin.f32 %v2717_v23, %v2718_v15 }
 0x4e6   :  { %11629 = vst [vmem:[#allocation417_spill] sm:$0xff] %v8330_v44  ;;  %v8338_v28 = vpop.xlane.xlu1 %2520 }
 0x4e7   :  { %11630 = vst [vmem:[#allocation418_spill] sm:$0xff] %v8332_v53  ;;  %v2725_v53 = vadd.f32 %v8263_v4, %v11227_v30 }
 0x4e8   :  { %11631 = vst [vmem:[#allocation419_spill] sm:$0xff] %v8338_v28  ;;  %v2732_v28 = vadd.f32 %v8266_v42, %v11537_v52  ;;  %v2738_v52 = vadd.f32 %v8266_v42, %v11592_v36 }
 0x4e9   :  { %v2801_v31 = vmin.f32 %v2725_v53, %v2726_v63  ;;  %v2727_v63 = vadd.f32 %v8263_v4, %v11279_v45  ;;  %v2728_v53 = vadd.f32 %v8266_v42, %v11431_v13 }
 0x4ea   :  { %2781 = vmin.xlane.f32.xlu2 %v2780_v49  ;;  %2793 = vmin.xlane.f32.xlu0 %v2792_v50  ;;  %v2795_v49 = vmin.f32 %v2721_v54, %v2722_v29  ;;  %v2723_v50 = vadd.f32 %v8263_v4, %v11173_v8  ;;  %v3381_v54 = vlaneseq }
 0x4eb   :  { %2787 = vmin.xlane.f32.xlu1 %v2786_v14  ;;  %v2724_v14 = vadd.f32 %v8266_v42, %v11327_v12 }
 0x4ed   :  { %v8348_v44 = vpop.xlane.xlu2 %2523  ;;  %v8350_v61 = vpop.xlane.xlu0 %2535  ;;  %v2798_v29 = vmin.f32 %v2723_v50, %v2724_v14  ;;  %v2734_v14 = vadd.f32 %v8266_v42, %v11589_v55 }
 0x4ee   :  { %11632 = vst [vmem:[#allocation420_spill] sm:$0xff] %v8348_v44  ;;  %v8356_v57 = vpop.xlane.xlu1 %2529 }
 0x4ef   :  { %11633 = vst [vmem:[#allocation421_spill] sm:$0xff] %v8350_v61  ;;  %v2731_v61 = vadd.f32 %v8263_v4, %v11383_v51  ;;  %v2743_v51 = vadd.f32 %v8263_v4, %v11547_v21 }
 0x4f0   :  { %11634 = vst [vmem:[#allocation422_spill] sm:$0xff] %v8356_v57  ;;  %v2729_v57 = vadd.f32 %v8263_v4, %v11483_v10  ;;  %v11636_v10 = vld [vmem:[#allocation12_spill] sm:$0xff] }
 0x4f2   :  { %2790 = vmin.xlane.f32.xlu2 %v2789_v35  ;;  %2802 = vmin.xlane.f32.xlu0 %v2801_v31  ;;  %v2810_v35 = vmin.f32 %v2731_v61, %v2732_v28  ;;  %v2804_v31 = vmin.f32 %v2727_v63, %v2728_v53  ;;  %v2733_v61 = vadd.f32 %v8263_v4, %v11436_v27 }
 0x4f3   :  { %2796 = vmin.xlane.f32.xlu1 %v2795_v49  ;;  %v8372_v49 = vand.u32 127, %v3381_v54 }
 0x4f5   :  { %v8366_v44 = vpop.xlane.xlu2 %2532  ;;  %v2611_v23 = vpop.xlane.xlu0 %2610  ;;  %v8387_v63 = vadd.s32 4294967288, %v8372_v49  ;;  %v8392_v36 = vadd.s32 4294967280, %v8372_v49  ;;  %v8422_v27 = vadd.s32 4294967240, %v8372_v49 }
 0x4f6   :  { %11635 = vst [vmem:[#allocation423_spill] sm:$0xff] %v8366_v44  ;;  %v2605_v15 = vpop.xlane.xlu1 %2604  ;;  %v2730_v44 = vadd.f32 %v8266_v42, %v11484_v5 }
 0x4f7   :  { %v4688_v40 = vperm.slane %v2605_v15, %v8372_v49  ;;  %v4691_v15 = vperm.slane %v2611_v23, %v8392_v36 }
 0x4fa   :  { %2799 = vmin.xlane.f32.xlu2 %v2798_v29  ;;  %2811 = vmin.xlane.f32.xlu0 %v2810_v35  ;;  %v2807_v29 = vmin.f32 %v2729_v57, %v2730_v44  ;;  %v2819_v35 = vmin.f32 %v2737_v0, %v2738_v52  ;;  %v11637_v44 = vld [vmem:[#allocation15_spill] sm:$0xff]  ;;  %v2744_v0 = vadd.f32 %v8266_v42, %v11598_v59  ;;  %v8404_v57 = vadd.s32 4294967264, %v8372_v49 }
 0x4fb   :  { %2805 = vmin.xlane.f32.xlu1 %v2804_v31  ;;  %v2813_v31 = vmin.f32 %v2733_v61, %v2734_v14  ;;  %v2736_v52 = vadd.f32 %v8266_v42, %v11637_v44 }
 0x4fd   :  { %v2608_v50 = vpop.xlane.xlu2 %2607  ;;  %v2620_v28 = vpop.xlane.xlu0 %2619 }
 0x4fe   :  { %v2614_v53 = vpop.xlane.xlu1 %2613  ;;  %v4689_v54 = vperm.slane %v2608_v50, %v8387_v63  ;;  %v2735_v50 = vadd.f32 %v8263_v4, %v11636_v10  ;;  %v2828_v10 = vmin.f32 %v2743_v51, %v2744_v0  ;;  %v11641_v0 = vld [vmem:[#allocation19_spill] sm:$0xff] }
 0x500   :  { %v4690_v5 = vsel %vm3386_vm0, %v4689_v54, %v4688_v40  ;;  %v11638_v40 = vld [vmem:[#allocation59_spill] sm:$0xff]  ;;  %v2816_v23 = vmin.f32 %v2735_v50, %v2736_v52  ;;  %v11640_v50 = vld [vmem:[#allocation18_spill] sm:$0xff] }
 0x501   :  { %v2740_v54 = vadd.f32 %v8266_v42, %v11638_v40  ;;  %v4692_v59 = vsel %vm3390_vm1, %v4691_v15, %v4690_v5  ;;  %v2741_v52 = vadd.f32 %v8263_v4, %v11640_v50  ;;  %v2742_v15 = vadd.f32 %v8266_v42, %v11641_v0 }
 0x502   :  { %2808 = vmin.xlane.f32.xlu2 %v2807_v29  ;;  %2820 = vmin.xlane.f32.xlu0 %v2819_v35  ;;  %v2739_v29 = vadd.f32 %v8263_v4, %v11594_v2  ;;  %v8412_v35 = vadd.s32 4294967272, %v8372_v49  ;;  %v8418_v2 = vadd.s32 4294967256, %v8372_v49  ;;  %v8445_v0 = vadd.s32 4294967232, %v8372_v49 }
 0x503   :  { %2814 = vmin.xlane.f32.xlu1 %v2813_v31 }
 0x504   :  { %11639 = vst [vmem:[#allocation424_spill] sm:$0xff] %v8412_v35  ;;  %v4693_v44 = vperm.slane %v2614_v53, %v8412_v35  ;;  %v2822_v55 = vmin.f32 %v2739_v29, %v2740_v54  ;;  %v2749_v53 = vadd.f32 %v8263_v4, %v11553_v16  ;;  %v4697_v51 = vperm.slane %v2620_v28, %v8418_v2 }
 0x505   :  { %v2617_v61 = vpop.xlane.xlu2 %2616  ;;  %v2629_v14 = vpop.xlane.xlu0 %2628 }
 0x506   :  { %v2623_v31 = vpop.xlane.xlu1 %2622  ;;  %v4695_v21 = vperm.slane %v2617_v61, %v8404_v57  ;;  %v4694_v40 = vsel %vm10965_vm2, %v4693_v44, %v4692_v59  ;;  %v8435_v59 = vadd.s32 4294967248, %v8372_v49  ;;  %v2745_v44 = vadd.f32 %v8263_v4, %v11600_v43  ;;  %v11642_v61 = vld [vmem:[#allocation62_spill] sm:$0xff] }
 0x507   :  { %v2746_v28 = vadd.f32 %v8266_v42, %v11642_v61 }
 0x508   :  { %v4696_v5 = vsel %vm10964_vm3, %v4695_v21, %v4694_v40 }
 0x509   :  { %v4698_v29 = vsel %vm10963_vm4, %v4697_v51, %v4696_v5  ;;  %v2831_v43 = vmin.f32 %v2745_v44, %v2746_v28  ;;  %v8450_v5 = vadd.s32 4294967224, %v8372_v49  ;;  %v11643_v51 = vld [vmem:[#allocation20_spill] sm:$0xff] }
 0x50a   :  { %2817 = vmin.xlane.f32.xlu2 %v2816_v23  ;;  %2829 = vmin.xlane.f32.xlu0 %v2828_v10  ;;  %v2750_v10 = vadd.f32 %v8266_v42, %v11554_v24  ;;  %v4699_v23 = vperm.slane %v2623_v31, %v8435_v59  ;;  %v2825_v24 = vmin.f32 %v2741_v52, %v2742_v15  ;;  %v8453_v31 = vadd.s32 4294967216, %v8372_v49  ;;  %v11644_v15 = vld [vmem:[#allocation21_spill] sm:$0xff] }
 0x50b   :  { %2823 = vmin.xlane.f32.xlu1 %v2822_v55  ;;  %v2747_v52 = vadd.f32 %v8263_v4, %v11643_v51 }
 0x50c   :  { %v2837_v16 = vmin.f32 %v2749_v53, %v2750_v10  ;;  %v4700_v50 = vsel %vm10962_vm5, %v4699_v23, %v4698_v29  ;;  %v4703_v53 = vperm.slane %v2629_v14, %v8445_v0  ;;  %v2748_v10 = vadd.f32 %v8266_v42, %v11644_v15  ;;  %v11646_v29 = vld [vmem:[#allocation65_spill] sm:$0xff] }
 0x50d   :  { %v2626_v21 = vpop.xlane.xlu2 %2625  ;;  %v2638_v55 = vpop.xlane.xlu0 %2637  ;;  %v2751_v14 = vadd.f32 %v8263_v4, %v11646_v29 }
 0x50e   :  { %v4701_v40 = vperm.slane %v2626_v21, %v8422_v27  ;;  %v2632_v54 = vpop.xlane.xlu1 %2631 }
 0x50f   :  { %v4705_v23 = vperm.slane %v2632_v54, %v8450_v5  ;;  %v8478_v54 = vadd.s32 4294967200, %v8372_v49 }
 0x510   :  { %v4702_v1 = vsel %vm3410_vm6, %v4701_v40, %v4700_v50 }
 0x511   :  { %v4704_v21 = vsel %vm10952_vm7, %v4703_v53, %v4702_v1  ;;  %v2834_v53 = vmin.f32 %v2747_v52, %v2748_v10  ;;  %11648 = vst [vmem:[#allocation425_spill] sm:$0xff] %v8478_v54  ;;  %v11649_v10 = vld [vmem:[#allocation23_spill] sm:$0xff] }
 0x512   :  { %2826 = vmin.xlane.f32.xlu2 %v2825_v24  ;;  %2838 = vmin.xlane.f32.xlu0 %v2837_v16  ;;  %v2755_v24 = vadd.f32 %v8263_v4, %v11610_v56  ;;  %v11645_v16 = vld [vmem:[#allocation64_spill] sm:$0xff]  ;;  %v8472_v56 = vadd.s32 4294967208, %v8372_v49  ;;  %v4706_v1 = vsel %vm10951_vm8, %v4705_v23, %v4704_v21  ;;  %v2761_v21 = vadd.f32 %v8263_v4, %v11567_v37 }
 0x513   :  { %2832 = vmin.xlane.f32.xlu1 %v2831_v43  ;;  %v2756_v50 = vadd.f32 %v8266_v42, %v11645_v16  ;;  %v11647_v43 = vld [vmem:[#allocation66_spill] sm:$0xff]  ;;  %v2757_v23 = vadd.f32 %v8263_v4, %v11615_v17 }
 0x514   :  { %v2752_v40 = vadd.f32 %v8266_v42, %v11647_v43  ;;  %v4709_v30 = vperm.slane %v2638_v55, %v8472_v56 }
 0x515   :  { %v2635_v44 = vpop.xlane.xlu2 %2634  ;;  %v2647_v28 = vpop.xlane.xlu0 %2646  ;;  %v2846_v16 = vmin.f32 %v2755_v24, %v2756_v50  ;;  %v11650_v24 = vld [vmem:[#allocation67_spill] sm:$0xff]  ;;  %v8493_v50 = vadd.s32 4294967184, %v8372_v49 }
 0x516   :  { %v4707_v15 = vperm.slane %v2635_v44, %v8453_v31  ;;  %v2641_v51 = vpop.xlane.xlu1 %2640  ;;  %v2840_v29 = vmin.f32 %v2751_v14, %v2752_v40  ;;  %v8481_v44 = vadd.s32 4294967192, %v8372_v49  ;;  %v2754_v55 = vadd.f32 %v8266_v42, %v11650_v24 }
 0x517   :  { %11651 = vst [vmem:[#allocation426_spill] sm:$0xff] %v8493_v50  ;;  %v4711_v14 = vperm.slane %v2641_v51, %v8478_v54  ;;  %v4715_v51 = vperm.slane %v2647_v28, %v8493_v50 }
 0x518   :  { %v4708_v61 = vsel %vm10950_vm9, %v4707_v15, %v4706_v1  ;;  %v2753_v15 = vadd.f32 %v8263_v4, %v11649_v10  ;;  %v8501_v1 = vadd.s32 4294967176, %v8372_v49 }
 0x519   :  { %v4710_v52 = vsel %vm10949_vm10, %v4709_v30, %v4708_v61  ;;  %v11652_v30 = vld [vmem:[#allocation68_spill] sm:$0xff] }
 0x51a   :  { %2835 = vmin.xlane.f32.xlu2 %v2834_v53  ;;  %2847 = vmin.xlane.f32.xlu0 %v2846_v16  ;;  %v2762_v16 = vadd.f32 %v8266_v42, %v11568_v19  ;;  %v2758_v61 = vadd.f32 %v8266_v42, %v11652_v30  ;;  %v4712_v37 = vsel %vm3430_vm11, %v4711_v14, %v4710_v52  ;;  %v8515_v52 = vld [vmem:[%s10631_s4] sm:$0xff] }
 0x51b   :  { %2841 = vmin.xlane.f32.xlu1 %v2840_v29  ;;  %v2843_v17 = vmin.f32 %v2753_v15, %v2754_v55  ;;  %11654 = vst [vmem:[#allocation428_spill] sm:$0xff] %v8515_v52  ;;  %v2763_v14 = vadd.f32 %v8263_v4, %v11620_v7 }
 0x51c   :  { %v2855_v43 = vmin.f32 %v2761_v21, %v2762_v16  ;;  %v2849_v54 = vmin.f32 %v2757_v23, %v2758_v61  ;;  %v11655_v21 = vld [vmem:[#allocation70_spill] sm:$0xff] }
 0x51d   :  { %v2644_v29 = vpop.xlane.xlu2 %2643  ;;  %v2656_v40 = vpop.xlane.xlu0 %2655 }
 0x51e   :  { %v4713_v53 = vperm.slane %v2644_v29, %v8481_v44  ;;  %v2650_v19 = vpop.xlane.xlu1 %2649  ;;  %v4720_v29 = vperm.slane %v2656_v40, %v8387_v63 }
 0x51f   :  { %v4717_v10 = vperm.slane %v2650_v19, %v8501_v1  ;;  %v5079_v19 = vld [vmem:[%s10631_s4 + $0x8] sm:$0xff] }
 0x520   :  { %v4714_v24 = vsel %vm3434_vm12, %v4713_v53, %v4712_v37  ;;  %v8518_v37 = vperm.slane %v8515_v52, 6  ;;  %v8523_v28 = vperm.slane %v5079_v19, 6 }
 0x521   :  { %v4716_v30 = vsel %vm3438_vm13, %v4715_v51, %v4714_v24 }
 0x522   :  { %v8510_v12 = vsel %vm3442_vm14, %v4717_v10, %v4716_v30  ;;  %2844 = vmin.xlane.f32.xlu2 %v2843_v17  ;;  %2856 = vmin.xlane.f32.xlu0 %v2855_v43  ;;  %v2759_v10 = vadd.f32 %v8263_v4, %v11655_v21  ;;  %v11656_v17 = vld [vmem:[#allocation71_spill] sm:$0xff]  ;;  %v2865_v15 = vadd.f32 %v8518_v37, %v11572_v41  ;;  %v11657_v4 = vld [vmem:[#allocation13_spill] sm:$0xff] }
 0x523   :  { %11653 = vst [vmem:[#allocation427_spill] sm:$0xff] %v8510_v12  ;;  %2850 = vmin.xlane.f32.xlu1 %v2849_v54  ;;  %v2760_v43 = vadd.f32 %v8266_v42, %v11656_v17  ;;  %v2866_v24 = vadd.f32 %v8523_v28, %v11573_v39  ;;  %v2764_v54 = vadd.f32 %v8266_v42, %v11621_v32  ;;  %v11658_v39 = vld [vmem:[#allocation14_spill] sm:$0xff] }
 0x524   :  { %v2863_v42 = vadd.f32 %v8518_v37, %v11657_v4  ;;  %v2864_v40 = vadd.f32 %v8523_v28, %v11658_v39 }
 0x525   :  { %v2653_v55 = vpop.xlane.xlu2 %2652  ;;  %v2665_v16 = vpop.xlane.xlu0 %2664  ;;  %v2852_v51 = vmin.f32 %v2759_v10, %v2760_v43  ;;  %v2930_v19 = vmin.f32 %v2865_v15, %v2866_v24  ;;  %v2858_v52 = vmin.f32 %v2763_v14, %v2764_v54  ;;  %v2867_v15 = vadd.f32 %v8518_v37, %v11316_v25 }
 0x526   :  { %v4719_v23 = vperm.slane %v2653_v55, %v8372_v49  ;;  %v2659_v30 = vpop.xlane.xlu1 %2658  ;;  %v2871_v55 = vadd.f32 %v8518_v37, %v5703_v33  ;;  %v4726_v54 = vperm.slane %v2665_v16, %v8404_v57  ;;  %v2870_v16 = vadd.f32 %v8523_v28, %v5682_v6 }
 0x527   :  { %v4722_v61 = vperm.slane %v2659_v30, %v8392_v36 }
 0x528   :  { %v4721_v53 = vsel %vm3386_vm0, %v4720_v29, %v4719_v23  ;;  %v2872_v29 = vadd.f32 %v8523_v28, %v5706_v3 }
 0x529   :  { %v4723_v12 = vsel %vm3390_vm1, %v4722_v61, %v4721_v53  ;;  %v2927_v61 = vmin.f32 %v2863_v42, %v2864_v40  ;;  %v2878_v42 = vadd.f32 %v8523_v28, %v5752_v18 }
 0x52a   :  { %2853 = vmin.xlane.f32.xlu2 %v2852_v51  ;;  %2931 = vmin.xlane.f32.xlu0 %v2930_v19  ;;  %v2939_v53 = vmin.f32 %v2871_v55, %v2872_v29  ;;  %v2873_v29 = vadd.f32 %v8518_v37, %v5733_v58 }
 0x52b   :  { %2859 = vmin.xlane.f32.xlu1 %v2858_v52  ;;  %v2868_v52 = vadd.f32 %v8523_v28, %v11625_v38 }
 0x52d   :  { %v2662_v10 = vpop.xlane.xlu2 %2661  ;;  %v2674_v43 = vpop.xlane.xlu0 %2673  ;;  %v2933_v19 = vmin.f32 %v2867_v15, %v2868_v52  ;;  %v2874_v15 = vadd.f32 %v8523_v28, %v5736_v62 }
 0x52e   :  { %v4724_v24 = vperm.slane %v2662_v10, %v8412_v35  ;;  %v2668_v14 = vpop.xlane.xlu1 %2667  ;;  %v2869_v10 = vadd.f32 %v8518_v37, %v5679_v46 }
 0x52f   :  { %v4728_v30 = vperm.slane %v2668_v14, %v8418_v2  ;;  %v4732_v14 = vperm.slane %v2674_v43, %v8422_v27  ;;  %v2876_v43 = vadd.f32 %v8523_v28, %v11069_v60 }
 0x530   :  { %v4725_v23 = vsel %vm10965_vm2, %v4724_v24, %v4723_v12  ;;  %v2877_v12 = vadd.f32 %v8518_v37, %v5749_v34 }
 0x531   :  { %v4727_v51 = vsel %vm10964_vm3, %v4726_v54, %v4725_v23 }
 0x532   :  { %v4729_v3 = vsel %vm10963_vm4, %v4728_v30, %v4727_v51  ;;  %2928 = vmin.xlane.f32.xlu2 %v2927_v61  ;;  %2940 = vmin.xlane.f32.xlu0 %v2939_v53  ;;  %v2936_v30 = vmin.f32 %v2869_v10, %v2870_v16  ;;  %v2948_v61 = vmin.f32 %v2877_v12, %v2878_v42 }
 0x533   :  { %2934 = vmin.xlane.f32.xlu1 %v2933_v19  ;;  %v2942_v51 = vmin.f32 %v2873_v29, %v2874_v15  ;;  %v2884_v10 = vadd.f32 %v8523_v28, %v11275_v48  ;;  %v2879_v42 = vadd.f32 %v8518_v37, %v5777_v26  ;;  %v2880_v29 = vadd.f32 %v8523_v28, %v5782_v9 }
 0x535   :  { %v2671_v40 = vpop.xlane.xlu2 %2670  ;;  %v2683_v55 = vpop.xlane.xlu0 %2682 }
 0x536   :  { %v4730_v52 = vperm.slane %v2671_v40, %v8435_v59  ;;  %v2677_v24 = vpop.xlane.xlu1 %2676  ;;  %v2875_v40 = vadd.f32 %v8518_v37, %v5691_v22 }
 0x537   :  { %v4734_v23 = vperm.slane %v2677_v24, %v8445_v0  ;;  %v4738_v24 = vperm.slane %v2683_v55, %v8453_v31  ;;  %v2882_v55 = vadd.f32 %v8523_v28, %v11071_v20 }
 0x538   :  { %v4731_v54 = vsel %vm10962_vm5, %v4730_v52, %v4729_v3  ;;  %v2883_v3 = vadd.f32 %v8518_v37, %v5797_v11 }
 0x539   :  { %v4733_v53 = vsel %vm3410_vm6, %v4732_v14, %v4731_v54 }
 0x53a   :  { %v4735_v19 = vsel %vm10952_vm7, %v4734_v23, %v4733_v53  ;;  %2937 = vmin.xlane.f32.xlu2 %v2936_v30  ;;  %2949 = vmin.xlane.f32.xlu0 %v2948_v61  ;;  %v2945_v23 = vmin.f32 %v2875_v40, %v2876_v43  ;;  %v2957_v30 = vmin.f32 %v2883_v3, %v2884_v10 }
 0x53b   :  { %2943 = vmin.xlane.f32.xlu1 %v2942_v51  ;;  %v2951_v53 = vmin.f32 %v2879_v42, %v2880_v29  ;;  %v2890_v40 = vadd.f32 %v8523_v28, %v11431_v13  ;;  %v2885_v10 = vadd.f32 %v8518_v37, %v11173_v8  ;;  %v11659_v42 = vld [vmem:[#allocation50_spill] sm:$0xff] }
 0x53c   :  { %v2886_v29 = vadd.f32 %v8523_v28, %v11659_v42 }
 0x53d   :  { %v2680_v16 = vpop.xlane.xlu2 %2679  ;;  %v2692_v12 = vpop.xlane.xlu0 %2691 }
 0x53e   :  { %v4736_v15 = vperm.slane %v2680_v16, %v8450_v5  ;;  %v2686_v52 = vpop.xlane.xlu1 %2685  ;;  %v2881_v16 = vadd.f32 %v8518_v37, %v11070_v47  ;;  %v2960_v42 = vmin.f32 %v2885_v10, %v2886_v29  ;;  %v11668_v29 = vld [vmem:[#allocation24_spill] sm:$0xff] }
 0x53f   :  { %v4740_v54 = vperm.slane %v2686_v52, %v8472_v56 }
 0x540   :  { %v4737_v14 = vsel %vm10951_vm8, %v4736_v15, %v4735_v19  ;;  %v2889_v19 = vadd.f32 %v8518_v37, %v11279_v45  ;;  %v11660_v15 = vld [vmem:[#allocation425_spill] sm:$0xff]  ;;  %v11662_v45 = vld [vmem:[#allocation76_spill] sm:$0xff] }
 0x541   :  { %v4739_v61 = vsel %vm10950_vm9, %v4738_v24, %v4737_v14  ;;  %v11661_v14 = vld [vmem:[#allocation74_spill] sm:$0xff]  ;;  %v3383_v48 = vperm.slane %v11662_v45, %v8372_v49 }
 0x542   :  { %v4741_v51 = vsel %vm10949_vm10, %v4740_v54, %v4739_v61  ;;  %2946 = vmin.xlane.f32.xlu2 %v2945_v23  ;;  %2958 = vmin.xlane.f32.xlu0 %v2957_v30  ;;  %v3385_v54 = vperm.slane %v11661_v14, %v8387_v63  ;;  %v4744_v23 = vperm.slane %v2692_v12, %v8481_v44  ;;  %v11666_v45 = vld [vmem:[#allocation42_spill] sm:$0xff]  ;;  %v11669_v14 = vld [vmem:[#allocation55_spill] sm:$0xff] }
 0x543   :  { %2952 = vmin.xlane.f32.xlu1 %v2951_v53  ;;  %v2954_v53 = vmin.f32 %v2881_v16, %v2882_v55  ;;  %v2966_v13 = vmin.f32 %v2889_v19, %v2890_v40  ;;  %v11665_v16 = vld [vmem:[#allocation41_spill] sm:$0xff]  ;;  %v2888_v19 = vadd.f32 %v8523_v28, %v11666_v45 }
 0x544   :  { %v3387_v12 = vsel %vm3386_vm0, %v3385_v54, %v3383_v48  ;;  %v2887_v55 = vadd.f32 %v8518_v37, %v11665_v16  ;;  %v11667_v40 = vld [vmem:[#allocation57_spill] sm:$0xff]  ;;  %v2891_v48 = vadd.f32 %v8518_v37, %v11669_v14  ;;  %v11670_v54 = vld [vmem:[#allocation56_spill] sm:$0xff] }
 0x545   :  { %v2689_v43 = vpop.xlane.xlu2 %2688  ;;  %v2767_v3 = vpop.xlane.xlu0 %2766  ;;  %v2895_v10 = vadd.f32 %v8518_v37, %v11667_v40 }
 0x546   :  { %v4742_v52 = vperm.slane %v2689_v43, %v11660_v15  ;;  %v2695_v24 = vpop.xlane.xlu1 %2694  ;;  %v11663_v43 = vld [vmem:[#allocation75_spill] sm:$0xff]  ;;  %v3989_v45 = vperm.slane %v2767_v3, %v8372_v49 }
 0x547   :  { %v4746_v61 = vperm.slane %v2695_v24, %v8493_v50  ;;  %v3389_v8 = vperm.slane %v11663_v43, %v8392_v36 }
 0x548   :  { %v4743_v30 = vsel %vm3430_vm11, %v4742_v52, %v4741_v51  ;;  %v11664_v51 = vld [vmem:[#allocation77_spill] sm:$0xff] }
 0x549   :  { %v4745_v11 = vsel %vm3434_vm12, %v4744_v23, %v4743_v30  ;;  %v3393_v52 = vperm.slane %v11664_v51, %v8412_v35  ;;  %v3391_v23 = vsel %vm3390_vm1, %v3389_v8, %v3387_v12  ;;  %v11671_v30 = vld [vmem:[#allocation79_spill] sm:$0xff] }
 0x54a   :  { %v4747_v20 = vsel %vm3438_vm13, %v4746_v61, %v4745_v11  ;;  %2955 = vmin.xlane.f32.xlu2 %v2954_v53  ;;  %2967 = vmin.xlane.f32.xlu0 %v2966_v13  ;;  %v2896_v11 = vadd.f32 %v8523_v28, %v11668_v29  ;;  %v3397_v61 = vperm.slane %v11671_v30, %v8404_v57  ;;  %v11672_v29 = vld [vmem:[#allocation80_spill] sm:$0xff] }
 0x54b   :  { %2961 = vmin.xlane.f32.xlu1 %v2960_v42  ;;  %v2892_v42 = vadd.f32 %v8523_v28, %v11670_v54  ;;  %v3395_v51 = vsel %vm10965_vm2, %v3393_v52, %v3391_v23  ;;  %v3401_v40 = vperm.slane %v11672_v29, %v8418_v2  ;;  %v2963_v54 = vmin.f32 %v2887_v55, %v2888_v19  ;;  %v11674_v29 = vld [vmem:[#allocation47_spill] sm:$0xff]  ;;  %v11675_v23 = vld [vmem:[#allocation48_spill] sm:$0xff] }
 0x54c   :  { %v2975_v8 = vmin.f32 %v2895_v10, %v2896_v11  ;;  %v2893_v3 = vadd.f32 %v8518_v37, %v11674_v29  ;;  %v11677_v19 = vld [vmem:[#allocation59_spill] sm:$0xff]  ;;  %v11678_v10 = vld [vmem:[#allocation78_spill] sm:$0xff] }
 0x54d   :  { %v2698_v24 = vpop.xlane.xlu2 %2697  ;;  %v2776_v13 = vpop.xlane.xlu0 %2775  ;;  %v2969_v30 = vmin.f32 %v2891_v48, %v2892_v42  ;;  %v3405_v11 = vperm.slane %v11678_v10, %v8435_v59  ;;  %v11680_v42 = vld [vmem:[#allocation15_spill] sm:$0xff] }
 0x54e   :  { %v4748_v53 = vperm.slane %v2698_v24, %v8501_v1  ;;  %v2770_v43 = vpop.xlane.xlu1 %2769  ;;  %v3399_v24 = vsel %vm10964_vm3, %v3397_v61, %v3395_v51  ;;  %v2898_v61 = vadd.f32 %v8523_v28, %v11680_v42  ;;  %v3994_v10 = vperm.slane %v2776_v13, %v8412_v35 }
 0x54f   :  { %v3990_v14 = vperm.slane %v2770_v43, %v8387_v63  ;;  %v3403_v52 = vsel %vm10963_vm4, %v3401_v40, %v3399_v24  ;;  %v2894_v43 = vadd.f32 %v8523_v28, %v11675_v23 }
 0x550   :  { %v8645_v16 = vsel %vm3442_vm14, %v4748_v53, %v4747_v20  ;;  %v11676_v20 = vld [vmem:[#allocation11_spill] sm:$0xff] }
 0x551   :  { %11673 = vst [vmem:[#allocation13_spill] sm:$0xff] %v8645_v16  ;;  %v3991_v12 = vsel %vm3386_vm0, %v3990_v14, %v3989_v45  ;;  %v2901_v55 = vadd.f32 %v8518_v37, %v11676_v20  ;;  %v2902_v45 = vadd.f32 %v8523_v28, %v11677_v19  ;;  %v11682_v16 = vld [vmem:[#allocation83_spill] sm:$0xff]  ;;  %v2972_v23 = vmin.f32 %v2893_v3, %v2894_v43 }
 0x552   :  { %2964 = vmin.xlane.f32.xlu2 %v2963_v54  ;;  %2976 = vmin.xlane.f32.xlu0 %v2975_v8  ;;  %v11679_v54 = vld [vmem:[#allocation12_spill] sm:$0xff]  ;;  %v3407_v8 = vsel %vm10962_vm5, %v3405_v11, %v3403_v52  ;;  %v3413_v19 = vperm.slane %v11682_v16, %v8445_v0  ;;  %v11683_v52 = vld [vmem:[#allocation94_spill] sm:$0xff]  ;;  %v11684_v16 = vld [vmem:[#allocation81_spill] sm:$0xff] }
 0x553   :  { %2970 = vmin.xlane.f32.xlu1 %v2969_v30  ;;  %v2897_v40 = vadd.f32 %v8518_v37, %v11679_v54  ;;  %v11681_v30 = vld [vmem:[#allocation82_spill] sm:$0xff]  ;;  %v2984_v29 = vmin.f32 %v2901_v55, %v2902_v45  ;;  %v3445_v11 = vperm.slane %v11683_v52, %v8387_v63  ;;  %v3417_v13 = vperm.slane %v11684_v16, %v8450_v5  ;;  %v11685_v3 = vld [vmem:[#allocation91_spill] sm:$0xff]  ;;  %v11687_v45 = vld [vmem:[#allocation53_spill] sm:$0xff] }
 0x554   :  { %v3409_v24 = vperm.slane %v11681_v30, %v8422_v27  ;;  %v3444_v43 = vperm.slane %v11685_v3, %v8372_v49  ;;  %v11694_v16 = vld [vmem:[#allocation19_spill] sm:$0xff] }
 0x555   :  { %v2773_v14 = vpop.xlane.xlu2 %2772  ;;  %v2785_v48 = vpop.xlane.xlu0 %2784  ;;  %v2904_v3 = vadd.f32 %v8523_v28, %v11694_v16 }
 0x556   :  { %v3992_v53 = vperm.slane %v2773_v14, %v8392_v36  ;;  %v2779_v51 = vpop.xlane.xlu1 %2778  ;;  %v2978_v14 = vmin.f32 %v2897_v40, %v2898_v61  ;;  %v3411_v47 = vsel %vm3410_vm6, %v3409_v24, %v3407_v8  ;;  %v2899_v40 = vadd.f32 %v8518_v37, %v11687_v45  ;;  %v11688_v61 = vld [vmem:[#allocation54_spill] sm:$0xff] }
 0x557   :  { %v3996_v54 = vperm.slane %v2779_v51, %v8404_v57  ;;  %v11692_v51 = vld [vmem:[#allocation107_spill] sm:$0xff]  ;;  %v4000_v16 = vperm.slane %v2785_v48, %v8435_v59 }
 0x558   :  { %v3993_v20 = vsel %vm3390_vm1, %v3992_v53, %v3991_v12  ;;  %v3415_v12 = vsel %vm10952_vm7, %v3413_v19, %v3411_v47  ;;  %v11691_v47 = vld [vmem:[#allocation85_spill] sm:$0xff]  ;;  %v4209_v8 = vperm.slane %v11692_v51, %v8387_v63  ;;  %v11696_v51 = vld [vmem:[#allocation90_spill] sm:$0xff] }
 0x559   :  { %v3995_v42 = vsel %vm10965_vm2, %v3994_v10, %v3993_v20  ;;  %v11686_v20 = vld [vmem:[#allocation109_spill] sm:$0xff]  ;;  %v3421_v19 = vperm.slane %v11691_v47, %v8453_v31  ;;  %v3447_v18 = vperm.slane %v11696_v51, %v8392_v36 }
 0x55a   :  { %v3997_v30 = vsel %vm10964_vm3, %v3996_v54, %v3995_v42  ;;  %2973 = vmin.xlane.f32.xlu2 %v2972_v23  ;;  %2985 = vmin.xlane.f32.xlu0 %v2984_v29  ;;  %v4208_v55 = vperm.slane %v11686_v20, %v8372_v49  ;;  %v2900_v54 = vadd.f32 %v8523_v28, %v11688_v61  ;;  %v11689_v23 = vld [vmem:[#allocation17_spill] sm:$0xff]  ;;  %v11690_v42 = vld [vmem:[#allocation62_spill] sm:$0xff] }
 0x55b   :  { %2979 = vmin.xlane.f32.xlu1 %v2978_v14  ;;  %v2907_v29 = vadd.f32 %v8518_v37, %v11689_v23  ;;  %v2908_v53 = vadd.f32 %v8523_v28, %v11690_v42  ;;  %v11693_v14 = vld [vmem:[#allocation18_spill] sm:$0xff]  ;;  %v3419_v20 = vsel %vm10951_vm8, %v3417_v13, %v3415_v12  ;;  %v3446_v23 = vsel %vm3386_vm0, %v3445_v11, %v3444_v43  ;;  %v11695_v42 = vld [vmem:[#allocation111_spill] sm:$0xff] }
 0x55c   :  { %v2903_v52 = vadd.f32 %v8518_v37, %v11693_v14  ;;  %v4211_v61 = vperm.slane %v11695_v42, %v8392_v36  ;;  %v4210_v34 = vsel %vm3386_vm0, %v4209_v8, %v4208_v55  ;;  %v11697_v14 = vld [vmem:[#allocation112_spill] sm:$0xff]  ;;  %v2981_v12 = vmin.f32 %v2899_v40, %v2900_v54  ;;  %v11698_v42 = vld [vmem:[#allocation86_spill] sm:$0xff]  ;;  %v11699_v55 = vld [vmem:[#allocation97_spill] sm:$0xff] }
 0x55d   :  { %v2782_v24 = vpop.xlane.xlu2 %2781  ;;  %v2794_v10 = vpop.xlane.xlu0 %2793  ;;  %v4213_v60 = vperm.slane %v11697_v14, %v8412_v35  ;;  %v2993_v43 = vmin.f32 %v2907_v29, %v2908_v53  ;;  %v3448_v22 = vsel %vm3390_vm1, %v3447_v18, %v3446_v23  ;;  %v3451_v8 = vperm.slane %v11699_v55, %v8404_v57  ;;  %v11701_v54 = vld [vmem:[#allocation96_spill] sm:$0xff]  ;;  %v11702_v29 = vld [vmem:[#allocation9_spill] sm:$0xff]  ;;  %v11709_v55 = vld [vmem:[#allocation95_spill] sm:$0xff] }
 0x55e   :  { %v3998_v47 = vperm.slane %v2782_v24, %v8418_v2  ;;  %v2788_v45 = vpop.xlane.xlu1 %2787  ;;  %v3425_v24 = vperm.slane %v11698_v42, %v8472_v56  ;;  %v2987_v9 = vmin.f32 %v2903_v52, %v2904_v3  ;;  %v4212_v14 = vsel %vm3390_vm1, %v4211_v61, %v4210_v34  ;;  %v11703_v52 = vld [vmem:[#allocation58_spill] sm:$0xff]  ;;  %v11704_v61 = vld [vmem:[#allocation65_spill] sm:$0xff] }
 0x55f   :  { %v4002_v11 = vperm.slane %v2788_v45, %v8422_v27  ;;  %v11700_v45 = vld [vmem:[#allocation84_spill] sm:$0xff]  ;;  %v3449_v18 = vperm.slane %v11701_v54, %v8412_v35  ;;  %v4214_v23 = vsel %vm10965_vm2, %v4213_v60, %v4212_v14  ;;  %v2905_v53 = vadd.f32 %v8518_v37, %v11702_v29  ;;  %v11705_v3 = vld [vmem:[#allocation66_spill] sm:$0xff] }
 0x560   :  { %v3999_v13 = vsel %vm10963_vm4, %v3998_v47, %v3997_v30  ;;  %v3423_v30 = vsel %vm10950_vm9, %v3421_v19, %v3419_v20  ;;  %v3429_v40 = vperm.slane %v11700_v45, %v11660_v15  ;;  %v2906_v34 = vadd.f32 %v8523_v28, %v11703_v52  ;;  %v11706_v47 = vld [vmem:[#allocation110_spill] sm:$0xff] }
 0x561   :  { %v4001_v51 = vsel %vm10962_vm5, %v4000_v16, %v3999_v13  ;;  %v2913_v16 = vadd.f32 %v8518_v37, %v11704_v61  ;;  %v2914_v19 = vadd.f32 %v8523_v28, %v11705_v3  ;;  %v3450_v20 = vsel %vm10965_vm2, %v3449_v18, %v3448_v22  ;;  %v11711_v61 = vld [vmem:[#allocation115_spill] sm:$0xff] }
 0x562   :  { %v4003_v48 = vsel %vm3410_vm6, %v4002_v11, %v4001_v51  ;;  %2982 = vmin.xlane.f32.xlu2 %v2981_v12  ;;  %2994 = vmin.xlane.f32.xlu0 %v2993_v43  ;;  %v4215_v13 = vperm.slane %v11706_v47, %v8404_v57  ;;  %v11708_v43 = vld [vmem:[#allocation21_spill] sm:$0xff]  ;;  %v3427_v51 = vsel %vm10949_vm10, %v3425_v24, %v3423_v30  ;;  %v11710_v47 = vld [vmem:[#allocation114_spill] sm:$0xff] }
 0x563   :  { %2988 = vmin.xlane.f32.xlu1 %v2987_v9  ;;  %v11707_v9 = vld [vmem:[#allocation20_spill] sm:$0xff]  ;;  %v2910_v42 = vadd.f32 %v8523_v28, %v11708_v43  ;;  %v3453_v14 = vperm.slane %v11709_v55, %v8418_v2  ;;  %v3452_v45 = vsel %vm10964_vm3, %v3451_v8, %v3450_v20  ;;  %v4217_v3 = vperm.slane %v11710_v47, %v8418_v2 }
 0x564   :  { %v2909_v12 = vadd.f32 %v8518_v37, %v11707_v9  ;;  %v4216_v18 = vsel %vm10964_vm3, %v4215_v13, %v4214_v23  ;;  %v4219_v9 = vperm.slane %v11711_v61, %v8435_v59  ;;  %v4006_v43 = vperm.slane %v2794_v10, %v8450_v5  ;;  %v11712_v8 = vld [vmem:[#allocation88_spill] sm:$0xff] }
 0x565   :  { %v2791_v11 = vpop.xlane.xlu2 %2790  ;;  %v2803_v60 = vpop.xlane.xlu0 %2802  ;;  %v2990_v55 = vmin.f32 %v2905_v53, %v2906_v34  ;;  %v3002_v52 = vmin.f32 %v2913_v16, %v2914_v19  ;;  %v3433_v20 = vperm.slane %v11712_v8, %v8481_v44  ;;  %v11713_v47 = vld [vmem:[#allocation100_spill] sm:$0xff]  ;;  %v4218_v61 = vsel %vm10963_vm4, %v4217_v3, %v4216_v18  ;;  %v11714_v53 = vld [vmem:[#allocation89_spill] sm:$0xff]  ;;  %v11715_v16 = vld [vmem:[#allocation99_spill] sm:$0xff] }
 0x566   :  { %v4004_v22 = vperm.slane %v2791_v11, %v8445_v0  ;;  %v2797_v54 = vpop.xlane.xlu1 %2796  ;;  %v3454_v11 = vsel %vm10963_vm4, %v3453_v14, %v3452_v45  ;;  %v2996_v13 = vmin.f32 %v2909_v12, %v2910_v42  ;;  %v3457_v29 = vperm.slane %v11713_v47, %v8422_v27  ;;  %v11716_v12 = vld [vmem:[#allocation60_spill] sm:$0xff]  ;;  %v11717_v14 = vld [vmem:[#allocation61_spill] sm:$0xff]  ;;  %v11722_v8 = vld [vmem:[#allocation67_spill] sm:$0xff] }
 0x567   :  { %v4008_v30 = vperm.slane %v2797_v54, %v8453_v31  ;;  %v3437_v34 = vperm.slane %v11714_v53, %v8493_v50  ;;  %v3455_v19 = vperm.slane %v11715_v16, %v8435_v59  ;;  %v2911_v42 = vadd.f32 %v8518_v37, %v11716_v12  ;;  %v11718_v45 = vld [vmem:[#allocation8_spill] sm:$0xff]  ;;  %v11720_v54 = vld [vmem:[#allocation113_spill] sm:$0xff]  ;;  %v11723_v47 = vld [vmem:[#allocation98_spill] sm:$0xff] }
 0x568   :  { %v4005_v24 = vsel %vm10952_vm7, %v4004_v22, %v4003_v48  ;;  %v3431_v48 = vsel %vm3430_vm11, %v3429_v40, %v3427_v51  ;;  %v2912_v3 = vadd.f32 %v8523_v28, %v11717_v14  ;;  %v11719_v22 = vld [vmem:[#allocation68_spill] sm:$0xff]  ;;  %v4221_v18 = vperm.slane %v11720_v54, %v8422_v27  ;;  %v11724_v54 = vld [vmem:[#allocation117_spill] sm:$0xff] }
 0x569   :  { %v4007_v23 = vsel %vm10951_vm8, %v4006_v43, %v4005_v24  ;;  %v4220_v43 = vsel %vm10962_vm5, %v4219_v9, %v4218_v61  ;;  %v2920_v40 = vadd.f32 %v8523_v28, %v11719_v22  ;;  %v3456_v51 = vsel %vm10962_vm5, %v3455_v19, %v3454_v11 }
 0x56a   :  { %v4009_v10 = vsel %vm10950_vm9, %v4008_v30, %v4007_v23  ;;  %2991 = vmin.xlane.f32.xlu2 %v2990_v55  ;;  %3003 = vmin.xlane.f32.xlu0 %v3002_v52  ;;  %v2919_v52 = vadd.f32 %v8518_v37, %v11718_v45  ;;  %v11721_v30 = vld [vmem:[#allocation23_spill] sm:$0xff]  ;;  %v2916_v23 = vadd.f32 %v8523_v28, %v11722_v8  ;;  %v11725_v45 = vld [vmem:[#allocation118_spill] sm:$0xff] }
 0x56b   :  { %2997 = vmin.xlane.f32.xlu1 %v2996_v13  ;;  %v2915_v55 = vadd.f32 %v8518_v37, %v11721_v30  ;;  %v3435_v13 = vsel %vm3434_vm12, %v3433_v20, %v3431_v48  ;;  %v3459_v61 = vperm.slane %v11723_v47, %v8445_v0  ;;  %v3458_v53 = vsel %vm3410_vm6, %v3457_v29, %v3456_v51 }
 0x56c   :  { %v4222_v19 = vsel %vm3410_vm6, %v4221_v18, %v4220_v43  ;;  %v4223_v22 = vperm.slane %v11724_v54, %v8445_v0  ;;  %v4225_v30 = vperm.slane %v11725_v45, %v8450_v5  ;;  %v4012_v8 = vperm.slane %v2803_v60, %v11660_v15  ;;  %v11727_v60 = vld [vmem:[#allocation102_spill] sm:$0xff] }
 0x56d   :  { %v2800_v24 = vpop.xlane.xlu2 %2799  ;;  %v2812_v9 = vpop.xlane.xlu0 %2811  ;;  %v2999_v47 = vmin.f32 %v2911_v42, %v2912_v3  ;;  %v3011_v14 = vmin.f32 %v2919_v52, %v2920_v40  ;;  %v8799_v29 = vsel %vm3438_vm13, %v3437_v34, %v3435_v13  ;;  %v3005_v43 = vmin.f32 %v2915_v55, %v2916_v23  ;;  %v11728_v42 = vld [vmem:[#allocation101_spill] sm:$0xff]  ;;  %v11729_v34 = vld [vmem:[#allocation116_spill] sm:$0xff]  ;;  %v11730_v55 = vld [vmem:[#allocation63_spill] sm:$0xff] }
 0x56e   :  { %v4010_v11 = vperm.slane %v2800_v24, %v8472_v56  ;;  %v2806_v16 = vpop.xlane.xlu1 %2805  ;;  %11726 = vst [vmem:[#allocation14_spill] sm:$0xff] %v8799_v29  ;;  %v3460_v18 = vsel %vm10952_vm7, %v3459_v61, %v3458_v53  ;;  %v4224_v24 = vsel %vm10952_vm7, %v4223_v22, %v4222_v19  ;;  %v4227_v52 = vperm.slane %v11729_v34, %v8453_v31  ;;  %v11731_v22 = vld [vmem:[#allocation64_spill] sm:$0xff]  ;;  %v11732_v53 = vld [vmem:[#allocation103_spill] sm:$0xff] }
 0x56f   :  { %v4014_v48 = vperm.slane %v2806_v16, %v8481_v44  ;;  %v4226_v40 = vsel %vm10951_vm8, %v4225_v30, %v4224_v24  ;;  %v2918_v23 = vadd.f32 %v8523_v28, %v11731_v22  ;;  %v2926_v13 = vadd.f32 %v8523_v28, %v11621_v32  ;;  %v11736_v34 = vld [vmem:[#allocation140_spill] sm:$0xff]  ;;  %v11737_v3 = vld [vmem:[#allocation171_spill] sm:$0xff] }
 0x570   :  { %v4011_v20 = vsel %vm10949_vm10, %v4010_v11, %v4009_v10  ;;  %v3461_v10 = vperm.slane %v11727_v60, %v8450_v5  ;;  %v3463_v11 = vperm.slane %v11732_v53, %v8453_v31  ;;  %v2921_v19 = vadd.f32 %v8518_v37, %v11655_v21  ;;  %v11735_v60 = vld [vmem:[#allocation139_spill] sm:$0xff] }
 0x571   :  { %v4013_v51 = vsel %vm3430_vm11, %v4012_v8, %v4011_v20  ;;  %v2917_v8 = vadd.f32 %v8518_v37, %v11730_v55  ;;  %v2922_v54 = vadd.f32 %v8523_v28, %v11656_v17  ;;  %v4228_v20 = vsel %vm10950_vm9, %v4227_v52, %v4226_v40  ;;  %v11738_v40 = vld [vmem:[#allocation166_spill] sm:$0xff] }
 0x572   :  { %v4015_v45 = vsel %vm3434_vm12, %v4014_v48, %v4013_v51  ;;  %3000 = vmin.xlane.f32.xlu2 %v2999_v47  ;;  %3012 = vmin.xlane.f32.xlu0 %v3011_v14  ;;  %v2925_v14 = vadd.f32 %v8518_v37, %v11620_v7  ;;  %v3462_v61 = vsel %vm10951_vm8, %v3461_v10, %v3460_v18  ;;  %v11733_v48 = vld [vmem:[#allocation120_spill] sm:$0xff]  ;;  %v11734_v51 = vld [vmem:[#allocation170_spill] sm:$0xff] }
 0x573   :  { %3006 = vmin.xlane.f32.xlu1 %v3005_v43  ;;  %v4229_v47 = vperm.slane %v11733_v48, %v8472_v56  ;;  %v4305_v43 = vperm.slane %v11734_v51, %v8387_v63  ;;  %v3509_v10 = vperm.slane %v11735_v60, %v8372_v49  ;;  %v3510_v53 = vperm.slane %v11736_v34, %v8387_v63  ;;  %v5080_v60 = vld [vmem:[%s10632_s5] sm:$0xff] }
 0x574   :  { %v4307_v29 = vperm.slane %v11737_v3, %v8392_v36  ;;  %v4018_v52 = vperm.slane %v2812_v9, %v8501_v1  ;;  %v4304_v48 = vperm.slane %v11738_v40, %v8372_v49  ;;  %v3008_v51 = vmin.f32 %v2917_v8, %v2918_v23  ;;  %v5081_v9 = vld [vmem:[%s10632_s5 + $0x8] sm:$0xff]  ;;  %v11743_v40 = vld [vmem:[#allocation22_spill] sm:$0xff] }
 0x575   :  { %v2809_v16 = vpop.xlane.xlu2 %2808  ;;  %v2821_v30 = vpop.xlane.xlu0 %2820  ;;  %v3020_v7 = vmin.f32 %v2925_v14, %v2926_v13  ;;  %v3014_v22 = vmin.f32 %v2921_v19, %v2922_v54  ;;  %v8849_v34 = vperm.slane %v5080_v60, 7  ;;  %v8854_v3 = vperm.slane %v5081_v9, 7  ;;  %v11741_v14 = vld [vmem:[#allocation121_spill] sm:$0xff]  ;;  %v11742_v19 = vld [vmem:[#allocation138_spill] sm:$0xff] }
 0x576   :  { %v4016_v18 = vperm.slane %v2809_v16, %v8493_v50  ;;  %v2815_v24 = vpop.xlane.xlu1 %2814  ;;  %v4230_v23 = vsel %vm10949_vm10, %v4229_v47, %v4228_v20  ;;  %v4231_v13 = vperm.slane %v11741_v14, %v11660_v15  ;;  %v3512_v54 = vperm.slane %v11742_v19, %v8392_v36  ;;  %v11744_v9 = vld [vmem:[#allocation10_spill] sm:$0xff] }
 0x577   :  { %v2923_v60 = vadd.f32 %v8518_v37, %v11743_v40  ;;  %v2924_v20 = vadd.f32 %v8523_v28, %v11744_v9  ;;  %v3030_v47 = vadd.f32 %v8854_v3, %v11625_v38  ;;  %v3025_v37 = vadd.f32 %v8849_v34, %v11657_v4 }
 0x578   :  { %v4017_v32 = vsel %vm3438_vm13, %v4016_v18, %v4015_v45  ;;  %v3511_v18 = vsel %vm3386_vm0, %v3510_v53, %v3509_v10  ;;  %v11746_v10 = vld [vmem:[#allocation169_spill] sm:$0xff]  ;;  %v3026_v28 = vadd.f32 %v8854_v3, %v11658_v39  ;;  %v4020_v19 = vperm.slane %v2815_v24, %v8372_v49 }
 0x579   :  { %v8844_v16 = vsel %vm3442_vm14, %v4018_v52, %v4017_v32  ;;  %v4306_v32 = vsel %vm3386_vm0, %v4305_v43, %v4304_v48  ;;  %v11745_v43 = vld [vmem:[#allocation142_spill] sm:$0xff]  ;;  %v4309_v53 = vperm.slane %v11746_v10, %v8412_v35  ;;  %v4023_v9 = vperm.slane %v2821_v30, %v8392_v36  ;;  %v11750_v30 = vld [vmem:[#allocation119_spill] sm:$0xff] }
 0x57a   :  { %11739 = vst [vmem:[#allocation425_spill] sm:$0xff] %v8844_v16  ;;  %3009 = vmin.xlane.f32.xlu2 %v3008_v51  ;;  %3021 = vmin.xlane.f32.xlu0 %v3020_v7  ;;  %v4308_v52 = vsel %vm3390_vm1, %v4307_v29, %v4306_v32  ;;  %v3029_v7 = vadd.f32 %v8849_v34, %v11316_v25  ;;  %v11747_v32 = vld [vmem:[#allocation143_spill] sm:$0xff]  ;;  %v11748_v16 = vld [vmem:[#allocation173_spill] sm:$0xff]  ;;  %v11749_v25 = vld [vmem:[#allocation174_spill] sm:$0xff] }
 0x57b   :  { %3015 = vmin.xlane.f32.xlu1 %v3014_v22  ;;  %v3514_v48 = vperm.slane %v11745_v43, %v8412_v35  ;;  %v3513_v51 = vsel %vm3390_vm1, %v3512_v54, %v3511_v18  ;;  %v3516_v14 = vperm.slane %v11747_v32, %v8404_v57  ;;  %v4310_v10 = vsel %vm10965_vm2, %v4309_v53, %v4308_v52 }
 0x57c   :  { %v4311_v38 = vperm.slane %v11748_v16, %v8404_v57  ;;  %v4313_v45 = vperm.slane %v11749_v25, %v8418_v2  ;;  %v3017_v32 = vmin.f32 %v2923_v60, %v2924_v20  ;;  %v3095_v40 = vmin.f32 %v3029_v7, %v3030_v47  ;;  %v11751_v60 = vld [vmem:[#allocation141_spill] sm:$0xff]  ;;  %v11753_v47 = vld [vmem:[#allocation172_spill] sm:$0xff] }
 0x57d   :  { %v2818_v29 = vpop.xlane.xlu2 %2817  ;;  %v2830_v22 = vpop.xlane.xlu0 %2829  ;;  %v3464_v24 = vsel %vm10950_vm9, %v3463_v11, %v3462_v61  ;;  %v3089_v53 = vmin.f32 %v3025_v37, %v3026_v28  ;;  %v3515_v16 = vsel %vm10965_vm2, %v3514_v48, %v3513_v51  ;;  %v3518_v20 = vperm.slane %v11751_v60, %v8418_v2 }
 0x57e   :  { %v4021_v43 = vperm.slane %v2818_v29, %v8387_v63  ;;  %v2824_v8 = vpop.xlane.xlu1 %2823  ;;  %v4232_v29 = vsel %vm3430_vm11, %v4231_v13, %v4230_v23  ;;  %v4312_v55 = vsel %vm10964_vm3, %v4311_v38, %v4310_v10  ;;  %v3517_v61 = vsel %vm10964_vm3, %v3516_v14, %v3515_v16  ;;  %v11752_v13 = vld [vmem:[#allocation28_spill] sm:$0xff]  ;;  %v11754_v14 = vld [vmem:[#allocation145_spill] sm:$0xff] }
 0x57f   :  { %v4025_v18 = vperm.slane %v2824_v8, %v8412_v35  ;;  %v4233_v8 = vperm.slane %v11750_v30, %v8481_v44  ;;  %v4314_v11 = vsel %vm10963_vm4, %v4313_v45, %v4312_v55  ;;  %v3027_v23 = vadd.f32 %v8849_v34, %v11572_v41 }
 0x580   :  { %v4022_v54 = vsel %vm3386_vm0, %v4021_v43, %v4020_v19  ;;  %v3028_v38 = vadd.f32 %v8854_v3, %v11752_v13  ;;  %v4315_v48 = vperm.slane %v11753_v47, %v8435_v59  ;;  %v3031_v45 = vadd.f32 %v8849_v34, %v5679_v46  ;;  %v11755_v43 = vld [vmem:[#allocation146_spill] sm:$0xff]  ;;  %v11814_v46 = vld [vmem:[#allocation19_spill] sm:$0xff] }
 0x581   :  { %v4024_v52 = vsel %vm3390_vm1, %v4023_v9, %v4022_v54  ;;  %v3036_v9 = vadd.f32 %v8854_v3, %v5736_v62  ;;  %v4234_v7 = vsel %vm3434_vm12, %v4233_v8, %v4232_v29  ;;  %v3032_v28 = vadd.f32 %v8854_v3, %v5682_v6  ;;  %v11756_v29 = vld [vmem:[#allocation176_spill] sm:$0xff]  ;;  %v11786_v62 = vld [vmem:[#allocation46_spill] sm:$0xff] }
 0x582   :  { %v4026_v25 = vsel %vm10965_vm2, %v4025_v18, %v4024_v52  ;;  %3018 = vmin.xlane.f32.xlu2 %v3017_v32  ;;  %3096 = vmin.xlane.f32.xlu0 %v3095_v40  ;;  %v3035_v40 = vadd.f32 %v8849_v34, %v5733_v58  ;;  %v3519_v51 = vsel %vm10963_vm4, %v3518_v20, %v3517_v61  ;;  %v11787_v58 = vld [vmem:[#allocation42_spill] sm:$0xff] }
 0x583   :  { %3090 = vmin.xlane.f32.xlu1 %v3089_v53  ;;  %v3520_v19 = vperm.slane %v11754_v14, %v8435_v59  ;;  %v3522_v10 = vperm.slane %v11755_v43, %v8422_v27  ;;  %v4316_v32 = vsel %vm10962_vm5, %v4315_v48, %v4314_v11  ;;  %v4317_v52 = vperm.slane %v11756_v29, %v8422_v27  ;;  %v11757_v53 = vld [vmem:[#allocation177_spill] sm:$0xff]  ;;  %v11759_v11 = vld [vmem:[#allocation123_spill] sm:$0xff]  ;;  %v11818_v13 = vld [vmem:[#allocation366_spill] sm:$0xff] }
 0x584   :  { %v4319_v16 = vperm.slane %v11757_v53, %v8445_v0  ;;  %v4029_v30 = vperm.slane %v2830_v22, %v8418_v2  ;;  %v3092_v20 = vmin.f32 %v3027_v23, %v3028_v38  ;;  %v3104_v61 = vmin.f32 %v3035_v40, %v3036_v9 }
 0x585   :  { %v2827_v37 = vpop.xlane.xlu2 %2826  ;;  %v2839_v55 = vpop.xlane.xlu0 %2838  ;;  %v11758_v47 = vperm.slane %v11728_v42, %v8472_v56  ;;  %v4235_v48 = vperm.slane %v11759_v11, %v8493_v50  ;;  %v3098_v43 = vmin.f32 %v3031_v45, %v3032_v28  ;;  %v3521_v22 = vsel %vm10962_vm5, %v3520_v19, %v3519_v51  ;;  %v11760_v42 = vld [vmem:[#allocation144_spill] sm:$0xff]  ;;  %v11761_v45 = vld [vmem:[#allocation34_spill] sm:$0xff]  ;;  %v11768_v11 = vld [vmem:[#allocation149_spill] sm:$0xff] }
 0x586   :  { %v4027_v54 = vperm.slane %v2827_v37, %v8404_v57  ;;  %v2833_v18 = vpop.xlane.xlu1 %2832  ;;  %v3523_v38 = vsel %vm3410_vm6, %v3522_v10, %v3521_v22  ;;  %v3033_v9 = vadd.f32 %v8849_v34, %v5703_v33  ;;  %v3034_v28 = vadd.f32 %v8854_v3, %v11761_v45  ;;  %v11762_v19 = vld [vmem:[#allocation44_spill] sm:$0xff]  ;;  %v11764_v10 = vld [vmem:[#allocation175_spill] sm:$0xff]  ;;  %v11806_v33 = vld [vmem:[#allocation58_spill] sm:$0xff] }
 0x587   :  { %v4031_v60 = vperm.slane %v2833_v18, %v8435_v59  ;;  %v8940_v37 = vsel %vm10949_vm10, %v11758_v47, %v3464_v24  ;;  %v4236_v23 = vsel %vm3438_vm13, %v4235_v48, %v4234_v7  ;;  %v3524_v24 = vperm.slane %v11760_v42, %v8445_v0  ;;  %v11763_v18 = vld [vmem:[#allocation16_spill] sm:$0xff]  ;;  %v11805_v45 = vld [vmem:[#allocation15_spill] sm:$0xff] }
 0x588   :  { %v4028_v8 = vsel %vm10964_vm3, %v4027_v54, %v4026_v25  ;;  %v4318_v25 = vsel %vm3410_vm6, %v4317_v52, %v4316_v32  ;;  %v3041_v51 = vadd.f32 %v8849_v34, %v5777_v26  ;;  %v3042_v7 = vadd.f32 %v8854_v3, %v11762_v19 }
 0x589   :  { %v4030_v14 = vsel %vm10963_vm4, %v4029_v30, %v4028_v8  ;;  %v4320_v40 = vsel %vm10952_vm7, %v4319_v16, %v4318_v25  ;;  %v4237_v32 = vperm.slane %v11763_v18, %v8501_v1  ;;  %v4321_v29 = vperm.slane %v11764_v10, %v8450_v5  ;;  %v11765_v16 = vld [vmem:[#allocation31_spill] sm:$0xff]  ;;  %v11766_v8 = vld [vmem:[#allocation32_spill] sm:$0xff] }
 0x58a   :  { %v4032_v54 = vsel %vm10962_vm5, %v4031_v60, %v4030_v14  ;;  %3093 = vmin.xlane.f32.xlu2 %v3092_v20  ;;  %3105 = vmin.xlane.f32.xlu0 %v3104_v61  ;;  %v3037_v30 = vadd.f32 %v8849_v34, %v11765_v16  ;;  %v3038_v60 = vadd.f32 %v8854_v3, %v11766_v8  ;;  %v11767_v61 = vld [vmem:[#allocation148_spill] sm:$0xff]  ;;  %v11769_v25 = vld [vmem:[#allocation179_spill] sm:$0xff] }
 0x58b   :  { %3099 = vmin.xlane.f32.xlu1 %v3098_v43  ;;  %v3525_v20 = vsel %vm10952_vm7, %v3524_v24, %v3523_v38  ;;  %v3526_v47 = vperm.slane %v11767_v61, %v8450_v5  ;;  %v3528_v48 = vperm.slane %v11768_v11, %v8453_v31  ;;  %v4322_v22 = vsel %vm10951_vm8, %v4321_v29, %v4320_v40  ;;  %v11770_v18 = vld [vmem:[#allocation180_spill] sm:$0xff] }
 0x58c   :  { %v4323_v42 = vperm.slane %v11769_v25, %v8453_v31  ;;  %v4325_v10 = vperm.slane %v11770_v18, %v8472_v56  ;;  %v4035_v19 = vperm.slane %v2839_v55, %v8445_v0  ;;  %v3101_v61 = vmin.f32 %v3033_v9, %v3034_v28 }
 0x58d   :  { %v2836_v52 = vpop.xlane.xlu2 %2835  ;;  %v2848_v53 = vpop.xlane.xlu0 %2847  ;;  %v3113_v26 = vmin.f32 %v3041_v51, %v3042_v7  ;;  %v3527_v11 = vsel %vm10951_vm8, %v3526_v47, %v3525_v20  ;;  %v3107_v29 = vmin.f32 %v3037_v30, %v3038_v60  ;;  %v11773_v51 = vld [vmem:[#allocation39_spill] sm:$0xff]  ;;  %v11774_v20 = vld [vmem:[#allocation40_spill] sm:$0xff]  ;;  %v9090_v16 = vadd.f32 %v8854_v3, %v11806_v33 }
 0x58e   :  { %v4033_v14 = vperm.slane %v2836_v52, %v8422_v27  ;;  %v2842_v43 = vpop.xlane.xlu1 %2841  ;;  %v11771_v52 = vld [vmem:[#allocation147_spill] sm:$0xff]  ;;  %v3529_v25 = vsel %vm10950_vm9, %v3528_v48, %v3527_v11  ;;  %v4324_v18 = vsel %vm10950_vm9, %v4323_v42, %v4322_v22  ;;  %v3039_v7 = vadd.f32 %v8849_v34, %v11773_v51  ;;  %v11776_v47 = vld [vmem:[#allocation36_spill] sm:$0xff] }
 0x58f   :  { %v4037_v38 = vperm.slane %v2842_v43, %v8450_v5  ;;  %v3530_v8 = vperm.slane %v11771_v52, %v8472_v56  ;;  %v4326_v28 = vsel %vm10949_vm10, %v4325_v10, %v4324_v18  ;;  %v11775_v30 = vld [vmem:[#allocation35_spill] sm:$0xff]  ;;  %v3044_v48 = vadd.f32 %v8854_v3, %v11776_v47  ;;  %v11778_v43 = vld [vmem:[#allocation50_spill] sm:$0xff] }
 0x590   :  { %v4034_v24 = vsel %vm3410_vm6, %v4033_v14, %v4032_v54  ;;  %v11772_v54 = vld [vmem:[#allocation178_spill] sm:$0xff]  ;;  %v3043_v60 = vadd.f32 %v8849_v34, %v11775_v30  ;;  %v11777_v14 = vld [vmem:[#allocation49_spill] sm:$0xff]  ;;  %v3048_v22 = vadd.f32 %v8854_v3, %v11778_v43  ;;  %v9105_v33 = vadd.f32 %v8849_v34, %v11716_v12 }
 0x591   :  { %v4036_v40 = vsel %vm10952_vm7, %v4035_v19, %v4034_v24  ;;  %v4327_v9 = vperm.slane %v11772_v54, %v11660_v15  ;;  %v3040_v19 = vadd.f32 %v8854_v3, %v11774_v20  ;;  %v9008_v24 = vsel %vm3442_vm14, %v4237_v32, %v4236_v23  ;;  %v11782_v43 = vld [vmem:[#allocation182_spill] sm:$0xff]  ;;  %v11783_v23 = vld [vmem:[#allocation183_spill] sm:$0xff]  ;;  %v11785_v30 = vld [vmem:[#allocation45_spill] sm:$0xff] }
 0x592   :  { %v4038_v55 = vsel %vm10951_vm8, %v4037_v38, %v4036_v40  ;;  %3102 = vmin.xlane.f32.xlu2 %v3101_v61  ;;  %3114 = vmin.xlane.f32.xlu0 %v3113_v26  ;;  %v3047_v26 = vadd.f32 %v8849_v34, %v11777_v14  ;;  %v3531_v38 = vsel %vm10949_vm10, %v3530_v8, %v3529_v25  ;;  %v11780_v61 = vld [vmem:[#allocation151_spill] sm:$0xff] }
 0x593   :  { %3108 = vmin.xlane.f32.xlu1 %v3107_v29  ;;  %v3532_v11 = vperm.slane %v11780_v61, %v11660_v15  ;;  %v11781_v29 = vld [vmem:[#allocation152_spill] sm:$0xff]  ;;  %v4328_v54 = vsel %vm3430_vm11, %v4327_v9, %v4326_v28  ;;  %v4329_v14 = vperm.slane %v11782_v43, %v8481_v44  ;;  %v4331_v32 = vperm.slane %v11783_v23, %v8493_v50  ;;  %v11784_v61 = vld [vmem:[#allocation41_spill] sm:$0xff] }
 0x594   :  { %v3534_v18 = vperm.slane %v11781_v29, %v8481_v44  ;;  %v4041_v8 = vperm.slane %v2848_v53, %v8472_v56  ;;  %v3110_v25 = vmin.f32 %v3039_v7, %v3040_v19  ;;  %v3049_v47 = vadd.f32 %v8849_v34, %v11784_v61  ;;  %v11789_v19 = vld [vmem:[#allocation56_spill] sm:$0xff] }
 0x595   :  { %v2845_v52 = vpop.xlane.xlu2 %2844  ;;  %v2857_v40 = vpop.xlane.xlu0 %2856  ;;  %v3116_v9 = vmin.f32 %v3043_v60, %v3044_v48  ;;  %v3122_v28 = vmin.f32 %v3047_v26, %v3048_v22  ;;  %v3046_v23 = vadd.f32 %v8854_v3, %v11786_v62  ;;  %v3050_v53 = vadd.f32 %v8854_v3, %v11787_v58  ;;  %v11790_v48 = vld [vmem:[#allocation150_spill] sm:$0xff]  ;;  %v11796_v58 = vld [vmem:[#allocation47_spill] sm:$0xff]  ;;  %v11798_v62 = vld [vmem:[#allocation52_spill] sm:$0xff] }
 0x596   :  { %v4039_v10 = vperm.slane %v2845_v52, %v8453_v31  ;;  %v2851_v20 = vpop.xlane.xlu1 %2850  ;;  %v3045_v52 = vadd.f32 %v8849_v34, %v11785_v30  ;;  %v3054_v60 = vadd.f32 %v8854_v3, %v11789_v19  ;;  %v11794_v19 = vld [vmem:[#allocation428_spill] sm:$0xff]  ;;  %v4593_v41 = vperm.slane %v11818_v13, %v8387_v63  ;;  %v11822_v13 = vld [vmem:[#allocation299_spill] sm:$0xff]  ;;  %v11833_v22 = vld [vmem:[#allocation298_spill] sm:$0xff] }
 0x597   :  { %v4043_v29 = vperm.slane %v2851_v20, %v11660_v15  ;;  %v3125_v30 = vmin.f32 %v3049_v47, %v3050_v53  ;;  %v11800_v47 = vld [vmem:[#allocation53_spill] sm:$0xff]  ;;  %v11801_v53 = vld [vmem:[#allocation54_spill] sm:$0xff]  ;;  %v11804_v61 = vld [vmem:[#allocation12_spill] sm:$0xff] }
 0x598   :  { %v4040_v51 = vsel %vm10950_vm9, %v4039_v10, %v4038_v55  ;;  %v11788_v55 = vld [vmem:[#allocation55_spill] sm:$0xff]  ;;  %v3119_v10 = vmin.f32 %v3045_v52, %v3046_v23  ;;  %v9069_v23 = vadd.f32 %v8849_v34, %v11800_v47  ;;  %v3059_v47 = vadd.f32 %v8849_v34, %v11804_v61 }
 0x599   :  { %v4042_v43 = vsel %vm10949_vm10, %v4041_v8, %v4040_v51  ;;  %v3053_v20 = vadd.f32 %v8849_v34, %v11788_v55  ;;  %v3533_v51 = vsel %vm3430_vm11, %v3532_v11, %v3531_v38  ;;  %v9052_v38 = vperm.slane %v11794_v19, 7  ;;  %v11836_v8 = vld [vmem:[#allocation62_spill] sm:$0xff] }
 0x59a   :  { %v4044_v7 = vsel %vm3430_vm11, %v4043_v29, %v4042_v43  ;;  %3111 = vmin.xlane.f32.xlu2 %v3110_v25  ;;  %3123 = vmin.xlane.f32.xlu0 %v3122_v28  ;;  %v9046_v25 = vsel %vm3434_vm12, %v3534_v18, %v3533_v51  ;;  %v4330_v29 = vsel %vm3434_vm12, %v4329_v14, %v4328_v54  ;;  %v11793_v28 = vld [vmem:[#allocation181_spill] sm:$0xff]  ;;  %v11797_v54 = vld [vmem:[#allocation51_spill] sm:$0xff] }
 0x59b   :  { %3117 = vmin.xlane.f32.xlu1 %v3116_v9  ;;  %v4333_v43 = vperm.slane %v11793_v28, %v8501_v1  ;;  %11795 = vst [vmem:[#allocation74_spill] sm:$0xff] %v9052_v38  ;;  %v4332_v11 = vsel %vm3438_vm13, %v4331_v32, %v4330_v29  ;;  %v9057_v9 = vadd.f32 %v8849_v34, %v11796_v58  ;;  %v11799_v29 = vld [vmem:[#allocation48_spill] sm:$0xff]  ;;  %v11803_v58 = vld [vmem:[#allocation9_spill] sm:$0xff] }
 0x59c   :  { %v3131_v14 = vmin.f32 %v3053_v20, %v3054_v60  ;;  %v3051_v28 = vadd.f32 %v8849_v34, %v11797_v54  ;;  %v3052_v19 = vadd.f32 %v8854_v3, %v11798_v62  ;;  %v4047_v32 = vperm.slane %v2857_v40, %v8493_v50  ;;  %v11802_v20 = vld [vmem:[#allocation238_spill] sm:$0xff] }
 0x59d   :  { %v2854_v26 = vpop.xlane.xlu2 %2853  ;;  %v2932_v55 = vpop.xlane.xlu0 %2931  ;;  %v3056_v52 = vadd.f32 %v8854_v3, %v11799_v29  ;;  %v4401_v60 = vperm.slane %v11802_v20, %v8387_v63  ;;  %v9081_v40 = vadd.f32 %v8849_v34, %v11803_v58 }
 0x59e   :  { %v4045_v18 = vperm.slane %v2854_v26, %v8481_v44  ;;  %v2860_v51 = vpop.xlane.xlu1 %2859  ;;  %v9073_v26 = vadd.f32 %v8854_v3, %v11801_v53  ;;  %v3060_v53 = vadd.f32 %v8854_v3, %v11805_v45  ;;  %v4785_v58 = vperm.slane %v2932_v55, %v8387_v63  ;;  %v11817_v55 = vld [vmem:[#allocation240_spill] sm:$0xff] }
 0x59f   :  { %v4049_v62 = vperm.slane %v2860_v51, %v8501_v1 }
 0x5a0   :  { %v4046_v54 = vsel %vm3434_vm12, %v4045_v18, %v4044_v7  ;;  %v9093_v7 = vsel %vm3442_vm14, %v4333_v43, %v4332_v11  ;;  %v11807_v18 = vld [vmem:[#allocation237_spill] sm:$0xff] }
 0x5a1   :  { %v4048_v29 = vsel %vm3438_vm13, %v4047_v32, %v4046_v54  ;;  %v4400_v51 = vperm.slane %v11807_v18, %v8372_v49  ;;  %v3128_v54 = vmin.f32 %v3051_v28, %v3052_v19  ;;  %v3134_v32 = vmin.f32 %v9057_v9, %v3056_v52  ;;  %v11809_v11 = vld [vmem:[#allocation57_spill] sm:$0xff] }
 0x5a2   :  { %v9098_v20 = vsel %vm3442_vm14, %v4049_v62, %v4048_v29  ;;  %3120 = vmin.xlane.f32.xlu2 %v3119_v10  ;;  %3132 = vmin.xlane.f32.xlu0 %v3131_v14  ;;  %v9110_v18 = vadd.f32 %v8849_v34, %v11809_v11  ;;  %v11810_v62 = vld [vmem:[#allocation24_spill] sm:$0xff]  ;;  %v3140_v52 = vmin.f32 %v3059_v47, %v3060_v53  ;;  %v11815_v53 = vld [vmem:[#allocation241_spill] sm:$0xff] }
 0x5a3   :  { %11808 = vst [vmem:[#allocation76_spill] sm:$0xff] %v9098_v20  ;;  %3126 = vmin.xlane.f32.xlu1 %v3125_v30  ;;  %v4402_v43 = vsel %vm3386_vm0, %v4401_v60, %v4400_v51  ;;  %v9114_v10 = vadd.f32 %v8854_v3, %v11810_v62  ;;  %v11811_v30 = vld [vmem:[#allocation61_spill] sm:$0xff]  ;;  %v11812_v14 = vld [vmem:[#allocation236_spill] sm:$0xff]  ;;  %v9126_v51 = vadd.f32 %v9052_v38, %v11657_v4 }
 0x5a4   :  { %v9118_v9 = vadd.f32 %v8854_v3, %v11811_v30  ;;  %v4403_v28 = vperm.slane %v11812_v14, %v8392_v36  ;;  %v11813_v30 = vld [vmem:[#allocation18_spill] sm:$0xff]  ;;  %v3066_v14 = vadd.f32 %v8854_v3, %v11814_v46  ;;  %v4407_v60 = vperm.slane %v11815_v53, %v8404_v57  ;;  %v11816_v62 = vld [vmem:[#allocation297_spill] sm:$0xff]  ;;  %v11820_v53 = vld [vmem:[#allocation367_spill] sm:$0xff] }
 0x5a5   :  { %v2929_v19 = vpop.xlane.xlu2 %2928  ;;  %v2941_v29 = vpop.xlane.xlu0 %2940  ;;  %v3065_v6 = vadd.f32 %v8849_v34, %v11813_v30  ;;  %v4496_v4 = vperm.slane %v11816_v62, %v8372_v49  ;;  %v3137_v46 = vmin.f32 %v9110_v18, %v9114_v10  ;;  %v4595_v45 = vperm.slane %v11820_v53, %v8392_v36 }
 0x5a6   :  { %v4784_v20 = vperm.slane %v2929_v19, %v8372_v49  ;;  %v2935_v12 = vpop.xlane.xlu1 %2934  ;;  %v4404_v47 = vsel %vm3390_vm1, %v4403_v28, %v4402_v43  ;;  %v4405_v19 = vperm.slane %v11817_v55, %v8412_v35  ;;  %v11819_v43 = vld [vmem:[#allocation295_spill] sm:$0xff] }
 0x5a7   :  { %v4787_v11 = vperm.slane %v2935_v12, %v8392_v36  ;;  %v4497_v28 = vperm.slane %v11819_v43, %v8387_v63  ;;  %v11821_v12 = vld [vmem:[#allocation11_spill] sm:$0xff]  ;;  %v3149_v53 = vmin.f32 %v3065_v6, %v3066_v14  ;;  %v11829_v14 = vld [vmem:[#allocation21_spill] sm:$0xff] }
 0x5a8   :  { %v4786_v30 = vsel %vm3386_vm0, %v4785_v58, %v4784_v20  ;;  %v9154_v38 = vadd.f32 %v8849_v34, %v11821_v12  ;;  %v4406_v55 = vsel %vm10965_vm2, %v4405_v19, %v4404_v47  ;;  %v4499_v58 = vperm.slane %v11822_v13, %v8392_v36  ;;  %v11823_v20 = vld [vmem:[#allocation362_spill] sm:$0xff]  ;;  %v11825_v12 = vld [vmem:[#allocation239_spill] sm:$0xff] }
 0x5a9   :  { %v4788_v62 = vsel %vm3390_vm1, %v4787_v11, %v4786_v30  ;;  %v4592_v18 = vperm.slane %v11823_v20, %v8372_v49  ;;  %v4408_v10 = vsel %vm10964_vm3, %v4407_v60, %v4406_v55  ;;  %v4498_v43 = vsel %vm3386_vm0, %v4497_v28, %v4496_v4  ;;  %v11824_v11 = vld [vmem:[#allocation300_spill] sm:$0xff]  ;;  %v11826_v13 = vld [vmem:[#allocation59_spill] sm:$0xff]  ;;  %v11830_v55 = vld [vmem:[#allocation17_spill] sm:$0xff] }
 0x5aa   :  { %3129 = vmin.xlane.f32.xlu2 %v3128_v54  ;;  %3141 = vmin.xlane.f32.xlu0 %v3140_v52  ;;  %v4501_v30 = vperm.slane %v11824_v11, %v8412_v35  ;;  %v4409_v47 = vperm.slane %v11825_v12, %v8418_v2  ;;  %v9170_v61 = vadd.f32 %v8854_v3, %v11826_v13  ;;  %v11827_v54 = vld [vmem:[#allocation20_spill] sm:$0xff]  ;;  %v11828_v60 = vld [vmem:[#allocation243_spill] sm:$0xff]  ;;  %v11831_v11 = vld [vmem:[#allocation365_spill] sm:$0xff] }
 0x5ab   :  { %3135 = vmin.xlane.f32.xlu1 %v3134_v32  ;;  %v4594_v19 = vsel %vm3386_vm0, %v4593_v41, %v4592_v18  ;;  %v9174_v52 = vadd.f32 %v8849_v34, %v11827_v54  ;;  %v4411_v4 = vperm.slane %v11828_v60, %v8435_v59  ;;  %v3072_v12 = vadd.f32 %v8854_v3, %v11829_v14 }
 0x5ac   :  { %v4596_v28 = vsel %vm3390_vm1, %v4595_v45, %v4594_v19  ;;  %v9183_v41 = vadd.f32 %v8849_v34, %v11830_v55  ;;  %v4410_v20 = vsel %vm10963_vm4, %v4409_v47, %v4408_v10  ;;  %v4500_v18 = vsel %vm3390_vm1, %v4499_v58, %v4498_v43  ;;  %v11832_v45 = vld [vmem:[#allocation244_spill] sm:$0xff]  ;;  %v11834_v58 = vld [vmem:[#allocation370_spill] sm:$0xff] }
 0x5ad   :  { %v2938_v32 = vpop.xlane.xlu2 %2937  ;;  %v2950_v6 = vpop.xlane.xlu0 %2949  ;;  %v4597_v54 = vperm.slane %v11831_v11, %v8412_v35  ;;  %v4413_v19 = vperm.slane %v11832_v45, %v8422_v27  ;;  %v4503_v14 = vperm.slane %v11833_v22, %v8404_v57  ;;  %v4502_v42 = vsel %vm10965_vm2, %v4501_v30, %v4500_v18  ;;  %v11835_v45 = vld [vmem:[#allocation369_spill] sm:$0xff] }
 0x5ae   :  { %v4789_v60 = vperm.slane %v2938_v32, %v8412_v35  ;;  %v2944_v13 = vpop.xlane.xlu1 %2943  ;;  %v4791_v55 = vperm.slane %v2941_v29, %v8404_v57  ;;  %v4601_v43 = vperm.slane %v11834_v58, %v8418_v2  ;;  %v4412_v11 = vsel %vm10962_vm5, %v4411_v4, %v4410_v20  ;;  %v11838_v4 = vld [vmem:[#allocation302_spill] sm:$0xff] }
 0x5af   :  { %v4598_v10 = vsel %vm10965_vm2, %v4597_v54, %v4596_v28  ;;  %v4793_v32 = vperm.slane %v2944_v13, %v8418_v2  ;;  %v4599_v35 = vperm.slane %v11835_v45, %v8404_v57  ;;  %v9207_v30 = vadd.f32 %v8854_v3, %v11836_v8  ;;  %v11837_v54 = vld [vmem:[#allocation303_spill] sm:$0xff] }
 0x5b0   :  { %v4790_v47 = vsel %vm10965_vm2, %v4789_v60, %v4788_v62  ;;  %v4504_v29 = vsel %vm10964_vm3, %v4503_v14, %v4502_v42  ;;  %v4507_v28 = vperm.slane %v11837_v54, %v8435_v59  ;;  %v4414_v13 = vsel %vm3410_vm6, %v4413_v19, %v4412_v11  ;;  %v11840_v14 = vld [vmem:[#allocation242_spill] sm:$0xff] }
 0x5b1   :  { %v4792_v22 = vsel %vm10964_vm3, %v4791_v55, %v4790_v47  ;;  %v4505_v20 = vperm.slane %v11838_v4, %v8418_v2  ;;  %v4600_v55 = vsel %vm10964_vm3, %v4599_v35, %v4598_v10  ;;  %v11839_v18 = vmin.f32 %v9069_v23, %v9073_v26  ;;  %v11841_v35 = vld [vmem:[#allocation368_spill] sm:$0xff] }
 0x5b2   :  { %v4794_v62 = vsel %vm10963_vm4, %v4793_v32, %v4792_v22  ;;  %3138 = vmin.xlane.f32.xlu2 %v3137_v46  ;;  %3150 = vmin.xlane.f32.xlu0 %v3149_v53  ;;  %v3161_v42 = vmin.f32 %v9105_v33, %v9118_v9  ;;  %v4415_v60 = vperm.slane %v11840_v14, %v8445_v0  ;;  %v11842_v32 = vld [vmem:[#allocation23_spill] sm:$0xff]  ;;  %v11844_v22 = vld [vmem:[#allocation301_spill] sm:$0xff] }
 0x5b3   :  { %3144 = vmin.xlane.f32.xlu1 %v11839_v18  ;;  %v4602_v46 = vsel %vm10963_vm4, %v4601_v43, %v4600_v55  ;;  %v3146_v53 = vmin.f32 %v9154_v38, %v9170_v61  ;;  %v3158_v19 = vmin.f32 %v9174_v52, %v3072_v12  ;;  %v4506_v58 = vsel %vm10963_vm4, %v4505_v20, %v4504_v29  ;;  %v11843_v52 = vld [vmem:[#allocation67_spill] sm:$0xff] }
 0x5b4   :  { %v4603_v10 = vperm.slane %v11841_v35, %v8435_v59  ;;  %v3155_v47 = vmin.f32 %v9183_v41, %v9207_v30  ;;  %v3077_v11 = vadd.f32 %v8849_v34, %v11842_v32  ;;  %v4416_v43 = vsel %vm10952_vm7, %v4415_v60, %v4414_v13  ;;  %v11845_v41 = vld [vmem:[#allocation373_spill] sm:$0xff]  ;;  %v11846_v13 = vld [vmem:[#allocation247_spill] sm:$0xff]  ;;  %v11848_v60 = vld [vmem:[#allocation246_spill] sm:$0xff] }
 0x5b5   :  { %v2947_v23 = vpop.xlane.xlu2 %2946  ;;  %v2959_v26 = vpop.xlane.xlu0 %2958  ;;  %v4508_v45 = vsel %vm10962_vm5, %v4507_v28, %v4506_v58  ;;  %v3078_v12 = vadd.f32 %v8854_v3, %v11843_v52  ;;  %v4509_v29 = vperm.slane %v11844_v22, %v8422_v27  ;;  %v4607_v30 = vperm.slane %v11845_v41, %v8445_v0  ;;  %v11847_v28 = vld [vmem:[#allocation372_spill] sm:$0xff]  ;;  %v11849_v35 = vld [vmem:[#allocation306_spill] sm:$0xff]  ;;  %v11868_v9 = vld [vmem:[#allocation379_spill] sm:$0xff] }
 0x5b6   :  { %v4795_v61 = vperm.slane %v2947_v23, %v8435_v59  ;;  %v2953_v38 = vpop.xlane.xlu1 %2952  ;;  %v4604_v54 = vsel %vm10962_vm5, %v4603_v10, %v4602_v46  ;;  %v4797_v4 = vperm.slane %v2950_v6, %v8422_v27  ;;  %v4419_v20 = vperm.slane %v11846_v13, %v8453_v31  ;;  %v11850_v23 = vld [vmem:[#allocation305_spill] sm:$0xff] }
 0x5b7   :  { %v4605_v55 = vperm.slane %v11847_v28, %v8422_v27  ;;  %v4799_v14 = vperm.slane %v2953_v38, %v8445_v0  ;;  %v4417_v58 = vperm.slane %v11848_v60, %v8450_v5  ;;  %v4510_v46 = vsel %vm3410_vm6, %v4509_v29, %v4508_v45 }
 0x5b8   :  { %v4796_v18 = vsel %vm10962_vm5, %v4795_v61, %v4794_v62  ;;  %v4513_v10 = vperm.slane %v11849_v35, %v8450_v5  ;;  %v4511_v22 = vperm.slane %v11850_v23, %v8445_v0  ;;  %v5082_v62 = vld [vmem:[%s10631_s4 + $0x8] sm:$0xff]  ;;  %v11851_v29 = vmin.f32 %v9081_v40, %v9090_v16  ;;  %s5136_s4 = smov [#allocation2]  }
 0x5b9   :  { %v4798_v6 = vsel %vm3410_vm6, %v4797_v4, %v4796_v18  ;;  %v4606_v41 = vsel %vm3410_vm6, %v4605_v55, %v4604_v54  ;;  %v9265_v61 = vperm.slane %v5082_v62, 7  ;;  %v4418_v45 = vsel %vm10951_vm8, %v4417_v58, %v4416_v43  ;;  %v11852_v4 = vld [vmem:[#allocation65_spill] sm:$0xff]  ;;  %v11854_v43 = vld [vmem:[#allocation371_spill] sm:$0xff]  ;;  %s5026_s22 = sshll.u32 %s5136_s4, 4  ;;  %s5027_s22 = int_to_ptr.vmem [resolvable:$true] %s5026_s22 }
 0x5ba   :  { %v4800_v13 = vsel %vm10952_vm7, %v4799_v14, %v4798_v6  ;;  %3147 = vmin.xlane.f32.xlu2 %v3146_v53  ;;  %3159 = vmin.xlane.f32.xlu0 %v3158_v19  ;;  %v4608_v38 = vsel %vm10952_vm7, %v4607_v30, %v4606_v41  ;;  %v9274_v54 = vadd.f32 %v8849_v34, %v11852_v4  ;;  %v11853_v53 = vld [vmem:[#allocation66_spill] sm:$0xff]  ;;  %v11855_v14 = vld [vmem:[#allocation245_spill] sm:$0xff] }
 0x5bb   :  { %3153 = vmin.xlane.f32.xlu1 %v11851_v29  ;;  %v9278_v19 = vadd.f32 %v8854_v3, %v11853_v53  ;;  %v4420_v28 = vsel %vm10950_vm9, %v4419_v20, %v4418_v45  ;;  %v4512_v55 = vsel %vm10952_vm7, %v4511_v22, %v4510_v46  ;;  %v4609_v18 = vperm.slane %v11854_v43, %v8450_v5  ;;  %v11856_v40 = vld [vmem:[#allocation249_spill] sm:$0xff]  ;;  %v11857_v20 = vld [vmem:[#allocation304_spill] sm:$0xff] }
 0x5bc   :  { %v3167_v30 = vmin.f32 %v3077_v11, %v3078_v12  ;;  %v4421_v16 = vperm.slane %v11855_v14, %v8472_v56  ;;  %v4423_v60 = vperm.slane %v11856_v40, %v11660_v15  ;;  %v4514_v58 = vsel %vm10951_vm8, %v4513_v10, %v4512_v55  ;;  %v11858_v11 = vld [vmem:[#allocation376_spill] sm:$0xff]  ;;  %v11859_v10 = vld [vmem:[#allocation250_spill] sm:$0xff]  ;;  %v11860_v55 = vld [vmem:[#allocation375_spill] sm:$0xff] }
 0x5bd   :  { %v2956_v35 = vpop.xlane.xlu2 %2955  ;;  %v2968_v6 = vpop.xlane.xlu0 %2967  ;;  %v3083_v23 = vadd.f32 %v8849_v34, %v11655_v21  ;;  %v4515_v46 = vperm.slane %v11857_v20, %v8453_v31  ;;  %v4610_v22 = vsel %vm10951_vm8, %v4609_v18, %v4608_v38  ;;  %v4613_v12 = vperm.slane %v11858_v11, %v8472_v56  ;;  %v11861_v38 = vld [vmem:[#allocation309_spill] sm:$0xff]  ;;  %v11862_v11 = vld [vmem:[#allocation308_spill] sm:$0xff] }
 0x5be   :  { %v4801_v41 = vperm.slane %v2956_v35, %v8450_v5  ;;  %v2962_v62 = vpop.xlane.xlu1 %2961  ;;  %v4422_v45 = vsel %vm10949_vm10, %v4421_v16, %v4420_v28  ;;  %v4425_v29 = vperm.slane %v11859_v10, %v8481_v44  ;;  %v4611_v43 = vperm.slane %v11860_v55, %v8453_v31 }
 0x5bf   :  { %v4803_v14 = vperm.slane %v2959_v26, %v8453_v31  ;;  %v4516_v40 = vsel %vm10950_vm9, %v4515_v46, %v4514_v58  ;;  %v4519_v18 = vperm.slane %v11861_v38, %v11660_v15  ;;  %v4805_v35 = vperm.slane %v2962_v62, %v8472_v56  ;;  %v11863_v62 = vld [vmem:[#allocation374_spill] sm:$0xff] }
 0x5c0   :  { %v4802_v20 = vsel %vm10951_vm8, %v4801_v41, %v4800_v13  ;;  %v4517_v28 = vperm.slane %v11862_v11, %v8472_v56  ;;  %v4612_v16 = vsel %vm10950_vm9, %v4611_v43, %v4610_v22  ;;  %v3084_v55 = vadd.f32 %v8854_v3, %v11656_v17  ;;  %v11866_v43 = vld [vmem:[#allocation64_spill] sm:$0xff]  ;;  %v11869_v11 = vld [vmem:[#allocation378_spill] sm:$0xff] }
 0x5c1   :  { %v4804_v10 = vsel %vm10950_vm9, %v4803_v14, %v4802_v20  ;;  %v4424_v26 = vsel %vm3430_vm11, %v4423_v60, %v4422_v45  ;;  %v4614_v58 = vsel %vm10949_vm10, %v4613_v12, %v4612_v16  ;;  %v4615_v22 = vperm.slane %v11863_v62, %v11660_v15  ;;  %v11864_v12 = vld [vmem:[#allocation248_spill] sm:$0xff] }
 0x5c2   :  { %v4806_v46 = vsel %vm10949_vm10, %v4805_v35, %v4804_v10  ;;  %3156 = vmin.xlane.f32.xlu2 %v3155_v47  ;;  %3168 = vmin.xlane.f32.xlu0 %v3167_v30  ;;  %v4426_v13 = vsel %vm3434_vm12, %v4425_v29, %v4424_v26  ;;  %v4518_v41 = vsel %vm10949_vm10, %v4517_v28, %v4516_v40  ;;  %v11865_v30 = vld [vmem:[#allocation63_spill] sm:$0xff]  ;;  %vm10953_vm10 = vcmask 1041408   ;;  %v11944_v17 = vld [vmem:[#allocation212_spill] sm:$0xff] }
 0x5c3   :  { %3162 = vmin.xlane.f32.xlu1 %v3161_v42  ;;  %v9326_v60 = vadd.f32 %v9265_v61, %v11658_v39  ;;  %v4427_v45 = vperm.slane %v11864_v12, %v8493_v50  ;;  %v4520_v47 = vsel %vm3430_vm11, %v4519_v18, %v4518_v41  ;;  %v3079_v29 = vadd.f32 %v8849_v34, %v11865_v30  ;;  %v11867_v40 = vld [vmem:[#allocation307_spill] sm:$0xff]  ;;  %v11870_v41 = vld [vmem:[#allocation252_spill] sm:$0xff] }
 0x5c4   :  { %v3080_v14 = vadd.f32 %v8854_v3, %v11866_v43  ;;  %v4521_v38 = vperm.slane %v11867_v40, %v8481_v44  ;;  %v4616_v33 = vsel %vm3430_vm11, %v4615_v22, %v4614_v58  ;;  %v4619_v39 = vperm.slane %v11868_v9, %v8493_v50  ;;  %v11871_v22 = vld [vmem:[#allocation314_spill] sm:$0xff] }
 0x5c5   :  { %v2965_v42 = vpop.xlane.xlu2 %2964  ;;  %v2977_v20 = vpop.xlane.xlu0 %2976  ;;  %v3164_v35 = vmin.f32 %v9274_v54, %v9278_v19  ;;  %v4428_v18 = vsel %vm3438_vm13, %v4427_v45, %v4426_v13  ;;  %v4617_v28 = vperm.slane %v11869_v11, %v8481_v44  ;;  %v3176_v26 = vmin.f32 %v3083_v23, %v3084_v55  ;;  %v11872_v54 = vld [vmem:[#allocation311_spill] sm:$0xff] }
 0x5c6   :  { %v4807_v16 = vperm.slane %v2965_v42, %v11660_v15  ;;  %v2971_v10 = vpop.xlane.xlu1 %2970  ;;  %v4429_v58 = vperm.slane %v11870_v41, %v8501_v1  ;;  %v4522_v62 = vsel %vm3434_vm12, %v4521_v38, %v4520_v47  ;;  %v4525_v12 = vperm.slane %v11871_v22, %v8501_v1 }
 0x5c7   :  { %v4809_v40 = vperm.slane %v2968_v6, %v8481_v44  ;;  %v4523_v19 = vperm.slane %v11872_v54, %v8493_v50  ;;  %v4618_v13 = vsel %vm3434_vm12, %v4617_v28, %v4616_v33  ;;  %v4811_v9 = vperm.slane %v2971_v10, %v8493_v50  ;;  %v11873_v6 = vld [vmem:[#allocation377_spill] sm:$0xff]  ;;  %v11876_v28 = vld [vmem:[#allocation8_spill] sm:$0xff] }
 0x5c8   :  { %v4808_v45 = vsel %vm3430_vm11, %v4807_v16, %v4806_v46  ;;  %v4430_v23 = vsel %vm3442_vm14, %v4429_v58, %v4428_v18  ;;  %v4620_v55 = vsel %vm3438_vm13, %v4619_v39, %v4618_v13  ;;  %v3170_v38 = vmin.f32 %v3079_v29, %v3080_v14  ;;  %v11875_v39 = vld [vmem:[#allocation92_spill] sm:$0xff] }
 0x5c9   :  { %v4810_v47 = vsel %vm3434_vm12, %v4809_v40, %v4808_v45  ;;  %v4524_v42 = vsel %vm3438_vm13, %v4523_v19, %v4522_v62  ;;  %v4621_v11 = vperm.slane %v11873_v6, %v8501_v1  ;;  %v11874_v46 = vperm.slane %v11790_v48, %v8493_v50  ;;  %v11877_v10 = vld [vmem:[#allocation68_spill] sm:$0xff]  ;;  %v11878_v62 = vld [vmem:[#allocation22_spill] sm:$0xff] }
 0x5ca   :  { %v4812_v41 = vsel %vm3438_vm13, %v4811_v9, %v4810_v47  ;;  %3165 = vmin.xlane.f32.xlu2 %v3164_v35  ;;  %3177 = vmin.xlane.f32.xlu0 %v3176_v26  ;;  %v3540_v18 = vperm.slane %v11875_v39, %v8372_v49  ;;  %v4526_v29 = vsel %vm3442_vm14, %v4525_v12, %v4524_v42  ;;  %vm4155_vm9 = vcmask 1042432   ;;  %v11879_v12 = vld [vmem:[#allocation10_spill] sm:$0xff]  ;;  %v11881_v42 = vld [vmem:[#allocation155_spill] sm:$0xff] }
 0x5cb   :  { %v3537_v33 = vsel %vm3438_vm13, %v11874_v46, %v9046_v25  ;;  %3171 = vmin.xlane.f32.xlu1 %v3170_v38  ;;  %v4944_v14 = vsel %vm10954_vm15, %v9008_v24, %v9093_v7  ;;  %v4622_v35 = vsel %vm3442_vm14, %v4621_v11, %v4620_v55  ;;  %v3081_v16 = vadd.f32 %v8849_v34, %v11876_v28 }
 0x5cc   :  { %v3082_v48 = vadd.f32 %v8854_v3, %v11877_v10  ;;  %v4946_v25 = vsel %vm10953_vm10, %v4944_v14, %v4430_v23  ;;  %v3085_v22 = vadd.f32 %v8849_v34, %v11878_v62  ;;  %v3086_v40 = vadd.f32 %v8854_v3, %v11879_v12  ;;  %v11880_v23 = vld [vmem:[#allocation427_spill] sm:$0xff] }
 0x5cd   :  { %v2974_v26 = vpop.xlane.xlu2 %2973  ;;  %v2986_v58 = vpop.xlane.xlu0 %2985  ;;  %v4948_v24 = vsel %vm4155_vm9, %v4946_v25, %v4526_v29  ;;  %vm4158_vm8 = vcmask 1043456   ;;  %v3251_v19 = vmin.f32 %v9126_v51, %v9326_v60  ;;  %vm10958_vm7 = vcmask 1044480   ;;  %v11885_v29 = vld [vmem:[#allocation153_spill] sm:$0xff]  ;;  %v11889_v25 = vld [vmem:[#allocation87_spill] sm:$0xff] }
 0x5ce   :  { %v4813_v7 = vperm.slane %v2974_v26, %v8501_v1  ;;  %v2980_v54 = vpop.xlane.xlu1 %2979  ;;  %v4950_v13 = vsel %vm4158_vm8, %v4948_v24, %v4622_v35  ;;  %v4815_v45 = vperm.slane %v2977_v20, %v8372_v49  ;;  %vm10956_vm10 = vcmask 1045504   ;;  %v11883_v20 = vld [vmem:[#allocation105_spill] sm:$0xff]  ;;  %v11887_v35 = vld [vmem:[#allocation424_spill] sm:$0xff]  ;;  %v11891_v24 = vld [vmem:[#allocation106_spill] sm:$0xff] }
 0x5cf   :  { %v4816_v9 = vperm.slane %v2980_v54, %v8387_v63  ;;  %v4952_v55 = vsel %vm10958_vm7, %v4950_v13, %v11880_v23  ;;  %v3173_v38 = vmin.f32 %v3081_v16, %v3082_v48  ;;  %v3543_v6 = vperm.slane %v11881_v42, %v8392_v36  ;;  %v11888_v16 = vld [vmem:[#allocation156_spill] sm:$0xff]  ;;  %v11893_v54 = vld [vmem:[#allocation154_spill] sm:$0xff]  ;;  %v11899_v42 = vld [vmem:[#allocation15_spill] sm:$0xff] }
 0x5d0   :  { %v4814_v47 = vsel %vm3442_vm14, %v4813_v7, %v4812_v41  ;;  %v3179_v60 = vmin.f32 %v3085_v22, %v3086_v40  ;;  %v11884_v46 = vperm.slane %v11883_v20, %v11660_v15  ;;  %v11886_v14 = vperm.slane %v11885_v29, %v8387_v63  ;;  %v11890_v22 = vld [vmem:[#allocation104_spill] sm:$0xff] }
 0x5d1   :  { %v9398_v11 = vsel %vm10956_vm10, %v4952_v55, %v4814_v47  ;;  %v4817_v51 = vsel %vm3386_vm0, %v4816_v9, %v4815_v45  ;;  %v3545_v48 = vperm.slane %v11888_v16, %v11887_v35  ;;  %v3441_v26 = vperm.slane %v11889_v25, %v8501_v1  ;;  %v11895_v45 = vld [vmem:[#allocation72_spill] sm:$0xff]  ;;  %v11896_v9 = vld [vmem:[#allocation73_spill] sm:$0xff]  ;;  %v11898_v47 = vld [vmem:[#allocation74_spill] sm:$0xff] }
 0x5d2   :  { %11882 = vst [vmem:[#allocation75_spill] sm:$0xff] %v9398_v11  ;;  %v3468_v39 = vsel %vm3430_vm11, %v11884_v46, %v8940_v37  ;;  %v3542_v41 = vsel %vm3386_vm0, %v11886_v14, %v3540_v18  ;;  %3174 = vmin.xlane.f32.xlu2 %v3173_v38  ;;  %3252 = vmin.xlane.f32.xlu0 %v3251_v19  ;;  %v11897_v55 = vld [vmem:[#allocation12_spill] sm:$0xff]  ;;  %v11900_v46 = vld [vmem:[#allocation14_spill] sm:$0xff]  ;;  %vm11945_vm10 = vcmask 654912   ;;  %vm11948_vm7 = vcmask 720512  }
 0x5d3   :  { %v3471_v40 = vperm.slane %v11890_v22, %v8493_v50  ;;  %v11892_v7 = vperm.slane %v11891_v24, %v8481_v44  ;;  %v11894_v13 = vperm.slane %v11893_v54, %v8501_v1  ;;  %3180 = vmin.xlane.f32.xlu1 %v3179_v60  ;;  %v3087_v19 = vadd.f32 %v8849_v34, %v11895_v45  ;;  %v11901_v60 = vld [vmem:[#allocation27_spill] sm:$0xff]  ;;  %v11902_v34 = vld [vmem:[#allocation28_spill] sm:$0xff] }
 0x5d4   :  { %v3088_v23 = vadd.f32 %v8854_v3, %v11896_v9  ;;  %v3221_v38 = vadd.f32 %v11898_v47, %v11897_v55  ;;  %v3222_v20 = vadd.f32 %v9265_v61, %v11899_v42  ;;  %v3544_v29 = vsel %vm3390_vm1, %v3543_v6, %v3542_v41  ;;  %v11906_v41 = vld [vmem:[#allocation93_spill] sm:$0xff]  ;;  %v11907_v55 = vld [vmem:[#allocation203_spill] sm:$0xff] }
 0x5d5   :  { %v3470_v37 = vsel %vm3434_vm12, %v11892_v7, %v3468_v39  ;;  %v3539_v18 = vsel %vm3442_vm14, %v11894_v13, %v3537_v33  ;;  %v3443_v39 = vsel %vm3442_vm14, %v3441_v26, %v11900_v46  ;;  %v2983_v14 = vpop.xlane.xlu2 %2982  ;;  %v2995_v33 = vpop.xlane.xlu0 %2994  ;;  %v3189_v16 = vadd.f32 %v11898_v47, %v11901_v60  ;;  %v11923_v22 = vld [vmem:[#allocation31_spill] sm:$0xff] }
 0x5d6   :  { %v3190_v25 = vadd.f32 %v9265_v61, %v11902_v34  ;;  %v9440_v3 = vsel %vm3438_vm13, %v3471_v40, %v3470_v37  ;;  %v3546_v7 = vsel %vm10965_vm2, %v3545_v48, %v3544_v29  ;;  %v4818_v26 = vperm.slane %v2983_v14, %v8392_v36  ;;  %v2989_v54 = vpop.xlane.xlu1 %2988  ;;  %v11908_v14 = vld [vmem:[#allocation201_spill] sm:$0xff] }
 0x5d7   :  { %11903 = vst [vmem:[#allocation77_spill] sm:$0xff] %v9440_v3  ;;  %v9447_v6 = vsel %vm10954_vm15, %v3443_v39, %v3539_v18  ;;  %v3547_v13 = vperm.slane %v11906_v41, %v8404_v57  ;;  %v3605_v42 = vperm.slane %v11907_v55, %v8372_v49  ;;  %v4820_v40 = vperm.slane %v2986_v58, %v11887_v35  ;;  %v11909_v41 = vld [vmem:[#allocation159_spill] sm:$0xff]  ;;  %v11910_v55 = vld [vmem:[#allocation205_spill] sm:$0xff] }
 0x5d8   :  { %11905 = vst [vmem:[#allocation79_spill] sm:$0xff] %v9447_v6  ;;  %v4819_v37 = vsel %vm3390_vm1, %v4818_v26, %v4817_v51  ;;  %v4822_v46 = vperm.slane %v2989_v54, %v8404_v57  ;;  %v3182_v60 = vmin.f32 %v3087_v19, %v3088_v23  ;;  %v3302_v48 = vmin.f32 %v3221_v38, %v3222_v20  ;;  %v11911_v19 = vld [vmem:[#allocation158_spill] sm:$0xff]  ;;  %v11912_v38 = vld [vmem:[#allocation157_spill] sm:$0xff]  ;;  %v11922_v20 = vld [vmem:[#allocation207_spill] sm:$0xff] }
 0x5d9   :  { %v3548_v29 = vsel %vm10964_vm3, %v3547_v13, %v3546_v7  ;;  %v3606_v18 = vperm.slane %v11908_v14, %v8387_v63  ;;  %v4821_v39 = vsel %vm10965_vm2, %v4820_v40, %v4819_v37  ;;  %v3254_v34 = vmin.f32 %v3189_v16, %v3190_v25  ;;  %v11913_v16 = vld [vmem:[#allocation206_spill] sm:$0xff]  ;;  %v11914_v26 = vld [vmem:[#allocation57_spill] sm:$0xff]  ;;  %v11915_v13 = vld [vmem:[#allocation24_spill] sm:$0xff] }
 0x5da   :  { %v3551_v24 = vperm.slane %v11909_v41, %v8435_v59  ;;  %v3608_v58 = vperm.slane %v11910_v55, %v8392_v36  ;;  %v4823_v51 = vsel %vm10964_vm3, %v4822_v46, %v4821_v39  ;;  %3183 = vmin.xlane.f32.xlu2 %v3182_v60  ;;  %3303 = vmin.xlane.f32.xlu0 %v3302_v48  ;;  %v11916_v37 = vld [vmem:[#allocation29_spill] sm:$0xff]  ;;  %v11917_v60 = vld [vmem:[#allocation30_spill] sm:$0xff]  ;;  %vm11943_vm15 = vcmask 589312  }
 0x5db   :  { %v3549_v23 = vperm.slane %v11911_v19, %v8418_v2  ;;  %v3607_v7 = vsel %vm3386_vm0, %v3606_v18, %v3605_v42  ;;  %v3610_v25 = vperm.slane %v11913_v16, %v11887_v35  ;;  %3255 = vmin.xlane.f32.xlu1 %v3254_v34  ;;  %v3219_v54 = vadd.f32 %v11898_v47, %v11914_v26  ;;  %v11919_v34 = vld [vmem:[#allocation25_spill] sm:$0xff]  ;;  %v11920_v19 = vld [vmem:[#allocation26_spill] sm:$0xff] }
 0x5dc   :  { %v3220_v40 = vadd.f32 %v9265_v61, %v11915_v13  ;;  %v3193_v46 = vadd.f32 %v11898_v47, %v11916_v37  ;;  %v3194_v48 = vadd.f32 %v9265_v61, %v11917_v60  ;;  %v3191_v55 = vadd.f32 %v11898_v47, %v11919_v34  ;;  %v11921_v37 = vld [vmem:[#allocation204_spill] sm:$0xff]  ;;  %v11925_v3 = vld [vmem:[#allocation33_spill] sm:$0xff] }
 0x5dd   :  { %v3550_v14 = vsel %vm10963_vm4, %v3549_v23, %v3548_v29  ;;  %v2992_v39 = vpop.xlane.xlu2 %2991  ;;  %v3004_v41 = vpop.xlane.xlu0 %3003  ;;  %v3192_v16 = vadd.f32 %v9265_v61, %v11920_v19  ;;  %v3609_v13 = vsel %vm3390_vm1, %v3608_v58, %v3607_v7  ;;  %v3612_v60 = vperm.slane %v11921_v37, %v8404_v57 }
 0x5de   :  { %v3552_v26 = vsel %vm10962_vm5, %v3551_v24, %v3550_v14  ;;  %v4824_v29 = vperm.slane %v2992_v39, %v8418_v2  ;;  %v2998_v23 = vpop.xlane.xlu1 %2997  ;;  %v3611_v18 = vsel %vm10965_vm2, %v3610_v25, %v3609_v13  ;;  %v3618_v11 = vperm.slane %v11922_v20, %v8422_v27  ;;  %v11924_v39 = vld [vmem:[#allocation208_spill] sm:$0xff] }
 0x5df   :  { %v4826_v34 = vperm.slane %v2995_v33, %v8435_v59  ;;  %v9498_v19 = vadd.f32 %v11898_v47, %v11923_v22  ;;  %v4828_v58 = vperm.slane %v2998_v23, %v8422_v27  ;;  %v3299_v7 = vmin.f32 %v3219_v54, %v3220_v40  ;;  %v11926_v22 = vld [vmem:[#allocation209_spill] sm:$0xff]  ;;  %v11927_v54 = vld [vmem:[#allocation34_spill] sm:$0xff] }
 0x5e0   :  { %v4825_v24 = vsel %vm10963_vm4, %v4824_v29, %v4823_v51  ;;  %v3260_v14 = vmin.f32 %v3193_v46, %v3194_v48  ;;  %v3614_v37 = vperm.slane %v11924_v39, %v8418_v2  ;;  %v3257_v13 = vmin.f32 %v3191_v55, %v3192_v16  ;;  %v11928_v46 = vld [vmem:[#allocation37_spill] sm:$0xff]  ;;  %v11932_v23 = vld [vmem:[#allocation54_spill] sm:$0xff] }
 0x5e1   :  { %v4827_v25 = vsel %vm10962_vm5, %v4826_v34, %v4825_v24  ;;  %v9507_v20 = vadd.f32 %v11898_v47, %v11925_v3  ;;  %v3613_v33 = vsel %vm10964_vm3, %v3612_v60, %v3611_v18  ;;  %v3616_v42 = vperm.slane %v11926_v22, %v8435_v59  ;;  %v11929_v3 = vld [vmem:[#allocation38_spill] sm:$0xff]  ;;  %v11930_v18 = vld [vmem:[#allocation32_spill] sm:$0xff]  ;;  %v11931_v60 = vld [vmem:[#allocation53_spill] sm:$0xff] }
 0x5e2   :  { %v4829_v51 = vsel %vm3410_vm6, %v4828_v58, %v4827_v25  ;;  %3300 = vmin.xlane.f32.xlu2 %v3299_v7  ;;  %3261 = vmin.xlane.f32.xlu0 %v3260_v14  ;;  %v9515_v40 = vadd.f32 %v9265_v61, %v11927_v54  ;;  %v9519_v48 = vadd.f32 %v11898_v47, %v11928_v46  ;;  %v11933_v24 = vld [vmem:[#allocation18_spill] sm:$0xff]  ;;  %v11934_v7 = vld [vmem:[#allocation19_spill] sm:$0xff] }
 0x5e3   :  { %3258 = vmin.xlane.f32.xlu1 %v3257_v13  ;;  %v9523_v55 = vadd.f32 %v9265_v61, %v11929_v3  ;;  %v9527_v16 = vadd.f32 %v9265_v61, %v11930_v18  ;;  %v3223_v29 = vadd.f32 %v11898_v47, %v11931_v60  ;;  %v3224_v34 = vadd.f32 %v9265_v61, %v11932_v23  ;;  %v11935_v22 = vld [vmem:[#allocation11_spill] sm:$0xff] }
 0x5e4   :  { %v3227_v58 = vadd.f32 %v11898_v47, %v11933_v24  ;;  %v3228_v14 = vadd.f32 %v9265_v61, %v11934_v7  ;;  %v3615_v39 = vsel %vm10963_vm4, %v3614_v37, %v3613_v33  ;;  %v3225_v54 = vadd.f32 %v11898_v47, %v11935_v22  ;;  %v11936_v46 = vld [vmem:[#allocation59_spill] sm:$0xff]  ;;  %v11939_v33 = vld [vmem:[#allocation36_spill] sm:$0xff] }
 0x5e5   :  { %v3001_v25 = vpop.xlane.xlu2 %3000  ;;  %v3013_v13 = vpop.xlane.xlu0 %3012  ;;  %v3226_v3 = vadd.f32 %v9265_v61, %v11936_v46  ;;  %v11937_v18 = vld [vmem:[#allocation35_spill] sm:$0xff]  ;;  %v3617_v23 = vsel %vm10962_vm5, %v3616_v42, %v3615_v39  ;;  %v9554_v45 = vadd.f32 %v9265_v61, %v11939_v33  ;;  %v4832_v22 = vperm.slane %v3004_v41, %v8450_v5  ;;  %v11940_v46 = vld [vmem:[#allocation40_spill] sm:$0xff] }
 0x5e6   :  { %v9544_v60 = vadd.f32 %v11898_v47, %v11937_v18  ;;  %v4830_v24 = vperm.slane %v3001_v25, %v8445_v0  ;;  %v3007_v9 = vpop.xlane.xlu1 %3006  ;;  %v11938_v7 = vld [vmem:[#allocation39_spill] sm:$0xff]  ;;  %v9559_v12 = vadd.f32 %v9265_v61, %v11940_v46  ;;  %v11942_v39 = vld [vmem:[#allocation44_spill] sm:$0xff]  ;;  %v3305_v33 = vmin.f32 %v3223_v29, %v3224_v34 }
 0x5e7   :  { %v9550_v37 = vadd.f32 %v11898_v47, %v11938_v7  ;;  %v11941_v18 = vld [vmem:[#allocation43_spill] sm:$0xff]  ;;  %v9567_v25 = vadd.f32 %v9265_v61, %v11942_v39  ;;  %v4834_v62 = vperm.slane %v3007_v9, %v8453_v31  ;;  %v3311_v6 = vmin.f32 %v3227_v58, %v3228_v14 }
 0x5e8   :  { %v9563_v42 = vadd.f32 %v11898_v47, %v11941_v18  ;;  %v4831_v7 = vsel %vm11943_vm15, %v4830_v24, %v4829_v51  ;;  %v3619_v41 = vsel %vm3410_vm6, %v3618_v11, %v3617_v23  ;;  %v3622_v46 = vperm.slane %v11944_v17, %v8450_v5  ;;  %v11947_v39 = vld [vmem:[#allocation211_spill] sm:$0xff]  ;;  %v11957_v23 = vld [vmem:[#allocation58_spill] sm:$0xff] }
 0x5e9   :  { %v4833_v21 = vsel %vm11945_vm10, %v4832_v22, %v4831_v7  ;;  %v3308_v10 = vmin.f32 %v3225_v54, %v3226_v3  ;;  %v3620_v43 = vperm.slane %v11947_v39, %v8445_v0  ;;  %v11949_v9 = vperm.slane %v11912_v38, %v8422_v27  ;;  %vm11951_vm10 = vmmov %vm11943_vm15  ;;  %v11956_v54 = vld [vmem:[#allocation9_spill] sm:$0xff] }
 0x5ea   :  { %v4835_v51 = vsel %vm11948_vm7, %v4834_v62, %v4833_v21  ;;  %3306 = vmin.xlane.f32.xlu2 %v3305_v33  ;;  %3312 = vmin.xlane.f32.xlu0 %v3311_v6  ;;  %v3263_v17 = vmin.f32 %v9507_v20, %v9515_v40  ;;  %v3266_v29 = vmin.f32 %v9519_v48, %v9523_v55  ;;  %v11952_v62 = vld [vmem:[#allocation210_spill] sm:$0xff]  ;;  %vm11954_vm7 = vcmask 654912   ;;  %v11958_v22 = vld [vmem:[#allocation45_spill] sm:$0xff] }
 0x5eb   :  { %v9584_v11 = vsel %vm3410_vm6, %v11949_v9, %v3552_v26  ;;  %3309 = vmin.xlane.f32.xlu1 %v3308_v10  ;;  %v3269_v34 = vmin.f32 %v9498_v19, %v9527_v16  ;;  %v3621_v21 = vsel %vm11951_vm10, %v3620_v43, %v3619_v41  ;;  %v3624_v6 = vperm.slane %v11952_v62, %v8453_v31  ;;  %v11953_v26 = vld [vmem:[#allocation41_spill] sm:$0xff]  ;;  %v11955_v19 = vld [vmem:[#allocation42_spill] sm:$0xff] }
 0x5ec   :  { %11950 = vst [vmem:[#allocation80_spill] sm:$0xff] %v9584_v11  ;;  %v9599_v10 = vadd.f32 %v11898_v47, %v11953_v26  ;;  %v3623_v20 = vsel %vm11954_vm7, %v3622_v46, %v3621_v21  ;;  %v9608_v55 = vadd.f32 %v9265_v61, %v11955_v19  ;;  %v3229_v3 = vadd.f32 %v11898_v47, %v11956_v54  ;;  %v11959_v41 = vld [vmem:[#allocation46_spill] sm:$0xff]  ;;  %v11960_v39 = vld [vmem:[#allocation49_spill] sm:$0xff]  ;;  %v11965_v54 = vld [vmem:[#allocation47_spill] sm:$0xff] }
 0x5ed   :  { %v3010_v40 = vpop.xlane.xlu2 %3009  ;;  %v3022_v58 = vpop.xlane.xlu0 %3021  ;;  %v3230_v24 = vadd.f32 %v9265_v61, %v11957_v23  ;;  %v9617_v7 = vadd.f32 %v11898_v47, %v11958_v22  ;;  %v4838_v33 = vperm.slane %v3013_v13, %v11660_v15  ;;  %v9622_v46 = vadd.f32 %v9265_v61, %v11959_v41  ;;  %v11961_v21 = vld [vmem:[#allocation50_spill] sm:$0xff] }
 0x5ee   :  { %v4836_v16 = vperm.slane %v3010_v40, %v8472_v56  ;;  %v3016_v14 = vpop.xlane.xlu1 %3015  ;;  %v9626_v9 = vadd.f32 %v11898_v47, %v11960_v39  ;;  %v9630_v62 = vadd.f32 %v9265_v61, %v11961_v21  ;;  %vm11963_vm15 = vcmask 720512   ;;  %v11967_v23 = vld [vmem:[#allocation214_spill] sm:$0xff]  ;;  %v11968_v21 = vld [vmem:[#allocation48_spill] sm:$0xff] }
 0x5ef   :  { %v3625_v26 = vsel %vm11963_vm15, %v3624_v6, %v3623_v20  ;;  %vm11964_vm10 = vcmask 786112   ;;  %v4840_v19 = vperm.slane %v3016_v14, %v8481_v44  ;;  %v9637_v13 = vadd.f32 %v11898_v47, %v11965_v54  ;;  %v11972_v54 = vld [vmem:[#allocation215_spill] sm:$0xff]  ;;  %v11974_v39 = vld [vmem:[#allocation20_spill] sm:$0xff] }
 0x5f0   :  { %11962 = vst [vmem:[#allocation78_spill] sm:$0xff] %v9630_v62  ;;  %v4837_v40 = vsel %vm11964_vm10, %v4836_v16, %v4835_v51  ;;  %v3626_v22 = vperm.slane %v11967_v23, %v8472_v56  ;;  %v9646_v28 = vadd.f32 %v9265_v61, %v11968_v21  ;;  %v11970_v51 = vld [vmem:[#allocation213_spill] sm:$0xff]  ;;  %v3314_v16 = vmin.f32 %v3229_v3, %v3230_v24  ;;  %vm11971_vm7 = vmmov %vm11964_vm10  ;;  %v11973_v21 = vld [vmem:[#allocation268_spill] sm:$0xff] }
 0x5f1   :  { %11966 = vst [vmem:[#allocation82_spill] sm:$0xff] %v9637_v13  ;;  %v4839_v41 = vsel %vm3430_vm11, %v4838_v33, %v4837_v40  ;;  %v3630_v6 = vperm.slane %v11970_v51, %v8481_v44  ;;  %v3628_v33 = vperm.slane %v11972_v54, %v11660_v15  ;;  %v3702_v51 = vperm.slane %v11973_v21, %v8387_v63  ;;  %v11976_v24 = vld [vmem:[#allocation60_spill] sm:$0xff]  ;;  %v11978_v54 = vld [vmem:[#allocation17_spill] sm:$0xff]  ;;  %v11983_v13 = vld [vmem:[#allocation51_spill] sm:$0xff] }
 0x5f2   :  { %11969 = vst [vmem:[#allocation83_spill] sm:$0xff] %v9646_v28  ;;  %v4841_v20 = vsel %vm3434_vm12, %v4840_v19, %v4839_v41  ;;  %3264 = vmin.xlane.f32.xlu2 %v3263_v17  ;;  %3270 = vmin.xlane.f32.xlu0 %v3269_v34  ;;  %v3627_v14 = vsel %vm11971_vm7, %v3626_v22, %v3625_v26  ;;  %v11975_v34 = vld [vmem:[#allocation21_spill] sm:$0xff]  ;;  %v11985_v28 = vld [vmem:[#allocation52_spill] sm:$0xff]  ;;  %v11987_v62 = vld [vmem:[#allocation331_spill] sm:$0xff]  ;;  %vm12015_vm15 = vcmask 589312   ;;  %vm12023_vm7 = vcmask 654912  }
 0x5f3   :  { %3267 = vmin.xlane.f32.xlu1 %v3266_v29  ;;  %v3233_v17 = vadd.f32 %v11898_v47, %v11974_v39  ;;  %v3234_v3 = vadd.f32 %v9265_v61, %v11975_v34  ;;  %v9666_v26 = vadd.f32 %v11898_v47, %v11976_v24  ;;  %v11977_v29 = vld [vmem:[#allocation269_spill] sm:$0xff]  ;;  %v3231_v23 = vadd.f32 %v11898_v47, %v11978_v54  ;;  %v11981_v24 = vld [vmem:[#allocation264_spill] sm:$0xff]  ;;  %vm12020_vm10 = vmmov %vm12015_vm15 }
 0x5f4   :  { %v3704_v19 = vperm.slane %v11977_v29, %v8392_v36  ;;  %v3232_v21 = vadd.f32 %v9265_v61, %v11836_v8  ;;  %v11979_v40 = vld [vmem:[#allocation61_spill] sm:$0xff]  ;;  %v3701_v38 = vperm.slane %v11981_v24, %v8372_v49  ;;  %v11982_v29 = vld [vmem:[#allocation332_spill] sm:$0xff]  ;;  %v3629_v54 = vsel %vm3430_vm11, %v3628_v33, %v3627_v14 }
 0x5f5   :  { %v3019_v22 = vpop.xlane.xlu2 %3018  ;;  %v3097_v41 = vpop.xlane.xlu0 %3096  ;;  %v9676_v39 = vadd.f32 %v9265_v61, %v11979_v40  ;;  %v11980_v34 = vld [vmem:[#allocation217_spill] sm:$0xff]  ;;  %v3798_v48 = vperm.slane %v11982_v29, %v8387_v63  ;;  %v4844_v8 = vperm.slane %v3022_v58, %v8501_v1  ;;  %v9689_v40 = vadd.f32 %v11898_v47, %v11983_v13  ;;  %v11989_v13 = vld [vmem:[#allocation55_spill] sm:$0xff] }
 0x5f6   :  { %v3632_v43 = vperm.slane %v11980_v34, %v8493_v50  ;;  %v4842_v18 = vperm.slane %v3019_v22, %v8493_v50  ;;  %v3091_v11 = vpop.xlane.xlu1 %3090  ;;  %v9693_v34 = vadd.f32 %v9265_v61, %v11985_v28  ;;  %v3703_v24 = vsel %vm3386_vm0, %v3702_v51, %v3701_v38  ;;  %v11991_v28 = vld [vmem:[#allocation267_spill] sm:$0xff] }
 0x5f7   :  { %11984 = vst [vmem:[#allocation94_spill] sm:$0xff] %v9689_v40  ;;  %v3797_v29 = vperm.slane %v11987_v62, %v8372_v49  ;;  %v3320_v50 = vmin.f32 %v3233_v17, %v3234_v3  ;;  %v3705_v14 = vsel %vm3390_vm1, %v3704_v19, %v3703_v24  ;;  %v3317_v33 = vmin.f32 %v3231_v23, %v3232_v21  ;;  %v11992_v62 = vld [vmem:[#allocation395_spill] sm:$0xff]  ;;  %v11994_v3 = vld [vmem:[#allocation56_spill] sm:$0xff] }
 0x5f8   :  { %11986 = vst [vmem:[#allocation81_spill] sm:$0xff] %v9693_v34  ;;  %v4843_v22 = vsel %vm3438_vm13, %v4842_v18, %v4841_v20  ;;  %v9705_v40 = vadd.f32 %v11898_v47, %v11989_v13  ;;  %v3706_v34 = vperm.slane %v11991_v28, %v11887_v35  ;;  %v3893_v51 = vperm.slane %v11992_v62, %v8372_v49  ;;  %v11993_v20 = vld [vmem:[#allocation330_spill] sm:$0xff]  ;;  %v11995_v21 = vld [vmem:[#allocation271_spill] sm:$0xff]  ;;  %v12000_v28 = vld [vmem:[#allocation397_spill] sm:$0xff] }
 0x5f9   :  { %v9701_v58 = vsel %vm3442_vm14, %v4844_v8, %v4843_v22  ;;  %v3799_v38 = vsel %vm3386_vm0, %v3798_v48, %v3797_v29  ;;  %v3631_v18 = vsel %vm3434_vm12, %v3630_v6, %v3629_v54  ;;  %v3800_v17 = vperm.slane %v11993_v20, %v8392_v36  ;;  %v11997_v6 = vld [vmem:[#allocation393_spill] sm:$0xff]  ;;  %v11998_v29 = vld [vmem:[#allocation334_spill] sm:$0xff] }
 0x5fa   :  { %11988 = vst [vmem:[#allocation91_spill] sm:$0xff] %v9701_v58  ;;  %3315 = vmin.xlane.f32.xlu2 %v3314_v16  ;;  %3321 = vmin.xlane.f32.xlu0 %v3320_v50  ;;  %v9719_v19 = vadd.f32 %v9265_v61, %v11994_v3  ;;  %v3707_v48 = vsel %vm10965_vm2, %v3706_v34, %v3705_v14  ;;  %v11996_v50 = vld [vmem:[#allocation272_spill] sm:$0xff]  ;;  %v12001_v3 = vld [vmem:[#allocation398_spill] sm:$0xff] }
 0x5fb   :  { %11990 = vst [vmem:[#allocation109_spill] sm:$0xff] %v9705_v40  ;;  %3318 = vmin.xlane.f32.xlu1 %v3317_v33  ;;  %v3708_v8 = vperm.slane %v11995_v21, %v8404_v57  ;;  %v3710_v16 = vperm.slane %v11996_v50, %v8418_v2  ;;  %v3894_v54 = vperm.slane %v11997_v6, %v8387_v63  ;;  %v11999_v33 = vld [vmem:[#allocation335_spill] sm:$0xff]  ;;  %v12002_v6 = vld [vmem:[#allocation270_spill] sm:$0xff] }
 0x5fc   :  { %v3801_v24 = vsel %vm3390_vm1, %v3800_v17, %v3799_v38  ;;  %v3802_v22 = vperm.slane %v11998_v29, %v11887_v35  ;;  %v3804_v13 = vperm.slane %v11999_v33, %v8404_v57  ;;  %v3896_v34 = vperm.slane %v12000_v28, %v8392_v36 }
 0x5fd   :  { %v3094_v14 = vpop.xlane.xlu2 %3093  ;;  %v3106_v62 = vpop.xlane.xlu0 %3105  ;;  %v3895_v20 = vsel %vm3386_vm0, %v3894_v54, %v3893_v51  ;;  %v3898_v21 = vperm.slane %v12001_v3, %v11887_v35  ;;  %v4085_v50 = vperm.slane %v3091_v11, %v8372_v49  ;;  %v3712_v29 = vperm.slane %v12002_v6, %v8435_v59 }
 0x5fe   :  { %v4086_v38 = vperm.slane %v3094_v14, %v8387_v63  ;;  %v3100_v17 = vpop.xlane.xlu1 %3099  ;;  %v4088_v33 = vperm.slane %v3097_v41, %v8392_v36  ;;  %v3237_v28 = vadd.f32 %v11898_v47, %v11852_v4  ;;  %v3238_v23 = vadd.f32 %v9265_v61, %v11853_v53  ;;  %v12003_v4 = vld [vmem:[#allocation333_spill] sm:$0xff] }
 0x5ff   :  { %v3709_v51 = vsel %vm10964_vm3, %v3708_v8, %v3707_v48  ;;  %v3803_v54 = vsel %vm10965_vm2, %v3802_v22, %v3801_v24  ;;  %v4090_v14 = vperm.slane %v3100_v17, %v11887_v35  ;;  %v3897_v41 = vsel %vm3390_vm1, %v3896_v34, %v3895_v20  ;;  %v12006_v22 = vld [vmem:[#allocation396_spill] sm:$0xff] }
 0x600   :  { %v4087_v11 = vsel %vm3386_vm0, %v4086_v38, %v4085_v50  ;;  %v3711_v3 = vsel %vm10963_vm4, %v3710_v16, %v3709_v51  ;;  %v3805_v6 = vsel %vm10964_vm3, %v3804_v13, %v3803_v54  ;;  %v3806_v40 = vperm.slane %v12003_v4, %v8418_v2 }
 0x601   :  { %v4089_v58 = vsel %vm3390_vm1, %v4088_v33, %v4087_v11  ;;  %v3899_v53 = vsel %vm10965_vm2, %v3898_v21, %v3897_v41  ;;  %v12004_v8 = vmin.f32 %v9550_v37, %v9559_v12  ;;  %v12005_v16 = vmin.f32 %v9544_v60, %v9554_v45  ;;  %v12008_v45 = vld [vmem:[#allocation274_spill] sm:$0xff]  ;;  %v12010_v21 = vld [vmem:[#allocation275_spill] sm:$0xff]  ;;  %v12013_v33 = vld [vmem:[#allocation220_spill] sm:$0xff] }
 0x602   :  { %v4091_v48 = vsel %vm10965_vm2, %v4090_v14, %v4089_v58  ;;  %v9766_v24 = vsel %vm3438_vm13, %v3632_v43, %v3631_v18  ;;  %v3900_v13 = vperm.slane %v12006_v22, %v8404_v57  ;;  %v12007_v34 = vmin.f32 %v9563_v42, %v9567_v25  ;;  %v12009_v18 = vld [vmem:[#allocation338_spill] sm:$0xff]  ;;  %v12011_v25 = vld [vmem:[#allocation337_spill] sm:$0xff] }
 0x603   :  { %3273 = vmin.xlane.f32.xlu2 %v12004_v8  ;;  %3279 = vmin.xlane.f32.xlu0 %v12005_v16  ;;  %v3239_v58 = vadd.f32 %v11898_v47, %v11842_v32  ;;  %v3240_v12 = vadd.f32 %v9265_v61, %v11843_v52  ;;  %v3713_v37 = vsel %vm10962_vm5, %v3712_v29, %v3711_v3  ;;  %v12012_v52 = vld [vmem:[#allocation401_spill] sm:$0xff] }
 0x604   :  { %3276 = vmin.xlane.f32.xlu1 %v12007_v34  ;;  %v3714_v60 = vperm.slane %v12008_v45, %v8422_v27  ;;  %v3807_v43 = vsel %vm10963_vm4, %v3806_v40, %v3805_v6  ;;  %v3810_v20 = vperm.slane %v12009_v18, %v8422_v27  ;;  %v3716_v42 = vperm.slane %v12010_v21, %v8445_v0  ;;  %v12014_v40 = vld [vmem:[#allocation400_spill] sm:$0xff] }
 0x605   :  { %v3808_v50 = vperm.slane %v12011_v25, %v8435_v59  ;;  %v3901_v32 = vsel %vm10964_vm3, %v3900_v13, %v3899_v53  ;;  %v3904_v38 = vperm.slane %v12012_v52, %v8435_v59  ;;  %v3103_v17 = vpop.xlane.xlu2 %3102  ;;  %v3115_v29 = vpop.xlane.xlu0 %3114  ;;  %v3634_v51 = vperm.slane %v12013_v33, %v8501_v1  ;;  %v12016_v45 = vld [vmem:[#allocation336_spill] sm:$0xff] }
 0x606   :  { %v3902_v54 = vperm.slane %v12014_v40, %v8418_v2  ;;  %v4092_v11 = vperm.slane %v3103_v17, %v8404_v57  ;;  %v3109_v14 = vpop.xlane.xlu1 %3108  ;;  %v3326_v3 = vmin.f32 %v3237_v28, %v3238_v23  ;;  %v3715_v6 = vsel %vm3410_vm6, %v3714_v60, %v3713_v37  ;;  %v12022_v25 = vld [vmem:[#allocation64_spill] sm:$0xff]  ;;  %v12026_v40 = vld [vmem:[#allocation277_spill] sm:$0xff] }
 0x607   :  { %v3809_v41 = vsel %vm10962_vm5, %v3808_v50, %v3807_v43  ;;  %v4094_v4 = vperm.slane %v3106_v62, %v8418_v2  ;;  %v3329_v53 = vmin.f32 %v3239_v58, %v3240_v12  ;;  %v4096_v13 = vperm.slane %v3109_v14, %v8435_v59  ;;  %v12017_v62 = vld [vmem:[#allocation273_spill] sm:$0xff]  ;;  %v12018_v12 = vld [vmem:[#allocation399_spill] sm:$0xff] }
 0x608   :  { %v3811_v8 = vsel %vm3410_vm6, %v3810_v20, %v3809_v41  ;;  %v3903_v16 = vsel %vm10963_vm4, %v3902_v54, %v3901_v32  ;;  %v4093_v22 = vsel %vm10964_vm3, %v4092_v11, %v4091_v48  ;;  %v3717_v34 = vsel %vm12015_vm15, %v3716_v42, %v3715_v6  ;;  %v12021_v20 = vld [vmem:[#allocation341_spill] sm:$0xff]  ;;  %v12028_v14 = vld [vmem:[#allocation403_spill] sm:$0xff]  ;;  %vm12030_vm15 = vmmov %vm12023_vm7 }
 0x609   :  { %v3812_v23 = vperm.slane %v12016_v45, %v8445_v0  ;;  %v3905_v28 = vsel %vm10962_vm5, %v3904_v38, %v3903_v16  ;;  %v4095_v37 = vsel %vm10963_vm4, %v4094_v4, %v4093_v22  ;;  %v3718_v58 = vperm.slane %v12017_v62, %v8450_v5  ;;  %v12025_v38 = vld [vmem:[#allocation404_spill] sm:$0xff]  ;;  %v12032_v45 = vld [vmem:[#allocation70_spill] sm:$0xff] }
 0x60a   :  { %v3906_v60 = vperm.slane %v12018_v12, %v8422_v27  ;;  %v4097_v43 = vsel %vm10962_vm5, %v4096_v13, %v4095_v37  ;;  %v12019_v48 = vmin.f32 %v9666_v26, %v9676_v39  ;;  %v3816_v21 = vperm.slane %v12021_v20, %v8453_v31  ;;  %v12024_v26 = vld [vmem:[#allocation340_spill] sm:$0xff]  ;;  %v12036_v12 = vld [vmem:[#allocation339_spill] sm:$0xff] }
 0x60b   :  { %3330 = vmin.xlane.f32.xlu0 %v3329_v53  ;;  %v3813_v18 = vsel %vm12020_vm10, %v3812_v23, %v3811_v8  ;;  %v9820_v42 = vadd.f32 %v11898_v47, %v11865_v30  ;;  %v9824_v50 = vadd.f32 %v9265_v61, %v12022_v25  ;;  %v3719_v32 = vsel %vm12023_vm7, %v3718_v58, %v3717_v34  ;;  %v12027_v30 = vld [vmem:[#allocation278_spill] sm:$0xff]  ;;  %v12029_v4 = vld [vmem:[#allocation8_spill] sm:$0xff] }
 0x60c   :  { %3324 = vmin.xlane.f32.xlu2 %v12019_v48  ;;  %3327 = vmin.xlane.f32.xlu1 %v3326_v3  ;;  %v3814_v39 = vperm.slane %v12024_v26, %v8450_v5  ;;  %v3907_v52 = vsel %vm3410_vm6, %v3906_v60, %v3905_v28  ;;  %v3910_v17 = vperm.slane %v12025_v38, %v8450_v5  ;;  %v12031_v13 = vld [vmem:[#allocation68_spill] sm:$0xff]  ;;  %vm12033_vm10 = vcmask 720512   ;;  %v12038_v26 = vld [vmem:[#allocation402_spill] sm:$0xff] }
 0x60d   :  { %v3720_v54 = vperm.slane %v12026_v40, %v8453_v31  ;;  %v3722_v11 = vperm.slane %v12027_v30, %v8472_v56  ;;  %v3908_v3 = vperm.slane %v12028_v14, %v8445_v0  ;;  %v3112_v6 = vpop.xlane.xlu2 %3111  ;;  %v3124_v41 = vpop.xlane.xlu0 %3123  ;;  %v9840_v53 = vadd.f32 %v11898_v47, %v12029_v4  ;;  %vm12034_vm7 = vmmov %vm12033_vm10  ;;  %v12042_v38 = vld [vmem:[#allocation344_spill] sm:$0xff]  ;;  %v12047_v14 = vld [vmem:[#allocation343_spill] sm:$0xff] }
 0x60e   :  { %v3815_v8 = vsel %vm12030_vm15, %v3814_v39, %v3813_v18  ;;  %v4098_v16 = vperm.slane %v3112_v6, %v8422_v27  ;;  %v3118_v22 = vpop.xlane.xlu1 %3117  ;;  %v3244_v34 = vadd.f32 %v9265_v61, %v12031_v13  ;;  %v3245_v23 = vadd.f32 %v11898_v47, %v12032_v45  ;;  %v12040_v39 = vld [vmem:[#allocation71_spill] sm:$0xff]  ;;  %v12046_v30 = vld [vmem:[#allocation276_spill] sm:$0xff]  ;;  %v12054_v13 = vld [vmem:[#allocation406_spill] sm:$0xff] }
 0x60f   :  { %v3721_v28 = vsel %vm12033_vm10, %v3720_v54, %v3719_v32  ;;  %v3817_v37 = vsel %vm12034_vm7, %v3816_v21, %v3815_v8  ;;  %vm12035_vm5 = vcmask 589312   ;;  %v4100_v58 = vperm.slane %v3115_v29, %v8445_v0  ;;  %vm12043_vm7 = vmmov %vm12030_vm15  ;;  %v12049_v4 = vld [vmem:[#allocation407_spill] sm:$0xff] }
 0x610   :  { %v3909_v62 = vsel %vm12035_vm5, %v3908_v3, %v3907_v52  ;;  %v3818_v60 = vperm.slane %v12036_v12, %v8472_v56  ;;  %v4099_v18 = vsel %vm3410_vm6, %v4098_v16, %v4097_v43  ;;  %v4102_v20 = vperm.slane %v3118_v22, %v8450_v5  ;;  %vm12039_vm10 = vmmov %vm12035_vm5  ;;  %v12050_v16 = vld [vmem:[#allocation78_spill] sm:$0xff] }
 0x611   :  { %v3911_v48 = vsel %vm12030_vm15, %v3910_v17, %v3909_v62  ;;  %vm12037_vm4 = vcmask 786112   ;;  %v3912_v32 = vperm.slane %v12038_v26, %v8453_v31  ;;  %v4101_v21 = vsel %vm12039_vm10, %v4100_v58, %v4099_v18  ;;  %v12055_v62 = vld [vmem:[#allocation426_spill] sm:$0xff]  ;;  %v12056_v58 = vld [vmem:[#allocation281_spill] sm:$0xff] }
 0x612   :  { %v3723_v25 = vsel %vm12037_vm4, %v3722_v11, %v3721_v28  ;;  %v3246_v52 = vadd.f32 %v9265_v61, %v12040_v39  ;;  %vm12041_vm5 = vmmov %vm12037_vm4  ;;  %v3822_v40 = vperm.slane %v12042_v38, %v8481_v44  ;;  %v4103_v17 = vsel %vm12043_vm7, %v4102_v20, %v4101_v21  ;;  %v12057_v20 = vld [vmem:[#allocation280_spill] sm:$0xff] }
 0x613   :  { %v3819_v29 = vsel %vm12041_vm5, %v3818_v60, %v3817_v37  ;;  %v12044_v43 = vmin.f32 %v9617_v7, %v9622_v46  ;;  %v12045_v54 = vmin.f32 %v9599_v10, %v9608_v55  ;;  %v3724_v11 = vperm.slane %v12046_v30, %v11660_v15  ;;  %v12052_v7 = vld [vmem:[#allocation222_spill] sm:$0xff]  ;;  %v12053_v10 = vld [vmem:[#allocation223_spill] sm:$0xff]  ;;  %vm12058_vm15 = vmmov %vm12041_vm5 }
 0x614   :  { %v3820_v3 = vperm.slane %v12047_v14, %v11660_v15  ;;  %vm12048_vm4 = vcmask 720512   ;;  %v3916_v8 = vperm.slane %v12049_v4, %v11660_v15  ;;  %v12051_v22 = vmin.f32 %v9626_v9, %v12050_v16 }
 0x615   :  { %3282 = vmin.xlane.f32.xlu2 %v12044_v43  ;;  %3288 = vmin.xlane.f32.xlu0 %v12045_v54  ;;  %v3913_v6 = vsel %vm12048_vm4, %v3912_v32, %v3911_v48  ;;  %v3637_v46 = vperm.slane %v12052_v7, %v8387_v63  ;;  %v3639_v55 = vperm.slane %v12053_v10, %v8392_v36  ;;  %v3121_v60 = vpop.xlane.xlu2 %3120  ;;  %v3133_v48 = vpop.xlane.xlu0 %3132  ;;  %vm12061_vm10 = vmmov %vm12048_vm4  ;;  %v12065_v7 = vld [vmem:[#allocation346_spill] sm:$0xff]  ;;  %vm12074_vm7 = vcmask 1041408  }
 0x616   :  { %3285 = vmin.xlane.f32.xlu1 %v12051_v22  ;;  %v3914_v45 = vperm.slane %v12054_v13, %v8472_v56  ;;  %v3332_v28 = vmin.f32 %v9820_v42, %v9824_v50  ;;  %v3725_v37 = vsel %vm3430_vm11, %v3724_v11, %v3723_v25  ;;  %v3728_v12 = vperm.slane %v12056_v58, %v12055_v62  ;;  %v3127_v50 = vpop.xlane.xlu1 %3126  ;;  %v12059_v25 = vld [vmem:[#allocation342_spill] sm:$0xff]  ;;  %v12062_v11 = vld [vmem:[#allocation279_spill] sm:$0xff]  ;;  %v12066_v13 = vld [vmem:[#allocation409_spill] sm:$0xff] }
 0x617   :  { %v3821_v9 = vsel %vm3430_vm11, %v3820_v3, %v3819_v29  ;;  %v3335_v18 = vmin.f32 %v9840_v53, %v3244_v34  ;;  %v3726_v26 = vperm.slane %v12057_v20, %v8481_v44  ;;  %v4104_v42 = vperm.slane %v3121_v60, %v8453_v31  ;;  %v12060_v34 = vld [vmem:[#allocation405_spill] sm:$0xff]  ;;  %v12070_v20 = vld [vmem:[#allocation83_spill] sm:$0xff] }
 0x618   :  { %v3823_v32 = vsel %vm3434_vm12, %v3822_v40, %v3821_v9  ;;  %v3915_v21 = vsel %vm12058_vm15, %v3914_v45, %v3913_v6  ;;  %v3824_v39 = vperm.slane %v12059_v25, %v12055_v62  ;;  %v4106_v29 = vperm.slane %v3124_v41, %v8472_v56  ;;  %v12069_v9 = vld [vmem:[#allocation94_spill] sm:$0xff]  ;;  %v12073_v25 = vld [vmem:[#allocation79_spill] sm:$0xff] }
 0x619   :  { %v3917_v38 = vsel %vm3430_vm11, %v3916_v8, %v3915_v21  ;;  %v3338_v43 = vmin.f32 %v3245_v23, %v3246_v52  ;;  %v3727_v53 = vsel %vm3434_vm12, %v3726_v26, %v3725_v37  ;;  %v3918_v54 = vperm.slane %v12060_v34, %v8481_v44  ;;  %v12063_v23 = vld [vmem:[#allocation347_spill] sm:$0xff]  ;;  %v12067_v37 = vld [vmem:[#allocation162_spill] sm:$0xff] }
 0x61a   :  { %v4105_v40 = vsel %vm12061_vm10, %v4104_v42, %v4103_v17  ;;  %v4108_v30 = vperm.slane %v3127_v50, %v11660_v15  ;;  %v3730_v14 = vperm.slane %v12062_v11, %v8501_v1  ;;  %v3729_v3 = vsel %vm3438_vm13, %v3728_v12, %v3727_v53  ;;  %v12064_v17 = vld [vmem:[#allocation216_spill] sm:$0xff]  ;;  %v12068_v12 = vld [vmem:[#allocation81_spill] sm:$0xff]  ;;  %v12071_v26 = vld [vmem:[#allocation82_spill] sm:$0xff] }
 0x61b   :  { %v3825_v6 = vsel %vm3438_vm13, %v3824_v39, %v3823_v32  ;;  %v4107_v4 = vsel %vm12041_vm5, %v4106_v29, %v4105_v40  ;;  %v3919_v41 = vsel %vm3434_vm12, %v3918_v54, %v3917_v38  ;;  %v3922_v52 = vperm.slane %v12063_v23, %v8501_v1  ;;  %v12076_v54 = vld [vmem:[#allocation218_spill] sm:$0xff] }
 0x61c   :  { %v4109_v8 = vsel %vm3430_vm11, %v4108_v30, %v4107_v4  ;;  %v3636_v16 = vperm.slane %v12064_v17, %v8372_v49  ;;  %v3635_v22 = vsel %vm3442_vm14, %v3634_v51, %v9766_v24  ;;  %v3826_v10 = vperm.slane %v12065_v7, %v8501_v1  ;;  %v12083_v7 = vld [vmem:[#allocation161_spill] sm:$0xff] }
 0x61d   :  { %3333 = vmin.xlane.f32.xlu2 %v3332_v28  ;;  %3339 = vmin.xlane.f32.xlu0 %v3338_v43  ;;  %v3920_v45 = vperm.slane %v12066_v13, %v12055_v62  ;;  %v3557_v28 = vperm.slane %v12067_v37, %v8450_v5  ;;  %v3731_v58 = vsel %vm3442_vm14, %v3730_v14, %v3729_v3  ;;  %v3130_v21 = vpop.xlane.xlu2 %3129  ;;  %v3142_v42 = vpop.xlane.xlu0 %3141  ;;  %vm10966_vm4 = vcmask 1046528  }
 0x61e   :  { %3336 = vmin.xlane.f32.xlu1 %v3335_v18  ;;  %v3290_v60 = vmin.f32 %v12069_v9, %v12068_v12  ;;  %v3296_v33 = vmin.f32 %v12071_v26, %v12070_v20  ;;  %v3638_v24 = vsel %vm3386_vm0, %v3637_v46, %v3636_v16  ;;  %v3827_v51 = vsel %vm3442_vm14, %v3826_v10, %v3825_v6  ;;  %v12072_v18 = vld [vmem:[#allocation109_spill] sm:$0xff]  ;;  %v3136_v53 = vpop.xlane.xlu1 %3135  ;;  %v12077_v6 = vld [vmem:[#allocation226_spill] sm:$0xff] }
 0x61f   :  { %v3921_v32 = vsel %vm3438_vm13, %v3920_v45, %v3919_v41  ;;  %v3293_v50 = vmin.f32 %v12072_v18, %v9719_v19  ;;  %v4153_v39 = vsel %vm12074_vm7, %v12073_v25, %v3635_v22  ;;  %v3640_v38 = vsel %vm3390_vm1, %v3639_v55, %v3638_v24  ;;  %v12075_v46 = vld [vmem:[#allocation221_spill] sm:$0xff]  ;;  %v12082_v22 = vld [vmem:[#allocation80_spill] sm:$0xff]  ;;  %v12089_v26 = vld [vmem:[#allocation22_spill] sm:$0xff] }
 0x620   :  { %v3923_v29 = vsel %vm3442_vm14, %v3922_v52, %v3921_v32  ;;  %v4110_v43 = vperm.slane %v3130_v21, %v8481_v44  ;;  %v3641_v34 = vperm.slane %v12075_v46, %v11887_v35  ;;  %v3733_v40 = vperm.slane %v12076_v54, %v8387_v63  ;;  %v12079_v52 = vld [vmem:[#allocation283_spill] sm:$0xff]  ;;  %v12080_v16 = vld [vmem:[#allocation425_spill] sm:$0xff]  ;;  %v12086_v45 = vld [vmem:[#allocation164_spill] sm:$0xff] }
 0x621   :  { %v4156_v30 = vsel %vm4155_vm9, %v4153_v39, %v3731_v58  ;;  %v4112_v19 = vperm.slane %v3133_v48, %v12055_v62  ;;  %v4114_v55 = vperm.slane %v3136_v53, %v8501_v1  ;;  %v3645_v4 = vperm.slane %v12077_v6, %v8418_v2  ;;  %v12087_v58 = vld [vmem:[#allocation225_spill] sm:$0xff]  ;;  %v12090_v24 = vld [vmem:[#allocation10_spill] sm:$0xff] }
 0x622   :  { %v4159_v11 = vsel %vm4158_vm8, %v4156_v30, %v3827_v51  ;;  %v4111_v14 = vsel %vm3434_vm12, %v4110_v43, %v4109_v8  ;;  %v3642_v3 = vsel %vm10965_vm2, %v3641_v34, %v3640_v38  ;;  %vm12078_vm15 = vcmask 1044480   ;;  %v12091_v21 = vld [vmem:[#allocation282_spill] sm:$0xff]  ;;  %v12092_v38 = vld [vmem:[#allocation72_spill] sm:$0xff] }
 0x623   :  { %v4162_v41 = vsel %vm12078_vm15, %v4159_v11, %v3923_v29  ;;  %v4113_v23 = vsel %vm3438_vm13, %v4112_v19, %v4111_v14  ;;  %v3732_v17 = vperm.slane %v12079_v52, %v8372_v49  ;;  %vm12081_vm10 = vcmask 1045504   ;;  %v12093_v29 = vld [vmem:[#allocation73_spill] sm:$0xff]  ;;  %v12094_v43 = vld [vmem:[#allocation224_spill] sm:$0xff]  ;;  %v12099_v6 = vld [vmem:[#allocation410_spill] sm:$0xff] }
 0x624   :  { %v4115_v48 = vsel %vm3442_vm14, %v4114_v55, %v4113_v23  ;;  %v4165_v8 = vsel %vm12081_vm10, %v4162_v41, %v12080_v16  ;;  %v12084_v10 = vperm.slane %v12083_v7, %v8445_v0  ;;  %vm12085_vm5 = vcmask 589312   ;;  %v12096_v19 = vld [vmem:[#allocation285_spill] sm:$0xff]  ;;  %v12098_v55 = vld [vmem:[#allocation284_spill] sm:$0xff] }
 0x625   :  { %3291 = vmin.xlane.f32.xlu2 %v3290_v60  ;;  %3297 = vmin.xlane.f32.xlu0 %v3296_v33  ;;  %v3561_v37 = vperm.slane %v12086_v45, %v8472_v56  ;;  %v3643_v12 = vperm.slane %v12087_v58, %v8404_v57  ;;  %v9976_v9 = vsel %vm10966_vm4, %v4165_v8, %v4115_v48  ;;  %vm12088_vm7 = vcmask 654912   ;;  %v3139_v25 = vpop.xlane.xlu2 %3138  ;;  %v3151_v39 = vpop.xlane.xlu0 %3150  ;;  %v12100_v23 = vld [vmem:[#allocation345_spill] sm:$0xff]  ;;  %v12104_v58 = vld [vmem:[#allocation408_spill] sm:$0xff]  ;;  %v12124_v45 = vld [vmem:[#allocation227_spill] sm:$0xff] }
 0x626   :  { %v3556_v13 = vsel %vm12085_vm5, %v12084_v10, %v12082_v22  ;;  %3294 = vmin.xlane.f32.xlu1 %v3293_v50  ;;  %v3734_v60 = vsel %vm3386_vm0, %v3733_v40, %v3732_v17  ;;  %v3247_v33 = vadd.f32 %v11898_v47, %v12089_v26  ;;  %v3248_v51 = vadd.f32 %v9265_v61, %v12090_v24  ;;  %v3145_v40 = vpop.xlane.xlu1 %3144  ;;  %v12101_v17 = vld [vmem:[#allocation411_spill] sm:$0xff] }
 0x627   :  { %v3558_v20 = vsel %vm12088_vm7, %v3557_v28, %v3556_v13  ;;  %v3644_v32 = vsel %vm10964_vm3, %v3643_v12, %v3642_v3  ;;  %v3735_v18 = vperm.slane %v12091_v21, %v8392_v36  ;;  %v3249_v50 = vadd.f32 %v11898_v47, %v12092_v38  ;;  %v12097_v47 = vld [vmem:[#allocation349_spill] sm:$0xff]  ;;  %v12103_v10 = vld [vmem:[#allocation351_spill] sm:$0xff]  ;;  %v12107_v21 = vld [vmem:[#allocation160_spill] sm:$0xff] }
 0x628   :  { %v3250_v28 = vadd.f32 %v9265_v61, %v12093_v29  ;;  %v3647_v53 = vperm.slane %v12094_v43, %v8435_v59  ;;  %vm12095_vm15 = vcmask 392512   ;;  %v4117_v34 = vperm.slane %v3142_v42, %v8387_v63  ;;  %v12110_v38 = vld [vmem:[#allocation165_spill] sm:$0xff]  ;;  %v12111_v29 = vld [vmem:[#allocation219_spill] sm:$0xff] }
 0x629   :  { %v3646_v46 = vsel %vm12095_vm15, %v3645_v4, %v3644_v32  ;;  %v4116_v54 = vperm.slane %v3139_v25, %v8372_v49  ;;  %v3736_v30 = vsel %vm3390_vm1, %v3735_v18, %v3734_v60  ;;  %v3739_v11 = vperm.slane %v12096_v19, %v8404_v57  ;;  %v12105_v60 = vld [vmem:[#allocation228_spill] sm:$0xff]  ;;  %vm12114_vm7 = vmmov %vm12095_vm15 }
 0x62a   :  { %v3828_v14 = vperm.slane %v12097_v47, %v8372_v49  ;;  %v4119_v61 = vperm.slane %v3145_v40, %v8392_v36  ;;  %v3737_v3 = vperm.slane %v12098_v55, %v11887_v35  ;;  %v3925_v4 = vperm.slane %v12099_v6, %v8387_v63  ;;  %v12116_v6 = vld [vmem:[#allocation288_spill] sm:$0xff] }
 0x62b   :  { %v4118_v42 = vsel %vm3386_vm0, %v4117_v34, %v4116_v54  ;;  %v3341_v41 = vmin.f32 %v3247_v33, %v3248_v51  ;;  %v3829_v52 = vperm.slane %v12100_v23, %v8387_v63  ;;  %v3927_v48 = vperm.slane %v12101_v17, %v8392_v36  ;;  %v12106_v51 = vld [vmem:[#allocation352_spill] sm:$0xff]  ;;  %v12113_v54 = vld [vmem:[#allocation287_spill] sm:$0xff] }
 0x62c   :  { %v4120_v16 = vsel %vm3390_vm1, %v4119_v61, %v4118_v42  ;;  %v3344_v8 = vmin.f32 %v3249_v50, %v3250_v28  ;;  %vm12102_vm10 = vcmask 458112   ;;  %v3738_v7 = vsel %vm10965_vm2, %v3737_v3, %v3736_v30  ;;  %v12117_v42 = vld [vmem:[#allocation350_spill] sm:$0xff] }
 0x62d   :  { %v3648_v22 = vsel %vm12102_vm10, %v3647_v53, %v3646_v46  ;;  %v3831_v13 = vperm.slane %v12103_v10, %v8392_v36  ;;  %v3924_v12 = vperm.slane %v12104_v58, %v8372_v49  ;;  %3342 = vmin.xlane.f32.xlu2 %v3341_v41  ;;  %v3649_v26 = vperm.slane %v12105_v60, %v8422_v27  ;;  %v12112_v46 = vld [vmem:[#allocation229_spill] sm:$0xff]  ;;  %v3148_v19 = vpop.xlane.xlu2 %3147 }
 0x62e   :  { %v3740_v33 = vsel %vm10964_vm3, %v3739_v11, %v3738_v7  ;;  %v3830_v24 = vsel %vm3386_vm0, %v3829_v52, %v3828_v14  ;;  %v3833_v32 = vperm.slane %v12106_v51, %v11887_v35  ;;  %3345 = vmin.xlane.f32.xlu1 %v3344_v8  ;;  %v12108_v18 = vperm.slane %v12107_v21, %v8453_v31  ;;  %v12115_v14 = vld [vmem:[#allocation348_spill] sm:$0xff]  ;;  %v3154_v3 = vpop.xlane.xlu1 %3153  ;;  %v12121_v58 = vld [vmem:[#allocation413_spill] sm:$0xff] }
 0x62f   :  { %vm12109_vm5 = vcmask 720512   ;;  %v3563_v50 = vperm.slane %v12110_v38, %v11660_v15  ;;  %v3741_v28 = vperm.slane %v12111_v29, %v8418_v2  ;;  %v3926_v43 = vsel %vm3386_vm0, %v3925_v4, %v3924_v12 }
 0x630   :  { %v3560_v25 = vsel %vm12109_vm5, %v12108_v18, %v3558_v20  ;;  %v3650_v53 = vsel %vm3410_vm6, %v3649_v26, %v3648_v22  ;;  %v3651_v34 = vperm.slane %v12112_v46, %v8445_v0  ;;  %v3743_v40 = vperm.slane %v12113_v54, %v8435_v59  ;;  %v3160_v20 = vpop.xlane.xlu0 %3159 }
 0x631   :  { %v3928_v30 = vsel %vm3390_vm1, %v3927_v48, %v3926_v43  ;;  %v3742_v11 = vsel %vm12114_vm7, %v3741_v28, %v3740_v33  ;;  %v3832_v47 = vsel %vm3390_vm1, %v3831_v13, %v3830_v24  ;;  %v3929_v61 = vperm.slane %v12115_v14, %v11887_v35  ;;  %v12118_v48 = vld [vmem:[#allocation414_spill] sm:$0xff]  ;;  %v12133_v14 = vld [vmem:[#allocation232_spill] sm:$0xff] }
 0x632   :  { %v4121_v55 = vperm.slane %v3148_v19, %v11887_v35  ;;  %v3745_v4 = vperm.slane %v12116_v6, %v8422_v27  ;;  %v3835_v41 = vperm.slane %v12117_v42, %v8404_v57  ;;  %v3834_v23 = vsel %vm10965_vm2, %v3833_v32, %v3832_v47  ;;  %v12125_v32 = vld [vmem:[#allocation354_spill] sm:$0xff] }
 0x633   :  { %v4123_v52 = vperm.slane %v3151_v39, %v8404_v57  ;;  %v3930_v17 = vsel %vm10965_vm2, %v3929_v61, %v3928_v30  ;;  %v3933_v8 = vperm.slane %v12118_v48, %v8418_v2  ;;  %v4125_v7 = vperm.slane %v3154_v3, %v8418_v2  ;;  %v12127_v28 = vld [vmem:[#allocation286_spill] sm:$0xff]  ;;  %v12132_v30 = vld [vmem:[#allocation412_spill] sm:$0xff]  ;;  %v12139_v48 = vld [vmem:[#allocation291_spill] sm:$0xff] }
 0x634   :  { %v4122_v22 = vsel %vm10965_vm2, %v4121_v55, %v4120_v16  ;;  %vm12119_vm15 = vcmask 786112   ;;  %vm12120_vm10 = vcmask 589312   ;;  %v3931_v12 = vperm.slane %v12121_v58, %v8404_v57  ;;  %v12123_v16 = vld [vmem:[#allocation355_spill] sm:$0xff]  ;;  %v12141_v58 = vld [vmem:[#allocation290_spill] sm:$0xff] }
 0x635   :  { %v3562_v10 = vsel %vm12119_vm15, %v3561_v37, %v3560_v25  ;;  %v3652_v13 = vsel %vm12120_vm10, %v3651_v34, %v3650_v53  ;;  %v4124_v39 = vsel %vm10964_vm3, %v4123_v52, %v4122_v22  ;;  %vm12122_vm5 = vcmask 458112   ;;  %v12126_v25 = vld [vmem:[#allocation163_spill] sm:$0xff]  ;;  %vm12128_vm15 = vmmov %vm12114_vm7  ;;  %v12140_v22 = vld [vmem:[#allocation416_spill] sm:$0xff] }
 0x636   :  { %v3744_v60 = vsel %vm12122_vm5, %v3743_v40, %v3742_v11  ;;  %v3836_v26 = vsel %vm10964_vm3, %v3835_v41, %v3834_v23  ;;  %v3839_v33 = vperm.slane %v12123_v16, %v8435_v59  ;;  %v4126_v24 = vsel %vm12114_vm7, %v4125_v7, %v4124_v39  ;;  %v12130_v34 = vld [vmem:[#allocation231_spill] sm:$0xff]  ;;  %vm12131_vm5 = vmmov %vm12114_vm7  ;;  %v3157_v11 = vpop.xlane.xlu2 %3156  ;;  %v3163_v6 = vpop.xlane.xlu1 %3162  ;;  %v12138_v23 = vld [vmem:[#allocation417_spill] sm:$0xff] }
 0x637   :  { %v3653_v51 = vperm.slane %v12124_v45, %v8450_v5  ;;  %v3746_v37 = vsel %vm3410_vm6, %v3745_v4, %v3744_v60  ;;  %v3837_v21 = vperm.slane %v12125_v32, %v8418_v2  ;;  %v3932_v18 = vsel %vm10964_vm3, %v3931_v12, %v3930_v17  ;;  %v12136_v4 = vld [vmem:[#allocation353_spill] sm:$0xff]  ;;  %v12142_v60 = vld [vmem:[#allocation358_spill] sm:$0xff]  ;;  %v12143_v16 = vld [vmem:[#allocation167_spill] sm:$0xff] }
 0x638   :  { %v3565_v38 = vperm.slane %v12126_v25, %v8481_v44  ;;  %v3564_v29 = vsel %vm3430_vm11, %v3563_v50, %v3562_v10  ;;  %v3747_v43 = vperm.slane %v12127_v28, %v8445_v0  ;;  %v3934_v53 = vsel %vm12128_vm15, %v3933_v8, %v3932_v18  ;;  %v3169_v47 = vpop.xlane.xlu0 %3168  ;;  %v12144_v45 = vld [vmem:[#allocation357_spill] sm:$0xff] }
 0x639   :  { %vm12129_vm10 = vcmask 654912   ;;  %v3655_v54 = vperm.slane %v12130_v34, %v8453_v31  ;;  %v3838_v40 = vsel %vm12131_vm5, %v3837_v21, %v3836_v26  ;;  %v3935_v19 = vperm.slane %v12132_v30, %v8435_v59  ;;  %v12152_v34 = vld [vmem:[#allocation415_spill] sm:$0xff]  ;;  %v12153_v30 = vld [vmem:[#allocation168_spill] sm:$0xff] }
 0x63a   :  { %v3654_v46 = vsel %vm12129_vm10, %v3653_v51, %v3652_v13  ;;  %v3657_v50 = vperm.slane %v12133_v14, %v8472_v56  ;;  %vm12134_vm7 = vcmask 589312   ;;  %vm12135_vm3 = vcmask 458112  }
 0x63b   :  { %v3748_v61 = vsel %vm12134_vm7, %v3747_v43, %v3746_v37  ;;  %v3840_v55 = vsel %vm12135_vm3, %v3839_v33, %v3838_v40  ;;  %v4127_v3 = vperm.slane %v3157_v11, %v8435_v59  ;;  %v3841_v42 = vperm.slane %v12136_v4, %v8422_v27  ;;  %vm12137_vm15 = vmmov %vm12135_vm3 }
 0x63c   :  { %v3936_v41 = vsel %vm12137_vm15, %v3935_v19, %v3934_v53  ;;  %v3939_v52 = vperm.slane %v12138_v23, %v8445_v0  ;;  %v4129_v17 = vperm.slane %v3160_v20, %v8422_v27  ;;  %v3751_v8 = vperm.slane %v12139_v48, %v8453_v31  ;;  %vm12145_vm10 = vmmov %vm12134_vm7 }
 0x63d   :  { %v3937_v7 = vperm.slane %v12140_v22, %v8422_v27  ;;  %v4128_v10 = vsel %vm12135_vm3, %v4127_v3, %v4126_v24  ;;  %v4131_v13 = vperm.slane %v3163_v6, %v8445_v0  ;;  %v3749_v12 = vperm.slane %v12141_v58, %v8450_v5  ;;  %vm12148_vm15 = vmmov %vm12145_vm10  ;;  %v12159_v6 = vld [vmem:[#allocation420_spill] sm:$0xff]  ;;  %v12162_v22 = vld [vmem:[#allocation294_spill] sm:$0xff] }
 0x63e   :  { %v3842_v39 = vsel %vm3410_vm6, %v3841_v42, %v3840_v55  ;;  %v3845_v26 = vperm.slane %v12142_v60, %v8450_v5  ;;  %v4130_v20 = vsel %vm3410_vm6, %v4129_v17, %v4128_v10  ;;  %v3567_v33 = vperm.slane %v12143_v16, %v12055_v62  ;;  %vm12151_vm4 = vmmov %vm12145_vm10  ;;  %v3166_v14 = vpop.xlane.xlu2 %3165  ;;  %v12161_v17 = vld [vmem:[#allocation419_spill] sm:$0xff] }
 0x63f   :  { %v3843_v51 = vperm.slane %v12144_v45, %v8445_v0  ;;  %v3938_v24 = vsel %vm3410_vm6, %v3937_v7, %v3936_v41  ;;  %v4132_v37 = vsel %vm12145_vm10, %v4131_v13, %v4130_v20  ;;  %v3566_v32 = vsel %vm3434_vm12, %v3565_v38, %v3564_v29  ;;  %v12154_v38 = vld [vmem:[#allocation230_spill] sm:$0xff]  ;;  %v3172_v41 = vpop.xlane.xlu1 %3171  ;;  %v12163_v13 = vld [vmem:[#allocation361_spill] sm:$0xff] }
 0x640   :  { %vm12146_vm5 = vcmask 720512   ;;  %vm12147_vm7 = vcmask 654912   ;;  %v3940_v25 = vsel %vm12148_vm15, %v3939_v52, %v3938_v24  ;;  %vm12149_vm3 = vcmask 786112   ;;  %v12169_v45 = vld [vmem:[#allocation77_spill] sm:$0xff] }
 0x641   :  { %v3656_v21 = vsel %vm12146_vm5, %v3655_v54, %v3654_v46  ;;  %v3750_v18 = vsel %vm12147_vm7, %v3749_v12, %v3748_v61  ;;  %vm12150_vm2 = vmmov %vm12146_vm5  ;;  %v3844_v53 = vsel %vm12151_vm4, %v3843_v51, %v3842_v39  ;;  %v3941_v40 = vperm.slane %v12152_v34, %v8450_v5  ;;  %v12155_v46 = vld [vmem:[#allocation289_spill] sm:$0xff]  ;;  %v12157_v61 = vld [vmem:[#allocation356_spill] sm:$0xff] }
 0x642   :  { %v3658_v28 = vsel %vm12149_vm3, %v3657_v50, %v3656_v21  ;;  %v3752_v43 = vsel %vm12150_vm2, %v3751_v8, %v3750_v18  ;;  %v3569_v19 = vperm.slane %v12153_v30, %v8501_v1  ;;  %v3659_v29 = vperm.slane %v12154_v38, %v11660_v15  ;;  %vm12156_vm10 = vmmov %vm12147_vm7  ;;  %v10131_v50 = vpop.xlane.xlu0 %3177  ;;  %v12165_v39 = vld [vmem:[#allocation293_spill] sm:$0xff]  ;;  %v12170_v51 = vld [vmem:[#allocation108_spill] sm:$0xff] }
 0x643   :  { %v3753_v54 = vperm.slane %v12155_v46, %v8472_v56  ;;  %v3846_v11 = vsel %vm12156_vm10, %v3845_v26, %v3844_v53  ;;  %v3847_v55 = vperm.slane %v12157_v61, %v8453_v31  ;;  %vm12158_vm2 = vmmov %vm12147_vm7  ;;  %v3945_v4 = vperm.slane %v12159_v6, %v8472_v56  ;;  %v12166_v26 = vld [vmem:[#allocation360_spill] sm:$0xff]  ;;  %v12172_v18 = vld [vmem:[#allocation234_spill] sm:$0xff] }
 0x644   :  { %v3942_v3 = vsel %vm12158_vm2, %v3941_v40, %v3940_v25  ;;  %v4133_v42 = vperm.slane %v3166_v14, %v8450_v5  ;;  %v3660_v23 = vsel %vm3430_vm11, %v3659_v29, %v3658_v28  ;;  %vm12160_vm4 = vmmov %vm12149_vm3  ;;  %v3943_v48 = vperm.slane %v12161_v17, %v8453_v31  ;;  %v12176_v30 = vld [vmem:[#allocation418_spill] sm:$0xff]  ;;  %v12177_v14 = vld [vmem:[#allocation292_spill] sm:$0xff] }
 0x645   :  { %v3754_v52 = vsel %vm12160_vm4, %v3753_v54, %v3752_v43  ;;  %v4135_v8 = vperm.slane %v3169_v47, %v8453_v31  ;;  %v3757_v7 = vperm.slane %v12162_v22, %v8481_v44  ;;  %v3848_v10 = vsel %vm12146_vm5, %v3847_v55, %v3846_v11  ;;  %vm12164_vm7 = vmmov %vm12158_vm2  ;;  %v12181_v22 = vld [vmem:[#allocation233_spill] sm:$0xff] }
 0x646   :  { %v3851_v58 = vperm.slane %v12163_v13, %v11660_v15  ;;  %v4134_v12 = vsel %vm12164_vm7, %v4133_v42, %v4132_v37  ;;  %v3755_v60 = vperm.slane %v12165_v39, %v11660_v15  ;;  %v3849_v20 = vperm.slane %v12166_v26, %v8472_v56  ;;  %vm12167_vm15 = vmmov %vm12146_vm5  ;;  %v12173_v37 = vld [vmem:[#allocation235_spill] sm:$0xff]  ;;  %v12183_v39 = vld [vmem:[#allocation296_spill] sm:$0xff] }
 0x647   :  { %v3944_v16 = vsel %vm12167_vm15, %v3943_v48, %v3942_v3  ;;  %vm12168_vm3 = vmmov %vm12146_vm5  ;;  %v12171_v24 = vperm.slane %v12170_v51, %v8501_v1  ;;  %v3661_v25 = vperm.slane %v12172_v18, %v8481_v44  ;;  %v3663_v28 = vperm.slane %v12173_v37, %v12055_v62  ;;  %v12179_v3 = vld [vmem:[#allocation423_spill] sm:$0xff] }
 0x648   :  { %v4136_v47 = vsel %vm12168_vm3, %v4135_v8, %v4134_v12  ;;  %vm12174_vm10 = vmmov %vm12160_vm4  ;;  %v3568_v53 = vsel %vm3438_vm13, %v3567_v33, %v3566_v32  ;;  %v3756_v34 = vsel %vm3430_vm11, %v3755_v60, %v3754_v52  ;;  %v3947_v38 = vperm.slane %v12176_v30, %v11660_v15  ;;  %v12178_v33 = vld [vmem:[#allocation359_spill] sm:$0xff]  ;;  %v3181_v8 = vpop.xlane.xlu1 %3180 }
 0x649   :  { %v3474_v21 = vsel %vm3442_vm14, %v12171_v24, %v12169_v45  ;;  %v3946_v43 = vsel %vm12174_vm10, %v3945_v4, %v3944_v16  ;;  %vm12175_vm2 = vmmov %vm12160_vm4  ;;  %v3570_v29 = vsel %vm3442_vm14, %v3569_v19, %v3568_v53  ;;  %v3662_v46 = vsel %vm3434_vm12, %v3661_v25, %v3660_v23  ;;  %v3175_v4 = vpop.xlane.xlu2 %3174  ;;  %v12180_v23 = vld [vmem:[#allocation422_spill] sm:$0xff]  ;;  %v12184_v26 = vld [vmem:[#allocation363_spill] sm:$0xff] }
 0x64a   :  { %v3850_v40 = vsel %vm12175_vm2, %v3849_v20, %v3848_v10  ;;  %v3758_v54 = vsel %vm3434_vm12, %v3757_v7, %v3756_v34  ;;  %v3759_v61 = vperm.slane %v12177_v14, %v12055_v62  ;;  %v3853_v32 = vperm.slane %v12178_v33, %v8481_v44  ;;  %v10182_v42 = vpop.xlane.xlu0 %3252  ;;  %vm12185_vm4 = vmmov %vm12175_vm2  ;;  %v12186_v45 = vld [vmem:[#allocation124_spill] sm:$0xff] }
 0x64b   :  { %v3852_v11 = vsel %vm3430_vm11, %v3851_v58, %v3850_v40  ;;  %v3948_v55 = vsel %vm3430_vm11, %v3947_v38, %v3946_v43  ;;  %v3951_v6 = vperm.slane %v12179_v3, %v12055_v62  ;;  %v3664_v19 = vsel %vm3438_vm13, %v3663_v28, %v3662_v46  ;;  %v12182_v58 = vld [vmem:[#allocation364_spill] sm:$0xff]  ;;  %v12187_v43 = vld [vmem:[#allocation421_spill] sm:$0xff]  ;;  %v12190_v46 = vld [vmem:[#allocation122_spill] sm:$0xff] }
 0x64c   :  { %v3949_v52 = vperm.slane %v12180_v23, %v8481_v44  ;;  %v4137_v17 = vperm.slane %v3172_v41, %v8472_v56  ;;  %v4139_v48 = vperm.slane %v3175_v4, %v11660_v15  ;;  %v3665_v7 = vperm.slane %v12181_v22, %v8501_v1  ;;  %v12195_v22 = vld [vmem:[#allocation76_spill] sm:$0xff] }
 0x64d   :  { %v3760_v10 = vsel %vm3438_vm13, %v3759_v61, %v3758_v54  ;;  %v3854_v13 = vsel %vm3434_vm12, %v3853_v32, %v3852_v11  ;;  %v3857_v12 = vperm.slane %v12182_v58, %v8501_v1  ;;  %v3761_v60 = vperm.slane %v12183_v39, %v8501_v1 }
 0x64e   :  { %v3855_v20 = vperm.slane %v12184_v26, %v12055_v62  ;;  %v3950_v41 = vsel %vm3434_vm12, %v3949_v52, %v3948_v55  ;;  %v4138_v16 = vsel %vm12185_vm4, %v4137_v17, %v4136_v47  ;;  %v4240_v51 = vperm.slane %v12186_v45, %v8387_v63  ;;  %v12188_v47 = vld [vmem:[#allocation125_spill] sm:$0xff] }
 0x64f   :  { %v3666_v24 = vsel %vm3442_vm14, %v3665_v7, %v3664_v19  ;;  %v3952_v18 = vsel %vm3438_vm13, %v3951_v6, %v3950_v41  ;;  %v4140_v25 = vsel %vm3430_vm11, %v4139_v48, %v4138_v16  ;;  %v3762_v37 = vsel %vm3442_vm14, %v3761_v60, %v3760_v10  ;;  %v12193_v52 = vld [vmem:[#allocation69_spill] sm:$0xff]  ;;  %v12194_v48 = vld [vmem:[#allocation188_spill] sm:$0xff] }
 0x650   :  { %v3856_v28 = vsel %vm3438_vm13, %v3855_v20, %v3854_v13  ;;  %v3953_v53 = vperm.slane %v12187_v43, %v8501_v1  ;;  %v4141_v34 = vperm.slane %v10131_v50, %v8481_v44  ;;  %v4242_v40 = vperm.slane %v12188_v47, %v8392_v36  ;;  %v10228_v6 = vpop.xlane.xlu1 %3255  ;;  %v12200_v60 = vld [vmem:[#allocation185_spill] sm:$0xff]  ;;  %v12201_v20 = vld [vmem:[#allocation127_spill] sm:$0xff]  ;;  %v12207_v47 = vld [vmem:[#allocation312_spill] sm:$0xff] }
 0x651   :  { %vm12189_vm5 = vcmask 1040384   ;;  %v3858_v38 = vsel %vm3442_vm14, %v3857_v12, %v3856_v28  ;;  %v4239_v54 = vperm.slane %v12190_v46, %v8372_v49  ;;  %vm12191_vm7 = vcmask 1041408   ;;  %v3184_v32 = vpop.xlane.xlu2 %3183  ;;  %v12199_v12 = vld [vmem:[#allocation128_spill] sm:$0xff] }
 0x652   :  { %v4151_v30 = vsel %vm12189_vm5, %v3474_v21, %v3570_v29  ;;  %v3954_v14 = vsel %vm3442_vm14, %v3953_v53, %v3952_v18  ;;  %v4142_v61 = vsel %vm3434_vm12, %v4141_v34, %v4140_v25  ;;  %v4143_v50 = vperm.slane %v3181_v8, %v12055_v62  ;;  %v10223_v55 = vpop.xlane.xlu0 %3303  ;;  %v12204_v18 = vld [vmem:[#allocation186_spill] sm:$0xff]  ;;  %v12206_v53 = vld [vmem:[#allocation316_spill] sm:$0xff] }
 0x653   :  { %v4154_v11 = vsel %vm12191_vm7, %v4151_v30, %v3666_v24  ;;  %v4241_v21 = vsel %vm3386_vm0, %v4240_v51, %v4239_v54  ;;  %v4145_v3 = vperm.slane %v3184_v32, %v8501_v1  ;;  %vm12192_vm15 = vcmask 1044480   ;;  %v12203_v51 = vld [vmem:[#allocation184_spill] sm:$0xff] }
 0x654   :  { %v4157_v33 = vsel %vm4155_vm9, %v4154_v11, %v3762_v37  ;;  %v4243_v4 = vsel %vm3390_vm1, %v4242_v40, %v4241_v21  ;;  %v4144_v23 = vsel %vm3438_vm13, %v4143_v50, %v4142_v61  ;;  %v4244_v17 = vperm.slane %v12193_v52, %v11887_v35  ;;  %v12209_v11 = vld [vmem:[#allocation251_spill] sm:$0xff]  ;;  %v12210_v61 = vld [vmem:[#allocation317_spill] sm:$0xff] }
 0x655   :  { %v4160_v29 = vsel %vm4158_vm8, %v4157_v33, %v3858_v38  ;;  %v4336_v8 = vperm.slane %v12194_v48, %v8387_v63  ;;  %vm12196_vm3 = vcmask 1045504   ;;  %v4146_v10 = vsel %vm3442_vm14, %v4145_v3, %v4144_v23  ;;  %v12208_v38 = vld [vmem:[#allocation126_spill] sm:$0xff]  ;;  %v12211_v50 = vld [vmem:[#allocation191_spill] sm:$0xff]  ;;  %v12212_v21 = vld [vmem:[#allocation253_spill] sm:$0xff] }
 0x656   :  { %v4163_v19 = vsel %vm12192_vm15, %v4160_v29, %v3954_v14  ;;  %vm12197_vm10 = vcmask 1046528   ;;  %vm12198_vm2 = vcmask 261312   ;;  %v4248_v39 = vperm.slane %v12199_v12, %v8418_v2  ;;  %v12213_v3 = vld [vmem:[#allocation310_spill] sm:$0xff] }
 0x657   :  { %v4166_v7 = vsel %vm12196_vm3, %v4163_v19, %v12195_v22  ;;  %v4245_v58 = vsel %vm12198_vm2, %v4244_v17, %v4243_v4  ;;  %v4335_v26 = vperm.slane %v12200_v60, %v8372_v49  ;;  %v4246_v41 = vperm.slane %v12201_v20, %v8404_v57  ;;  %v12214_v19 = vld [vmem:[#allocation381_spill] sm:$0xff]  ;;  %v12216_v17 = vld [vmem:[#allocation190_spill] sm:$0xff]  ;;  %v12219_v60 = vld [vmem:[#allocation131_spill] sm:$0xff] }
 0x658   :  { %v10241_v13 = vsel %vm12197_vm10, %v4166_v7, %v4146_v10  ;;  %vm12202_vm4 = vcmask 326912   ;;  %v4338_v24 = vperm.slane %v12203_v51, %v8392_v36  ;;  %v4431_v25 = vperm.slane %v12204_v18, %v8372_v49  ;;  %v10265_v30 = vpop.xlane.xlu1 %3258  ;;  %v12217_v22 = vld [vmem:[#allocation254_spill] sm:$0xff]  ;;  %vm12220_vm15 = vmmov %vm12198_vm2 }
 0x659   :  { %v4337_v16 = vsel %vm3386_vm0, %v4336_v8, %v4335_v26  ;;  %v4247_v45 = vsel %vm12202_vm4, %v4246_v41, %v4245_v58  ;;  %v10256_v37 = vpop.xlane.xlu2 %3300  ;;  %vm12205_vm5 = vcmask 392512   ;;  %v4528_v34 = vperm.slane %v12206_v53, %v8387_v63  ;;  %v12218_v10 = vld [vmem:[#allocation130_spill] sm:$0xff]  ;;  %vm12222_vm3 = vmmov %vm12202_vm4  ;;  %v12224_v53 = vld [vmem:[#allocation189_spill] sm:$0xff] }
 0x65a   :  { %v10258_v28 = vpop.xlane.xlu0 %3261  ;;  %v4249_v43 = vsel %vm12205_vm5, %v4248_v39, %v4247_v45  ;;  %v4624_v40 = vperm.slane %v12207_v47, %v8387_v63  ;;  %v4250_v46 = vperm.slane %v12208_v38, %v8435_v59  ;;  %v4339_v54 = vsel %vm3390_vm1, %v4338_v24, %v4337_v16  ;;  %v12221_v16 = vld [vmem:[#allocation380_spill] sm:$0xff]  ;;  %vm12225_vm10 = vmmov %vm12198_vm2  ;;  %v12226_v38 = vld [vmem:[#allocation383_spill] sm:$0xff] }
 0x65b   :  { %v4432_v14 = vperm.slane %v12209_v11, %v8387_v63  ;;  %v4530_v33 = vperm.slane %v12210_v61, %v8392_v36  ;;  %v4342_v32 = vperm.slane %v12211_v50, %v8404_v57  ;;  %v4434_v29 = vperm.slane %v12212_v21, %v8392_v36  ;;  %v12228_v50 = vld [vmem:[#allocation320_spill] sm:$0xff]  ;;  %v12229_v21 = vld [vmem:[#allocation382_spill] sm:$0xff] }
 0x65c   :  { %v4527_v4 = vperm.slane %v12213_v3, %v8372_v49  ;;  %v4623_v23 = vperm.slane %v12214_v19, %v8372_v49  ;;  %vm12215_vm7 = vcmask 458112   ;;  %v4340_v48 = vperm.slane %v12216_v17, %v11887_v35  ;;  %v12232_v17 = vld [vmem:[#allocation319_spill] sm:$0xff] }
 0x65d   :  { %v4251_v52 = vsel %vm12215_vm7, %v4250_v46, %v4249_v43  ;;  %v4433_v8 = vsel %vm3386_vm0, %v4432_v14, %v4431_v25  ;;  %v4436_v7 = vperm.slane %v12217_v22, %v11887_v35  ;;  %v4252_v58 = vperm.slane %v12218_v10, %v8422_v27  ;;  %v12223_v25 = vld [vmem:[#allocation315_spill] sm:$0xff]  ;;  %vm12234_vm7 = vmmov %vm12222_vm3  ;;  %v12235_v10 = vld [vmem:[#allocation257_spill] sm:$0xff] }
 0x65e   :  { %v4529_v12 = vsel %vm3386_vm0, %v4528_v34, %v4527_v4  ;;  %v4625_v39 = vsel %vm3386_vm0, %v4624_v40, %v4623_v23  ;;  %v4254_v26 = vperm.slane %v12219_v60, %v8445_v0  ;;  %v4341_v20 = vsel %vm12220_vm15, %v4340_v48, %v4339_v54  ;;  %v12227_v14 = vld [vmem:[#allocation187_spill] sm:$0xff]  ;;  %v12231_v23 = vld [vmem:[#allocation194_spill] sm:$0xff]  ;;  %vm12236_vm15 = vmmov %vm12198_vm2 }
 0x65f   :  { %v4531_v41 = vsel %vm3390_vm1, %v4530_v33, %v4529_v12  ;;  %v4626_v45 = vperm.slane %v12221_v16, %v8392_v36  ;;  %v4253_v51 = vsel %vm3410_vm6, %v4252_v58, %v4251_v52  ;;  %v4343_v24 = vsel %vm12222_vm3, %v4342_v32, %v4341_v20 }
 0x660   :  { %v4435_v18 = vsel %vm3390_vm1, %v4434_v29, %v4433_v8  ;;  %v4532_v43 = vperm.slane %v12223_v25, %v11887_v35  ;;  %v4344_v34 = vperm.slane %v12224_v53, %v8418_v2  ;;  %v4630_v46 = vperm.slane %v12226_v38, %v8404_v57  ;;  %v10320_v3 = vpop.xlane.xlu1 %3309  ;;  %v12233_v8 = vld [vmem:[#allocation193_spill] sm:$0xff] }
 0x661   :  { %v4437_v47 = vsel %vm12225_vm10, %v4436_v7, %v4435_v18  ;;  %v4627_v40 = vsel %vm3390_vm1, %v4626_v45, %v4625_v39  ;;  %v10309_v54 = vpop.xlane.xlu2 %3306  ;;  %v4438_v61 = vperm.slane %v12227_v14, %v8404_v57  ;;  %v4536_v32 = vperm.slane %v12228_v50, %v8418_v2  ;;  %v12237_v39 = vld [vmem:[#allocation129_spill] sm:$0xff]  ;;  %vm12239_vm10 = vmmov %vm12222_vm3  ;;  %v12250_v50 = vld [vmem:[#allocation386_spill] sm:$0xff] }
 0x662   :  { %v10311_v11 = vpop.xlane.xlu0 %3312  ;;  %v4533_v33 = vsel %vm12198_vm2, %v4532_v43, %v4531_v41  ;;  %v4628_v29 = vperm.slane %v12229_v21, %v11887_v35  ;;  %vm12230_vm4 = vcmask 589312   ;;  %v4345_v19 = vsel %vm12205_vm5, %v4344_v34, %v4343_v24  ;;  %v12240_v45 = vld [vmem:[#allocation133_spill] sm:$0xff]  ;;  %v12251_v21 = vld [vmem:[#allocation255_spill] sm:$0xff] }
 0x663   :  { %v4255_v4 = vsel %vm12230_vm4, %v4254_v26, %v4253_v51  ;;  %v4348_v52 = vperm.slane %v12231_v23, %v8422_v27  ;;  %v4534_v48 = vperm.slane %v12232_v17, %v8404_v57  ;;  %v4346_v22 = vperm.slane %v12233_v8, %v8435_v59  ;;  %v12238_v26 = vld [vmem:[#allocation256_spill] sm:$0xff]  ;;  %vm12242_vm4 = vmmov %vm12205_vm5  ;;  %v12243_v25 = vld [vmem:[#allocation313_spill] sm:$0xff] }
 0x664   :  { %v4439_v7 = vsel %vm12234_vm7, %v4438_v61, %v4437_v47  ;;  %v4442_v58 = vperm.slane %v12235_v10, %v8435_v59  ;;  %v4629_v12 = vsel %vm12236_vm15, %v4628_v29, %v4627_v40  ;;  %v4256_v60 = vperm.slane %v12237_v39, %v8450_v5  ;;  %vm12245_vm7 = vmmov %vm12242_vm4  ;;  %v12246_v40 = vld [vmem:[#allocation318_spill] sm:$0xff] }
 0x665   :  { %v4440_v20 = vperm.slane %v12238_v26, %v8418_v2  ;;  %v4535_v41 = vsel %vm12222_vm3, %v4534_v48, %v4533_v33  ;;  %v4631_v16 = vsel %vm12239_vm10, %v4630_v46, %v4629_v12  ;;  %v4258_v51 = vperm.slane %v12240_v45, %v8453_v31  ;;  %v12247_v46 = vld [vmem:[#allocation192_spill] sm:$0xff]  ;;  %vm12249_vm3 = vmmov %vm12242_vm4  ;;  %v12258_v39 = vld [vmem:[#allocation322_spill] sm:$0xff] }
 0x666   :  { %vm12241_vm2 = vcmask 458112   ;;  %v4537_v18 = vsel %vm12242_vm4, %v4536_v32, %v4535_v41  ;;  %v4632_v43 = vperm.slane %v12243_v25, %v8418_v2  ;;  %vm12244_vm5 = vcmask 654912   ;;  %v12260_v45 = vld [vmem:[#allocation260_spill] sm:$0xff] }
 0x667   :  { %v4347_v24 = vsel %vm12241_vm2, %v4346_v22, %v4345_v19  ;;  %v4257_v53 = vsel %vm12244_vm5, %v4256_v60, %v4255_v4  ;;  %v4441_v47 = vsel %vm12245_vm7, %v4440_v20, %v4439_v7  ;;  %v4538_v38 = vperm.slane %v12246_v40, %v8435_v59  ;;  %vm12248_vm15 = vmmov %vm12241_vm2  ;;  %v12253_v19 = vld [vmem:[#allocation323_spill] sm:$0xff]  ;;  %v12255_v22 = vld [vmem:[#allocation134_spill] sm:$0xff] }
 0x668   :  { %v4349_v34 = vsel %vm3410_vm6, %v4348_v52, %v4347_v24  ;;  %v4350_v14 = vperm.slane %v12247_v46, %v8445_v0  ;;  %v4443_v61 = vsel %vm12248_vm15, %v4442_v58, %v4441_v47  ;;  %v4633_v33 = vsel %vm12249_vm3, %v4632_v43, %v4631_v16  ;;  %vm12252_vm10 = vmmov %vm12241_vm2  ;;  %v12254_v52 = vld [vmem:[#allocation385_spill] sm:$0xff]  ;;  %v10375_v26 = vpop.xlane.xlu1 %3267  ;;  %v12259_v20 = vld [vmem:[#allocation196_spill] sm:$0xff] }
 0x669   :  { %v4636_v32 = vperm.slane %v12250_v50, %v8422_v27  ;;  %v4444_v29 = vperm.slane %v12251_v21, %v8422_v27  ;;  %v4539_v4 = vsel %vm12252_vm10, %v4538_v38, %v4537_v18  ;;  %v4542_v23 = vperm.slane %v12253_v19, %v8445_v0  ;;  %v10364_v48 = vpop.xlane.xlu2 %3264  ;;  %v12257_v58 = vld [vmem:[#allocation197_spill] sm:$0xff]  ;;  %vm12261_vm4 = vmmov %vm12252_vm10  ;;  %v12262_v25 = vld [vmem:[#allocation132_spill] sm:$0xff] }
 0x66a   :  { %v4634_v17 = vperm.slane %v12254_v52, %v8435_v59  ;;  %v10366_v8 = vpop.xlane.xlu0 %3270  ;;  %v4260_v7 = vperm.slane %v12255_v22, %v8472_v56  ;;  %vm12256_vm2 = vcmask 589312   ;;  %v4354_v12 = vperm.slane %v12257_v58, %v8453_v31  ;;  %v12267_v50 = vld [vmem:[#allocation384_spill] sm:$0xff]  ;;  %v12270_v52 = vld [vmem:[#allocation321_spill] sm:$0xff] }
 0x66b   :  { %v4351_v10 = vsel %vm12256_vm2, %v4350_v14, %v4349_v34  ;;  %v4540_v60 = vperm.slane %v12258_v39, %v8422_v27  ;;  %v4352_v41 = vperm.slane %v12259_v20, %v8450_v5  ;;  %v4445_v16 = vsel %vm3410_vm6, %v4444_v29, %v4443_v61  ;;  %v12263_v34 = vld [vmem:[#allocation259_spill] sm:$0xff]  ;;  %vm12266_vm15 = vmmov %vm12256_vm2 }
 0x66c   :  { %v4448_v24 = vperm.slane %v12260_v45, %v8450_v5  ;;  %v4635_v18 = vsel %vm12261_vm4, %v4634_v17, %v4633_v33  ;;  %v4262_v43 = vperm.slane %v12262_v25, %v11660_v15  ;;  %v4446_v47 = vperm.slane %v12263_v34, %v8445_v0 }
 0x66d   :  { %v4541_v40 = vsel %vm3410_vm6, %v4540_v60, %v4539_v4  ;;  %v4637_v38 = vsel %vm3410_vm6, %v4636_v32, %v4635_v18  ;;  %vm12264_vm5 = vcmask 720512   ;;  %vm12265_vm7 = vcmask 654912   ;;  %v12271_v32 = vld [vmem:[#allocation195_spill] sm:$0xff]  ;;  %v12278_v60 = vld [vmem:[#allocation388_spill] sm:$0xff]  ;;  %v12281_v18 = vld [vmem:[#allocation325_spill] sm:$0xff] }
 0x66e   :  { %v4259_v46 = vsel %vm12264_vm5, %v4258_v51, %v4257_v53  ;;  %v4353_v14 = vsel %vm12265_vm7, %v4352_v41, %v4351_v10  ;;  %v4543_v61 = vsel %vm12266_vm15, %v4542_v23, %v4541_v40  ;;  %v4638_v21 = vperm.slane %v12267_v50, %v8445_v0  ;;  %vm12269_vm10 = vmmov %vm12264_vm5  ;;  %v12274_v23 = vld [vmem:[#allocation389_spill] sm:$0xff]  ;;  %v12275_v10 = vld [vmem:[#allocation258_spill] sm:$0xff] }
 0x66f   :  { %vm12268_vm3 = vcmask 786112   ;;  %v4355_v29 = vsel %vm12269_vm10, %v4354_v12, %v4353_v14  ;;  %v4447_v19 = vsel %vm12256_vm2, %v4446_v47, %v4445_v16  ;;  %v4544_v4 = vperm.slane %v12270_v52, %v8450_v5  ;;  %vm12272_vm4 = vmmov %vm12265_vm7  ;;  %v12277_v12 = vld [vmem:[#allocation326_spill] sm:$0xff]  ;;  %v12279_v16 = vld [vmem:[#allocation136_spill] sm:$0xff] }
 0x670   :  { %v4261_v33 = vsel %vm12268_vm3, %v4260_v7, %v4259_v46  ;;  %v4356_v17 = vperm.slane %v12271_v32, %v8472_v56  ;;  %v4449_v51 = vsel %vm12272_vm4, %v4448_v24, %v4447_v19  ;;  %vm12273_vm5 = vmmov %vm12256_vm2  ;;  %v4642_v22 = vperm.slane %v12274_v23, %v8453_v31  ;;  %v12282_v40 = vld [vmem:[#allocation200_spill] sm:$0xff]  ;;  %v12284_v14 = vld [vmem:[#allocation263_spill] sm:$0xff]  ;;  %v10428_v50 = vpop.xlane.xlu1 %3318 }
 0x671   :  { %v4639_v53 = vsel %vm12273_vm5, %v4638_v21, %v4637_v38  ;;  %v4450_v7 = vperm.slane %v12275_v10, %v8453_v31  ;;  %vm12276_vm7 = vmmov %vm12272_vm4  ;;  %v4548_v39 = vperm.slane %v12277_v12, %v8472_v56  ;;  %v4640_v20 = vperm.slane %v12278_v60, %v8450_v5  ;;  %v10418_v34 = vpop.xlane.xlu2 %3315  ;;  %v12286_v21 = vld [vmem:[#allocation199_spill] sm:$0xff]  ;;  %v12293_v12 = vld [vmem:[#allocation198_spill] sm:$0xff] }
 0x672   :  { %v4545_v58 = vsel %vm12276_vm7, %v4544_v4, %v4543_v61  ;;  %v4263_v41 = vsel %vm3430_vm11, %v4262_v43, %v4261_v33  ;;  %v4264_v45 = vperm.slane %v12279_v16, %v8481_v44  ;;  %vm12280_vm15 = vmmov %vm12268_vm3  ;;  %v4546_v25 = vperm.slane %v12281_v18, %v8453_v31  ;;  %v10420_v47 = vpop.xlane.xlu0 %3321 }
 0x673   :  { %v4357_v24 = vsel %vm12280_vm15, %v4356_v17, %v4355_v29  ;;  %v4360_v38 = vperm.slane %v12282_v40, %v8481_v44  ;;  %vm12283_vm3 = vmmov %vm12269_vm10  ;;  %v4454_v43 = vperm.slane %v12284_v14, %v11660_v15  ;;  %v4358_v33 = vperm.slane %v12286_v21, %v11660_v15  ;;  %v12287_v29 = vld [vmem:[#allocation262_spill] sm:$0xff]  ;;  %v12290_v17 = vld [vmem:[#allocation137_spill] sm:$0xff] }
 0x674   :  { %v4451_v46 = vsel %vm12283_vm3, %v4450_v7, %v4449_v51  ;;  %vm12285_vm10 = vmmov %vm12272_vm4  ;;  %v4452_v19 = vperm.slane %v12287_v29, %v8472_v56  ;;  %v4265_v32 = vsel %vm3434_vm12, %v4264_v45, %v4263_v41  ;;  %v4266_v51 = vperm.slane %v12290_v17, %v12055_v62  ;;  %v12299_v14 = vld [vmem:[#allocation329_spill] sm:$0xff] }
 0x675   :  { %v4641_v61 = vsel %vm12285_vm10, %v4640_v20, %v4639_v53  ;;  %vm12288_vm2 = vmmov %vm12283_vm3  ;;  %v12292_v53 = vld [vmem:[#allocation387_spill] sm:$0xff]  ;;  %v4359_v7 = vsel %vm3430_vm11, %v4358_v33, %v4357_v24  ;;  %v4362_v60 = vperm.slane %v12293_v12, %v12055_v62  ;;  %vm12309_vm3 = vcmask 1040384  }
 0x676   :  { %v4547_v52 = vsel %vm12288_vm2, %v4546_v25, %v4545_v58  ;;  %vm12289_vm4 = vmmov %vm12288_vm2  ;;  %v4644_v10 = vperm.slane %v12292_v53, %v8472_v56  ;;  %v12295_v58 = vld [vmem:[#allocation324_spill] sm:$0xff]  ;;  %v4361_v41 = vsel %vm3434_vm12, %v4360_v38, %v4359_v7  ;;  %v12298_v25 = vld [vmem:[#allocation261_spill] sm:$0xff]  ;;  %v4267_v38 = vsel %vm3438_vm13, %v4266_v51, %v4265_v32 }
 0x677   :  { %v4643_v4 = vsel %vm12289_vm4, %v4642_v22, %v4641_v61  ;;  %vm12291_vm5 = vmmov %vm12280_vm15  ;;  %v4550_v22 = vperm.slane %v12295_v58, %v11660_v15  ;;  %v4456_v24 = vperm.slane %v12298_v25, %v8481_v44  ;;  %v12300_v61 = vld [vmem:[#allocation391_spill] sm:$0xff]  ;;  %v4363_v29 = vsel %vm3438_vm13, %v4362_v60, %v4361_v41  ;;  %v12304_v32 = vld [vmem:[#allocation265_spill] sm:$0xff] }
 0x678   :  { %v4549_v23 = vsel %vm12291_vm5, %v4548_v39, %v4547_v52  ;;  %vm12294_vm7 = vmmov %vm12291_vm5  ;;  %v12297_v39 = vld [vmem:[#allocation392_spill] sm:$0xff]  ;;  %v4646_v21 = vperm.slane %v12300_v61, %v11660_v15  ;;  %v12302_v52 = vld [vmem:[#allocation266_spill] sm:$0xff]  ;;  %v4458_v51 = vperm.slane %v12304_v32, %v12055_v62  ;;  %vm12310_vm10 = vcmask 1041408  }
 0x679   :  { %v4453_v20 = vsel %vm12294_vm7, %v4452_v19, %v4451_v46  ;;  %vm12296_vm15 = vmmov %vm12291_vm5  ;;  %v4648_v18 = vperm.slane %v12297_v39, %v8481_v44  ;;  %v4551_v40 = vsel %vm3430_vm11, %v4550_v22, %v4549_v23  ;;  %v4554_v46 = vperm.slane %v12299_v14, %v12055_v62  ;;  %v10468_v23 = vpop.xlane.xlu2 %3273  ;;  %v12305_v58 = vld [vmem:[#allocation135_spill] sm:$0xff] }
 0x67a   :  { %v4455_v16 = vsel %vm3430_vm11, %v4454_v43, %v4453_v20  ;;  %v4645_v45 = vsel %vm12296_vm15, %v4644_v10, %v4643_v4  ;;  %v12301_v43 = vld [vmem:[#allocation328_spill] sm:$0xff]  ;;  %v4460_v4 = vperm.slane %v12302_v52, %v8501_v1  ;;  %v10470_v53 = vpop.xlane.xlu0 %3279  ;;  %v12303_v10 = vld [vmem:[#allocation202_spill] sm:$0xff]  ;;  %v10478_v20 = vpop.xlane.xlu1 %3276  ;;  %v4268_v22 = vperm.slane %v12305_v58, %v8501_v1 }
 0x67b   :  { %v4552_v33 = vperm.slane %v12301_v43, %v8481_v44  ;;  %v4457_v19 = vsel %vm3434_vm12, %v4456_v24, %v4455_v16  ;;  %v4647_v17 = vsel %vm3430_vm11, %v4646_v21, %v4645_v45  ;;  %v4364_v7 = vperm.slane %v12303_v10, %v8501_v1  ;;  %v12306_v16 = vld [vmem:[#allocation390_spill] sm:$0xff]  ;;  %v12307_v24 = vld [vmem:[#allocation327_spill] sm:$0xff] }
 0x67c   :  { %v4649_v60 = vsel %vm3434_vm12, %v4648_v18, %v4647_v17  ;;  %v4650_v45 = vperm.slane %v12306_v16, %v12055_v62  ;;  %v4459_v25 = vsel %vm3438_vm13, %v4458_v51, %v4457_v19  ;;  %v4556_v14 = vperm.slane %v12307_v24, %v8501_v1 }
 0x67d   :  { %v4553_v12 = vsel %vm3434_vm12, %v4552_v33, %v4551_v40  ;;  %v4365_v39 = vsel %vm3442_vm14, %v4364_v7, %v4363_v29  ;;  %v4269_v40 = vsel %vm3442_vm14, %v4268_v22, %v4267_v38  ;;  %v4461_v18 = vsel %vm3442_vm14, %v4460_v4, %v4459_v25  ;;  %v12313_v22 = vld [vmem:[#allocation91_spill] sm:$0xff] }
 0x67e   :  { %v4555_v41 = vsel %vm3438_vm13, %v4554_v46, %v4553_v12  ;;  %v4651_v61 = vsel %vm3438_vm13, %v4650_v45, %v4649_v60  ;;  %v12308_v46 = vld [vmem:[#allocation394_spill] sm:$0xff]  ;;  %v4881_v33 = vperm.slane %v10228_v6, %v8387_v63  ;;  %v4911_v29 = vperm.slane %v10256_v37, %v8372_v49  ;;  %v12311_v60 = vld [vmem:[#allocation13_spill] sm:$0xff] }
 0x67f   :  { %v4557_v21 = vsel %vm3442_vm14, %v4556_v14, %v4555_v41  ;;  %v4652_v43 = vperm.slane %v12308_v46, %v8501_v1  ;;  %v4945_v19 = vsel %vm12309_vm3, %v4269_v40, %v4365_v39  ;;  %v4883_v38 = vperm.slane %v10265_v30, %v8392_v36 }
 0x680   :  { %v4914_v52 = vperm.slane %v10309_v54, %v8392_v36  ;;  %v4947_v4 = vsel %vm12310_vm10, %v4945_v19, %v4461_v18  ;;  %v4880_v10 = vperm.slane %v10182_v42, %v8372_v49  ;;  %v4912_v6 = vperm.slane %v10223_v55, %v8387_v63 }
 0x681   :  { %v4653_v17 = vsel %vm3442_vm14, %v4652_v43, %v4651_v61  ;;  %v4949_v37 = vsel %vm4155_vm9, %v4947_v4, %v4557_v21  ;;  %v3325_v7 = vpop.xlane.xlu2 %3324  ;;  %v4885_v36 = vperm.slane %v10258_v28, %v11887_v35  ;;  %v4916_v54 = vperm.slane %v10320_v3, %v11887_v35 }
 0x682   :  { %v3331_v32 = vpop.xlane.xlu0 %3330  ;;  %v4882_v51 = vsel %vm3386_vm0, %v4881_v33, %v4880_v10  ;;  %v4913_v30 = vsel %vm3386_vm0, %v4912_v6, %v4911_v29  ;;  %v3328_v12 = vpop.xlane.xlu1 %3327  ;;  %v4951_v49 = vsel %vm4158_vm8, %v4949_v37, %v4653_v17  ;;  %v4887_v55 = vperm.slane %v10364_v48, %v8404_v57 }
 0x683   :  { %v4884_v42 = vsel %vm3390_vm1, %v4883_v38, %v4882_v51  ;;  %v4915_v63 = vsel %vm3390_vm1, %v4914_v52, %v4913_v30  ;;  %vm12312_vm9 = vcmask 1044480   ;;  %vm12314_vm0 = vcmask 1045504  }
 0x684   :  { %v4953_v58 = vsel %vm12312_vm9, %v4951_v49, %v12311_v60  ;;  %vm12315_vm2 = vcmask 261312   ;;  %v4889_v3 = vperm.slane %v10375_v26, %v8418_v2  ;;  %v4920_v16 = vperm.slane %v10418_v34, %v8418_v2 }
 0x685   :  { %v10526_v41 = vsel %vm12314_vm0, %v4953_v58, %v12313_v22  ;;  %v4886_v28 = vsel %vm12315_vm2, %v4885_v36, %v4884_v42  ;;  %vm12316_vm4 = vmmov %vm12315_vm2  ;;  %v4918_v48 = vperm.slane %v10311_v11, %v8404_v57  ;;  %vm12317_vm1 = vcmask 326912  }
 0x686   :  { %v4917_v35 = vsel %vm12316_vm4, %v4916_v54, %v4915_v63  ;;  %v4888_v45 = vsel %vm12317_vm1, %v4887_v55, %v4886_v28  ;;  %v10538_v39 = vmin.f32 %v9976_v9, 1e+30  ;;  %v10541_v25 = vmin.f32 %v10241_v13, 1e+30  ;;  %vm12318_vm8 = vmmov %vm12317_vm1 }
 0x687   :  { %v4919_v24 = vsel %vm12318_vm8, %v4918_v48, %v4917_v35  ;;  %v4922_v14 = vperm.slane %v10428_v50, %v8435_v59  ;;  %vm12319_vm5 = vcmask 392512   ;;  %v4893_v9 = vperm.slane %v10468_v23, %v8422_v27 }
 0x688   :  { %5060 = vrsqrt.f32 %v10538_v39  ;;  %v4890_v2 = vsel %vm12319_vm5, %v4889_v3, %v4888_v45  ;;  %vm12320_vm7 = vmmov %vm12319_vm5  ;;  %v4891_v13 = vperm.slane %v10366_v8, %v8435_v59  ;;  %vm12321_vm15 = vcmask 458112  }
 0x689   :  { %v3283_v26 = vpop.xlane.xlu2 %3282  ;;  %v4921_v57 = vsel %vm12320_vm7, %v4920_v16, %v4919_v24  ;;  %5062 = vrsqrt.f32 %v10541_v25  ;;  %vm12322_vm3 = vmmov %vm12321_vm15  ;;  %v4895_v18 = vperm.slane %v10478_v20, %v8445_v0  ;;  %v4926_v61 = vperm.slane %v3325_v7, %v8445_v0 }
 0x68a   :  { %v3289_v40 = vpop.xlane.xlu0 %3288  ;;  %v3286_v11 = vpop.xlane.xlu1 %3285  ;;  %v4892_v34 = vsel %vm12321_vm15, %v4891_v13, %v4890_v2  ;;  %v4923_v50 = vsel %vm12322_vm3, %v4922_v14, %v4921_v57  ;;  %v4924_v21 = vperm.slane %v10420_v47, %v8422_v27  ;;  %v4928_v59 = vperm.slane %v3328_v12, %v8450_v5 }
 0x68b   :  { %v4894_v23 = vsel %vm3410_vm6, %v4893_v9, %v4892_v34  ;;  %vm12323_vm10 = vcmask 589312   ;;  %v4899_v20 = vperm.slane %v3283_v26, %v8453_v31  ;;  %v4897_v47 = vperm.slane %v10470_v53, %v8450_v5 }
 0x68c   :  { %v4925_v33 = vsel %vm3410_vm6, %v4924_v21, %v4923_v50  ;;  %v4896_v29 = vsel %vm12323_vm10, %v4895_v18, %v4894_v23  ;;  %vm12324_vm9 = vmmov %vm12323_vm10  ;;  %vm12325_vm6 = vcmask 654912   ;;  %v4901_v37 = vperm.slane %v3286_v11, %v8472_v56  ;;  %v12331_v11 = vld [vmem:[#allocation75_spill] sm:$0xff] }
 0x68d   :  { %v4927_v19 = vsel %vm12324_vm9, %v4926_v61, %v4925_v33  ;;  %v4898_v10 = vsel %vm12325_vm6, %v4897_v47, %v4896_v29  ;;  %vm12326_vm0 = vmmov %vm12325_vm6  ;;  %v4930_v51 = vperm.slane %v3331_v32, %v8453_v31  ;;  %vm12327_vm2 = vcmask 720512  }
 0x68e   :  { %v5061_v46 = vpop.eup %5060  ;;  %v4929_v6 = vsel %vm12326_vm0, %v4928_v59, %v4927_v19  ;;  %v4900_v30 = vsel %vm12327_vm2, %v4899_v20, %v4898_v10  ;;  %vm12328_vm4 = vmmov %vm12327_vm2  ;;  %vm12329_vm1 = vcmask 786112   ;;  %vm4974_vm8 = vcmp.eq.f32.partialorder %v10538_v39, inf }
 0x68f   :  { %v5063_v43 = vpop.eup %5062  ;;  %v4968_v8 = vmul.f32 %v5061_v46, %v10538_v39  ;;  %v4931_v12 = vsel %vm12328_vm4, %v4930_v51, %v4929_v6  ;;  %v4902_v5 = vsel %vm12329_vm1, %v4901_v37, %v4900_v30  ;;  %vm4976_vm5 = vcmp.eq.f32.partialorder %v10538_v39, 0.0  ;;  %vm12330_vm3 = vmmov %vm12329_vm1 }
 0x690   :  { %v4980_v27 = vmul.f32 %v5063_v43, %v10541_v25  ;;  %v4903_v42 = vperm.slane %v3289_v40, %v11660_v15  ;;  %v4977_v32 = vand.u32 2147483648, %v10538_v39  ;;  %vm4986_vm7 = vcmp.eq.f32.partialorder %v10541_v25, inf }
 0x691   :  { %v3334_v0 = vpop.xlane.xlu2 %3333  ;;  %v4969_v4 = vmul.f32 %v5061_v46, %v4968_v8  ;;  %vm4988_vm15 = vcmp.eq.f32.partialorder %v10541_v25, 0.0  ;;  %v4989_v16 = vand.u32 2147483648, %v10541_v25  ;;  %vm12332_vm10 = vcmask 1046528  }
 0x692   :  { %v10568_v38 = vpop.xlane.xlu0 %3339  ;;  %v3337_v52 = vpop.xlane.xlu1 %3336  ;;  %v4981_v17 = vmul.f32 %v5063_v43, %v4980_v27  ;;  %v4932_v63 = vperm.slane %v3334_v0, %v8472_v56  ;;  %v4904_v56 = vsel %vm3430_vm11, %v4903_v42, %v4902_v5 }
 0x693   :  { %v4970_v7 = vmul.f32 0.5, %v4969_v4  ;;  %v4934_v48 = vperm.slane %v3337_v52, %v11660_v15  ;;  %v4936_v50 = vperm.slane %v10568_v38, %v8481_v44 }
 0x694   :  { %v4982_v36 = vmul.f32 0.5, %v4981_v17  ;;  %v4933_v26 = vsel %vm12330_vm3, %v4932_v63, %v4931_v12 }
 0x695   :  { %v4971_v54 = vsub.f32 1.5, %v4970_v7  ;;  %v4935_v34 = vsel %vm3430_vm11, %v4934_v48, %v4933_v26  ;;  %vm12333_vm11 = vmmov %vm12332_vm10 }
 0x696   :  { %v4983_v49 = vsub.f32 1.5, %v4982_v36 }
 0x697   :  { %v4972_v53 = vmul.f32 %v5061_v46, %v4971_v54 }
 0x698   :  { %v4984_v60 = vmul.f32 %v5063_v43, %v4983_v49 }
 0x699   :  { %v3292_v55 = vpop.xlane.xlu2 %3291  ;;  %v4973_v28 = vmul.f32 %v4972_v53, %v10538_v39 }
 0x69a   :  { %v3298_v31 = vpop.xlane.xlu0 %3297  ;;  %v4905_v58 = vperm.slane %v3292_v55, %v8481_v44  ;;  %v3295_v22 = vpop.xlane.xlu1 %3294  ;;  %v4985_v3 = vmul.f32 %v4984_v60, %v10541_v25 }
 0x69b   :  { %v4907_v35 = vperm.slane %v3295_v22, %v12055_v62  ;;  %v4909_v24 = vperm.slane %v3298_v31, %v8501_v1  ;;  %v4975_v14 = vsel %vm4974_vm8, %v10538_v39, %v4973_v28 }
 0x69c   :  { %v4906_v45 = vsel %vm3434_vm12, %v4905_v58, %v4904_v56  ;;  %v4978_v2 = vsel %vm4976_vm5, %v4977_v32, %v4975_v14  ;;  %v4987_v57 = vsel %vm4986_vm7, %v10541_v25, %v4985_v3  ;;  %v4937_v25 = vsel %vm3434_vm12, %v4936_v50, %v4935_v34 }
 0x69d   :  { %v4908_v40 = vsel %vm3438_vm13, %v4907_v35, %v4906_v45  ;;  %v4990_v9 = vsel %vm4988_vm15, %v4989_v16, %v4987_v57  ;;  %4991 = vst [vmem:[#allocation2] sm:$0xff] %v4978_v2 }
 0x69e   :  { %v4910_v15 = vsel %vm3442_vm14, %v4909_v24, %v4908_v40  ;;  %4992 = vst [vmem:[#allocation2 + $0x8] sm:$0xff] %v4990_v9 }
 0x69f   :  { %v4956_v13 = vsel %vm12332_vm10, %v12331_v11, %v4910_v15  ;;  %5031 = dma.vmem_to_hbm [thread:$0]  %s5027_s22, 256, %s5029_s25, [#allocation3]  }
 0x6a0   :  { %v4958_v39 = vmin.f32 %v4956_v13, 1e+30 }
 0x6a1   :  { %v3343_v18 = vpop.xlane.xlu2 %3342 }
 0x6a2   :  { %v4938_v61 = vperm.slane %v3343_v18, %v12055_v62  ;;  %v3346_v21 = vpop.xlane.xlu1 %3345  ;;  %5064 = vrsqrt.f32 %v4958_v39  ;;  %vm5002_vm12 = vcmp.eq.f32.partialorder %v4958_v39, inf }
 0x6a3   :  { %v4940_v23 = vperm.slane %v3346_v21, %v8501_v1  ;;  %v5005_v1 = vand.u32 2147483648, %v4958_v39 }
 0x6a4   :  { %v4939_v46 = vsel %vm3438_vm13, %v4938_v61, %v4937_v25  ;;  %vm5004_vm13 = vcmp.eq.f32.partialorder %v4958_v39, 0.0 }
 0x6a5   :  { %v4941_v43 = vsel %vm3442_vm14, %v4940_v23, %v4939_v46 }
 0x6a6   :  { %v4957_v33 = vsel %vm12333_vm11, %v10526_v41, %v4941_v43 }
 0x6a7   :  { %v4959_v59 = vmin.f32 %v4957_v33, 1e+30 }
 0x6a8   :  { %v5065_v8 = vpop.eup %5064 }
 0x6a9   :  { %v4996_v29 = vmul.f32 %v5065_v8, %v4958_v39  ;;  %5066 = vrsqrt.f32 %v4959_v59  ;;  %vm5014_vm14 = vcmp.eq.f32.partialorder %v4959_v59, inf  ;;  %v5017_v37 = vand.u32 2147483648, %v4959_v59 }
 0x6aa   :  { %vm5016_vm9 = vcmp.eq.f32.partialorder %v4959_v59, 0.0 }
 0x6ab   :  { %v4997_v44 = vmul.f32 %v5065_v8, %v4996_v29 }
 0x6ad   :  { %v4998_v19 = vmul.f32 0.5, %v4997_v44 }
 0x6af   :  { %v5067_v62 = vpop.eup %5066  ;;  %v4999_v20 = vsub.f32 1.5, %v4998_v19 }
 0x6b0   :  { %v5008_v0 = vmul.f32 %v5067_v62, %v4959_v59 }
 0x6b1   :  { %v5000_v38 = vmul.f32 %v5065_v8, %v4999_v20 }
 0x6b2   :  { %v5009_v27 = vmul.f32 %v5067_v62, %v5008_v0 }
 0x6b3   :  { %v5001_v47 = vmul.f32 %v5000_v38, %v4958_v39 }
 0x6b4   :  { %v5010_v52 = vmul.f32 0.5, %v5009_v27 }
 0x6b5   :  { %v5003_v4 = vsel %vm5002_vm12, %v4958_v39, %v5001_v47 }
 0x6b6   :  { %v5006_v17 = vsel %vm5004_vm13, %v5005_v1, %v5003_v4  ;;  %v5011_v10 = vsub.f32 1.5, %v5010_v52 }
 0x6b7   :  { %5019 = vst [vmem:[#allocation4] sm:$0xff] %v5006_v17 }
 0x6b8   :  { %v5012_v41 = vmul.f32 %v5067_v62, %v5011_v10 }
 0x6ba   :  { %v5013_v6 = vmul.f32 %v5012_v41, %v4959_v59 }
 0x6bc   :  { %v5015_v7 = vsel %vm5014_vm14, %v4959_v59, %v5013_v6 }
 0x6bd   :  { %v5018_v51 = vsel %vm5016_vm9, %v5017_v37, %v5015_v7 }
 0x6be   :  { %5020 = vst [vmem:[#allocation4 + $0x8] sm:$0xff] %v5018_v51 }
 0x6bf   :  { %5042 = dma.vmem_to_hbm [thread:$0]  %s5038_s26, 256, %s5040_s28, [#allocation5]  }
 0x6c0   :  { %5131 = dma.done.wait [#allocation3], 256  }
 0x6c1   :  { %5132 = vsyncadd [#allocation3], 4294967040 }
 0x6c2   :  { %5133 = dma.done.wait [#allocation5], 256  }
 0x6c3   :  { %5134 = vsyncadd [#allocation5], 4294967040 }
 0x6c4   :  { %5051 = vsyncpa [#allocation3], 1 }
 0x6c5   :  { %5052 = vsyncpa [#allocation5], 1 }

</bundles_post_ra>
